<compile_context>
chip_gen: v5e
topology: v5e:2x2
jax: 0.10.0
libtpu: 0.0.40
codegen_flags: <defaults>
</compile_context>

<pallas_src>
import math as pymath

import jax
import jax.numpy as jnp
from jax import lax
from jax.experimental import pallas as pl
from jax.experimental.pallas import tpu as pltpu


def _round_up(n, m):
    return ((n + m - 1) // m) * m


# ---------------------------------------------------------------------------
# Kernel
# ---------------------------------------------------------------------------
def _make_rnn_pue_kernel(T, b_block, din0, Hp, Mp):
    """Build the per-batch-block kernel body (all sizes are static Python ints)."""
    BT = b_block * T

    def kernel(x_ref,
               wih0_ref, whh0_ref, b0_ref,
               wih1_ref, whh1_ref, b1_ref,
               wih2_ref, whh2_ref, b2_ref,
               whd_ref, bhd_ref,
               out_ref,
               gate_buf, hbuf):
        # x_ref    : (b_block, T, din0)   batch-first input block
        # wihX     : (din_l, 4*Hp)        input->gates weights (transposed, gate-padded)
        # whhX     : (Hp, 4*Hp)           hidden->gates weights (transposed, padded)
        # bX       : (1, 4*Hp)            b_ih + b_hh (gate-padded)
        # whd/bhd  : (Hp, Mp) / (1, Mp)   fused [mu | logvar] head (lane-padded)
        # out_ref  : (b_block, T, Mp)
        # gate_buf : (BT, 4*Hp) VMEM      precomputed input-side gate pre-activations
        # hbuf     : (BT, Hp)   VMEM      hidden sequence of the current layer
        # Rows of gate_buf / hbuf are batch-major: row = b * T + t.

        def row_slice(t):
            if b_block == 1:
                return pl.ds(t, 1)
            return pl.ds(t, b_block, stride=T)   # rows {b*T + t}

        def input_projection(x2d, wih_ref, b_ref):
            # One tall matmul + one bias broadcast, hoisted off the serial path.
            gate_buf[...] = (
                jnp.dot(x2d, wih_ref[...], preferred_element_type=jnp.float32)
                + b_ref[...])

        def recurrence(whh_ref):
            whh = whh_ref[...]                    # hoisted load, loop-invariant

            def step(t, carry):
                h, c = carry
                rows = row_slice(t)
                # Single matmul on the serial critical path; gate slices are
                # 128-lane aligned thanks to Hp padding.
                gates = gate_buf[rows, :] + jnp.dot(
                    h, whh, preferred_element_type=jnp.float32)
                i_g = jax.nn.sigmoid(gates[:, 0 * Hp:1 * Hp])  # PyTorch order i,f,g,o
                f_g = jax.nn.sigmoid(gates[:, 1 * Hp:2 * Hp])
                g_g = jnp.tanh(gates[:, 2 * Hp:3 * Hp])
                o_g = jax.nn.sigmoid(gates[:, 3 * Hp:4 * Hp])
                c_new = f_g * c + i_g * g_g
                h_new = o_g * jnp.tanh(c_new)
                hbuf[rows, :] = h_new
                return h_new, c_new

            zeros = jnp.zeros((b_block, Hp), jnp.float32)
            lax.fori_loop(0, T, step, (zeros, zeros), unroll=min(T, 8))

        # ---- layer 0 (input -> hidden) ----
        x2d = x_ref[...].reshape(BT, din0)
        input_projection(x2d, wih0_ref, b0_ref)
        recurrence(whh0_ref)
        # ---- layer 1 ----
        input_projection(hbuf[...], wih1_ref, b1_ref)
        recurrence(whh1_ref)
        # ---- layer 2 ----
        input_projection(hbuf[...], wih2_ref, b2_ref)
        recurrence(whh2_ref)
        # ---- fused mu/logvar head: one (BT, Hp) @ (Hp, Mp) matmul ----
        head = (jnp.dot(hbuf[...], whd_ref[...],
                        preferred_element_type=jnp.float32) + bhd_ref[...])
        out_ref[...] = head.reshape(b_block, T, Mp)

    return kernel


# ---------------------------------------------------------------------------
# Wrapper
# ---------------------------------------------------------------------------
def my_rnn_pue_forward(x, kp):
    """x: (B, T, input_dim) float32, batch-first (like the PyTorch module).

    kp: prepared kernel params (see prepare_kernel_params).
    Returns (mu, logvar), each (B, T, dim)."""
    B, T, din0 = x.shape
    Hp = kp['whh0'].shape[0]
    Mp = kp['w_head'].shape[1]
    mu_dim = kp['mu_dim']
    lv_dim = kp['logvar_dim']

    # Batch blocking: >= 2 blocks whenever possible so a "parallel" grid axis can
    # use both v7x TensorCores; sequences are fully independent.
    b_block = 1 if B <= 1 else min(128, max(1, B // 2))
    nb = pl.cdiv(B, b_block)

    kernel = _make_rnn_pue_kernel(T, b_block, din0, Hp, Mp)

    def const_spec(shape):
        nd = len(shape)
        return pl.BlockSpec(shape, lambda i: (0,) * nd)

    weight_args = (kp['wih0'], kp['whh0'], kp['b0'],
                   kp['wih1'], kp['whh1'], kp['b1'],
                   kp['wih2'], kp['whh2'], kp['b2'],
                   kp['w_head'], kp['b_head'])

    in_specs = [pl.BlockSpec((b_block, T, din0), lambda i: (i, 0, 0))]
    in_specs += [const_spec(w.shape) for w in weight_args]
    out_spec = pl.BlockSpec((b_block, T, Mp), lambda i: (i, 0, 0))

    # Explicit VMEM budget (resident weights + double-buffered I/O blocks +
    # scratch slabs), clamped so it also fits v7x's 64 MiB VMEM.
    f32 = 4
    resident = (2 * b_block * T * (din0 + Mp) * f32
                + sum(int(pymath.prod(w.shape)) * f32 for w in weight_args)
                + b_block * T * (4 * Hp + Hp) * f32)
    vmem_limit = int(min(64 * 2 ** 20, max(32 * 2 ** 20, 4 * resident)))

    out = pl.pallas_call(
        kernel,
        out_shape=jax.ShapeDtypeStruct((B, T, Mp), jnp.float32),
        grid_spec=pltpu.PrefetchScalarGridSpec(
            num_scalar_prefetch=0,
            grid=(nb,),
            in_specs=in_specs,
            out_specs=out_spec,
            scratch_shapes=[pltpu.VMEM((b_block * T, 4 * Hp), jnp.float32),
                            pltpu.VMEM((b_block * T, Hp), jnp.float32)]),
        compiler_params=pltpu.CompilerParams(
            dimension_semantics=("parallel",),
            vmem_limit_bytes=vmem_limit),
    )(x, *weight_args)

    mu = out[..., :mu_dim]
    logvar = out[..., mu_dim:mu_dim + lv_dim]
    return mu, logvar


# ---------------------------------------------------------------------------
# Parameter construction / preprocessing
# ---------------------------------------------------------------------------
def init_params(key, input_dim, hidden_dim, mu_dim, logvar_dim):
    """PyTorch-layout parameters (nn.LSTM num_layers=3 + two nn.Linear heads),
    uniform(-1/sqrt(H), 1/sqrt(H)) init like torch defaults."""
    H = hidden_dim
    s = 1.0 / pymath.sqrt(H)
    keys = iter(jax.random.split(key, 32))

    def u(shape):
        return jax.random.uniform(next(keys), shape, jnp.float32, -s, s)

    p = {}
    dins = [input_dim, H, H]
    for l, din in enumerate(dins):
        p[f'w_ih_l{l}'] = u((4 * H, din))
        p[f'w_hh_l{l}'] = u((4 * H, H))
        p[f'b_ih_l{l}'] = u((4 * H,))
        p[f'b_hh_l{l}'] = u((4 * H,))
    p['w_mu'] = u((mu_dim, H))
    p['b_mu'] = u((mu_dim,))
    p['w_lv'] = u((logvar_dim, H))
    p['b_lv'] = u((logvar_dim,))
    return p


def prepare_kernel_params(p, input_dim, hidden_dim, mu_dim, logvar_dim):
    """One-time transform of PyTorch-layout weights into kernel layout:
    transpose, sum the two LSTM biases, zero-pad the hidden dim to Hp=round_up(H,128)
    per gate (padded hidden units stay exactly 0), and fuse+pad the mu/logvar heads
    into one lane-dense (Hp, 128k) matmul."""
    H = hidden_dim
    Hp = _round_up(H, 128)
    M = mu_dim + logvar_dim
    Mp = _round_up(M, 128)

    def pad_cols_per_gate(wT):            # (rows, 4H) -> (rows, 4Hp)
        parts = [jnp.pad(wT[:, g * H:(g + 1) * H], ((0, 0), (0, Hp - H)))
                 for g in range(4)]
        return jnp.concatenate(parts, axis=1)

    kp = {'mu_dim': mu_dim, 'logvar_dim': logvar_dim}
    dins = [input_dim, H, H]
    for l, din in enumerate(dins):
        wih = pad_cols_per_gate(p[f'w_ih_l{l}'].T)            # (din, 4Hp)
        if l > 0:
            wih = jnp.pad(wih, ((0, Hp - H), (0, 0)))          # (Hp, 4Hp)
        whh = jnp.pad(pad_cols_per_gate(p[f'w_hh_l{l}'].T),
                      ((0, Hp - H), (0, 0)))                   # (Hp, 4Hp)
        b = pad_cols_per_gate(
            (p[f'b_ih_l{l}'] + p[f'b_hh_l{l}']).reshape(1, 4 * H))
        kp[f'wih{l}'], kp[f'whh{l}'], kp[f'b{l}'] = wih, whh, b

    w_head = jnp.concatenate([p['w_mu'].T, p['w_lv'].T], axis=1)   # (H, M)
    kp['w_head'] = jnp.pad(w_head, ((0, Hp - H), (0, Mp - M)))     # (Hp, Mp)
    b_head = jnp.concatenate([p['b_mu'], p['b_lv']]).reshape(1, M)
    kp['b_head'] = jnp.pad(b_head, ((0, 0), (0, Mp - M)))          # (1, Mp)
    return kp


# ---------------------------------------------------------------------------
# Pure-JAX reference (mirrors the PyTorch forward) for correctness checking
# ---------------------------------------------------------------------------
def reference_forward(x, p, hidden_dim):
    B, T, _ = x.shape
    H = hidden_dim
    h_in = x
    for l in range(3):
        wihT = p[f'w_ih_l{l}'].T
        whhT = p[f'w_hh_l{l}'].T
        b = p[f'b_ih_l{l}'] + p[f'b_hh_l{l}']
        h = jnp.zeros((B, H), jnp.float32)
        c = jnp.zeros((B, H), jnp.float32)
        outs = []
        for t in range(T):
            gates = h_in[:, t, :] @ wihT + h @ whhT + b
            i = jax.nn.sigmoid(gates[:, :H])
            f = jax.nn.sigmoid(gates[:, H:2 * H])
            g = jnp.tanh(gates[:, 2 * H:3 * H])
            o = jax.nn.sigmoid(gates[:, 3 * H:])
            c = f * c + i * g
            h = o * jnp.tanh(c)
            outs.append(h)
        h_in = jnp.stack(outs, axis=1)
    mu = h_in @ p['w_mu'].T + p['b_mu']
    lv = h_in @ p['w_lv'].T + p['b_lv']
    return mu, lv


if __name__ == "__main__":
    key = jax.random.PRNGKey(0)
    kx, kparam = jax.random.split(key)

    B, T, INPUT_DIM, HIDDEN_DIM, MU_DIM, LOGVAR_DIM = 2, 8, 4, 32, 4, 4
    x = jax.random.normal(kx, (B, T, INPUT_DIM), jnp.float32)

    params = init_params(kparam, INPUT_DIM, HIDDEN_DIM, MU_DIM, LOGVAR_DIM)
    kp = prepare_kernel_params(params, INPUT_DIM, HIDDEN_DIM, MU_DIM, LOGVAR_DIM)

    mu, logvar = my_rnn_pue_forward(x, kp)
    jax.block_until_ready((mu, logvar))

    mu_ref, lv_ref = reference_forward(x, params, HIDDEN_DIM)
    assert mu.shape == (B, T, MU_DIM) and logvar.shape == (B, T, LOGVAR_DIM)
    assert jnp.allclose(mu, mu_ref, atol=1e-4, rtol=1e-4)
    assert jnp.allclose(logvar, lv_ref, atol=1e-4, rtol=1e-4)
    print("KERNEL_OK")
</pallas_src>

<mosaic_0001>
module attributes {stable_mosaic.version = 11 : i64} {
  func.func @kernel(%arg0: i32, %arg1: memref<1x8x4xf32, #tpu.memory_space<vmem>>, %arg2: memref<4x512xf32, #tpu.memory_space<vmem>>, %arg3: memref<128x512xf32, #tpu.memory_space<vmem>>, %arg4: memref<1x512xf32, #tpu.memory_space<vmem>>, %arg5: memref<128x512xf32, #tpu.memory_space<vmem>>, %arg6: memref<128x512xf32, #tpu.memory_space<vmem>>, %arg7: memref<1x512xf32, #tpu.memory_space<vmem>>, %arg8: memref<128x512xf32, #tpu.memory_space<vmem>>, %arg9: memref<128x512xf32, #tpu.memory_space<vmem>>, %arg10: memref<1x512xf32, #tpu.memory_space<vmem>>, %arg11: memref<128x128xf32, #tpu.memory_space<vmem>>, %arg12: memref<1x128xf32, #tpu.memory_space<vmem>>, %arg13: memref<1x8x128xf32, #tpu.memory_space<vmem>>, %arg14: memref<8x512xf32, #tpu.memory_space<vmem>>, %arg15: memref<8x128xf32, #tpu.memory_space<vmem>>) attributes {dimension_semantics = [#tpu.dimension_semantics<parallel>], iteration_bounds = array<i64: 2>, scalar_prefetch = 0 : i64, scratch_operands = 2 : i64, tpu.core_type = #tpu.core_type<tc>, window_params = [{transform_indices = @transform_0, window_bounds = array<i64: 1, 8, 4>}, {pipeline_mode = #tpu.pipeline_mode<synchronous>, transform_indices = @transform_1, window_bounds = array<i64: 4, 512>}, {pipeline_mode = #tpu.pipeline_mode<synchronous>, transform_indices = @transform_2, window_bounds = array<i64: 128, 512>}, {pipeline_mode = #tpu.pipeline_mode<synchronous>, transform_indices = @transform_3, window_bounds = array<i64: 1, 512>}, {pipeline_mode = #tpu.pipeline_mode<synchronous>, transform_indices = @transform_4, window_bounds = array<i64: 128, 512>}, {pipeline_mode = #tpu.pipeline_mode<synchronous>, transform_indices = @transform_5, window_bounds = array<i64: 128, 512>}, {pipeline_mode = #tpu.pipeline_mode<synchronous>, transform_indices = @transform_6, window_bounds = array<i64: 1, 512>}, {pipeline_mode = #tpu.pipeline_mode<synchronous>, transform_indices = @transform_7, window_bounds = array<i64: 128, 512>}, {pipeline_mode = #tpu.pipeline_mode<synchronous>, transform_indices = @transform_8, window_bounds = array<i64: 128, 512>}, {pipeline_mode = #tpu.pipeline_mode<synchronous>, transform_indices = @transform_9, window_bounds = array<i64: 1, 512>}, {pipeline_mode = #tpu.pipeline_mode<synchronous>, transform_indices = @transform_10, window_bounds = array<i64: 128, 128>}, {pipeline_mode = #tpu.pipeline_mode<synchronous>, transform_indices = @transform_11, window_bounds = array<i64: 1, 128>}, {transform_indices = @transform_12, window_bounds = array<i64: 1, 8, 128>}]} {
    %c0 = arith.constant 0 : index
    %c0_0 = arith.constant 0 : index
    %c0_1 = arith.constant 0 : index
    %0 = vector.load %arg1[%c0, %c0_0, %c0_1] : memref<1x8x4xf32, #tpu.memory_space<vmem>>, vector<1x8x4xf32>
    %1 = vector.shape_cast %0 : vector<1x8x4xf32> to vector<8x4xf32>
    %c0_2 = arith.constant 0 : index
    %c0_3 = arith.constant 0 : index
    %2 = vector.load %arg2[%c0_2, %c0_3] : memref<4x512xf32, #tpu.memory_space<vmem>>, vector<4x512xf32>
    %cst = arith.constant dense<0.000000e+00> : vector<8x512xf32>
    %3 = tpu.matmul %1, %2, %cst {dimension_numbers = #tpu.dot_dimension_numbers<[1], [0], [0], [1], [0, 0, 1, 1], [], []>} : vector<8x4xf32>, vector<4x512xf32>, vector<8x512xf32> -> vector<8x512xf32>
    %c0_4 = arith.constant 0 : index
    %c0_5 = arith.constant 0 : index
    %4 = vector.load %arg4[%c0_4, %c0_5] : memref<1x512xf32, #tpu.memory_space<vmem>>, vector<1x512xf32>
    %5 = vector.broadcast %4 : vector<1x512xf32> to vector<8x512xf32>
    %6 = arith.addf %3, %5 : vector<8x512xf32>
    %c0_6 = arith.constant 0 : index
    %c0_7 = arith.constant 0 : index
    %7 = vector.load %arg14[%c0_6, %c0_7] : memref<8x512xf32, #tpu.memory_space<vmem>>, vector<8x512xf32>
    tpu.vector_store %arg14[%c0_6, %c0_7], %6 {strides = array<i32>} : memref<8x512xf32, #tpu.memory_space<vmem>>, vector<8x512xf32>,
    %c0_8 = arith.constant 0 : index
    %c0_9 = arith.constant 0 : index
    %8 = vector.load %arg3[%c0_8, %c0_9] : memref<128x512xf32, #tpu.memory_space<vmem>>, vector<128x512xf32>
    %cst_10 = arith.constant 0.000000e+00 : f32
    %9 = vector.broadcast %cst_10 : f32 to vector<1x128xf32>
    %c0_i32 = arith.constant 0 : i32
    %10 = arith.index_cast %c0_i32 : i32 to index
    %c0_11 = arith.constant 0 : index
    %11 = vector.load %arg14[%10, %c0_11] : memref<8x512xf32, #tpu.memory_space<vmem>>, vector<1x512xf32>
    %cst_12 = arith.constant dense<0.000000e+00> : vector<1x512xf32>
    %12 = tpu.matmul %9, %8, %cst_12 {dimension_numbers = #tpu.dot_dimension_numbers<[1], [0], [0], [1], [0, 0, 1, 1], [], []>} : vector<1x128xf32>, vector<128x512xf32>, vector<1x512xf32> -> vector<1x512xf32>
    %13 = arith.addf %11, %12 : vector<1x512xf32>
    %14 = vector.extract_strided_slice %13 {offsets = [0, 0], sizes = [1, 128], strides = [1, 1]} : vector<1x512xf32> to vector<1x128xf32>
    %15 = arith.negf %14 : vector<1x128xf32>
    %16 = math.exp %15 : vector<1x128xf32>
    %cst_13 = arith.constant 1.000000e+00 : f32
    %17 = vector.broadcast %cst_13 : f32 to vector<1x128xf32>
    %18 = arith.addf %17, %16 : vector<1x128xf32>
    %19 = arith.divf %17, %18 : vector<1x128xf32>
    %20 = vector.extract_strided_slice %13 {offsets = [0, 128], sizes = [1, 128], strides = [1, 1]} : vector<1x512xf32> to vector<1x128xf32>
    %21 = arith.negf %20 : vector<1x128xf32>
    %22 = math.exp %21 : vector<1x128xf32>
    %cst_14 = arith.constant 1.000000e+00 : f32
    %23 = vector.broadcast %cst_14 : f32 to vector<1x128xf32>
    %24 = arith.addf %23, %22 : vector<1x128xf32>
    %25 = arith.divf %23, %24 : vector<1x128xf32>
    %26 = vector.extract_strided_slice %13 {offsets = [0, 256], sizes = [1, 128], strides = [1, 1]} : vector<1x512xf32> to vector<1x128xf32>
    %27 = math.tanh %26 : vector<1x128xf32>
    %28 = vector.extract_strided_slice %13 {offsets = [0, 384], sizes = [1, 128], strides = [1, 1]} : vector<1x512xf32> to vector<1x128xf32>
    %29 = arith.negf %28 : vector<1x128xf32>
    %30 = math.exp %29 : vector<1x128xf32>
    %cst_15 = arith.constant 1.000000e+00 : f32
    %31 = vector.broadcast %cst_15 : f32 to vector<1x128xf32>
    %32 = arith.addf %31, %30 : vector<1x128xf32>
    %33 = arith.divf %31, %32 : vector<1x128xf32>
    %34 = arith.mulf %25, %9 : vector<1x128xf32>
    %35 = arith.mulf %19, %27 : vector<1x128xf32>
    %36 = arith.addf %34, %35 : vector<1x128xf32>
    %37 = math.tanh %36 : vector<1x128xf32>
    %38 = arith.mulf %33, %37 : vector<1x128xf32>
    %39 = arith.index_cast %c0_i32 : i32 to index
    %c0_16 = arith.constant 0 : index
    %40 = vector.load %arg15[%39, %c0_16] : memref<8x128xf32, #tpu.memory_space<vmem>>, vector<1x128xf32>
    tpu.vector_store %arg15[%39, %c0_16], %38 {strides = array<i32>} : memref<8x128xf32, #tpu.memory_space<vmem>>, vector<1x128xf32>,
    %c1_i32 = arith.constant 1 : i32
    %41 = arith.index_cast %c1_i32 : i32 to index
    %c0_17 = arith.constant 0 : index
    %42 = vector.load %arg14[%41, %c0_17] : memref<8x512xf32, #tpu.memory_space<vmem>>, vector<1x512xf32>
    %cst_18 = arith.constant dense<0.000000e+00> : vector<1x512xf32>
    %43 = tpu.matmul %38, %8, %cst_18 {dimension_numbers = #tpu.dot_dimension_numbers<[1], [0], [0], [1], [0, 0, 1, 1], [], []>} : vector<1x128xf32>, vector<128x512xf32>, vector<1x512xf32> -> vector<1x512xf32>
    %44 = arith.addf %42, %43 : vector<1x512xf32>
    %45 = vector.extract_strided_slice %44 {offsets = [0, 0], sizes = [1, 128], strides = [1, 1]} : vector<1x512xf32> to vector<1x128xf32>
    %46 = arith.negf %45 : vector<1x128xf32>
    %47 = math.exp %46 : vector<1x128xf32>
    %cst_19 = arith.constant 1.000000e+00 : f32
    %48 = vector.broadcast %cst_19 : f32 to vector<1x128xf32>
    %49 = arith.addf %48, %47 : vector<1x128xf32>
    %50 = arith.divf %48, %49 : vector<1x128xf32>
    %51 = vector.extract_strided_slice %44 {offsets = [0, 128], sizes = [1, 128], strides = [1, 1]} : vector<1x512xf32> to vector<1x128xf32>
    %52 = arith.negf %51 : vector<1x128xf32>
    %53 = math.exp %52 : vector<1x128xf32>
    %cst_20 = arith.constant 1.000000e+00 : f32
    %54 = vector.broadcast %cst_20 : f32 to vector<1x128xf32>
    %55 = arith.addf %54, %53 : vector<1x128xf32>
    %56 = arith.divf %54, %55 : vector<1x128xf32>
    %57 = vector.extract_strided_slice %44 {offsets = [0, 256], sizes = [1, 128], strides = [1, 1]} : vector<1x512xf32> to vector<1x128xf32>
    %58 = math.tanh %57 : vector<1x128xf32>
    %59 = vector.extract_strided_slice %44 {offsets = [0, 384], sizes = [1, 128], strides = [1, 1]} : vector<1x512xf32> to vector<1x128xf32>
    %60 = arith.negf %59 : vector<1x128xf32>
    %61 = math.exp %60 : vector<1x128xf32>
    %cst_21 = arith.constant 1.000000e+00 : f32
    %62 = vector.broadcast %cst_21 : f32 to vector<1x128xf32>
    %63 = arith.addf %62, %61 : vector<1x128xf32>
    %64 = arith.divf %62, %63 : vector<1x128xf32>
    %65 = arith.mulf %56, %36 : vector<1x128xf32>
    %66 = arith.mulf %50, %58 : vector<1x128xf32>
    %67 = arith.addf %65, %66 : vector<1x128xf32>
    %68 = math.tanh %67 : vector<1x128xf32>
    %69 = arith.mulf %64, %68 : vector<1x128xf32>
    %70 = arith.index_cast %c1_i32 : i32 to index
    %c0_22 = arith.constant 0 : index
    %71 = vector.load %arg15[%70, %c0_22] : memref<8x128xf32, #tpu.memory_space<vmem>>, vector<1x128xf32>
    tpu.vector_store %arg15[%70, %c0_22], %69 {strides = array<i32>} : memref<8x128xf32, #tpu.memory_space<vmem>>, vector<1x128xf32>,
    %c2_i32 = arith.constant 2 : i32
    %72 = arith.index_cast %c2_i32 : i32 to index
    %c0_23 = arith.constant 0 : index
    %73 = vector.load %arg14[%72, %c0_23] : memref<8x512xf32, #tpu.memory_space<vmem>>, vector<1x512xf32>
    %cst_24 = arith.constant dense<0.000000e+00> : vector<1x512xf32>
    %74 = tpu.matmul %69, %8, %cst_24 {dimension_numbers = #tpu.dot_dimension_numbers<[1], [0], [0], [1], [0, 0, 1, 1], [], []>} : vector<1x128xf32>, vector<128x512xf32>, vector<1x512xf32> -> vector<1x512xf32>
    %75 = arith.addf %73, %74 : vector<1x512xf32>
    %76 = vector.extract_strided_slice %75 {offsets = [0, 0], sizes = [1, 128], strides = [1, 1]} : vector<1x512xf32> to vector<1x128xf32>
    %77 = arith.negf %76 : vector<1x128xf32>
    %78 = math.exp %77 : vector<1x128xf32>
    %cst_25 = arith.constant 1.000000e+00 : f32
    %79 = vector.broadcast %cst_25 : f32 to vector<1x128xf32>
    %80 = arith.addf %79, %78 : vector<1x128xf32>
    %81 = arith.divf %79, %80 : vector<1x128xf32>
    %82 = vector.extract_strided_slice %75 {offsets = [0, 128], sizes = [1, 128], strides = [1, 1]} : vector<1x512xf32> to vector<1x128xf32>
    %83 = arith.negf %82 : vector<1x128xf32>
    %84 = math.exp %83 : vector<1x128xf32>
    %cst_26 = arith.constant 1.000000e+00 : f32
    %85 = vector.broadcast %cst_26 : f32 to vector<1x128xf32>
    %86 = arith.addf %85, %84 : vector<1x128xf32>
    %87 = arith.divf %85, %86 : vector<1x128xf32>
    %88 = vector.extract_strided_slice %75 {offsets = [0, 256], sizes = [1, 128], strides = [1, 1]} : vector<1x512xf32> to vector<1x128xf32>
    %89 = math.tanh %88 : vector<1x128xf32>
    %90 = vector.extract_strided_slice %75 {offsets = [0, 384], sizes = [1, 128], strides = [1, 1]} : vector<1x512xf32> to vector<1x128xf32>
    %91 = arith.negf %90 : vector<1x128xf32>
    %92 = math.exp %91 : vector<1x128xf32>
    %cst_27 = arith.constant 1.000000e+00 : f32
    %93 = vector.broadcast %cst_27 : f32 to vector<1x128xf32>
    %94 = arith.addf %93, %92 : vector<1x128xf32>
    %95 = arith.divf %93, %94 : vector<1x128xf32>
    %96 = arith.mulf %87, %67 : vector<1x128xf32>
    %97 = arith.mulf %81, %89 : vector<1x128xf32>
    %98 = arith.addf %96, %97 : vector<1x128xf32>
    %99 = math.tanh %98 : vector<1x128xf32>
    %100 = arith.mulf %95, %99 : vector<1x128xf32>
    %101 = arith.index_cast %c2_i32 : i32 to index
    %c0_28 = arith.constant 0 : index
    %102 = vector.load %arg15[%101, %c0_28] : memref<8x128xf32, #tpu.memory_space<vmem>>, vector<1x128xf32>
    tpu.vector_store %arg15[%101, %c0_28], %100 {strides = array<i32>} : memref<8x128xf32, #tpu.memory_space<vmem>>, vector<1x128xf32>,
    %c3_i32 = arith.constant 3 : i32
    %103 = arith.index_cast %c3_i32 : i32 to index
    %c0_29 = arith.constant 0 : index
    %104 = vector.load %arg14[%103, %c0_29] : memref<8x512xf32, #tpu.memory_space<vmem>>, vector<1x512xf32>
    %cst_30 = arith.constant dense<0.000000e+00> : vector<1x512xf32>
    %105 = tpu.matmul %100, %8, %cst_30 {dimension_numbers = #tpu.dot_dimension_numbers<[1], [0], [0], [1], [0, 0, 1, 1], [], []>} : vector<1x128xf32>, vector<128x512xf32>, vector<1x512xf32> -> vector<1x512xf32>
    %106 = arith.addf %104, %105 : vector<1x512xf32>
    %107 = vector.extract_strided_slice %106 {offsets = [0, 0], sizes = [1, 128], strides = [1, 1]} : vector<1x512xf32> to vector<1x128xf32>
    %108 = arith.negf %107 : vector<1x128xf32>
    %109 = math.exp %108 : vector<1x128xf32>
    %cst_31 = arith.constant 1.000000e+00 : f32
    %110 = vector.broadcast %cst_31 : f32 to vector<1x128xf32>
    %111 = arith.addf %110, %109 : vector<1x128xf32>
    %112 = arith.divf %110, %111 : vector<1x128xf32>
    %113 = vector.extract_strided_slice %106 {offsets = [0, 128], sizes = [1, 128], strides = [1, 1]} : vector<1x512xf32> to vector<1x128xf32>
    %114 = arith.negf %113 : vector<1x128xf32>
    %115 = math.exp %114 : vector<1x128xf32>
    %cst_32 = arith.constant 1.000000e+00 : f32
    %116 = vector.broadcast %cst_32 : f32 to vector<1x128xf32>
    %117 = arith.addf %116, %115 : vector<1x128xf32>
    %118 = arith.divf %116, %117 : vector<1x128xf32>
    %119 = vector.extract_strided_slice %106 {offsets = [0, 256], sizes = [1, 128], strides = [1, 1]} : vector<1x512xf32> to vector<1x128xf32>
    %120 = math.tanh %119 : vector<1x128xf32>
    %121 = vector.extract_strided_slice %106 {offsets = [0, 384], sizes = [1, 128], strides = [1, 1]} : vector<1x512xf32> to vector<1x128xf32>
    %122 = arith.negf %121 : vector<1x128xf32>
    %123 = math.exp %122 : vector<1x128xf32>
    %cst_33 = arith.constant 1.000000e+00 : f32
    %124 = vector.broadcast %cst_33 : f32 to vector<1x128xf32>
    %125 = arith.addf %124, %123 : vector<1x128xf32>
    %126 = arith.divf %124, %125 : vector<1x128xf32>
    %127 = arith.mulf %118, %98 : vector<1x128xf32>
    %128 = arith.mulf %112, %120 : vector<1x128xf32>
    %129 = arith.addf %127, %128 : vector<1x128xf32>
    %130 = math.tanh %129 : vector<1x128xf32>
    %131 = arith.mulf %126, %130 : vector<1x128xf32>
    %132 = arith.index_cast %c3_i32 : i32 to index
    %c0_34 = arith.constant 0 : index
    %133 = vector.load %arg15[%132, %c0_34] : memref<8x128xf32, #tpu.memory_space<vmem>>, vector<1x128xf32>
    tpu.vector_store %arg15[%132, %c0_34], %131 {strides = array<i32>} : memref<8x128xf32, #tpu.memory_space<vmem>>, vector<1x128xf32>,
    %c4_i32 = arith.constant 4 : i32
    %134 = arith.index_cast %c4_i32 : i32 to index
    %c0_35 = arith.constant 0 : index
    %135 = vector.load %arg14[%134, %c0_35] : memref<8x512xf32, #tpu.memory_space<vmem>>, vector<1x512xf32>
    %cst_36 = arith.constant dense<0.000000e+00> : vector<1x512xf32>
    %136 = tpu.matmul %131, %8, %cst_36 {dimension_numbers = #tpu.dot_dimension_numbers<[1], [0], [0], [1], [0, 0, 1, 1], [], []>} : vector<1x128xf32>, vector<128x512xf32>, vector<1x512xf32> -> vector<1x512xf32>
    %137 = arith.addf %135, %136 : vector<1x512xf32>
    %138 = vector.extract_strided_slice %137 {offsets = [0, 0], sizes = [1, 128], strides = [1, 1]} : vector<1x512xf32> to vector<1x128xf32>
    %139 = arith.negf %138 : vector<1x128xf32>
    %140 = math.exp %139 : vector<1x128xf32>
    %cst_37 = arith.constant 1.000000e+00 : f32
    %141 = vector.broadcast %cst_37 : f32 to vector<1x128xf32>
    %142 = arith.addf %141, %140 : vector<1x128xf32>
    %143 = arith.divf %141, %142 : vector<1x128xf32>
    %144 = vector.extract_strided_slice %137 {offsets = [0, 128], sizes = [1, 128], strides = [1, 1]} : vector<1x512xf32> to vector<1x128xf32>
    %145 = arith.negf %144 : vector<1x128xf32>
    %146 = math.exp %145 : vector<1x128xf32>
    %cst_38 = arith.constant 1.000000e+00 : f32
    %147 = vector.broadcast %cst_38 : f32 to vector<1x128xf32>
    %148 = arith.addf %147, %146 : vector<1x128xf32>
    %149 = arith.divf %147, %148 : vector<1x128xf32>
    %150 = vector.extract_strided_slice %137 {offsets = [0, 256], sizes = [1, 128], strides = [1, 1]} : vector<1x512xf32> to vector<1x128xf32>
    %151 = math.tanh %150 : vector<1x128xf32>
    %152 = vector.extract_strided_slice %137 {offsets = [0, 384], sizes = [1, 128], strides = [1, 1]} : vector<1x512xf32> to vector<1x128xf32>
    %153 = arith.negf %152 : vector<1x128xf32>
    %154 = math.exp %153 : vector<1x128xf32>
    %cst_39 = arith.constant 1.000000e+00 : f32
    %155 = vector.broadcast %cst_39 : f32 to vector<1x128xf32>
    %156 = arith.addf %155, %154 : vector<1x128xf32>
    %157 = arith.divf %155, %156 : vector<1x128xf32>
    %158 = arith.mulf %149, %129 : vector<1x128xf32>
    %159 = arith.mulf %143, %151 : vector<1x128xf32>
    %160 = arith.addf %158, %159 : vector<1x128xf32>
    %161 = math.tanh %160 : vector<1x128xf32>
    %162 = arith.mulf %157, %161 : vector<1x128xf32>
    %163 = arith.index_cast %c4_i32 : i32 to index
    %c0_40 = arith.constant 0 : index
    %164 = vector.load %arg15[%163, %c0_40] : memref<8x128xf32, #tpu.memory_space<vmem>>, vector<1x128xf32>
    tpu.vector_store %arg15[%163, %c0_40], %162 {strides = array<i32>} : memref<8x128xf32, #tpu.memory_space<vmem>>, vector<1x128xf32>,
    %c5_i32 = arith.constant 5 : i32
    %165 = arith.index_cast %c5_i32 : i32 to index
    %c0_41 = arith.constant 0 : index
    %166 = vector.load %arg14[%165, %c0_41] : memref<8x512xf32, #tpu.memory_space<vmem>>, vector<1x512xf32>
    %cst_42 = arith.constant dense<0.000000e+00> : vector<1x512xf32>
    %167 = tpu.matmul %162, %8, %cst_42 {dimension_numbers = #tpu.dot_dimension_numbers<[1], [0], [0], [1], [0, 0, 1, 1], [], []>} : vector<1x128xf32>, vector<128x512xf32>, vector<1x512xf32> -> vector<1x512xf32>
    %168 = arith.addf %166, %167 : vector<1x512xf32>
    %169 = vector.extract_strided_slice %168 {offsets = [0, 0], sizes = [1, 128], strides = [1, 1]} : vector<1x512xf32> to vector<1x128xf32>
    %170 = arith.negf %169 : vector<1x128xf32>
    %171 = math.exp %170 : vector<1x128xf32>
    %cst_43 = arith.constant 1.000000e+00 : f32
    %172 = vector.broadcast %cst_43 : f32 to vector<1x128xf32>
    %173 = arith.addf %172, %171 : vector<1x128xf32>
    %174 = arith.divf %172, %173 : vector<1x128xf32>
    %175 = vector.extract_strided_slice %168 {offsets = [0, 128], sizes = [1, 128], strides = [1, 1]} : vector<1x512xf32> to vector<1x128xf32>
    %176 = arith.negf %175 : vector<1x128xf32>
    %177 = math.exp %176 : vector<1x128xf32>
    %cst_44 = arith.constant 1.000000e+00 : f32
    %178 = vector.broadcast %cst_44 : f32 to vector<1x128xf32>
    %179 = arith.addf %178, %177 : vector<1x128xf32>
    %180 = arith.divf %178, %179 : vector<1x128xf32>
    %181 = vector.extract_strided_slice %168 {offsets = [0, 256], sizes = [1, 128], strides = [1, 1]} : vector<1x512xf32> to vector<1x128xf32>
    %182 = math.tanh %181 : vector<1x128xf32>
    %183 = vector.extract_strided_slice %168 {offsets = [0, 384], sizes = [1, 128], strides = [1, 1]} : vector<1x512xf32> to vector<1x128xf32>
    %184 = arith.negf %183 : vector<1x128xf32>
    %185 = math.exp %184 : vector<1x128xf32>
    %cst_45 = arith.constant 1.000000e+00 : f32
    %186 = vector.broadcast %cst_45 : f32 to vector<1x128xf32>
    %187 = arith.addf %186, %185 : vector<1x128xf32>
    %188 = arith.divf %186, %187 : vector<1x128xf32>
    %189 = arith.mulf %180, %160 : vector<1x128xf32>
    %190 = arith.mulf %174, %182 : vector<1x128xf32>
    %191 = arith.addf %189, %190 : vector<1x128xf32>
    %192 = math.tanh %191 : vector<1x128xf32>
    %193 = arith.mulf %188, %192 : vector<1x128xf32>
    %194 = arith.index_cast %c5_i32 : i32 to index
    %c0_46 = arith.constant 0 : index
    %195 = vector.load %arg15[%194, %c0_46] : memref<8x128xf32, #tpu.memory_space<vmem>>, vector<1x128xf32>
    tpu.vector_store %arg15[%194, %c0_46], %193 {strides = array<i32>} : memref<8x128xf32, #tpu.memory_space<vmem>>, vector<1x128xf32>,
    %c6_i32 = arith.constant 6 : i32
    %196 = arith.index_cast %c6_i32 : i32 to index
    %c0_47 = arith.constant 0 : index
    %197 = vector.load %arg14[%196, %c0_47] : memref<8x512xf32, #tpu.memory_space<vmem>>, vector<1x512xf32>
    %cst_48 = arith.constant dense<0.000000e+00> : vector<1x512xf32>
    %198 = tpu.matmul %193, %8, %cst_48 {dimension_numbers = #tpu.dot_dimension_numbers<[1], [0], [0], [1], [0, 0, 1, 1], [], []>} : vector<1x128xf32>, vector<128x512xf32>, vector<1x512xf32> -> vector<1x512xf32>
    %199 = arith.addf %197, %198 : vector<1x512xf32>
    %200 = vector.extract_strided_slice %199 {offsets = [0, 0], sizes = [1, 128], strides = [1, 1]} : vector<1x512xf32> to vector<1x128xf32>
    %201 = arith.negf %200 : vector<1x128xf32>
    %202 = math.exp %201 : vector<1x128xf32>
    %cst_49 = arith.constant 1.000000e+00 : f32
    %203 = vector.broadcast %cst_49 : f32 to vector<1x128xf32>
    %204 = arith.addf %203, %202 : vector<1x128xf32>
    %205 = arith.divf %203, %204 : vector<1x128xf32>
    %206 = vector.extract_strided_slice %199 {offsets = [0, 128], sizes = [1, 128], strides = [1, 1]} : vector<1x512xf32> to vector<1x128xf32>
    %207 = arith.negf %206 : vector<1x128xf32>
    %208 = math.exp %207 : vector<1x128xf32>
    %cst_50 = arith.constant 1.000000e+00 : f32
    %209 = vector.broadcast %cst_50 : f32 to vector<1x128xf32>
    %210 = arith.addf %209, %208 : vector<1x128xf32>
    %211 = arith.divf %209, %210 : vector<1x128xf32>
    %212 = vector.extract_strided_slice %199 {offsets = [0, 256], sizes = [1, 128], strides = [1, 1]} : vector<1x512xf32> to vector<1x128xf32>
    %213 = math.tanh %212 : vector<1x128xf32>
    %214 = vector.extract_strided_slice %199 {offsets = [0, 384], sizes = [1, 128], strides = [1, 1]} : vector<1x512xf32> to vector<1x128xf32>
    %215 = arith.negf %214 : vector<1x128xf32>
    %216 = math.exp %215 : vector<1x128xf32>
    %cst_51 = arith.constant 1.000000e+00 : f32
    %217 = vector.broadcast %cst_51 : f32 to vector<1x128xf32>
    %218 = arith.addf %217, %216 : vector<1x128xf32>
    %219 = arith.divf %217, %218 : vector<1x128xf32>
    %220 = arith.mulf %211, %191 : vector<1x128xf32>
    %221 = arith.mulf %205, %213 : vector<1x128xf32>
    %222 = arith.addf %220, %221 : vector<1x128xf32>
    %223 = math.tanh %222 : vector<1x128xf32>
    %224 = arith.mulf %219, %223 : vector<1x128xf32>
    %225 = arith.index_cast %c6_i32 : i32 to index
    %c0_52 = arith.constant 0 : index
    %226 = vector.load %arg15[%225, %c0_52] : memref<8x128xf32, #tpu.memory_space<vmem>>, vector<1x128xf32>
    tpu.vector_store %arg15[%225, %c0_52], %224 {strides = array<i32>} : memref<8x128xf32, #tpu.memory_space<vmem>>, vector<1x128xf32>,
    %c7_i32 = arith.constant 7 : i32
    %227 = arith.index_cast %c7_i32 : i32 to index
    %c0_53 = arith.constant 0 : index
    %228 = vector.load %arg14[%227, %c0_53] : memref<8x512xf32, #tpu.memory_space<vmem>>, vector<1x512xf32>
    %cst_54 = arith.constant dense<0.000000e+00> : vector<1x512xf32>
    %229 = tpu.matmul %224, %8, %cst_54 {dimension_numbers = #tpu.dot_dimension_numbers<[1], [0], [0], [1], [0, 0, 1, 1], [], []>} : vector<1x128xf32>, vector<128x512xf32>, vector<1x512xf32> -> vector<1x512xf32>
    %230 = arith.addf %228, %229 : vector<1x512xf32>
    %231 = vector.extract_strided_slice %230 {offsets = [0, 0], sizes = [1, 128], strides = [1, 1]} : vector<1x512xf32> to vector<1x128xf32>
    %232 = arith.negf %231 : vector<1x128xf32>
    %233 = math.exp %232 : vector<1x128xf32>
    %cst_55 = arith.constant 1.000000e+00 : f32
    %234 = vector.broadcast %cst_55 : f32 to vector<1x128xf32>
    %235 = arith.addf %234, %233 : vector<1x128xf32>
    %236 = arith.divf %234, %235 : vector<1x128xf32>
    %237 = vector.extract_strided_slice %230 {offsets = [0, 128], sizes = [1, 128], strides = [1, 1]} : vector<1x512xf32> to vector<1x128xf32>
    %238 = arith.negf %237 : vector<1x128xf32>
    %239 = math.exp %238 : vector<1x128xf32>
    %cst_56 = arith.constant 1.000000e+00 : f32
    %240 = vector.broadcast %cst_56 : f32 to vector<1x128xf32>
    %241 = arith.addf %240, %239 : vector<1x128xf32>
    %242 = arith.divf %240, %241 : vector<1x128xf32>
    %243 = vector.extract_strided_slice %230 {offsets = [0, 256], sizes = [1, 128], strides = [1, 1]} : vector<1x512xf32> to vector<1x128xf32>
    %244 = math.tanh %243 : vector<1x128xf32>
    %245 = vector.extract_strided_slice %230 {offsets = [0, 384], sizes = [1, 128], strides = [1, 1]} : vector<1x512xf32> to vector<1x128xf32>
    %246 = arith.negf %245 : vector<1x128xf32>
    %247 = math.exp %246 : vector<1x128xf32>
    %cst_57 = arith.constant 1.000000e+00 : f32
    %248 = vector.broadcast %cst_57 : f32 to vector<1x128xf32>
    %249 = arith.addf %248, %247 : vector<1x128xf32>
    %250 = arith.divf %248, %249 : vector<1x128xf32>
    %251 = arith.mulf %242, %222 : vector<1x128xf32>
    %252 = arith.mulf %236, %244 : vector<1x128xf32>
    %253 = arith.addf %251, %252 : vector<1x128xf32>
    %254 = math.tanh %253 : vector<1x128xf32>
    %255 = arith.mulf %250, %254 : vector<1x128xf32>
    %256 = arith.index_cast %c7_i32 : i32 to index
    %c0_58 = arith.constant 0 : index
    %257 = vector.load %arg15[%256, %c0_58] : memref<8x128xf32, #tpu.memory_space<vmem>>, vector<1x128xf32>
    tpu.vector_store %arg15[%256, %c0_58], %255 {strides = array<i32>} : memref<8x128xf32, #tpu.memory_space<vmem>>, vector<1x128xf32>,
    %c8_i32 = arith.constant 8 : i32
    %c0_59 = arith.constant 0 : index
    %c0_60 = arith.constant 0 : index
    %258 = vector.load %arg15[%c0_59, %c0_60] : memref<8x128xf32, #tpu.memory_space<vmem>>, vector<8x128xf32>
    %c0_61 = arith.constant 0 : index
    %c0_62 = arith.constant 0 : index
    %259 = vector.load %arg5[%c0_61, %c0_62] : memref<128x512xf32, #tpu.memory_space<vmem>>, vector<128x512xf32>
    %cst_63 = arith.constant dense<0.000000e+00> : vector<8x512xf32>
    %260 = tpu.matmul %258, %259, %cst_63 {dimension_numbers = #tpu.dot_dimension_numbers<[1], [0], [0], [1], [0, 0, 1, 1], [], []>} : vector<8x128xf32>, vector<128x512xf32>, vector<8x512xf32> -> vector<8x512xf32>
    %c0_64 = arith.constant 0 : index
    %c0_65 = arith.constant 0 : index
    %261 = vector.load %arg7[%c0_64, %c0_65] : memref<1x512xf32, #tpu.memory_space<vmem>>, vector<1x512xf32>
    %262 = vector.broadcast %261 : vector<1x512xf32> to vector<8x512xf32>
    %263 = arith.addf %260, %262 : vector<8x512xf32>
    %c0_66 = arith.constant 0 : index
    %c0_67 = arith.constant 0 : index
    %264 = vector.load %arg14[%c0_66, %c0_67] : memref<8x512xf32, #tpu.memory_space<vmem>>, vector<8x512xf32>
    tpu.vector_store %arg14[%c0_66, %c0_67], %263 {strides = array<i32>} : memref<8x512xf32, #tpu.memory_space<vmem>>, vector<8x512xf32>,
    %c0_68 = arith.constant 0 : index
    %c0_69 = arith.constant 0 : index
    %265 = vector.load %arg6[%c0_68, %c0_69] : memref<128x512xf32, #tpu.memory_space<vmem>>, vector<128x512xf32>
    %cst_70 = arith.constant 0.000000e+00 : f32
    %266 = vector.broadcast %cst_70 : f32 to vector<1x128xf32>
    %c0_i32_71 = arith.constant 0 : i32
    %267 = arith.index_cast %c0_i32_71 : i32 to index
    %c0_72 = arith.constant 0 : index
    %268 = vector.load %arg14[%267, %c0_72] : memref<8x512xf32, #tpu.memory_space<vmem>>, vector<1x512xf32>
    %cst_73 = arith.constant dense<0.000000e+00> : vector<1x512xf32>
    %269 = tpu.matmul %266, %265, %cst_73 {dimension_numbers = #tpu.dot_dimension_numbers<[1], [0], [0], [1], [0, 0, 1, 1], [], []>} : vector<1x128xf32>, vector<128x512xf32>, vector<1x512xf32> -> vector<1x512xf32>
    %270 = arith.addf %268, %269 : vector<1x512xf32>
    %271 = vector.extract_strided_slice %270 {offsets = [0, 0], sizes = [1, 128], strides = [1, 1]} : vector<1x512xf32> to vector<1x128xf32>
    %272 = arith.negf %271 : vector<1x128xf32>
    %273 = math.exp %272 : vector<1x128xf32>
    %cst_74 = arith.constant 1.000000e+00 : f32
    %274 = vector.broadcast %cst_74 : f32 to vector<1x128xf32>
    %275 = arith.addf %274, %273 : vector<1x128xf32>
    %276 = arith.divf %274, %275 : vector<1x128xf32>
    %277 = vector.extract_strided_slice %270 {offsets = [0, 128], sizes = [1, 128], strides = [1, 1]} : vector<1x512xf32> to vector<1x128xf32>
    %278 = arith.negf %277 : vector<1x128xf32>
    %279 = math.exp %278 : vector<1x128xf32>
    %cst_75 = arith.constant 1.000000e+00 : f32
    %280 = vector.broadcast %cst_75 : f32 to vector<1x128xf32>
    %281 = arith.addf %280, %279 : vector<1x128xf32>
    %282 = arith.divf %280, %281 : vector<1x128xf32>
    %283 = vector.extract_strided_slice %270 {offsets = [0, 256], sizes = [1, 128], strides = [1, 1]} : vector<1x512xf32> to vector<1x128xf32>
    %284 = math.tanh %283 : vector<1x128xf32>
    %285 = vector.extract_strided_slice %270 {offsets = [0, 384], sizes = [1, 128], strides = [1, 1]} : vector<1x512xf32> to vector<1x128xf32>
    %286 = arith.negf %285 : vector<1x128xf32>
    %287 = math.exp %286 : vector<1x128xf32>
    %cst_76 = arith.constant 1.000000e+00 : f32
    %288 = vector.broadcast %cst_76 : f32 to vector<1x128xf32>
    %289 = arith.addf %288, %287 : vector<1x128xf32>
    %290 = arith.divf %288, %289 : vector<1x128xf32>
    %291 = arith.mulf %282, %266 : vector<1x128xf32>
    %292 = arith.mulf %276, %284 : vector<1x128xf32>
    %293 = arith.addf %291, %292 : vector<1x128xf32>
    %294 = math.tanh %293 : vector<1x128xf32>
    %295 = arith.mulf %290, %294 : vector<1x128xf32>
    %296 = arith.index_cast %c0_i32_71 : i32 to index
    %c0_77 = arith.constant 0 : index
    %297 = vector.load %arg15[%296, %c0_77] : memref<8x128xf32, #tpu.memory_space<vmem>>, vector<1x128xf32>
    tpu.vector_store %arg15[%296, %c0_77], %295 {strides = array<i32>} : memref<8x128xf32, #tpu.memory_space<vmem>>, vector<1x128xf32>,
    %c1_i32_78 = arith.constant 1 : i32
    %298 = arith.index_cast %c1_i32_78 : i32 to index
    %c0_79 = arith.constant 0 : index
    %299 = vector.load %arg14[%298, %c0_79] : memref<8x512xf32, #tpu.memory_space<vmem>>, vector<1x512xf32>
    %cst_80 = arith.constant dense<0.000000e+00> : vector<1x512xf32>
    %300 = tpu.matmul %295, %265, %cst_80 {dimension_numbers = #tpu.dot_dimension_numbers<[1], [0], [0], [1], [0, 0, 1, 1], [], []>} : vector<1x128xf32>, vector<128x512xf32>, vector<1x512xf32> -> vector<1x512xf32>
    %301 = arith.addf %299, %300 : vector<1x512xf32>
    %302 = vector.extract_strided_slice %301 {offsets = [0, 0], sizes = [1, 128], strides = [1, 1]} : vector<1x512xf32> to vector<1x128xf32>
    %303 = arith.negf %302 : vector<1x128xf32>
    %304 = math.exp %303 : vector<1x128xf32>
    %cst_81 = arith.constant 1.000000e+00 : f32
    %305 = vector.broadcast %cst_81 : f32 to vector<1x128xf32>
    %306 = arith.addf %305, %304 : vector<1x128xf32>
    %307 = arith.divf %305, %306 : vector<1x128xf32>
    %308 = vector.extract_strided_slice %301 {offsets = [0, 128], sizes = [1, 128], strides = [1, 1]} : vector<1x512xf32> to vector<1x128xf32>
    %309 = arith.negf %308 : vector<1x128xf32>
    %310 = math.exp %309 : vector<1x128xf32>
    %cst_82 = arith.constant 1.000000e+00 : f32
    %311 = vector.broadcast %cst_82 : f32 to vector<1x128xf32>
    %312 = arith.addf %311, %310 : vector<1x128xf32>
    %313 = arith.divf %311, %312 : vector<1x128xf32>
    %314 = vector.extract_strided_slice %301 {offsets = [0, 256], sizes = [1, 128], strides = [1, 1]} : vector<1x512xf32> to vector<1x128xf32>
    %315 = math.tanh %314 : vector<1x128xf32>
    %316 = vector.extract_strided_slice %301 {offsets = [0, 384], sizes = [1, 128], strides = [1, 1]} : vector<1x512xf32> to vector<1x128xf32>
    %317 = arith.negf %316 : vector<1x128xf32>
    %318 = math.exp %317 : vector<1x128xf32>
    %cst_83 = arith.constant 1.000000e+00 : f32
    %319 = vector.broadcast %cst_83 : f32 to vector<1x128xf32>
    %320 = arith.addf %319, %318 : vector<1x128xf32>
    %321 = arith.divf %319, %320 : vector<1x128xf32>
    %322 = arith.mulf %313, %293 : vector<1x128xf32>
    %323 = arith.mulf %307, %315 : vector<1x128xf32>
    %324 = arith.addf %322, %323 : vector<1x128xf32>
    %325 = math.tanh %324 : vector<1x128xf32>
    %326 = arith.mulf %321, %325 : vector<1x128xf32>
    %327 = arith.index_cast %c1_i32_78 : i32 to index
    %c0_84 = arith.constant 0 : index
    %328 = vector.load %arg15[%327, %c0_84] : memref<8x128xf32, #tpu.memory_space<vmem>>, vector<1x128xf32>
    tpu.vector_store %arg15[%327, %c0_84], %326 {strides = array<i32>} : memref<8x128xf32, #tpu.memory_space<vmem>>, vector<1x128xf32>,
    %c2_i32_85 = arith.constant 2 : i32
    %329 = arith.index_cast %c2_i32_85 : i32 to index
    %c0_86 = arith.constant 0 : index
    %330 = vector.load %arg14[%329, %c0_86] : memref<8x512xf32, #tpu.memory_space<vmem>>, vector<1x512xf32>
    %cst_87 = arith.constant dense<0.000000e+00> : vector<1x512xf32>
    %331 = tpu.matmul %326, %265, %cst_87 {dimension_numbers = #tpu.dot_dimension_numbers<[1], [0], [0], [1], [0, 0, 1, 1], [], []>} : vector<1x128xf32>, vector<128x512xf32>, vector<1x512xf32> -> vector<1x512xf32>
    %332 = arith.addf %330, %331 : vector<1x512xf32>
    %333 = vector.extract_strided_slice %332 {offsets = [0, 0], sizes = [1, 128], strides = [1, 1]} : vector<1x512xf32> to vector<1x128xf32>
    %334 = arith.negf %333 : vector<1x128xf32>
    %335 = math.exp %334 : vector<1x128xf32>
    %cst_88 = arith.constant 1.000000e+00 : f32
    %336 = vector.broadcast %cst_88 : f32 to vector<1x128xf32>
    %337 = arith.addf %336, %335 : vector<1x128xf32>
    %338 = arith.divf %336, %337 : vector<1x128xf32>
    %339 = vector.extract_strided_slice %332 {offsets = [0, 128], sizes = [1, 128], strides = [1, 1]} : vector<1x512xf32> to vector<1x128xf32>
    %340 = arith.negf %339 : vector<1x128xf32>
    %341 = math.exp %340 : vector<1x128xf32>
    %cst_89 = arith.constant 1.000000e+00 : f32
    %342 = vector.broadcast %cst_89 : f32 to vector<1x128xf32>
    %343 = arith.addf %342, %341 : vector<1x128xf32>
    %344 = arith.divf %342, %343 : vector<1x128xf32>
    %345 = vector.extract_strided_slice %332 {offsets = [0, 256], sizes = [1, 128], strides = [1, 1]} : vector<1x512xf32> to vector<1x128xf32>
    %346 = math.tanh %345 : vector<1x128xf32>
    %347 = vector.extract_strided_slice %332 {offsets = [0, 384], sizes = [1, 128], strides = [1, 1]} : vector<1x512xf32> to vector<1x128xf32>
    %348 = arith.negf %347 : vector<1x128xf32>
    %349 = math.exp %348 : vector<1x128xf32>
    %cst_90 = arith.constant 1.000000e+00 : f32
    %350 = vector.broadcast %cst_90 : f32 to vector<1x128xf32>
    %351 = arith.addf %350, %349 : vector<1x128xf32>
    %352 = arith.divf %350, %351 : vector<1x128xf32>
    %353 = arith.mulf %344, %324 : vector<1x128xf32>
    %354 = arith.mulf %338, %346 : vector<1x128xf32>
    %355 = arith.addf %353, %354 : vector<1x128xf32>
    %356 = math.tanh %355 : vector<1x128xf32>
    %357 = arith.mulf %352, %356 : vector<1x128xf32>
    %358 = arith.index_cast %c2_i32_85 : i32 to index
    %c0_91 = arith.constant 0 : index
    %359 = vector.load %arg15[%358, %c0_91] : memref<8x128xf32, #tpu.memory_space<vmem>>, vector<1x128xf32>
    tpu.vector_store %arg15[%358, %c0_91], %357 {strides = array<i32>} : memref<8x128xf32, #tpu.memory_space<vmem>>, vector<1x128xf32>,
    %c3_i32_92 = arith.constant 3 : i32
    %360 = arith.index_cast %c3_i32_92 : i32 to index
    %c0_93 = arith.constant 0 : index
    %361 = vector.load %arg14[%360, %c0_93] : memref<8x512xf32, #tpu.memory_space<vmem>>, vector<1x512xf32>
    %cst_94 = arith.constant dense<0.000000e+00> : vector<1x512xf32>
    %362 = tpu.matmul %357, %265, %cst_94 {dimension_numbers = #tpu.dot_dimension_numbers<[1], [0], [0], [1], [0, 0, 1, 1], [], []>} : vector<1x128xf32>, vector<128x512xf32>, vector<1x512xf32> -> vector<1x512xf32>
    %363 = arith.addf %361, %362 : vector<1x512xf32>
    %364 = vector.extract_strided_slice %363 {offsets = [0, 0], sizes = [1, 128], strides = [1, 1]} : vector<1x512xf32> to vector<1x128xf32>
    %365 = arith.negf %364 : vector<1x128xf32>
    %366 = math.exp %365 : vector<1x128xf32>
    %cst_95 = arith.constant 1.000000e+00 : f32
    %367 = vector.broadcast %cst_95 : f32 to vector<1x128xf32>
    %368 = arith.addf %367, %366 : vector<1x128xf32>
    %369 = arith.divf %367, %368 : vector<1x128xf32>
    %370 = vector.extract_strided_slice %363 {offsets = [0, 128], sizes = [1, 128], strides = [1, 1]} : vector<1x512xf32> to vector<1x128xf32>
    %371 = arith.negf %370 : vector<1x128xf32>
    %372 = math.exp %371 : vector<1x128xf32>
    %cst_96 = arith.constant 1.000000e+00 : f32
    %373 = vector.broadcast %cst_96 : f32 to vector<1x128xf32>
    %374 = arith.addf %373, %372 : vector<1x128xf32>
    %375 = arith.divf %373, %374 : vector<1x128xf32>
    %376 = vector.extract_strided_slice %363 {offsets = [0, 256], sizes = [1, 128], strides = [1, 1]} : vector<1x512xf32> to vector<1x128xf32>
    %377 = math.tanh %376 : vector<1x128xf32>
    %378 = vector.extract_strided_slice %363 {offsets = [0, 384], sizes = [1, 128], strides = [1, 1]} : vector<1x512xf32> to vector<1x128xf32>
    %379 = arith.negf %378 : vector<1x128xf32>
    %380 = math.exp %379 : vector<1x128xf32>
    %cst_97 = arith.constant 1.000000e+00 : f32
    %381 = vector.broadcast %cst_97 : f32 to vector<1x128xf32>
    %382 = arith.addf %381, %380 : vector<1x128xf32>
    %383 = arith.divf %381, %382 : vector<1x128xf32>
    %384 = arith.mulf %375, %355 : vector<1x128xf32>
    %385 = arith.mulf %369, %377 : vector<1x128xf32>
    %386 = arith.addf %384, %385 : vector<1x128xf32>
    %387 = math.tanh %386 : vector<1x128xf32>
    %388 = arith.mulf %383, %387 : vector<1x128xf32>
    %389 = arith.index_cast %c3_i32_92 : i32 to index
    %c0_98 = arith.constant 0 : index
    %390 = vector.load %arg15[%389, %c0_98] : memref<8x128xf32, #tpu.memory_space<vmem>>, vector<1x128xf32>
    tpu.vector_store %arg15[%389, %c0_98], %388 {strides = array<i32>} : memref<8x128xf32, #tpu.memory_space<vmem>>, vector<1x128xf32>,
    %c4_i32_99 = arith.constant 4 : i32
    %391 = arith.index_cast %c4_i32_99 : i32 to index
    %c0_100 = arith.constant 0 : index
    %392 = vector.load %arg14[%391, %c0_100] : memref<8x512xf32, #tpu.memory_space<vmem>>, vector<1x512xf32>
    %cst_101 = arith.constant dense<0.000000e+00> : vector<1x512xf32>
    %393 = tpu.matmul %388, %265, %cst_101 {dimension_numbers = #tpu.dot_dimension_numbers<[1], [0], [0], [1], [0, 0, 1, 1], [], []>} : vector<1x128xf32>, vector<128x512xf32>, vector<1x512xf32> -> vector<1x512xf32>
    %394 = arith.addf %392, %393 : vector<1x512xf32>
    %395 = vector.extract_strided_slice %394 {offsets = [0, 0], sizes = [1, 128], strides = [1, 1]} : vector<1x512xf32> to vector<1x128xf32>
    %396 = arith.negf %395 : vector<1x128xf32>
    %397 = math.exp %396 : vector<1x128xf32>
    %cst_102 = arith.constant 1.000000e+00 : f32
    %398 = vector.broadcast %cst_102 : f32 to vector<1x128xf32>
    %399 = arith.addf %398, %397 : vector<1x128xf32>
    %400 = arith.divf %398, %399 : vector<1x128xf32>
    %401 = vector.extract_strided_slice %394 {offsets = [0, 128], sizes = [1, 128], strides = [1, 1]} : vector<1x512xf32> to vector<1x128xf32>
    %402 = arith.negf %401 : vector<1x128xf32>
    %403 = math.exp %402 : vector<1x128xf32>
    %cst_103 = arith.constant 1.000000e+00 : f32
    %404 = vector.broadcast %cst_103 : f32 to vector<1x128xf32>
    %405 = arith.addf %404, %403 : vector<1x128xf32>
    %406 = arith.divf %404, %405 : vector<1x128xf32>
    %407 = vector.extract_strided_slice %394 {offsets = [0, 256], sizes = [1, 128], strides = [1, 1]} : vector<1x512xf32> to vector<1x128xf32>
    %408 = math.tanh %407 : vector<1x128xf32>
    %409 = vector.extract_strided_slice %394 {offsets = [0, 384], sizes = [1, 128], strides = [1, 1]} : vector<1x512xf32> to vector<1x128xf32>
    %410 = arith.negf %409 : vector<1x128xf32>
    %411 = math.exp %410 : vector<1x128xf32>
    %cst_104 = arith.constant 1.000000e+00 : f32
    %412 = vector.broadcast %cst_104 : f32 to vector<1x128xf32>
    %413 = arith.addf %412, %411 : vector<1x128xf32>
    %414 = arith.divf %412, %413 : vector<1x128xf32>
    %415 = arith.mulf %406, %386 : vector<1x128xf32>
    %416 = arith.mulf %400, %408 : vector<1x128xf32>
    %417 = arith.addf %415, %416 : vector<1x128xf32>
    %418 = math.tanh %417 : vector<1x128xf32>
    %419 = arith.mulf %414, %418 : vector<1x128xf32>
    %420 = arith.index_cast %c4_i32_99 : i32 to index
    %c0_105 = arith.constant 0 : index
    %421 = vector.load %arg15[%420, %c0_105] : memref<8x128xf32, #tpu.memory_space<vmem>>, vector<1x128xf32>
    tpu.vector_store %arg15[%420, %c0_105], %419 {strides = array<i32>} : memref<8x128xf32, #tpu.memory_space<vmem>>, vector<1x128xf32>,
    %c5_i32_106 = arith.constant 5 : i32
    %422 = arith.index_cast %c5_i32_106 : i32 to index
    %c0_107 = arith.constant 0 : index
    %423 = vector.load %arg14[%422, %c0_107] : memref<8x512xf32, #tpu.memory_space<vmem>>, vector<1x512xf32>
    %cst_108 = arith.constant dense<0.000000e+00> : vector<1x512xf32>
    %424 = tpu.matmul %419, %265, %cst_108 {dimension_numbers = #tpu.dot_dimension_numbers<[1], [0], [0], [1], [0, 0, 1, 1], [], []>} : vector<1x128xf32>, vector<128x512xf32>, vector<1x512xf32> -> vector<1x512xf32>
    %425 = arith.addf %423, %424 : vector<1x512xf32>
    %426 = vector.extract_strided_slice %425 {offsets = [0, 0], sizes = [1, 128], strides = [1, 1]} : vector<1x512xf32> to vector<1x128xf32>
    %427 = arith.negf %426 : vector<1x128xf32>
    %428 = math.exp %427 : vector<1x128xf32>
    %cst_109 = arith.constant 1.000000e+00 : f32
    %429 = vector.broadcast %cst_109 : f32 to vector<1x128xf32>
    %430 = arith.addf %429, %428 : vector<1x128xf32>
    %431 = arith.divf %429, %430 : vector<1x128xf32>
    %432 = vector.extract_strided_slice %425 {offsets = [0, 128], sizes = [1, 128], strides = [1, 1]} : vector<1x512xf32> to vector<1x128xf32>
    %433 = arith.negf %432 : vector<1x128xf32>
    %434 = math.exp %433 : vector<1x128xf32>
    %cst_110 = arith.constant 1.000000e+00 : f32
    %435 = vector.broadcast %cst_110 : f32 to vector<1x128xf32>
    %436 = arith.addf %435, %434 : vector<1x128xf32>
    %437 = arith.divf %435, %436 : vector<1x128xf32>
    %438 = vector.extract_strided_slice %425 {offsets = [0, 256], sizes = [1, 128], strides = [1, 1]} : vector<1x512xf32> to vector<1x128xf32>
    %439 = math.tanh %438 : vector<1x128xf32>
    %440 = vector.extract_strided_slice %425 {offsets = [0, 384], sizes = [1, 128], strides = [1, 1]} : vector<1x512xf32> to vector<1x128xf32>
    %441 = arith.negf %440 : vector<1x128xf32>
    %442 = math.exp %441 : vector<1x128xf32>
    %cst_111 = arith.constant 1.000000e+00 : f32
    %443 = vector.broadcast %cst_111 : f32 to vector<1x128xf32>
    %444 = arith.addf %443, %442 : vector<1x128xf32>
    %445 = arith.divf %443, %444 : vector<1x128xf32>
    %446 = arith.mulf %437, %417 : vector<1x128xf32>
    %447 = arith.mulf %431, %439 : vector<1x128xf32>
    %448 = arith.addf %446, %447 : vector<1x128xf32>
    %449 = math.tanh %448 : vector<1x128xf32>
    %450 = arith.mulf %445, %449 : vector<1x128xf32>
    %451 = arith.index_cast %c5_i32_106 : i32 to index
    %c0_112 = arith.constant 0 : index
    %452 = vector.load %arg15[%451, %c0_112] : memref<8x128xf32, #tpu.memory_space<vmem>>, vector<1x128xf32>
    tpu.vector_store %arg15[%451, %c0_112], %450 {strides = array<i32>} : memref<8x128xf32, #tpu.memory_space<vmem>>, vector<1x128xf32>,
    %c6_i32_113 = arith.constant 6 : i32
    %453 = arith.index_cast %c6_i32_113 : i32 to index
    %c0_114 = arith.constant 0 : index
    %454 = vector.load %arg14[%453, %c0_114] : memref<8x512xf32, #tpu.memory_space<vmem>>, vector<1x512xf32>
    %cst_115 = arith.constant dense<0.000000e+00> : vector<1x512xf32>
    %455 = tpu.matmul %450, %265, %cst_115 {dimension_numbers = #tpu.dot_dimension_numbers<[1], [0], [0], [1], [0, 0, 1, 1], [], []>} : vector<1x128xf32>, vector<128x512xf32>, vector<1x512xf32> -> vector<1x512xf32>
    %456 = arith.addf %454, %455 : vector<1x512xf32>
    %457 = vector.extract_strided_slice %456 {offsets = [0, 0], sizes = [1, 128], strides = [1, 1]} : vector<1x512xf32> to vector<1x128xf32>
    %458 = arith.negf %457 : vector<1x128xf32>
    %459 = math.exp %458 : vector<1x128xf32>
    %cst_116 = arith.constant 1.000000e+00 : f32
    %460 = vector.broadcast %cst_116 : f32 to vector<1x128xf32>
    %461 = arith.addf %460, %459 : vector<1x128xf32>
    %462 = arith.divf %460, %461 : vector<1x128xf32>
    %463 = vector.extract_strided_slice %456 {offsets = [0, 128], sizes = [1, 128], strides = [1, 1]} : vector<1x512xf32> to vector<1x128xf32>
    %464 = arith.negf %463 : vector<1x128xf32>
    %465 = math.exp %464 : vector<1x128xf32>
    %cst_117 = arith.constant 1.000000e+00 : f32
    %466 = vector.broadcast %cst_117 : f32 to vector<1x128xf32>
    %467 = arith.addf %466, %465 : vector<1x128xf32>
    %468 = arith.divf %466, %467 : vector<1x128xf32>
    %469 = vector.extract_strided_slice %456 {offsets = [0, 256], sizes = [1, 128], strides = [1, 1]} : vector<1x512xf32> to vector<1x128xf32>
    %470 = math.tanh %469 : vector<1x128xf32>
    %471 = vector.extract_strided_slice %456 {offsets = [0, 384], sizes = [1, 128], strides = [1, 1]} : vector<1x512xf32> to vector<1x128xf32>
    %472 = arith.negf %471 : vector<1x128xf32>
    %473 = math.exp %472 : vector<1x128xf32>
    %cst_118 = arith.constant 1.000000e+00 : f32
    %474 = vector.broadcast %cst_118 : f32 to vector<1x128xf32>
    %475 = arith.addf %474, %473 : vector<1x128xf32>
    %476 = arith.divf %474, %475 : vector<1x128xf32>
    %477 = arith.mulf %468, %448 : vector<1x128xf32>
    %478 = arith.mulf %462, %470 : vector<1x128xf32>
    %479 = arith.addf %477, %478 : vector<1x128xf32>
    %480 = math.tanh %479 : vector<1x128xf32>
    %481 = arith.mulf %476, %480 : vector<1x128xf32>
    %482 = arith.index_cast %c6_i32_113 : i32 to index
    %c0_119 = arith.constant 0 : index
    %483 = vector.load %arg15[%482, %c0_119] : memref<8x128xf32, #tpu.memory_space<vmem>>, vector<1x128xf32>
    tpu.vector_store %arg15[%482, %c0_119], %481 {strides = array<i32>} : memref<8x128xf32, #tpu.memory_space<vmem>>, vector<1x128xf32>,
    %c7_i32_120 = arith.constant 7 : i32
    %484 = arith.index_cast %c7_i32_120 : i32 to index
    %c0_121 = arith.constant 0 : index
    %485 = vector.load %arg14[%484, %c0_121] : memref<8x512xf32, #tpu.memory_space<vmem>>, vector<1x512xf32>
    %cst_122 = arith.constant dense<0.000000e+00> : vector<1x512xf32>
    %486 = tpu.matmul %481, %265, %cst_122 {dimension_numbers = #tpu.dot_dimension_numbers<[1], [0], [0], [1], [0, 0, 1, 1], [], []>} : vector<1x128xf32>, vector<128x512xf32>, vector<1x512xf32> -> vector<1x512xf32>
    %487 = arith.addf %485, %486 : vector<1x512xf32>
    %488 = vector.extract_strided_slice %487 {offsets = [0, 0], sizes = [1, 128], strides = [1, 1]} : vector<1x512xf32> to vector<1x128xf32>
    %489 = arith.negf %488 : vector<1x128xf32>
    %490 = math.exp %489 : vector<1x128xf32>
    %cst_123 = arith.constant 1.000000e+00 : f32
    %491 = vector.broadcast %cst_123 : f32 to vector<1x128xf32>
    %492 = arith.addf %491, %490 : vector<1x128xf32>
    %493 = arith.divf %491, %492 : vector<1x128xf32>
    %494 = vector.extract_strided_slice %487 {offsets = [0, 128], sizes = [1, 128], strides = [1, 1]} : vector<1x512xf32> to vector<1x128xf32>
    %495 = arith.negf %494 : vector<1x128xf32>
    %496 = math.exp %495 : vector<1x128xf32>
    %cst_124 = arith.constant 1.000000e+00 : f32
    %497 = vector.broadcast %cst_124 : f32 to vector<1x128xf32>
    %498 = arith.addf %497, %496 : vector<1x128xf32>
    %499 = arith.divf %497, %498 : vector<1x128xf32>
    %500 = vector.extract_strided_slice %487 {offsets = [0, 256], sizes = [1, 128], strides = [1, 1]} : vector<1x512xf32> to vector<1x128xf32>
    %501 = math.tanh %500 : vector<1x128xf32>
    %502 = vector.extract_strided_slice %487 {offsets = [0, 384], sizes = [1, 128], strides = [1, 1]} : vector<1x512xf32> to vector<1x128xf32>
    %503 = arith.negf %502 : vector<1x128xf32>
    %504 = math.exp %503 : vector<1x128xf32>
    %cst_125 = arith.constant 1.000000e+00 : f32
    %505 = vector.broadcast %cst_125 : f32 to vector<1x128xf32>
    %506 = arith.addf %505, %504 : vector<1x128xf32>
    %507 = arith.divf %505, %506 : vector<1x128xf32>
    %508 = arith.mulf %499, %479 : vector<1x128xf32>
    %509 = arith.mulf %493, %501 : vector<1x128xf32>
    %510 = arith.addf %508, %509 : vector<1x128xf32>
    %511 = math.tanh %510 : vector<1x128xf32>
    %512 = arith.mulf %507, %511 : vector<1x128xf32>
    %513 = arith.index_cast %c7_i32_120 : i32 to index
    %c0_126 = arith.constant 0 : index
    %514 = vector.load %arg15[%513, %c0_126] : memref<8x128xf32, #tpu.memory_space<vmem>>, vector<1x128xf32>
    tpu.vector_store %arg15[%513, %c0_126], %512 {strides = array<i32>} : memref<8x128xf32, #tpu.memory_space<vmem>>, vector<1x128xf32>,
    %c8_i32_127 = arith.constant 8 : i32
    %c0_128 = arith.constant 0 : index
    %c0_129 = arith.constant 0 : index
    %515 = vector.load %arg15[%c0_128, %c0_129] : memref<8x128xf32, #tpu.memory_space<vmem>>, vector<8x128xf32>
    %c0_130 = arith.constant 0 : index
    %c0_131 = arith.constant 0 : index
    %516 = vector.load %arg8[%c0_130, %c0_131] : memref<128x512xf32, #tpu.memory_space<vmem>>, vector<128x512xf32>
    %cst_132 = arith.constant dense<0.000000e+00> : vector<8x512xf32>
    %517 = tpu.matmul %515, %516, %cst_132 {dimension_numbers = #tpu.dot_dimension_numbers<[1], [0], [0], [1], [0, 0, 1, 1], [], []>} : vector<8x128xf32>, vector<128x512xf32>, vector<8x512xf32> -> vector<8x512xf32>
    %c0_133 = arith.constant 0 : index
    %c0_134 = arith.constant 0 : index
    %518 = vector.load %arg10[%c0_133, %c0_134] : memref<1x512xf32, #tpu.memory_space<vmem>>, vector<1x512xf32>
    %519 = vector.broadcast %518 : vector<1x512xf32> to vector<8x512xf32>
    %520 = arith.addf %517, %519 : vector<8x512xf32>
    %c0_135 = arith.constant 0 : index
    %c0_136 = arith.constant 0 : index
    %521 = vector.load %arg14[%c0_135, %c0_136] : memref<8x512xf32, #tpu.memory_space<vmem>>, vector<8x512xf32>
    tpu.vector_store %arg14[%c0_135, %c0_136], %520 {strides = array<i32>} : memref<8x512xf32, #tpu.memory_space<vmem>>, vector<8x512xf32>,
    %c0_137 = arith.constant 0 : index
    %c0_138 = arith.constant 0 : index
    %522 = vector.load %arg9[%c0_137, %c0_138] : memref<128x512xf32, #tpu.memory_space<vmem>>, vector<128x512xf32>
    %cst_139 = arith.constant 0.000000e+00 : f32
    %523 = vector.broadcast %cst_139 : f32 to vector<1x128xf32>
    %c0_i32_140 = arith.constant 0 : i32
    %524 = arith.index_cast %c0_i32_140 : i32 to index
    %c0_141 = arith.constant 0 : index
    %525 = vector.load %arg14[%524, %c0_141] : memref<8x512xf32, #tpu.memory_space<vmem>>, vector<1x512xf32>
    %cst_142 = arith.constant dense<0.000000e+00> : vector<1x512xf32>
    %526 = tpu.matmul %523, %522, %cst_142 {dimension_numbers = #tpu.dot_dimension_numbers<[1], [0], [0], [1], [0, 0, 1, 1], [], []>} : vector<1x128xf32>, vector<128x512xf32>, vector<1x512xf32> -> vector<1x512xf32>
    %527 = arith.addf %525, %526 : vector<1x512xf32>
    %528 = vector.extract_strided_slice %527 {offsets = [0, 0], sizes = [1, 128], strides = [1, 1]} : vector<1x512xf32> to vector<1x128xf32>
    %529 = arith.negf %528 : vector<1x128xf32>
    %530 = math.exp %529 : vector<1x128xf32>
    %cst_143 = arith.constant 1.000000e+00 : f32
    %531 = vector.broadcast %cst_143 : f32 to vector<1x128xf32>
    %532 = arith.addf %531, %530 : vector<1x128xf32>
    %533 = arith.divf %531, %532 : vector<1x128xf32>
    %534 = vector.extract_strided_slice %527 {offsets = [0, 128], sizes = [1, 128], strides = [1, 1]} : vector<1x512xf32> to vector<1x128xf32>
    %535 = arith.negf %534 : vector<1x128xf32>
    %536 = math.exp %535 : vector<1x128xf32>
    %cst_144 = arith.constant 1.000000e+00 : f32
    %537 = vector.broadcast %cst_144 : f32 to vector<1x128xf32>
    %538 = arith.addf %537, %536 : vector<1x128xf32>
    %539 = arith.divf %537, %538 : vector<1x128xf32>
    %540 = vector.extract_strided_slice %527 {offsets = [0, 256], sizes = [1, 128], strides = [1, 1]} : vector<1x512xf32> to vector<1x128xf32>
    %541 = math.tanh %540 : vector<1x128xf32>
    %542 = vector.extract_strided_slice %527 {offsets = [0, 384], sizes = [1, 128], strides = [1, 1]} : vector<1x512xf32> to vector<1x128xf32>
    %543 = arith.negf %542 : vector<1x128xf32>
    %544 = math.exp %543 : vector<1x128xf32>
    %cst_145 = arith.constant 1.000000e+00 : f32
    %545 = vector.broadcast %cst_145 : f32 to vector<1x128xf32>
    %546 = arith.addf %545, %544 : vector<1x128xf32>
    %547 = arith.divf %545, %546 : vector<1x128xf32>
    %548 = arith.mulf %539, %523 : vector<1x128xf32>
    %549 = arith.mulf %533, %541 : vector<1x128xf32>
    %550 = arith.addf %548, %549 : vector<1x128xf32>
    %551 = math.tanh %550 : vector<1x128xf32>
    %552 = arith.mulf %547, %551 : vector<1x128xf32>
    %553 = arith.index_cast %c0_i32_140 : i32 to index
    %c0_146 = arith.constant 0 : index
    %554 = vector.load %arg15[%553, %c0_146] : memref<8x128xf32, #tpu.memory_space<vmem>>, vector<1x128xf32>
    tpu.vector_store %arg15[%553, %c0_146], %552 {strides = array<i32>} : memref<8x128xf32, #tpu.memory_space<vmem>>, vector<1x128xf32>,
    %c1_i32_147 = arith.constant 1 : i32
    %555 = arith.index_cast %c1_i32_147 : i32 to index
    %c0_148 = arith.constant 0 : index
    %556 = vector.load %arg14[%555, %c0_148] : memref<8x512xf32, #tpu.memory_space<vmem>>, vector<1x512xf32>
    %cst_149 = arith.constant dense<0.000000e+00> : vector<1x512xf32>
    %557 = tpu.matmul %552, %522, %cst_149 {dimension_numbers = #tpu.dot_dimension_numbers<[1], [0], [0], [1], [0, 0, 1, 1], [], []>} : vector<1x128xf32>, vector<128x512xf32>, vector<1x512xf32> -> vector<1x512xf32>
    %558 = arith.addf %556, %557 : vector<1x512xf32>
    %559 = vector.extract_strided_slice %558 {offsets = [0, 0], sizes = [1, 128], strides = [1, 1]} : vector<1x512xf32> to vector<1x128xf32>
    %560 = arith.negf %559 : vector<1x128xf32>
    %561 = math.exp %560 : vector<1x128xf32>
    %cst_150 = arith.constant 1.000000e+00 : f32
    %562 = vector.broadcast %cst_150 : f32 to vector<1x128xf32>
    %563 = arith.addf %562, %561 : vector<1x128xf32>
    %564 = arith.divf %562, %563 : vector<1x128xf32>
    %565 = vector.extract_strided_slice %558 {offsets = [0, 128], sizes = [1, 128], strides = [1, 1]} : vector<1x512xf32> to vector<1x128xf32>
    %566 = arith.negf %565 : vector<1x128xf32>
    %567 = math.exp %566 : vector<1x128xf32>
    %cst_151 = arith.constant 1.000000e+00 : f32
    %568 = vector.broadcast %cst_151 : f32 to vector<1x128xf32>
    %569 = arith.addf %568, %567 : vector<1x128xf32>
    %570 = arith.divf %568, %569 : vector<1x128xf32>
    %571 = vector.extract_strided_slice %558 {offsets = [0, 256], sizes = [1, 128], strides = [1, 1]} : vector<1x512xf32> to vector<1x128xf32>
    %572 = math.tanh %571 : vector<1x128xf32>
    %573 = vector.extract_strided_slice %558 {offsets = [0, 384], sizes = [1, 128], strides = [1, 1]} : vector<1x512xf32> to vector<1x128xf32>
    %574 = arith.negf %573 : vector<1x128xf32>
    %575 = math.exp %574 : vector<1x128xf32>
    %cst_152 = arith.constant 1.000000e+00 : f32
    %576 = vector.broadcast %cst_152 : f32 to vector<1x128xf32>
    %577 = arith.addf %576, %575 : vector<1x128xf32>
    %578 = arith.divf %576, %577 : vector<1x128xf32>
    %579 = arith.mulf %570, %550 : vector<1x128xf32>
    %580 = arith.mulf %564, %572 : vector<1x128xf32>
    %581 = arith.addf %579, %580 : vector<1x128xf32>
    %582 = math.tanh %581 : vector<1x128xf32>
    %583 = arith.mulf %578, %582 : vector<1x128xf32>
    %584 = arith.index_cast %c1_i32_147 : i32 to index
    %c0_153 = arith.constant 0 : index
    %585 = vector.load %arg15[%584, %c0_153] : memref<8x128xf32, #tpu.memory_space<vmem>>, vector<1x128xf32>
    tpu.vector_store %arg15[%584, %c0_153], %583 {strides = array<i32>} : memref<8x128xf32, #tpu.memory_space<vmem>>, vector<1x128xf32>,
    %c2_i32_154 = arith.constant 2 : i32
    %586 = arith.index_cast %c2_i32_154 : i32 to index
    %c0_155 = arith.constant 0 : index
    %587 = vector.load %arg14[%586, %c0_155] : memref<8x512xf32, #tpu.memory_space<vmem>>, vector<1x512xf32>
    %cst_156 = arith.constant dense<0.000000e+00> : vector<1x512xf32>
    %588 = tpu.matmul %583, %522, %cst_156 {dimension_numbers = #tpu.dot_dimension_numbers<[1], [0], [0], [1], [0, 0, 1, 1], [], []>} : vector<1x128xf32>, vector<128x512xf32>, vector<1x512xf32> -> vector<1x512xf32>
    %589 = arith.addf %587, %588 : vector<1x512xf32>
    %590 = vector.extract_strided_slice %589 {offsets = [0, 0], sizes = [1, 128], strides = [1, 1]} : vector<1x512xf32> to vector<1x128xf32>
    %591 = arith.negf %590 : vector<1x128xf32>
    %592 = math.exp %591 : vector<1x128xf32>
    %cst_157 = arith.constant 1.000000e+00 : f32
    %593 = vector.broadcast %cst_157 : f32 to vector<1x128xf32>
    %594 = arith.addf %593, %592 : vector<1x128xf32>
    %595 = arith.divf %593, %594 : vector<1x128xf32>
    %596 = vector.extract_strided_slice %589 {offsets = [0, 128], sizes = [1, 128], strides = [1, 1]} : vector<1x512xf32> to vector<1x128xf32>
    %597 = arith.negf %596 : vector<1x128xf32>
    %598 = math.exp %597 : vector<1x128xf32>
    %cst_158 = arith.constant 1.000000e+00 : f32
    %599 = vector.broadcast %cst_158 : f32 to vector<1x128xf32>
    %600 = arith.addf %599, %598 : vector<1x128xf32>
    %601 = arith.divf %599, %600 : vector<1x128xf32>
    %602 = vector.extract_strided_slice %589 {offsets = [0, 256], sizes = [1, 128], strides = [1, 1]} : vector<1x512xf32> to vector<1x128xf32>
    %603 = math.tanh %602 : vector<1x128xf32>
    %604 = vector.extract_strided_slice %589 {offsets = [0, 384], sizes = [1, 128], strides = [1, 1]} : vector<1x512xf32> to vector<1x128xf32>
    %605 = arith.negf %604 : vector<1x128xf32>
    %606 = math.exp %605 : vector<1x128xf32>
    %cst_159 = arith.constant 1.000000e+00 : f32
    %607 = vector.broadcast %cst_159 : f32 to vector<1x128xf32>
    %608 = arith.addf %607, %606 : vector<1x128xf32>
    %609 = arith.divf %607, %608 : vector<1x128xf32>
    %610 = arith.mulf %601, %581 : vector<1x128xf32>
    %611 = arith.mulf %595, %603 : vector<1x128xf32>
    %612 = arith.addf %610, %611 : vector<1x128xf32>
    %613 = math.tanh %612 : vector<1x128xf32>
    %614 = arith.mulf %609, %613 : vector<1x128xf32>
    %615 = arith.index_cast %c2_i32_154 : i32 to index
    %c0_160 = arith.constant 0 : index
    %616 = vector.load %arg15[%615, %c0_160] : memref<8x128xf32, #tpu.memory_space<vmem>>, vector<1x128xf32>
    tpu.vector_store %arg15[%615, %c0_160], %614 {strides = array<i32>} : memref<8x128xf32, #tpu.memory_space<vmem>>, vector<1x128xf32>,
    %c3_i32_161 = arith.constant 3 : i32
    %617 = arith.index_cast %c3_i32_161 : i32 to index
    %c0_162 = arith.constant 0 : index
    %618 = vector.load %arg14[%617, %c0_162] : memref<8x512xf32, #tpu.memory_space<vmem>>, vector<1x512xf32>
    %cst_163 = arith.constant dense<0.000000e+00> : vector<1x512xf32>
    %619 = tpu.matmul %614, %522, %cst_163 {dimension_numbers = #tpu.dot_dimension_numbers<[1], [0], [0], [1], [0, 0, 1, 1], [], []>} : vector<1x128xf32>, vector<128x512xf32>, vector<1x512xf32> -> vector<1x512xf32>
    %620 = arith.addf %618, %619 : vector<1x512xf32>
    %621 = vector.extract_strided_slice %620 {offsets = [0, 0], sizes = [1, 128], strides = [1, 1]} : vector<1x512xf32> to vector<1x128xf32>
    %622 = arith.negf %621 : vector<1x128xf32>
    %623 = math.exp %622 : vector<1x128xf32>
    %cst_164 = arith.constant 1.000000e+00 : f32
    %624 = vector.broadcast %cst_164 : f32 to vector<1x128xf32>
    %625 = arith.addf %624, %623 : vector<1x128xf32>
    %626 = arith.divf %624, %625 : vector<1x128xf32>
    %627 = vector.extract_strided_slice %620 {offsets = [0, 128], sizes = [1, 128], strides = [1, 1]} : vector<1x512xf32> to vector<1x128xf32>
    %628 = arith.negf %627 : vector<1x128xf32>
    %629 = math.exp %628 : vector<1x128xf32>
    %cst_165 = arith.constant 1.000000e+00 : f32
    %630 = vector.broadcast %cst_165 : f32 to vector<1x128xf32>
    %631 = arith.addf %630, %629 : vector<1x128xf32>
    %632 = arith.divf %630, %631 : vector<1x128xf32>
    %633 = vector.extract_strided_slice %620 {offsets = [0, 256], sizes = [1, 128], strides = [1, 1]} : vector<1x512xf32> to vector<1x128xf32>
    %634 = math.tanh %633 : vector<1x128xf32>
    %635 = vector.extract_strided_slice %620 {offsets = [0, 384], sizes = [1, 128], strides = [1, 1]} : vector<1x512xf32> to vector<1x128xf32>
    %636 = arith.negf %635 : vector<1x128xf32>
    %637 = math.exp %636 : vector<1x128xf32>
    %cst_166 = arith.constant 1.000000e+00 : f32
    %638 = vector.broadcast %cst_166 : f32 to vector<1x128xf32>
    %639 = arith.addf %638, %637 : vector<1x128xf32>
    %640 = arith.divf %638, %639 : vector<1x128xf32>
    %641 = arith.mulf %632, %612 : vector<1x128xf32>
    %642 = arith.mulf %626, %634 : vector<1x128xf32>
    %643 = arith.addf %641, %642 : vector<1x128xf32>
    %644 = math.tanh %643 : vector<1x128xf32>
    %645 = arith.mulf %640, %644 : vector<1x128xf32>
    %646 = arith.index_cast %c3_i32_161 : i32 to index
    %c0_167 = arith.constant 0 : index
    %647 = vector.load %arg15[%646, %c0_167] : memref<8x128xf32, #tpu.memory_space<vmem>>, vector<1x128xf32>
    tpu.vector_store %arg15[%646, %c0_167], %645 {strides = array<i32>} : memref<8x128xf32, #tpu.memory_space<vmem>>, vector<1x128xf32>,
    %c4_i32_168 = arith.constant 4 : i32
    %648 = arith.index_cast %c4_i32_168 : i32 to index
    %c0_169 = arith.constant 0 : index
    %649 = vector.load %arg14[%648, %c0_169] : memref<8x512xf32, #tpu.memory_space<vmem>>, vector<1x512xf32>
    %cst_170 = arith.constant dense<0.000000e+00> : vector<1x512xf32>
    %650 = tpu.matmul %645, %522, %cst_170 {dimension_numbers = #tpu.dot_dimension_numbers<[1], [0], [0], [1], [0, 0, 1, 1], [], []>} : vector<1x128xf32>, vector<128x512xf32>, vector<1x512xf32> -> vector<1x512xf32>
    %651 = arith.addf %649, %650 : vector<1x512xf32>
    %652 = vector.extract_strided_slice %651 {offsets = [0, 0], sizes = [1, 128], strides = [1, 1]} : vector<1x512xf32> to vector<1x128xf32>
    %653 = arith.negf %652 : vector<1x128xf32>
    %654 = math.exp %653 : vector<1x128xf32>
    %cst_171 = arith.constant 1.000000e+00 : f32
    %655 = vector.broadcast %cst_171 : f32 to vector<1x128xf32>
    %656 = arith.addf %655, %654 : vector<1x128xf32>
    %657 = arith.divf %655, %656 : vector<1x128xf32>
    %658 = vector.extract_strided_slice %651 {offsets = [0, 128], sizes = [1, 128], strides = [1, 1]} : vector<1x512xf32> to vector<1x128xf32>
    %659 = arith.negf %658 : vector<1x128xf32>
    %660 = math.exp %659 : vector<1x128xf32>
    %cst_172 = arith.constant 1.000000e+00 : f32
    %661 = vector.broadcast %cst_172 : f32 to vector<1x128xf32>
    %662 = arith.addf %661, %660 : vector<1x128xf32>
    %663 = arith.divf %661, %662 : vector<1x128xf32>
    %664 = vector.extract_strided_slice %651 {offsets = [0, 256], sizes = [1, 128], strides = [1, 1]} : vector<1x512xf32> to vector<1x128xf32>
    %665 = math.tanh %664 : vector<1x128xf32>
    %666 = vector.extract_strided_slice %651 {offsets = [0, 384], sizes = [1, 128], strides = [1, 1]} : vector<1x512xf32> to vector<1x128xf32>
    %667 = arith.negf %666 : vector<1x128xf32>
    %668 = math.exp %667 : vector<1x128xf32>
    %cst_173 = arith.constant 1.000000e+00 : f32
    %669 = vector.broadcast %cst_173 : f32 to vector<1x128xf32>
    %670 = arith.addf %669, %668 : vector<1x128xf32>
    %671 = arith.divf %669, %670 : vector<1x128xf32>
    %672 = arith.mulf %663, %643 : vector<1x128xf32>
    %673 = arith.mulf %657, %665 : vector<1x128xf32>
    %674 = arith.addf %672, %673 : vector<1x128xf32>
    %675 = math.tanh %674 : vector<1x128xf32>
    %676 = arith.mulf %671, %675 : vector<1x128xf32>
    %677 = arith.index_cast %c4_i32_168 : i32 to index
    %c0_174 = arith.constant 0 : index
    %678 = vector.load %arg15[%677, %c0_174] : memref<8x128xf32, #tpu.memory_space<vmem>>, vector<1x128xf32>
    tpu.vector_store %arg15[%677, %c0_174], %676 {strides = array<i32>} : memref<8x128xf32, #tpu.memory_space<vmem>>, vector<1x128xf32>,
    %c5_i32_175 = arith.constant 5 : i32
    %679 = arith.index_cast %c5_i32_175 : i32 to index
    %c0_176 = arith.constant 0 : index
    %680 = vector.load %arg14[%679, %c0_176] : memref<8x512xf32, #tpu.memory_space<vmem>>, vector<1x512xf32>
    %cst_177 = arith.constant dense<0.000000e+00> : vector<1x512xf32>
    %681 = tpu.matmul %676, %522, %cst_177 {dimension_numbers = #tpu.dot_dimension_numbers<[1], [0], [0], [1], [0, 0, 1, 1], [], []>} : vector<1x128xf32>, vector<128x512xf32>, vector<1x512xf32> -> vector<1x512xf32>
    %682 = arith.addf %680, %681 : vector<1x512xf32>
    %683 = vector.extract_strided_slice %682 {offsets = [0, 0], sizes = [1, 128], strides = [1, 1]} : vector<1x512xf32> to vector<1x128xf32>
    %684 = arith.negf %683 : vector<1x128xf32>
    %685 = math.exp %684 : vector<1x128xf32>
    %cst_178 = arith.constant 1.000000e+00 : f32
    %686 = vector.broadcast %cst_178 : f32 to vector<1x128xf32>
    %687 = arith.addf %686, %685 : vector<1x128xf32>
    %688 = arith.divf %686, %687 : vector<1x128xf32>
    %689 = vector.extract_strided_slice %682 {offsets = [0, 128], sizes = [1, 128], strides = [1, 1]} : vector<1x512xf32> to vector<1x128xf32>
    %690 = arith.negf %689 : vector<1x128xf32>
    %691 = math.exp %690 : vector<1x128xf32>
    %cst_179 = arith.constant 1.000000e+00 : f32
    %692 = vector.broadcast %cst_179 : f32 to vector<1x128xf32>
    %693 = arith.addf %692, %691 : vector<1x128xf32>
    %694 = arith.divf %692, %693 : vector<1x128xf32>
    %695 = vector.extract_strided_slice %682 {offsets = [0, 256], sizes = [1, 128], strides = [1, 1]} : vector<1x512xf32> to vector<1x128xf32>
    %696 = math.tanh %695 : vector<1x128xf32>
    %697 = vector.extract_strided_slice %682 {offsets = [0, 384], sizes = [1, 128], strides = [1, 1]} : vector<1x512xf32> to vector<1x128xf32>
    %698 = arith.negf %697 : vector<1x128xf32>
    %699 = math.exp %698 : vector<1x128xf32>
    %cst_180 = arith.constant 1.000000e+00 : f32
    %700 = vector.broadcast %cst_180 : f32 to vector<1x128xf32>
    %701 = arith.addf %700, %699 : vector<1x128xf32>
    %702 = arith.divf %700, %701 : vector<1x128xf32>
    %703 = arith.mulf %694, %674 : vector<1x128xf32>
    %704 = arith.mulf %688, %696 : vector<1x128xf32>
    %705 = arith.addf %703, %704 : vector<1x128xf32>
    %706 = math.tanh %705 : vector<1x128xf32>
    %707 = arith.mulf %702, %706 : vector<1x128xf32>
    %708 = arith.index_cast %c5_i32_175 : i32 to index
    %c0_181 = arith.constant 0 : index
    %709 = vector.load %arg15[%708, %c0_181] : memref<8x128xf32, #tpu.memory_space<vmem>>, vector<1x128xf32>
    tpu.vector_store %arg15[%708, %c0_181], %707 {strides = array<i32>} : memref<8x128xf32, #tpu.memory_space<vmem>>, vector<1x128xf32>,
    %c6_i32_182 = arith.constant 6 : i32
    %710 = arith.index_cast %c6_i32_182 : i32 to index
    %c0_183 = arith.constant 0 : index
    %711 = vector.load %arg14[%710, %c0_183] : memref<8x512xf32, #tpu.memory_space<vmem>>, vector<1x512xf32>
    %cst_184 = arith.constant dense<0.000000e+00> : vector<1x512xf32>
    %712 = tpu.matmul %707, %522, %cst_184 {dimension_numbers = #tpu.dot_dimension_numbers<[1], [0], [0], [1], [0, 0, 1, 1], [], []>} : vector<1x128xf32>, vector<128x512xf32>, vector<1x512xf32> -> vector<1x512xf32>
    %713 = arith.addf %711, %712 : vector<1x512xf32>
    %714 = vector.extract_strided_slice %713 {offsets = [0, 0], sizes = [1, 128], strides = [1, 1]} : vector<1x512xf32> to vector<1x128xf32>
    %715 = arith.negf %714 : vector<1x128xf32>
    %716 = math.exp %715 : vector<1x128xf32>
    %cst_185 = arith.constant 1.000000e+00 : f32
    %717 = vector.broadcast %cst_185 : f32 to vector<1x128xf32>
    %718 = arith.addf %717, %716 : vector<1x128xf32>
    %719 = arith.divf %717, %718 : vector<1x128xf32>
    %720 = vector.extract_strided_slice %713 {offsets = [0, 128], sizes = [1, 128], strides = [1, 1]} : vector<1x512xf32> to vector<1x128xf32>
    %721 = arith.negf %720 : vector<1x128xf32>
    %722 = math.exp %721 : vector<1x128xf32>
    %cst_186 = arith.constant 1.000000e+00 : f32
    %723 = vector.broadcast %cst_186 : f32 to vector<1x128xf32>
    %724 = arith.addf %723, %722 : vector<1x128xf32>
    %725 = arith.divf %723, %724 : vector<1x128xf32>
    %726 = vector.extract_strided_slice %713 {offsets = [0, 256], sizes = [1, 128], strides = [1, 1]} : vector<1x512xf32> to vector<1x128xf32>
    %727 = math.tanh %726 : vector<1x128xf32>
    %728 = vector.extract_strided_slice %713 {offsets = [0, 384], sizes = [1, 128], strides = [1, 1]} : vector<1x512xf32> to vector<1x128xf32>
    %729 = arith.negf %728 : vector<1x128xf32>
    %730 = math.exp %729 : vector<1x128xf32>
    %cst_187 = arith.constant 1.000000e+00 : f32
    %731 = vector.broadcast %cst_187 : f32 to vector<1x128xf32>
    %732 = arith.addf %731, %730 : vector<1x128xf32>
    %733 = arith.divf %731, %732 : vector<1x128xf32>
    %734 = arith.mulf %725, %705 : vector<1x128xf32>
    %735 = arith.mulf %719, %727 : vector<1x128xf32>
    %736 = arith.addf %734, %735 : vector<1x128xf32>
    %737 = math.tanh %736 : vector<1x128xf32>
    %738 = arith.mulf %733, %737 : vector<1x128xf32>
    %739 = arith.index_cast %c6_i32_182 : i32 to index
    %c0_188 = arith.constant 0 : index
    %740 = vector.load %arg15[%739, %c0_188] : memref<8x128xf32, #tpu.memory_space<vmem>>, vector<1x128xf32>
    tpu.vector_store %arg15[%739, %c0_188], %738 {strides = array<i32>} : memref<8x128xf32, #tpu.memory_space<vmem>>, vector<1x128xf32>,
    %c7_i32_189 = arith.constant 7 : i32
    %741 = arith.index_cast %c7_i32_189 : i32 to index
    %c0_190 = arith.constant 0 : index
    %742 = vector.load %arg14[%741, %c0_190] : memref<8x512xf32, #tpu.memory_space<vmem>>, vector<1x512xf32>
    %cst_191 = arith.constant dense<0.000000e+00> : vector<1x512xf32>
    %743 = tpu.matmul %738, %522, %cst_191 {dimension_numbers = #tpu.dot_dimension_numbers<[1], [0], [0], [1], [0, 0, 1, 1], [], []>} : vector<1x128xf32>, vector<128x512xf32>, vector<1x512xf32> -> vector<1x512xf32>
    %744 = arith.addf %742, %743 : vector<1x512xf32>
    %745 = vector.extract_strided_slice %744 {offsets = [0, 0], sizes = [1, 128], strides = [1, 1]} : vector<1x512xf32> to vector<1x128xf32>
    %746 = arith.negf %745 : vector<1x128xf32>
    %747 = math.exp %746 : vector<1x128xf32>
    %cst_192 = arith.constant 1.000000e+00 : f32
    %748 = vector.broadcast %cst_192 : f32 to vector<1x128xf32>
    %749 = arith.addf %748, %747 : vector<1x128xf32>
    %750 = arith.divf %748, %749 : vector<1x128xf32>
    %751 = vector.extract_strided_slice %744 {offsets = [0, 128], sizes = [1, 128], strides = [1, 1]} : vector<1x512xf32> to vector<1x128xf32>
    %752 = arith.negf %751 : vector<1x128xf32>
    %753 = math.exp %752 : vector<1x128xf32>
    %cst_193 = arith.constant 1.000000e+00 : f32
    %754 = vector.broadcast %cst_193 : f32 to vector<1x128xf32>
    %755 = arith.addf %754, %753 : vector<1x128xf32>
    %756 = arith.divf %754, %755 : vector<1x128xf32>
    %757 = vector.extract_strided_slice %744 {offsets = [0, 256], sizes = [1, 128], strides = [1, 1]} : vector<1x512xf32> to vector<1x128xf32>
    %758 = math.tanh %757 : vector<1x128xf32>
    %759 = vector.extract_strided_slice %744 {offsets = [0, 384], sizes = [1, 128], strides = [1, 1]} : vector<1x512xf32> to vector<1x128xf32>
    %760 = arith.negf %759 : vector<1x128xf32>
    %761 = math.exp %760 : vector<1x128xf32>
    %cst_194 = arith.constant 1.000000e+00 : f32
    %762 = vector.broadcast %cst_194 : f32 to vector<1x128xf32>
    %763 = arith.addf %762, %761 : vector<1x128xf32>
    %764 = arith.divf %762, %763 : vector<1x128xf32>
    %765 = arith.mulf %756, %736 : vector<1x128xf32>
    %766 = arith.mulf %750, %758 : vector<1x128xf32>
    %767 = arith.addf %765, %766 : vector<1x128xf32>
    %768 = math.tanh %767 : vector<1x128xf32>
    %769 = arith.mulf %764, %768 : vector<1x128xf32>
    %770 = arith.index_cast %c7_i32_189 : i32 to index
    %c0_195 = arith.constant 0 : index
    %771 = vector.load %arg15[%770, %c0_195] : memref<8x128xf32, #tpu.memory_space<vmem>>, vector<1x128xf32>
    tpu.vector_store %arg15[%770, %c0_195], %769 {strides = array<i32>} : memref<8x128xf32, #tpu.memory_space<vmem>>, vector<1x128xf32>,
    %c8_i32_196 = arith.constant 8 : i32
    %c0_197 = arith.constant 0 : index
    %c0_198 = arith.constant 0 : index
    %772 = vector.load %arg15[%c0_197, %c0_198] : memref<8x128xf32, #tpu.memory_space<vmem>>, vector<8x128xf32>
    %c0_199 = arith.constant 0 : index
    %c0_200 = arith.constant 0 : index
    %773 = vector.load %arg11[%c0_199, %c0_200] : memref<128x128xf32, #tpu.memory_space<vmem>>, vector<128x128xf32>
    %cst_201 = arith.constant dense<0.000000e+00> : vector<8x128xf32>
    %774 = tpu.matmul %772, %773, %cst_201 {dimension_numbers = #tpu.dot_dimension_numbers<[1], [0], [0], [1], [0, 0, 1, 1], [], []>} : vector<8x128xf32>, vector<128x128xf32>, vector<8x128xf32> -> vector<8x128xf32>
    %c0_202 = arith.constant 0 : index
    %c0_203 = arith.constant 0 : index
    %775 = vector.load %arg12[%c0_202, %c0_203] : memref<1x128xf32, #tpu.memory_space<vmem>>, vector<1x128xf32>
    %776 = vector.broadcast %775 : vector<1x128xf32> to vector<8x128xf32>
    %777 = arith.addf %774, %776 : vector<8x128xf32>
    %778 = vector.shape_cast %777 : vector<8x128xf32> to vector<1x8x128xf32>
    %c0_204 = arith.constant 0 : index
    %c0_205 = arith.constant 0 : index
    %c0_206 = arith.constant 0 : index
    %779 = vector.load %arg13[%c0_204, %c0_205, %c0_206] : memref<1x8x128xf32, #tpu.memory_space<vmem>>, vector<1x8x128xf32>
    tpu.vector_store %arg13[%c0_204, %c0_205, %c0_206], %778 {strides = array<i32>} : memref<1x8x128xf32, #tpu.memory_space<vmem>>, vector<1x8x128xf32>,
    return
  }
  func.func @transform_0(%arg0: i32) -> (i32, i32, i32) {
    %c0_i32 = arith.constant 0 : i32
    %c0_i32_0 = arith.constant 0 : i32
    %c0_i32_1 = arith.constant 0 : i32
    return %arg0, %c0_i32, %c0_i32_0 : i32, i32, i32
  }
  func.func @transform_1(%arg0: i32) -> (i32, i32) {
    %c0_i32 = arith.constant 0 : i32
    %c0_i32_0 = arith.constant 0 : i32
    %c0_i32_1 = arith.constant 0 : i32
    return %c0_i32, %c0_i32_0 : i32, i32
  }
  func.func @transform_2(%arg0: i32) -> (i32, i32) {
    %c0_i32 = arith.constant 0 : i32
    %c0_i32_0 = arith.constant 0 : i32
    %c0_i32_1 = arith.constant 0 : i32
    return %c0_i32, %c0_i32_0 : i32, i32
  }
  func.func @transform_3(%arg0: i32) -> (i32, i32) {
    %c0_i32 = arith.constant 0 : i32
    %c0_i32_0 = arith.constant 0 : i32
    %c0_i32_1 = arith.constant 0 : i32
    return %c0_i32, %c0_i32_0 : i32, i32
  }
  func.func @transform_4(%arg0: i32) -> (i32, i32) {
    %c0_i32 = arith.constant 0 : i32
    %c0_i32_0 = arith.constant 0 : i32
    %c0_i32_1 = arith.constant 0 : i32
    return %c0_i32, %c0_i32_0 : i32, i32
  }
  func.func @transform_5(%arg0: i32) -> (i32, i32) {
    %c0_i32 = arith.constant 0 : i32
    %c0_i32_0 = arith.constant 0 : i32
    %c0_i32_1 = arith.constant 0 : i32
    return %c0_i32, %c0_i32_0 : i32, i32
  }
  func.func @transform_6(%arg0: i32) -> (i32, i32) {
    %c0_i32 = arith.constant 0 : i32
    %c0_i32_0 = arith.constant 0 : i32
    %c0_i32_1 = arith.constant 0 : i32
    return %c0_i32, %c0_i32_0 : i32, i32
  }
  func.func @transform_7(%arg0: i32) -> (i32, i32) {
    %c0_i32 = arith.constant 0 : i32
    %c0_i32_0 = arith.constant 0 : i32
    %c0_i32_1 = arith.constant 0 : i32
    return %c0_i32, %c0_i32_0 : i32, i32
  }
  func.func @transform_8(%arg0: i32) -> (i32, i32) {
    %c0_i32 = arith.constant 0 : i32
    %c0_i32_0 = arith.constant 0 : i32
    %c0_i32_1 = arith.constant 0 : i32
    return %c0_i32, %c0_i32_0 : i32, i32
  }
  func.func @transform_9(%arg0: i32) -> (i32, i32) {
    %c0_i32 = arith.constant 0 : i32
    %c0_i32_0 = arith.constant 0 : i32
    %c0_i32_1 = arith.constant 0 : i32
    return %c0_i32, %c0_i32_0 : i32, i32
  }
  func.func @transform_10(%arg0: i32) -> (i32, i32) {
    %c0_i32 = arith.constant 0 : i32
    %c0_i32_0 = arith.constant 0 : i32
    %c0_i32_1 = arith.constant 0 : i32
    return %c0_i32, %c0_i32_0 : i32, i32
  }
  func.func @transform_11(%arg0: i32) -> (i32, i32) {
    %c0_i32 = arith.constant 0 : i32
    %c0_i32_0 = arith.constant 0 : i32
    %c0_i32_1 = arith.constant 0 : i32
    return %c0_i32, %c0_i32_0 : i32, i32
  }
  func.func @transform_12(%arg0: i32) -> (i32, i32, i32) {
    %c0_i32 = arith.constant 0 : i32
    %c0_i32_0 = arith.constant 0 : i32
    %c0_i32_1 = arith.constant 0 : i32
    return %arg0, %c0_i32, %c0_i32_0 : i32, i32, i32
  }
}

</mosaic_0001>

<bundles_post_ra>
// kernel: tpu_custom_call.1
= control target key start
LH: loop header
LB: loop body
LE: loop exit
PB: predicated region body
PF: predicated region fallthrough
CT: control target
= control target key end

     0   :  { %s9141_s0 = inlined_call_operand.vmem [shape: f32[2,8,4], index: 0, kind: input, shape index: {}]   ;;  %s9142_s1 = inlined_call_operand.vmem [shape: f32[4,512], index: 1, kind: input, shape index: {}]   ;;  %s9143_s2 = inlined_call_operand.hbm [shape: f32[128,512], index: 2, kind: input, shape index: {}]   ;;  %s9144_s3 = inlined_call_operand.vmem [shape: f32[1,512], index: 3, kind: input, shape index: {}]   ;;  %s9145_s4 = inlined_call_operand.hbm [shape: f32[128,512], index: 4, kind: input, shape index: {}]   ;;  %s9146_s5 = inlined_call_operand.hbm [shape: f32[128,512], index: 5, kind: input, shape index: {}]   ;;  %s9147_s6 = inlined_call_operand.vmem [shape: f32[1,512], index: 6, kind: input, shape index: {}]   ;;  %s9148_s7 = inlined_call_operand.hbm [shape: f32[128,512], index: 7, kind: input, shape index: {}]   ;;  %s9149_s8 = inlined_call_operand.hbm [shape: f32[128,512], index: 8, kind: input, shape index: {}]   ;;  %s9150_s9 = inlined_call_operand.vmem [shape: f32[1,512], index: 9, kind: input, shape index: {}]   ;;  %s9151_s10 = inlined_call_operand.hbm [shape: f32[128,128], index: 10, kind: input, shape index: {}]   ;;  %s9152_s11 = inlined_call_operand.vmem [shape: f32[1,128], index: 11, kind: input, shape index: {}]   ;;  %s9153_s12 = inlined_call_operand.hbm [shape: f32[2,8,128], index: 12, kind: output, shape index: {}]  }
   0x1   :  { %9500 = sst [smem:[#allocation54_spill]] %s9145_s4 }
   0x2   :  { %9501 = sst [smem:[#allocation55_spill]] %s9148_s7 }
   0x3   :  { %17 = vsyncpa [#allocation5], 0 }
   0x4   :  { %18 = vsyncpa [#allocation8], 0 }
   0x5   :  { %19 = vsyncpa [#allocation11], 0 }
   0x6   :  { %20 = vsyncpa [#allocation14], 0 }
   0x7   :  { %21 = vsyncpa [#allocation6], 0 }
   0x8   :  { %23 = vsyncpa [#allocation6 + $0x1], 0  ;;  %s6381_s21 = smov 0   ;;  %s6383_s22 = smov 0  }
   0x9   :  { %s6385_s23 = smov 0   ;;  %s6387_s24 = smov 0  }
   0xa LB: > { %9502 = sst [smem:[#allocation21_spill]] %s6291_s21  ;;  %s6402_s25 = sadd.s32 4294967295, %s6303_s24   ;;  %s6303_s24 = sphi %s6387_s24, %s9981_s24   ;;  %s6299_s23 = sphi %s6385_s23, %s9983_s23   ;;  %s6295_s22 = sphi %s6383_s22, %s9985_s22   ;;  %s6291_s21 = sphi %s6381_s21, %s9984_s21  }
   0xb   : > { %9503 = sst [smem:[#allocation22_spill]] %s6299_s23  ;;  %s5261_s26 = sadd.s32 4294967294, %s6303_s24  }
   0xc   : > { %9504 = sst [smem:[#allocation23_spill]] %s6303_s24  ;;  %s6406_s27 = sadd.s32 1, %s6303_s24  }
   0xd   : > { %9505 = sst [smem:[#allocation24_spill]] %s6406_s27  ;;  %s293_s28 = sadd.s32 1, %s6299_s23 }
   0xe   : > { %s290_s29 = ssub.s32 %s6303_s24, %s6406_s27  ;;  %p303_p0 = scmp.ne.s32.totalorder %s6299_s23, %s6295_s22 }
   0xf   : > { %p291_p1 = scmp.eq.s32.totalorder %s290_s29, 0  ;;  %p304_p2 = scmp.eq.s32.totalorder %s6402_s25, 1 }
  0x10   : > { %p309_p3 = scmp.ne.s32.totalorder %s6295_s22, %s6291_s21  ;;  %p310_p4 = scmp.eq.s32.totalorder %s5261_s26, 1 }
  0x11   : > { %s6417_s30 = scalar_select %p291_p1, %s6299_s23, %s293_s28  }
  0x12   : > { %p6419_p5 = por %p304_p2, %p303_p0  ;;  %p6423_p6 = por %p310_p4, %p309_p3 }
  0x13   : > { %9506 = sst [smem:[#allocation25_spill]] %s6417_s30  ;;  %p5262_p7 = scmp.ge.s32.totalorder %s6303_s24, 1 }
  0x14   : > { %s9508_s14 = scalar_select %p6423_p6, 1, 0 }
  0x15   : > { %p317_p8 = scmp.lt.s32.totalorder %s6303_s24, 3  ;;  %p5412_p9 = scmp.eq.s32.totalorder %s6402_s25, 0 }
  0x16   : > { %9509 = sst [smem:[#allocation26_spill]] %s9508_s14  ;;  %s6305_s29 = smov [#allocation7]  }
  0x17   : > { %p6430_p10 = pnand %p5262_p7, %p317_p8  ;;  %s9511_s4 = sld [smem:[#allocation54_spill]] }
  0x18   : > { %s9512_s7 = sld [smem:[#allocation55_spill]]  ;;  %s350_s30 = sshll.u32 %s6305_s29, 4  ;;  %s351_s30 = int_to_ptr.vmem [resolvable:$true] %s350_s30 }
  0x19   : > { %p5389_p11 = pneg %p6430_p10  ;;  %s6306_s16 = smov 512  }
  0x1a   : > { %s6307_s17 = smov 32   ;;  %s362_s14 = sshll.u32 %s9146_s5, 4  ;;  %s363_s14 = int_to_ptr.hbm [resolvable:$true] %s362_s14 }
  0x1b   : > { %p6444_p12 = pnand %p5412_p9, %p5389_p11  ;;  %s6309_s21 = smov [#allocation4]  }
  0x1c   : > { %s333_s24 = sshll.u32 %s6309_s21, 4  ;;  %s393_s20 = sshll.u32 %s9149_s8, 4  ;;  %s334_s24 = int_to_ptr.vmem [resolvable:$true] %s333_s24  ;;  %s394_s20 = int_to_ptr.hbm [resolvable:$true] %s393_s20 }
  0x1d   : > { %s348_s18 = sshll.u32 %s9511_s4, 4  ;;  %s6308_s4 = smov [#allocation10]   ;;  %s349_s18 = int_to_ptr.hbm [resolvable:$true] %s348_s18 }
  0x1e   : > { %s379_s26 = sshll.u32 %s9512_s7, 4  ;;  %s381_s23 = sshll.u32 %s6308_s4, 4  ;;  %s380_s26 = int_to_ptr.hbm [resolvable:$true] %s379_s26  ;;  %s382_s23 = int_to_ptr.vmem [resolvable:$true] %s381_s23 }
  0x1f   : > { %5395 = dma.hbm_to_vmem [thread:$0]  (!%p6444_p12), %s349_s18, 8192, %s351_s30, [#allocation8], %s6306_s16, %s6306_s16, %s6307_s17  }
  0x20   : > { %s331_s7 = sshll.u32 %s9143_s2, 4  ;;  %s6310_s4 = smov [#allocation9]   ;;  %s332_s7 = int_to_ptr.hbm [resolvable:$true] %s331_s7 }
  0x21   : > { %5401 = dma.hbm_to_vmem [thread:$0]  (!%p6444_p12), %s380_s26, 8192, %s382_s23, [#allocation11], %s6306_s16, %s6306_s16, %s6307_s17  }
  0x22   : > { %5392 = dma.hbm_to_vmem [thread:$0]  (!%p6444_p12), %s332_s7, 8192, %s334_s24, [#allocation5], %s6306_s16, %s6306_s16, %s6307_s17  }
  0x23   : > { %s364_s30 = sshll.u32 %s6310_s4, 4  ;;  %s410_s26 = sshll.u32 %s9151_s10, 4  ;;  %s365_s30 = int_to_ptr.vmem [resolvable:$true] %s364_s30  ;;  %s411_s26 = int_to_ptr.hbm [resolvable:$true] %s410_s26 }
  0x24   : > { %5398 = dma.hbm_to_vmem [thread:$0]  (!%p6444_p12), %s363_s14, 8192, %s365_s30, [#allocation8], %s6306_s16, %s6306_s16, %s6307_s17  }
  0x25   : > { %s6311_s21 = smov [#allocation12]   ;;  %s6312_s7 = smov [#allocation13]  }
  0x26   : > { %s395_s29 = sshll.u32 %s6311_s21, 4  ;;  %s412_s24 = sshll.u32 %s6312_s7, 4  ;;  %s396_s29 = int_to_ptr.vmem [resolvable:$true] %s395_s29  ;;  %s413_s24 = int_to_ptr.vmem [resolvable:$true] %s412_s24 }
  0x27   : > { %5404 = dma.hbm_to_vmem [thread:$0]  (!%p6444_p12), %s394_s20, 8192, %s396_s29, [#allocation11], %s6306_s16, %s6306_s16, %s6307_s17  }
  0x28   : > { %s6313_s4 = smov 128   ;;  %s6314_s18 = smov 8  }
  0x29   : > { %5407 = dma.hbm_to_vmem [thread:$0]  (!%p6444_p12), %s411_s26, 2048, %s413_s24, [#allocation14], %s6313_s4, %s6313_s4, %s6314_s18  }
  0x2a   : > { %438 = sbr.rel (%p6430_p10) target bundleno = 4636 (0x121c), region = 68 }
  0x2f   : > { %6270 = dma.done.wait (%p5412_p9), [#allocation5], 8192  }
  0x30   : > { %6272 = vsyncadd (%p5412_p9), [#allocation5], 4294959104 }
  0x31   : > { %6274 = dma.done.wait (%p5412_p9), [#allocation8], 16384  }
  0x32   : > { %6276 = vsyncadd (%p5412_p9), [#allocation8], 4294950912 }
  0x33   : > { %6278 = dma.done.wait (%p5412_p9), [#allocation11], 16384  }
  0x34   : > { %6280 = vsyncadd (%p5412_p9), [#allocation11], 4294950912 }
  0x35   : > { %6282 = dma.done.wait (%p5412_p9), [#allocation14], 2048  }
  0x36   : > { %6284 = vsyncadd (%p5412_p9), [#allocation14], 4294965248  ;;  %p505_p13 = scmp.lt.s32.totalorder %s6402_s25, 1  ;;  %v510_v0 = vld [vmem:[%s9142_s1] sm:$0xff]  ;;  %v511_v1 = vld [vmem:[%s9142_s1 + $0x8] sm:$0xff]  ;;  %vm535_vm0 = vcmask 1043456  }
  0x37   : > { %524 = vst [vmem:[#allocation1] ss:$2 sm:$0xff] %v510_v0  ;;  %v6501_v2 = vld [vmem:[#allocation4 + $0x1e0] sm:$0xff]  ;;  %vm531_vm1 = vcmask 31744   ;;  %v6509_v7 = vld [vmem:[#allocation4 + $0x1f0] sm:$0xff]  ;;  %v6511_v8 = vld [vmem:[#allocation4 + $0x1f8] sm:$0xff] }
  0x38   : > { %s506_s14 = scalar_select %p505_p13, %s6402_s25, 1  ;;  %526 = vst [vmem:[#allocation1 + $0x10] ss:$2 sm:$0xff] %v511_v1  ;;  %693 = vmatpush.msra.mxu0 %v6501_v2  ;;  %v6504_v3 = vld [vmem:[#allocation4 + $0x1c0] sm:$0xff]  ;;  %v6517_v11 = vld [vmem:[#allocation4 + $0x1d0] sm:$0xff]  ;;  %v6521_v12 = vld [vmem:[#allocation4 + $0x1d8] sm:$0xff] }
  0x39   : > { %v6506_v4 = vld [vmem:[#allocation4 + $0x1a0] sm:$0xff]  ;;  %v6525_v14 = vld [vmem:[#allocation4 + $0x1b0] sm:$0xff]  ;;  %v6527_v15 = vld [vmem:[#allocation4 + $0x1e8] sm:$0xff]  ;;  %vm780_vm2 = vcmask 1040384   ;;  %vm782_vm3 = vcmask 1042434   ;;  %vm784_vm4 = vcmask 1041408  }
  0x3a   : > { %s5278_s30 = sshll.u32 %s506_s14, 3  ;;  %694 = vmatpush.msra.mxu0 %v6504_v3  ;;  %v6531_v16 = vld [vmem:[#allocation4 + $0x1b8] sm:$0xff]  ;;  %v6533_v17 = vld [vmem:[#allocation4 + $0x180] sm:$0xff]  ;;  %v6537_v18 = vld [vmem:[#allocation4 + $0x190] sm:$0xff]  ;;  %s502_s4 = sand.u32 1, %s6295_s22  }
  0x3b   : > { %s508_s23 = scalar_lea.vmem %s9141_s0, %s5278_s30  ;;  %v6539_v19 = vld [vmem:[#allocation4 + $0x1c8] sm:$0xff]  ;;  %v6543_v20 = vld [vmem:[#allocation4 + $0x198] sm:$0xff]  ;;  %v6545_v21 = vld [vmem:[#allocation4 + $0x160] sm:$0xff]  ;;  %s5277_s18 = sshll.u32 %s502_s4, 3 }
  0x3c   : > { %v509_v5 = vld [vmem:[%s508_s23] sm:$0xff]  ;;  %695 = vmatpush.msra.mxu0 %v6506_v4  ;;  %v6553_v23 = vld [vmem:[#allocation4 + $0x178] sm:$0xff]  ;;  %v6555_v24 = vld [vmem:[#allocation4 + $0x1a8] sm:$0xff]  ;;  %s5360_s14 = sshll.u32 %s6402_s25, 3  ;;  %s504_s19 = scalar_lea.vmem [#allocation15], %s5277_s18 }
  0x3d   : > { %v6548_v22 = vld [vmem:[#allocation4 + $0x170] sm:$0xff]  ;;  %v6561_v26 = vld [vmem:[#allocation4 + $0x140] sm:$0xff]  ;;  %v6565_v27 = vld [vmem:[#allocation4 + $0x158] sm:$0xff]  ;;  %s5137_s16 = scalar_lea.hbm %s9153_s12, %s5360_s14  ;;  %s5139_s20 = sshll.u32 %s504_s19, 4  ;;  %s5140_s20 = int_to_ptr.vmem [resolvable:$true] %s5139_s20 }
  0x3e   : > { %v527_v6 = vld.sshfl [vmem:[#allocation1] sm:$0xff pattern:$0x75316420]  ;;  %v528_v13 = vld.sshfl [vmem:[#allocation1 + $0x8] sm:$0xff pattern:$0x75316420]  ;;  %696 = vmatpush.msra.mxu0 %v6533_v17 }
  0x3f   : > { %5279 = vmatpush.msk.msra.mxu1 %vm535_vm0, %v527_v6  ;;  %v529_v9 = vld.sshfl [vmem:[#allocation1 + $0x10] sm:$0xff pattern:$0x75316420]  ;;  %v530_v10 = vld.sshfl [vmem:[#allocation1 + $0x18] sm:$0xff pattern:$0x75316420] }
  0x40   : > { %5283 = vmatpush.msk.msra.mxu2 %vm535_vm0, %v529_v9  ;;  %5285 = vmatpush.msk.msra.mxu3 %vm535_vm0, %v530_v10  ;;  %v6558_v25 = vld [vmem:[#allocation4 + $0x150] sm:$0xff]  ;;  %v6567_v28 = vld [vmem:[#allocation4 + $0x188] sm:$0xff]  ;;  %v6573_v30 = vld [vmem:[#allocation4 + $0x120] sm:$0xff]  ;;  %v9162_v10 = vmov 0.0   ;;  %s5141_s23 = sshll.u32 %s5137_s16, 4  ;;  %s5127_s27 = scalar_lea.sflag [#allocation6], %s502_s4  ;;  %s5142_s23 = int_to_ptr.hbm [resolvable:$true] %s5141_s23 }
  0x41   : > { %5280 = vmatmul.msk.f32.vlgmr.msra.gmra.mxu1 %vm531_vm1, %v509_v5  ;;  %5284 = vmatmul.msk.f32.vlgmr.msra.gmra.mxu2 %vm531_vm1, %v509_v5  ;;  %v6571_v29 = vld [vmem:[#allocation4 + $0x130] sm:$0xff]  ;;  %v6576_v31 = vld [vmem:[#allocation4 + $0x138] sm:$0xff]  ;;  %v6578_v32 = vld [vmem:[#allocation4 + $0x168] sm:$0xff]  ;;  %s6239_s26 = sshra.s32 %s5142_s23, 4  ;;  %s6245_s7 = scalar_lea.hbm %s9153_s12, 16  ;;  %s6240_s26 = int_to_ptr.hbm [resolvable:$true] %s6239_s26 }
  0x42   : > { %733 = vmatpush.msrb.mxu2 %v6509_v7  ;;  %753 = vmatpush.msrb.mxu3 %v6511_v8  ;;  %v6583_v33 = vld [vmem:[#allocation4 + $0x110] sm:$0xff]  ;;  %v6585_v34 = vld [vmem:[#allocation4 + $0x100] sm:$0xff]  ;;  %v6588_v35 = vld [vmem:[#allocation4 + $0x118] sm:$0xff]  ;;  %s6241_s25 = scalar_lea.hbm %s6240_s26, 8  ;;  %p6246_p3 = scmp.lt.s32.totalorder %s6240_s26, %s9153_s12 }
  0x43   : > { %5286 = vmatmul.msk.f32.vlgmr.msra.gmra.mxu3 %vm531_vm1, %v509_v5  ;;  %5281 = vmatpush.msk.msrb.mxu1 %vm535_vm0, %v528_v13  ;;  %v6590_v36 = vld [vmem:[#allocation4 + $0x148] sm:$0xff]  ;;  %v6595_v37 = vld [vmem:[#allocation4 + $0xf0] sm:$0xff]  ;;  %v6597_v38 = vld [vmem:[#allocation4 + $0xe0] sm:$0xff]  ;;  %p6242_p0 = scmp.ne.s32.totalorder %s6240_s26, %s6241_s25  ;;  %p6247_p4 = scmp.lt.s32.totalorder %s6245_s7, %s6241_s25 }
  0x44   : > { %734 = vmatpush.msrb.mxu2 %v6517_v11  ;;  %754 = vmatpush.msrb.mxu3 %v6521_v12  ;;  %v6600_v39 = vld [vmem:[#allocation4 + $0xf8] sm:$0xff]  ;;  %v6602_v40 = vld [vmem:[#allocation4 + $0x128] sm:$0xff]  ;;  %v6607_v41 = vld [vmem:[#allocation4 + $0xd0] sm:$0xff] }
  0x45   : > { %713 = vmatpush.msra.mxu1 %v6527_v15  ;;  %697 = vmatpush.msra.mxu0 %v6545_v21  ;;  %9514 = vst [vmem:[#allocation27_spill] sm:$0xff] %v6607_v41  ;;  %v6609_v42 = vld [vmem:[#allocation4 + $0xc0] sm:$0xff]  ;;  %v6612_v43 = vld [vmem:[#allocation4 + $0xd8] sm:$0xff]  ;;  %v6614_v44 = vld [vmem:[#allocation4 + $0x108] sm:$0xff]  ;;  %p6243_p1 = pnand %p6242_p0, %p6419_p5  ;;  %p6248_p7 = por %p6247_p4, %p6246_p3 }
  0x46   : > { %735 = vmatpush.msrb.mxu2 %v6525_v14  ;;  %755 = vmatpush.msrb.mxu3 %v6531_v16  ;;  %9515 = vst [vmem:[#allocation28_spill] sm:$0xff] %v6612_v43  ;;  %v6619_v45 = vld [vmem:[#allocation4 + $0xb0] sm:$0xff]  ;;  %v6621_v46 = vld [vmem:[#allocation4 + $0xa0] sm:$0xff]  ;;  %v6624_v47 = vld [vmem:[#allocation4 + $0xb8] sm:$0xff] }
  0x47   : > { %714 = vmatpush.msra.mxu1 %v6539_v19  ;;  %698 = vmatpush.msra.mxu0 %v6561_v26  ;;  %9516 = vst [vmem:[#allocation29_spill] sm:$0xff] %v6619_v45  ;;  %v6626_v48 = vld [vmem:[#allocation4 + $0xe8] sm:$0xff]  ;;  %v6631_v49 = vld [vmem:[#allocation4 + $0x90] sm:$0xff]  ;;  %v6633_v50 = vld [vmem:[#allocation4 + $0x80] sm:$0xff]  ;;  %p6244_p2 = pneg %p6243_p1 }
  0x48   : > { %736 = vmatpush.msrb.mxu2 %v6537_v18  ;;  %756 = vmatpush.msrb.mxu3 %v6543_v20  ;;  %9517 = vst [vmem:[#allocation30_spill] sm:$0xff] %v6621_v46  ;;  %v6636_v51 = vld [vmem:[#allocation4 + $0x98] sm:$0xff]  ;;  %v6638_v52 = vld [vmem:[#allocation4 + $0xc8] sm:$0xff]  ;;  %v6643_v53 = vld [vmem:[#allocation4 + $0x70] sm:$0xff] }
  0x49   : > { %5282 = vmatmul.msk.f32.vlgmr.msrb.gmra.mxu1 %vm531_vm1, %v509_v5  ;;  %699 = vmatpush.msra.mxu0 %v6573_v30  ;;  %9518 = vst [vmem:[#allocation31_spill] sm:$0xff] %v6624_v47  ;;  %v6645_v54 = vld [vmem:[#allocation4 + $0x60] sm:$0xff]  ;;  %v6648_v55 = vld [vmem:[#allocation4 + $0x78] sm:$0xff]  ;;  %v6650_v56 = vld [vmem:[#allocation4 + $0xa8] sm:$0xff]  ;;  %p6249_p8 = pnand %p6248_p7, %p6244_p2 }
  0x4a   : > { %737 = vmatpush.msrb.mxu2 %v6548_v22  ;;  %757 = vmatpush.msrb.mxu3 %v6553_v23  ;;  %9519 = vst [vmem:[#allocation32_spill] sm:$0xff] %v6631_v49  ;;  %v6655_v57 = vld [vmem:[#allocation4 + $0x50] sm:$0xff]  ;;  %v6657_v58 = vld [vmem:[#allocation4 + $0x40] sm:$0xff]  ;;  %v6660_v59 = vld [vmem:[#allocation4 + $0x58] sm:$0xff] }
  0x4b   : > { %715 = vmatpush.msra.mxu1 %v6555_v24  ;;  %700 = vmatpush.msra.mxu0 %v6585_v34  ;;  %9520 = vst [vmem:[#allocation33_spill] sm:$0xff] %v6633_v50  ;;  %v6662_v60 = vld [vmem:[#allocation4 + $0x88] sm:$0xff]  ;;  %v6667_v61 = vld [vmem:[#allocation4 + $0x30] sm:$0xff]  ;;  %v6669_v62 = vld [vmem:[#allocation4 + $0x20] sm:$0xff] }
  0x4c   : > { %738 = vmatpush.msrb.mxu2 %v6558_v25  ;;  %758 = vmatpush.msrb.mxu3 %v6565_v27  ;;  %9521 = vst [vmem:[#allocation34_spill] sm:$0xff] %v6636_v51  ;;  %v6672_v63 = vld [vmem:[#allocation4 + $0x38] sm:$0xff]  ;;  %v6674_v0 = vld [vmem:[#allocation4 + $0x68] sm:$0xff]  ;;  %v6679_v1 = vld [vmem:[#allocation4 + $0x10] sm:$0xff] }
  0x4d   : > { %716 = vmatpush.msra.mxu1 %v6567_v28  ;;  %701 = vmatpush.msra.mxu0 %v6597_v38  ;;  %9522 = vst [vmem:[#allocation35_spill] sm:$0xff] %v6643_v53  ;;  %v6681_v5 = vld [vmem:[#allocation4] sm:$0xff]  ;;  %v6684_v6 = vld [vmem:[#allocation4 + $0x18] sm:$0xff]  ;;  %v6689_v9 = vld [vmem:[#allocation4 + $0x48] sm:$0xff] }
  0x4e   : > { %739 = vmatpush.msrb.mxu2 %v6571_v29  ;;  %759 = vmatpush.msrb.mxu3 %v6576_v31  ;;  %9523 = vst [vmem:[#allocation36_spill] sm:$0xff] %v6645_v54  ;;  %v6695_v13 = vld [vmem:[#allocation4 + $0x28] sm:$0xff] }
  0x4f   : > { %717 = vmatpush.msra.mxu1 %v6578_v32  ;;  %702 = vmatpush.msra.mxu0 %v6609_v42  ;;  %9524 = vst [vmem:[#allocation37_spill] sm:$0xff] %v6648_v55 }
  0x50   : > { %740 = vmatpush.msrb.mxu2 %v6583_v33  ;;  %760 = vmatpush.msrb.mxu3 %v6588_v35  ;;  %9525 = vst [vmem:[#allocation38_spill] sm:$0xff] %v6650_v56 }
  0x51   : > { %718 = vmatpush.msra.mxu1 %v6590_v36  ;;  %703 = vmatpush.msra.mxu0 %v6621_v46  ;;  %9526 = vst [vmem:[#allocation39_spill] sm:$0xff] %v6655_v57 }
  0x52   : > { %741 = vmatpush.msrb.mxu2 %v6595_v37  ;;  %761 = vmatpush.msrb.mxu3 %v6600_v39  ;;  %9527 = vst [vmem:[#allocation40_spill] sm:$0xff] %v6657_v58 }
  0x53   : > { %719 = vmatpush.msra.mxu1 %v6602_v40  ;;  %704 = vmatpush.msra.mxu0 %v6633_v50  ;;  %9528 = vst [vmem:[#allocation41_spill] sm:$0xff] %v6660_v59 }
  0x54   : > { %742 = vmatpush.msrb.mxu2 %v6607_v41  ;;  %762 = vmatpush.msrb.mxu3 %v6612_v43  ;;  %9529 = vst [vmem:[#allocation42_spill] sm:$0xff] %v6662_v60 }
  0x55   : > { %720 = vmatpush.msra.mxu1 %v6614_v44  ;;  %705 = vmatpush.msra.mxu0 %v6645_v54  ;;  %9530 = vst [vmem:[#allocation43_spill] sm:$0xff] %v6667_v61 }
  0x56   : > { %743 = vmatpush.msrb.mxu2 %v6619_v45  ;;  %763 = vmatpush.msrb.mxu3 %v6624_v47  ;;  %9531 = vst [vmem:[#allocation44_spill] sm:$0xff] %v6669_v62 }
  0x57   : > { %721 = vmatpush.msra.mxu1 %v6626_v48  ;;  %9532 = vst [vmem:[#allocation45_spill] sm:$0xff] %v6672_v63  ;;  %706 = vmatpush.msra.mxu0 %v6657_v58 }
  0x58   : > { %744 = vmatpush.msrb.mxu2 %v6631_v49  ;;  %764 = vmatpush.msrb.mxu3 %v6636_v51  ;;  %9533 = vst [vmem:[#allocation46_spill] sm:$0xff] %v6674_v0 }
  0x59   : > { %722 = vmatpush.msra.mxu1 %v6638_v52  ;;  %9534 = vst [vmem:[#allocation47_spill] sm:$0xff] %v6679_v1  ;;  %707 = vmatpush.msra.mxu0 %v6669_v62 }
  0x5a   : > { %745 = vmatpush.msrb.mxu2 %v6643_v53  ;;  %765 = vmatpush.msrb.mxu3 %v6648_v55  ;;  %9535 = vst [vmem:[#allocation48_spill] sm:$0xff] %v6681_v5 }
  0x5b   : > { %723 = vmatpush.msra.mxu1 %v6650_v56  ;;  %9536 = vst [vmem:[#allocation49_spill] sm:$0xff] %v6684_v6  ;;  %708 = vmatpush.msra.mxu0 %v6681_v5 }
  0x5c   : > { %746 = vmatpush.msrb.mxu2 %v6655_v57  ;;  %766 = vmatpush.msrb.mxu3 %v6660_v59  ;;  %9537 = vst [vmem:[#allocation50_spill] sm:$0xff] %v6689_v9 }
  0x5d   : > { %724 = vmatpush.msra.mxu1 %v6662_v60  ;;  %9538 = vst [vmem:[#allocation51_spill] sm:$0xff] %v6695_v13  ;;  %709 = vmatmul.f32.vlgmr.msra.gmra.mxu0 %v9162_v10 }
  0x5e   : > { %747 = vmatpush.msrb.mxu2 %v6667_v61  ;;  %767 = vmatpush.msrb.mxu3 %v6672_v63  ;;  %v6699_v63 = vld [vmem:[#allocation4 + $0x8] sm:$0xff] }
  0x5f   : > { %725 = vmatpush.msra.mxu1 %v6674_v0  ;;  %9539 = vst [vmem:[#allocation52_spill] sm:$0xff] %v6699_v63  ;;  %861 = vmatpush.msrb.mxu0 %v6501_v2 }
  0x60   : > { %748 = vmatpush.msrb.mxu2 %v6679_v1  ;;  %768 = vmatpush.msrb.mxu3 %v6684_v6 }
  0x61   : > { %749 = vmatmul.f32.vlgmr.msrb.gmra.mxu2 %v9162_v10  ;;  %769 = vmatmul.f32.vlgmr.msrb.gmra.mxu3 %v9162_v10 }
  0x62   : > { %726 = vmatpush.msra.mxu1 %v6689_v9  ;;  %901 = vmatpush.msra.mxu2 %v6509_v7 }
  0x63   : > { %921 = vmatpush.msra.mxu3 %v6511_v8  ;;  %862 = vmatpush.msrb.mxu0 %v6504_v3 }
  0x64   : > { %727 = vmatpush.msra.mxu1 %v6695_v13  ;;  %902 = vmatpush.msra.mxu2 %v6517_v11 }
  0x65   : > { %922 = vmatpush.msra.mxu3 %v6521_v12  ;;  %863 = vmatpush.msrb.mxu0 %v6506_v4 }
  0x66   : > { %728 = vmatpush.msra.mxu1 %v6699_v63  ;;  %903 = vmatpush.msra.mxu2 %v6525_v14 }
  0x67   : > { %729 = vmatmul.f32.vlgmr.msra.gmra.mxu1 %v9162_v10  ;;  %923 = vmatpush.msra.mxu3 %v6531_v16  ;;  %v9540_v10 = vld [vmem:[#allocation45_spill] sm:$0xff] }
  0x68   : > { %881 = vmatpush.msrb.mxu1 %v6527_v15  ;;  %864 = vmatpush.msrb.mxu0 %v6533_v17 }
  0x69   : > { %904 = vmatpush.msra.mxu2 %v6537_v18  ;;  %924 = vmatpush.msra.mxu3 %v6543_v20 }
  0x6a   : > { %882 = vmatpush.msrb.mxu1 %v6539_v19  ;;  %865 = vmatpush.msrb.mxu0 %v6545_v21 }
  0x6b   : > { %905 = vmatpush.msra.mxu2 %v6548_v22  ;;  %925 = vmatpush.msra.mxu3 %v6553_v23 }
  0x6c   : > { %883 = vmatpush.msrb.mxu1 %v6555_v24  ;;  %866 = vmatpush.msrb.mxu0 %v6561_v26 }
  0x6d   : > { %906 = vmatpush.msra.mxu2 %v6558_v25  ;;  %926 = vmatpush.msra.mxu3 %v6565_v27 }
  0x6e   : > { %884 = vmatpush.msrb.mxu1 %v6567_v28  ;;  %867 = vmatpush.msrb.mxu0 %v6573_v30 }
  0x6f   : > { %907 = vmatpush.msra.mxu2 %v6571_v29  ;;  %927 = vmatpush.msra.mxu3 %v6576_v31 }
  0x70   : > { %885 = vmatpush.msrb.mxu1 %v6578_v32  ;;  %868 = vmatpush.msrb.mxu0 %v6585_v34 }
  0x71   : > { %908 = vmatpush.msra.mxu2 %v6583_v33  ;;  %928 = vmatpush.msra.mxu3 %v6588_v35 }
  0x72   : > { %886 = vmatpush.msrb.mxu1 %v6590_v36  ;;  %869 = vmatpush.msrb.mxu0 %v6597_v38 }
  0x73   : > { %909 = vmatpush.msra.mxu2 %v6595_v37  ;;  %929 = vmatpush.msra.mxu3 %v6600_v39 }
  0x74   : > { %887 = vmatpush.msrb.mxu1 %v6602_v40  ;;  %870 = vmatpush.msrb.mxu0 %v6609_v42 }
  0x75   : > { %910 = vmatpush.msra.mxu2 %v6607_v41  ;;  %930 = vmatpush.msra.mxu3 %v6612_v43 }
  0x76   : > { %888 = vmatpush.msrb.mxu1 %v6614_v44  ;;  %871 = vmatpush.msrb.mxu0 %v6621_v46 }
  0x77   : > { %911 = vmatpush.msra.mxu2 %v6619_v45  ;;  %931 = vmatpush.msra.mxu3 %v6624_v47 }
  0x78   : > { %889 = vmatpush.msrb.mxu1 %v6626_v48  ;;  %872 = vmatpush.msrb.mxu0 %v6633_v50 }
  0x79   : > { %912 = vmatpush.msra.mxu2 %v6631_v49  ;;  %932 = vmatpush.msra.mxu3 %v6636_v51 }
  0x7a   : > { %890 = vmatpush.msrb.mxu1 %v6638_v52  ;;  %873 = vmatpush.msrb.mxu0 %v6645_v54 }
  0x7b   : > { %913 = vmatpush.msra.mxu2 %v6643_v53  ;;  %933 = vmatpush.msra.mxu3 %v6648_v55 }
  0x7c   : > { %891 = vmatpush.msrb.mxu1 %v6650_v56  ;;  %874 = vmatpush.msrb.mxu0 %v6657_v58 }
  0x7d   : > { %914 = vmatpush.msra.mxu2 %v6655_v57  ;;  %934 = vmatpush.msra.mxu3 %v6660_v59 }
  0x7e   : > { %892 = vmatpush.msrb.mxu1 %v6662_v60  ;;  %875 = vmatpush.msrb.mxu0 %v6669_v62 }
  0x7f   : > { %915 = vmatpush.msra.mxu2 %v6667_v61  ;;  %935 = vmatpush.msra.mxu3 %v9540_v10 }
  0x80   : > { %893 = vmatpush.msrb.mxu1 %v6674_v0  ;;  %876 = vmatpush.msrb.mxu0 %v6681_v5 }
  0x81   : > { %916 = vmatpush.msra.mxu2 %v6679_v1  ;;  %936 = vmatpush.msra.mxu3 %v6684_v6 }
  0x82   : > { %894 = vmatpush.msrb.mxu1 %v6689_v9  ;;  %1026 = vmatpush.msra.mxu0 %v6501_v2 }
  0x83   : > { %1066 = vmatpush.msrb.mxu2 %v6509_v7  ;;  %1086 = vmatpush.msrb.mxu3 %v6511_v8 }
  0x84   : > { %895 = vmatpush.msrb.mxu1 %v6695_v13  ;;  %1027 = vmatpush.msra.mxu0 %v6504_v3 }
  0x85   : > { %1067 = vmatpush.msrb.mxu2 %v6517_v11  ;;  %1087 = vmatpush.msrb.mxu3 %v6521_v12 }
  0x86   : > { %896 = vmatpush.msrb.mxu1 %v6699_v63  ;;  %1028 = vmatpush.msra.mxu0 %v6506_v4 }
  0x87   : > { %1068 = vmatpush.msrb.mxu2 %v6525_v14  ;;  %1088 = vmatpush.msrb.mxu3 %v6531_v16 }
  0x88   : > { %1046 = vmatpush.msra.mxu1 %v6527_v15  ;;  %1029 = vmatpush.msra.mxu0 %v6533_v17 }
  0x89   : > { %1069 = vmatpush.msrb.mxu2 %v6537_v18  ;;  %1089 = vmatpush.msrb.mxu3 %v6543_v20 }
  0x8a   : > { %1047 = vmatpush.msra.mxu1 %v6539_v19  ;;  %1030 = vmatpush.msra.mxu0 %v6545_v21 }
  0x8b   : > { %1070 = vmatpush.msrb.mxu2 %v6548_v22  ;;  %1090 = vmatpush.msrb.mxu3 %v6553_v23 }
  0x8c   : > { %1048 = vmatpush.msra.mxu1 %v6555_v24  ;;  %1031 = vmatpush.msra.mxu0 %v6561_v26 }
  0x8d   : > { %1071 = vmatpush.msrb.mxu2 %v6558_v25  ;;  %1091 = vmatpush.msrb.mxu3 %v6565_v27 }
  0x8e   : > { %1049 = vmatpush.msra.mxu1 %v6567_v28  ;;  %1032 = vmatpush.msra.mxu0 %v6573_v30 }
  0x8f   : > { %1072 = vmatpush.msrb.mxu2 %v6571_v29  ;;  %1092 = vmatpush.msrb.mxu3 %v6576_v31 }
  0x90   : > { %1050 = vmatpush.msra.mxu1 %v6578_v32  ;;  %1033 = vmatpush.msra.mxu0 %v6585_v34 }
  0x91   : > { %1073 = vmatpush.msrb.mxu2 %v6583_v33  ;;  %1093 = vmatpush.msrb.mxu3 %v6588_v35 }
  0x92   : > { %1051 = vmatpush.msra.mxu1 %v6590_v36  ;;  %1034 = vmatpush.msra.mxu0 %v6597_v38 }
  0x93   : > { %1074 = vmatpush.msrb.mxu2 %v6595_v37  ;;  %1094 = vmatpush.msrb.mxu3 %v6600_v39 }
  0x94   : > { %1052 = vmatpush.msra.mxu1 %v6602_v40  ;;  %1035 = vmatpush.msra.mxu0 %v6609_v42 }
  0x95   : > { %1075 = vmatpush.msrb.mxu2 %v6607_v41  ;;  %1095 = vmatpush.msrb.mxu3 %v6612_v43 }
  0x96   : > { %1053 = vmatpush.msra.mxu1 %v6614_v44  ;;  %1036 = vmatpush.msra.mxu0 %v6621_v46 }
  0x97   : > { %1076 = vmatpush.msrb.mxu2 %v6619_v45  ;;  %1096 = vmatpush.msrb.mxu3 %v6624_v47 }
  0x98   : > { %1054 = vmatpush.msra.mxu1 %v6626_v48  ;;  %1037 = vmatpush.msra.mxu0 %v6633_v50 }
  0x99   : > { %1077 = vmatpush.msrb.mxu2 %v6631_v49  ;;  %1097 = vmatpush.msrb.mxu3 %v6636_v51 }
  0x9a   : > { %1055 = vmatpush.msra.mxu1 %v6638_v52  ;;  %1038 = vmatpush.msra.mxu0 %v6645_v54 }
  0x9b   : > { %1078 = vmatpush.msrb.mxu2 %v6643_v53  ;;  %1098 = vmatpush.msrb.mxu3 %v6648_v55 }
  0x9c   : > { %1056 = vmatpush.msra.mxu1 %v6650_v56  ;;  %1039 = vmatpush.msra.mxu0 %v6657_v58 }
  0x9d   : > { %1079 = vmatpush.msrb.mxu2 %v6655_v57  ;;  %1099 = vmatpush.msrb.mxu3 %v6660_v59 }
  0x9e   : > { %1057 = vmatpush.msra.mxu1 %v6662_v60  ;;  %1040 = vmatpush.msra.mxu0 %v6669_v62  ;;  %v512_v62 = vld [vmem:[%s9144_s3] sm:$0xf] }
  0x9f   : > { %1080 = vmatpush.msrb.mxu2 %v6667_v61  ;;  %1100 = vmatpush.msrb.mxu3 %v9540_v10  ;;  %v514_v59 = vperm.slane %v512_v62, 0  ;;  %v516_v61 = vperm.slane %v512_v62, 2  ;;  %v515_v10 = vperm.slane %v512_v62, 1  ;;  %v517_v58 = vperm.slane %v512_v62, 3 }
  0xa0   : > { %1058 = vmatpush.msra.mxu1 %v6674_v0  ;;  %1041 = vmatpush.msra.mxu0 %v6681_v5 }
  0xa1   : > { %1081 = vmatpush.msrb.mxu2 %v6679_v1  ;;  %1101 = vmatpush.msrb.mxu3 %v6684_v6 }
  0xa2   : > { %1059 = vmatpush.msra.mxu1 %v6689_v9 }
  0xa4   : > { %1060 = vmatpush.msra.mxu1 %v6695_v13 }
  0xa6   : > { %1061 = vmatpush.msra.mxu1 %v6699_v63 }
  0xbe   : > { %v561_v57 = vpop.f32.mrf.mxu1 }
  0xbf   : > { %v562_v9 = vadd.f32 %v561_v57, %v514_v59 }
  0xc1   : > { %624 = vst [vmem:[#allocation2] sm:$0xff] %v562_v9 }
  0xc4   : > { %v601_v5 = vpop.f32.mrf.mxu2 }
  0xc5   : > { %v602_v13 = vadd.f32 %v601_v5, %v516_v61 }
  0xc6   : > { %v581_v55 = vpop.f32.mrf.mxu1  ;;  %v621_v53 = vpop.f32.mrf.mxu3 }
  0xc7   : > { %v582_v1 = vadd.f32 %v581_v55, %v515_v10  ;;  %v622_v0 = vadd.f32 %v621_v53, %v517_v58  ;;  %626 = vst [vmem:[#allocation2 + $0x10] sm:$0xff] %v602_v13 }
  0xc9   : > { %625 = vst [vmem:[#allocation2 + $0x8] sm:$0xff] %v582_v1 }
  0xca   : > { %627 = vst [vmem:[#allocation2 + $0x18] sm:$0xff] %v622_v0 }
  0xd1   : > { %v692_v5 = vld [vmem:[#allocation2] ss:$8 sm:$0xf] }
  0xda   : > { %v710_v6 = vpop.f32.mrf.mxu0 }
  0xe4   : > { %v730_v63 = vpop.f32.mrf.mxu1  ;;  %v750_v54 = vpop.f32.mrf.mxu2 }
  0xe5   : > { %v777_v51 = vrot.slane %v730_v63, 7  ;;  %v778_v49 = vrot.slane %v750_v54, 6  ;;  %v770_v57 = vpop.f32.mrf.mxu3 }
  0xe6   : > { %v779_v59 = vrot.slane %v770_v57, 5 }
  0xe7   : > { %v781_v62 = vsel %vm780_vm2, %v710_v6, %v777_v51 }
  0xe8   : > { %v783_v61 = vsel %vm782_vm3, %v778_v49, %v779_v59 }
  0xe9   : > { %v785_v53 = vsel %vm784_vm4, %v781_v62, %v783_v61 }
  0xea   : > { %v787_v55 = vadd.f32 %v785_v53, %v692_v5 }
  0xec   : > { %v5287_v58 = vmul.f32 -1.442695, %v787_v55  ;;  %v808_v0 = vrot.slane %v787_v55, 1  ;;  %v832_v1 = vrot.slane %v787_v55, 3  ;;  %v829_v5 = vrot.slane %v787_v55, 2 }
  0xee   : > { %5469 = vpow2.f32 %v5287_v58  ;;  %v5288_v9 = vmul.f32 -1.442695, %v808_v0  ;;  %v5289_v10 = vmul.f32 -1.442695, %v832_v1 }
  0xf0   : > { %5471 = vpow2.f32 %v5288_v9 }
  0xf1   : > { %5473 = vpow2.f32 %v5289_v10 }
  0xf4   : > { %v5470_v54 = vpop.eup %5469 }
  0xf5   : > { %v791_v63 = vadd.f32 1.0, %v5470_v54 }
  0xf6   : > { %v5472_v13 = vpop.eup %5471 }
  0xf7   : > { %v5474_v57 = vpop.eup %5473  ;;  %5475 = vrcp.f32 %v791_v63  ;;  %v813_v51 = vadd.f32 1.0, %v5472_v13  ;;  %v803_v1 = vand.u32 2147483648, %v791_v63  ;;  %v801_v10 = vand.u32 2147483647, %v791_v63 }
  0xf8   : > { %v837_v6 = vadd.f32 1.0, %v5474_v57  ;;  %vm797_vm6 = vweird.f32 %v791_v63 }
  0xf9   : > { %5477 = vrcp.f32 %v813_v51  ;;  %v825_v13 = vand.u32 2147483648, %v813_v51  ;;  %v823_v50 = vand.u32 2147483647, %v813_v51  ;;  %v804_v45 = vor.u32 1.1754944e-38, %v803_v1  ;;  %v9557_v1 = vld [vmem:[#allocation39_spill] sm:$0xff] }
  0xfa   : > { %5479 = vrcp.f32 %v837_v6  ;;  %vm802_vm9 = vcmp.eq.f32.partialorder %v801_v10, 8.507059e+37  ;;  %vm819_vm10 = vweird.f32 %v813_v51  ;;  %vm843_vm14 = vweird.f32 %v837_v6  ;;  %v9559_v10 = vld [vmem:[#allocation44_spill] sm:$0xff] }
  0xfb   : > { %5481 = vtanh.f32 %v829_v5  ;;  %v826_v56 = vor.u32 1.1754944e-38, %v825_v13  ;;  %vm824_vm12 = vcmp.eq.f32.partialorder %v823_v50, 8.507059e+37  ;;  %v9560_v13 = vld [vmem:[#allocation51_spill] sm:$0xff] }
  0xfd   : > { %v5476_v49 = vpop.eup %5475 }
  0xfe   : > { %v793_v59 = vmul.f32 %v5476_v49, %v791_v63  ;;  %vm798_vm5 = vweird.f32 %v5476_v49 }
  0xff   : > { %v5478_v62 = vpop.eup %5477  ;;  %vm799_vm7 = vmor %vm797_vm6, %vm798_vm5 }
 0x100   : > { %v794_v61 = vsub.f32 1.0, %v793_v59  ;;  %v5480_v53 = vpop.eup %5479  ;;  %v815_v58 = vmul.f32 %v5478_v62, %v813_v51  ;;  %vm820_vm8 = vweird.f32 %v5478_v62  ;;  %v847_v51 = vand.u32 2147483647, %v837_v6 }
 0x101   : > { %v839_v9 = vmul.f32 %v5480_v53, %v837_v6  ;;  %vm821_vm11 = vmor %vm819_vm10, %vm820_vm8  ;;  %vm844_vm13 = vweird.f32 %v5480_v53 }
 0x102   : > { %v795_v0 = vmul.f32 %v5476_v49, %v794_v61  ;;  %v816_v54 = vsub.f32 1.0, %v815_v58  ;;  %v5482_v58 = vpop.eup %5481  ;;  %vm845_vm15 = vmor %vm843_vm14, %vm844_vm13  ;;  %vm848_vm0 = vcmp.eq.f32.partialorder %v847_v51, 8.507059e+37 }
 0x103   : > { %v840_v59 = vsub.f32 1.0, %v839_v9  ;;  %v9558_v9 = vld [vmem:[#allocation41_spill] sm:$0xff] }
 0x104   : > { %v796_v60 = vadd.f32 %v5476_v49, %v795_v0  ;;  %v817_v57 = vmul.f32 %v5478_v62, %v816_v54 }
 0x105   : > { %v841_v63 = vmul.f32 %v5480_v53, %v840_v59  ;;  %v9562_v59 = vld [vmem:[#allocation45_spill] sm:$0xff] }
 0x106   : > { %v800_v47 = vsel %vm799_vm7, %v5476_v49, %v796_v60  ;;  %v818_v55 = vadd.f32 %v5478_v62, %v817_v57  ;;  %v849_v60 = vand.u32 2147483648, %v837_v6  ;;  %v9555_v6 = vld [vmem:[#allocation40_spill] sm:$0xff]  ;;  %v9561_v57 = vld [vmem:[#allocation43_spill] sm:$0xff] }
 0x107   : > { %v805_v61 = vsel %vm802_vm9, %v804_v45, %v800_v47  ;;  %v842_v54 = vadd.f32 %v5480_v53, %v841_v63 }
 0x108   : > { %v822_v46 = vsel %vm821_vm11, %v5478_v62, %v818_v55  ;;  %v854_v5 = vmul.f32 %v5482_v58, %v805_v61  ;;  %v850_v47 = vor.u32 1.1754944e-38, %v849_v60  ;;  %v9563_v55 = vld [vmem:[#allocation48_spill] sm:$0xff]  ;;  %v9565_v58 = vld [vmem:[#allocation47_spill] sm:$0xff] }
 0x109   : > { %v827_v0 = vsel %vm824_vm12, %v826_v56, %v822_v46  ;;  %v846_v45 = vsel %vm845_vm15, %v5480_v53, %v842_v54  ;;  %v9553_v46 = vld [vmem:[#allocation35_spill] sm:$0xff]  ;;  %v9554_v56 = vld [vmem:[#allocation37_spill] sm:$0xff]  ;;  %v9556_v53 = vld [vmem:[#allocation50_spill] sm:$0xff] }
 0x10a   : > { %v853_v43 = vmul.f32 0.0, %v827_v0  ;;  %v851_v50 = vsel %vm848_vm0, %v850_v47, %v846_v45  ;;  %v9564_v61 = vld [vmem:[#allocation52_spill] sm:$0xff]  ;;  %v9566_v0 = vld [vmem:[#allocation49_spill] sm:$0xff] }
 0x10c   : > { %v6839_v41 = vadd.f32 %v854_v5, %v853_v43  ;;  %v9552_v43 = vld [vmem:[#allocation46_spill] sm:$0xff] }
 0x10e   : > { %5483 = vtanh.f32 %v6839_v41 }
 0x114   : > { %v5484_v49 = vpop.eup %5483 }
 0x115   : > { %v857_v62 = vmul.f32 %v5484_v49, %v851_v50 }
 0x117   : > { %858 = vst [vmem:[#allocation3] sm:$0x1] %v857_v62  ;;  %877 = vmatmul.f32.vlgmr.msrb.gmra.mxu0 %v857_v62  ;;  %897 = vmatmul.f32.vlgmr.msrb.gmra.mxu1 %v857_v62 }
 0x118   : > { %917 = vmatmul.f32.vlgmr.msra.gmra.mxu2 %v857_v62  ;;  %937 = vmatmul.f32.vlgmr.msra.gmra.mxu3 %v857_v62  ;;  %v860_v62 = vld [vmem:[#allocation2 + $0x1] ss:$8 sm:$0xf] }
 0x119   : > { %1191 = vmatpush.msrb.mxu0 %v6501_v2  ;;  %1211 = vmatpush.msrb.mxu1 %v6527_v15  ;;  %v9541_v2 = vld [vmem:[#allocation27_spill] sm:$0xff] }
 0x11a   : > { %1231 = vmatpush.msra.mxu2 %v6509_v7  ;;  %1251 = vmatpush.msra.mxu3 %v6511_v8  ;;  %v9544_v7 = vld [vmem:[#allocation38_spill] sm:$0xff]  ;;  %v9545_v8 = vld [vmem:[#allocation29_spill] sm:$0xff] }
 0x11b   : > { %1192 = vmatpush.msrb.mxu0 %v6504_v3  ;;  %1212 = vmatpush.msrb.mxu1 %v6539_v19  ;;  %v9542_v3 = vld [vmem:[#allocation28_spill] sm:$0xff] }
 0x11c   : > { %1232 = vmatpush.msra.mxu2 %v6517_v11  ;;  %1252 = vmatpush.msra.mxu3 %v6521_v12  ;;  %v9546_v11 = vld [vmem:[#allocation31_spill] sm:$0xff]  ;;  %v9547_v12 = vld [vmem:[#allocation33_spill] sm:$0xff] }
 0x11d   : > { %1193 = vmatpush.msrb.mxu0 %v6506_v4  ;;  %1213 = vmatpush.msrb.mxu1 %v6555_v24  ;;  %v9543_v4 = vld [vmem:[#allocation30_spill] sm:$0xff] }
 0x11e   : > { %1233 = vmatpush.msra.mxu2 %v6525_v14  ;;  %1253 = vmatpush.msra.mxu3 %v6531_v16  ;;  %v9548_v14 = vld [vmem:[#allocation42_spill] sm:$0xff]  ;;  %v9549_v16 = vld [vmem:[#allocation32_spill] sm:$0xff] }
 0x11f   : > { %1194 = vmatpush.msrb.mxu0 %v6533_v17  ;;  %1214 = vmatpush.msrb.mxu1 %v6567_v28  ;;  %v9550_v17 = vld [vmem:[#allocation34_spill] sm:$0xff] }
 0x120   : > { %1234 = vmatpush.msra.mxu2 %v6537_v18  ;;  %1254 = vmatpush.msra.mxu3 %v6543_v20  ;;  %v9551_v18 = vld [vmem:[#allocation36_spill] sm:$0xff] }
 0x121   : > { %1195 = vmatpush.msrb.mxu0 %v6545_v21  ;;  %1215 = vmatpush.msrb.mxu1 %v6578_v32 }
 0x122   : > { %1235 = vmatpush.msra.mxu2 %v6548_v22  ;;  %1255 = vmatpush.msra.mxu3 %v6553_v23 }
 0x123   : > { %1196 = vmatpush.msrb.mxu0 %v6561_v26  ;;  %1216 = vmatpush.msrb.mxu1 %v6590_v36 }
 0x124   : > { %1236 = vmatpush.msra.mxu2 %v6558_v25  ;;  %1256 = vmatpush.msra.mxu3 %v6565_v27 }
 0x125   : > { %1197 = vmatpush.msrb.mxu0 %v6573_v30  ;;  %1217 = vmatpush.msrb.mxu1 %v6602_v40 }
 0x126   : > { %1237 = vmatpush.msra.mxu2 %v6571_v29  ;;  %1257 = vmatpush.msra.mxu3 %v6576_v31 }
 0x127   : > { %1198 = vmatpush.msrb.mxu0 %v6585_v34  ;;  %1218 = vmatpush.msrb.mxu1 %v6614_v44 }
 0x128   : > { %1238 = vmatpush.msra.mxu2 %v6583_v33  ;;  %1258 = vmatpush.msra.mxu3 %v6588_v35 }
 0x129   : > { %1199 = vmatpush.msrb.mxu0 %v6597_v38  ;;  %1219 = vmatpush.msrb.mxu1 %v6626_v48 }
 0x12a   : > { %1239 = vmatpush.msra.mxu2 %v6595_v37  ;;  %1259 = vmatpush.msra.mxu3 %v6600_v39 }
 0x12b   : > { %1200 = vmatpush.msrb.mxu0 %v6609_v42  ;;  %1220 = vmatpush.msrb.mxu1 %v6638_v52 }
 0x12c   : > { %1240 = vmatpush.msra.mxu2 %v9541_v2  ;;  %1260 = vmatpush.msra.mxu3 %v9542_v3 }
 0x12d   : > { %1201 = vmatpush.msrb.mxu0 %v9543_v4  ;;  %1221 = vmatpush.msrb.mxu1 %v9544_v7 }
 0x12e   : > { %1241 = vmatpush.msra.mxu2 %v9545_v8  ;;  %1261 = vmatpush.msra.mxu3 %v9546_v11 }
 0x12f   : > { %1202 = vmatpush.msrb.mxu0 %v9547_v12  ;;  %1222 = vmatpush.msrb.mxu1 %v9548_v14 }
 0x130   : > { %1242 = vmatpush.msra.mxu2 %v9549_v16  ;;  %1262 = vmatpush.msra.mxu3 %v9550_v17 }
 0x131   : > { %1203 = vmatpush.msrb.mxu0 %v9551_v18  ;;  %1223 = vmatpush.msrb.mxu1 %v9552_v43 }
 0x132   : > { %1243 = vmatpush.msra.mxu2 %v9553_v46  ;;  %1263 = vmatpush.msra.mxu3 %v9554_v56 }
 0x133   : > { %1204 = vmatpush.msrb.mxu0 %v9555_v6  ;;  %1224 = vmatpush.msrb.mxu1 %v9556_v53 }
 0x134   : > { %1244 = vmatpush.msra.mxu2 %v9557_v1  ;;  %1264 = vmatpush.msra.mxu3 %v9558_v9 }
 0x135   : > { %1205 = vmatpush.msrb.mxu0 %v9559_v10  ;;  %1225 = vmatpush.msrb.mxu1 %v9560_v13 }
 0x136   : > { %1245 = vmatpush.msra.mxu2 %v9561_v57  ;;  %1265 = vmatpush.msra.mxu3 %v9562_v59 }
 0x137   : > { %1206 = vmatpush.msrb.mxu0 %v9563_v55  ;;  %1226 = vmatpush.msrb.mxu1 %v9564_v61 }
 0x138   : > { %1246 = vmatpush.msra.mxu2 %v9565_v58  ;;  %1266 = vmatpush.msra.mxu3 %v9566_v0 }
 0x194   : > { %v898_v63 = vpop.f32.mrf.mxu1  ;;  %v878_v47 = vpop.f32.mrf.mxu0 }
 0x195   : > { %v945_v5 = vrot.slane %v898_v63, 7 }
 0x197   : > { %v948_v49 = vsel %vm780_vm2, %v878_v47, %v945_v5 }
 0x19b   : > { %v918_v54 = vpop.f32.mrf.mxu2  ;;  %v938_v60 = vpop.f32.mrf.mxu3 }
 0x19c   : > { %v946_v51 = vrot.slane %v918_v54, 6  ;;  %v947_v45 = vrot.slane %v938_v60, 5 }
 0x19e   : > { %v949_v50 = vsel %vm782_vm3, %v946_v51, %v947_v45 }
 0x19f   : > { %v950_v55 = vsel %vm784_vm4, %v948_v49, %v949_v50 }
 0x1a0   : > { %v952_v59 = vadd.f32 %v950_v55, %v860_v62 }
 0x1a2   : > { %v5290_v61 = vmul.f32 -1.442695, %v952_v59  ;;  %v973_v57 = vrot.slane %v952_v59, 1  ;;  %v997_v58 = vrot.slane %v952_v59, 3  ;;  %v994_v49 = vrot.slane %v952_v59, 2 }
 0x1a4   : > { %5485 = vpow2.f32 %v5290_v61  ;;  %v5291_v0 = vmul.f32 -1.442695, %v973_v57  ;;  %v5292_v13 = vmul.f32 -1.442695, %v997_v58 }
 0x1a6   : > { %5487 = vpow2.f32 %v5291_v0 }
 0x1a7   : > { %5489 = vpow2.f32 %v5292_v13 }
 0x1aa   : > { %v5486_v63 = vpop.eup %5485 }
 0x1ab   : > { %v956_v54 = vadd.f32 1.0, %v5486_v63 }
 0x1ac   : > { %v5488_v60 = vpop.eup %5487 }
 0x1ad   : > { %v5490_v10 = vpop.eup %5489  ;;  %5491 = vrcp.f32 %v956_v54  ;;  %v978_v5 = vadd.f32 1.0, %v5488_v60  ;;  %v968_v57 = vand.u32 2147483648, %v956_v54  ;;  %v966_v63 = vand.u32 2147483647, %v956_v54 }
 0x1ae   : > { %v1002_v47 = vadd.f32 1.0, %v5490_v10  ;;  %vm962_vm5 = vweird.f32 %v956_v54 }
 0x1af   : > { %5493 = vrcp.f32 %v978_v5  ;;  %v990_v9 = vand.u32 2147483648, %v978_v5  ;;  %v988_v1 = vand.u32 2147483647, %v978_v5  ;;  %v969_v53 = vor.u32 1.1754944e-38, %v968_v57 }
 0x1b0   : > { %5495 = vrcp.f32 %v1002_v47  ;;  %vm967_vm8 = vcmp.eq.f32.partialorder %v966_v63, 8.507059e+37  ;;  %vm984_vm9 = vweird.f32 %v978_v5  ;;  %v1014_v57 = vand.u32 2147483648, %v1002_v47  ;;  %v6947_v63 = vld [vmem:[#allocation4 + $0x190] sm:$0xff] }
 0x1b1   : > { %5497 = vtanh.f32 %v994_v49  ;;  %vm989_vm11 = vcmp.eq.f32.partialorder %v988_v1, 8.507059e+37  ;;  %vm1008_vm13 = vweird.f32 %v1002_v47 }
 0x1b3   : > { %v5492_v51 = vpop.eup %5491 }
 0x1b4   : > { %v958_v45 = vmul.f32 %v5492_v51, %v956_v54  ;;  %vm963_vm1 = vweird.f32 %v5492_v51 }
 0x1b5   : > { %v5494_v55 = vpop.eup %5493  ;;  %vm964_vm7 = vmor %vm962_vm5, %vm963_vm1 }
 0x1b6   : > { %v5496_v50 = vpop.eup %5495  ;;  %v959_v62 = vsub.f32 1.0, %v958_v45  ;;  %v980_v61 = vmul.f32 %v5494_v55, %v978_v5  ;;  %vm985_vm6 = vweird.f32 %v5494_v55  ;;  %v1012_v5 = vand.u32 2147483647, %v1002_v47 }
 0x1b7   : > { %v1004_v58 = vmul.f32 %v5496_v50, %v1002_v47  ;;  %vm986_vm10 = vmor %vm984_vm9, %vm985_vm6  ;;  %v5498_v46 = vpop.eup %5497  ;;  %vm1009_vm12 = vweird.f32 %v5496_v50  ;;  %v6930_v47 = vld [vmem:[#allocation4 + $0x1d8] sm:$0xff] }
 0x1b8   : > { %v981_v0 = vsub.f32 1.0, %v980_v61  ;;  %v960_v13 = vmul.f32 %v5492_v51, %v959_v62  ;;  %v991_v61 = vor.u32 1.1754944e-38, %v990_v9  ;;  %vm1010_vm14 = vmor %vm1008_vm13, %vm1009_vm12  ;;  %v1015_v9 = vor.u32 1.1754944e-38, %v1014_v57 }
 0x1b9   : > { %v1005_v6 = vsub.f32 1.0, %v1004_v58  ;;  %vm1013_vm15 = vcmp.eq.f32.partialorder %v1012_v5, 8.507059e+37  ;;  %v6940_v58 = vld [vmem:[#allocation4 + $0x1b8] sm:$0xff] }
 0x1ba   : > { %v961_v60 = vadd.f32 %v5492_v51, %v960_v13  ;;  %v982_v10 = vmul.f32 %v5494_v55, %v981_v0 }
 0x1bb   : > { %v1006_v54 = vmul.f32 %v5496_v50, %v1005_v6  ;;  %v6927_v6 = vld [vmem:[#allocation4 + $0x1d0] sm:$0xff] }
 0x1bc   : > { %v965_v59 = vsel %vm964_vm7, %v5492_v51, %v961_v60  ;;  %v983_v45 = vadd.f32 %v5494_v55, %v982_v10 }
 0x1bd   : > { %v970_v56 = vsel %vm967_vm8, %v969_v53, %v965_v59  ;;  %v1007_v18 = vadd.f32 %v5496_v50, %v1006_v54 }
 0x1be   : > { %v987_v62 = vsel %vm986_vm10, %v5494_v55, %v983_v45  ;;  %v1019_v0 = vmul.f32 %v5498_v46, %v970_v56  ;;  %v6917_v46 = vld [vmem:[#allocation4 + $0x1f0] sm:$0xff]  ;;  %v6923_v56 = vld [vmem:[#allocation4 + $0x1c0] sm:$0xff] }
 0x1bf   : > { %v992_v49 = vsel %vm989_vm11, %v991_v61, %v987_v62  ;;  %v1011_v53 = vsel %vm1010_vm14, %v5496_v50, %v1007_v18  ;;  %v6920_v18 = vld [vmem:[#allocation4 + $0x1f8] sm:$0xff]  ;;  %v6937_v50 = vld [vmem:[#allocation4 + $0x1b0] sm:$0xff] }
 0x1c0   : > { %v1018_v13 = vmul.f32 %v992_v49, %v6839_v41  ;;  %v1016_v51 = vsel %vm1013_vm15, %v1015_v9, %v1011_v53  ;;  %v6913_v41 = vld [vmem:[#allocation4 + $0x1e0] sm:$0xff] }
 0x1c2   : > { %v6910_v43 = vadd.f32 %v1019_v0, %v1018_v13 }
 0x1c4   : > { %5499 = vtanh.f32 %v6910_v43 }
 0x1ca   : > { %v5500_v1 = vpop.eup %5499 }
 0x1cb   : > { %v1022_v55 = vmul.f32 %v5500_v1, %v1016_v51 }
 0x1cd   : > { %1023 = vst [vmem:[#allocation3 + $0x1] sm:$0x1] %v1022_v55  ;;  %1042 = vmatmul.f32.vlgmr.msra.gmra.mxu0 %v1022_v55  ;;  %1062 = vmatmul.f32.vlgmr.msra.gmra.mxu1 %v1022_v55 }
 0x1ce   : > { %1082 = vmatmul.f32.vlgmr.msrb.gmra.mxu2 %v1022_v55  ;;  %1102 = vmatmul.f32.vlgmr.msrb.gmra.mxu3 %v1022_v55 }
 0x1cf   : > { %1356 = vmatpush.msra.mxu0 %v6913_v41  ;;  %1376 = vmatpush.msra.mxu1 %v6527_v15  ;;  %v6933_v15 = vld [vmem:[#allocation4 + $0x1a0] sm:$0xff] }
 0x1d0   : > { %1396 = vmatpush.msrb.mxu2 %v6917_v46  ;;  %1416 = vmatpush.msrb.mxu3 %v6920_v18 }
 0x1d1   : > { %1357 = vmatpush.msra.mxu0 %v6923_v56  ;;  %1377 = vmatpush.msra.mxu1 %v6539_v19  ;;  %v6943_v19 = vld [vmem:[#allocation4 + $0x180] sm:$0xff] }
 0x1d2   : > { %1397 = vmatpush.msrb.mxu2 %v6927_v6  ;;  %1417 = vmatpush.msrb.mxu3 %v6930_v47 }
 0x1d3   : > { %1358 = vmatpush.msra.mxu0 %v6933_v15  ;;  %1378 = vmatpush.msra.mxu1 %v6555_v24  ;;  %v9571_v24 = vld [vmem:[#allocation40_spill] sm:$0xff] }
 0x1d4   : > { %1398 = vmatpush.msrb.mxu2 %v6937_v50  ;;  %1418 = vmatpush.msrb.mxu3 %v6940_v58 }
 0x1d5   : > { %1359 = vmatpush.msra.mxu0 %v6943_v19  ;;  %1379 = vmatpush.msra.mxu1 %v6567_v28  ;;  %v9575_v28 = vld [vmem:[#allocation44_spill] sm:$0xff] }
 0x1d6   : > { %1399 = vmatpush.msrb.mxu2 %v6947_v63  ;;  %1419 = vmatpush.msrb.mxu3 %v6543_v20  ;;  %v9567_v20 = vld [vmem:[#allocation36_spill] sm:$0xff] }
 0x1d7   : > { %1360 = vmatpush.msra.mxu0 %v6545_v21  ;;  %1380 = vmatpush.msra.mxu1 %v6578_v32  ;;  %v9568_v21 = vld [vmem:[#allocation46_spill] sm:$0xff]  ;;  %v9579_v32 = vld [vmem:[#allocation48_spill] sm:$0xff] }
 0x1d8   : > { %1400 = vmatpush.msrb.mxu2 %v6548_v22  ;;  %1420 = vmatpush.msrb.mxu3 %v6553_v23  ;;  %v9569_v22 = vld [vmem:[#allocation35_spill] sm:$0xff]  ;;  %v9570_v23 = vld [vmem:[#allocation37_spill] sm:$0xff] }
 0x1d9   : > { %1361 = vmatpush.msra.mxu0 %v6561_v26  ;;  %1381 = vmatpush.msra.mxu1 %v6590_v36  ;;  %v9573_v26 = vld [vmem:[#allocation39_spill] sm:$0xff] }
 0x1da   : > { %1401 = vmatpush.msrb.mxu2 %v6558_v25  ;;  %1421 = vmatpush.msrb.mxu3 %v6565_v27  ;;  %v9572_v25 = vld [vmem:[#allocation50_spill] sm:$0xff]  ;;  %v9574_v27 = vld [vmem:[#allocation41_spill] sm:$0xff] }
 0x1db   : > { %1362 = vmatpush.msra.mxu0 %v6573_v30  ;;  %1382 = vmatpush.msra.mxu1 %v6602_v40  ;;  %v9577_v30 = vld [vmem:[#allocation43_spill] sm:$0xff] }
 0x1dc   : > { %1402 = vmatpush.msrb.mxu2 %v6571_v29  ;;  %1422 = vmatpush.msrb.mxu3 %v6576_v31  ;;  %v9576_v29 = vld [vmem:[#allocation51_spill] sm:$0xff]  ;;  %v9578_v31 = vld [vmem:[#allocation45_spill] sm:$0xff] }
 0x1dd   : > { %1363 = vmatpush.msra.mxu0 %v6585_v34  ;;  %1383 = vmatpush.msra.mxu1 %v6614_v44  ;;  %v9581_v34 = vld [vmem:[#allocation47_spill] sm:$0xff] }
 0x1de   : > { %1403 = vmatpush.msrb.mxu2 %v6583_v33  ;;  %1423 = vmatpush.msrb.mxu3 %v6588_v35  ;;  %v9580_v33 = vld [vmem:[#allocation52_spill] sm:$0xff]  ;;  %v9582_v35 = vld [vmem:[#allocation49_spill] sm:$0xff] }
 0x1df   : > { %1364 = vmatpush.msra.mxu0 %v6597_v38  ;;  %1384 = vmatpush.msra.mxu1 %v6626_v48 }
 0x1e0   : > { %1404 = vmatpush.msrb.mxu2 %v6595_v37  ;;  %1424 = vmatpush.msrb.mxu3 %v6600_v39 }
 0x1e1   : > { %1365 = vmatpush.msra.mxu0 %v6609_v42  ;;  %1385 = vmatpush.msra.mxu1 %v6638_v52 }
 0x1e2   : > { %1405 = vmatpush.msrb.mxu2 %v9541_v2  ;;  %1425 = vmatpush.msrb.mxu3 %v9542_v3  ;;  %v1025_v2 = vld [vmem:[#allocation2 + $0x2] ss:$8 sm:$0xf] }
 0x1e3   : > { %1366 = vmatpush.msra.mxu0 %v9543_v4  ;;  %1386 = vmatpush.msra.mxu1 %v9544_v7 }
 0x1e4   : > { %1406 = vmatpush.msrb.mxu2 %v9545_v8  ;;  %1426 = vmatpush.msrb.mxu3 %v9546_v11 }
 0x1e5   : > { %1367 = vmatpush.msra.mxu0 %v9547_v12  ;;  %1387 = vmatpush.msra.mxu1 %v9548_v14 }
 0x1e6   : > { %1407 = vmatpush.msrb.mxu2 %v9549_v16  ;;  %1427 = vmatpush.msrb.mxu3 %v9550_v17 }
 0x1e7   : > { %1368 = vmatpush.msra.mxu0 %v9567_v20  ;;  %1388 = vmatpush.msra.mxu1 %v9568_v21 }
 0x1e8   : > { %1408 = vmatpush.msrb.mxu2 %v9569_v22  ;;  %1428 = vmatpush.msrb.mxu3 %v9570_v23 }
 0x1e9   : > { %1369 = vmatpush.msra.mxu0 %v9571_v24  ;;  %1389 = vmatpush.msra.mxu1 %v9572_v25 }
 0x1ea   : > { %1409 = vmatpush.msrb.mxu2 %v9573_v26  ;;  %1429 = vmatpush.msrb.mxu3 %v9574_v27 }
 0x1eb   : > { %1370 = vmatpush.msra.mxu0 %v9575_v28  ;;  %1390 = vmatpush.msra.mxu1 %v9576_v29 }
 0x1ec   : > { %1410 = vmatpush.msrb.mxu2 %v9577_v30  ;;  %1430 = vmatpush.msrb.mxu3 %v9578_v31 }
 0x1ed   : > { %1371 = vmatpush.msra.mxu0 %v9579_v32  ;;  %1391 = vmatpush.msra.mxu1 %v9580_v33 }
 0x1ee   : > { %1411 = vmatpush.msrb.mxu2 %v9581_v34  ;;  %1431 = vmatpush.msrb.mxu3 %v9582_v35 }
 0x24a   : > { %v1063_v36 = vpop.f32.mrf.mxu1  ;;  %v1043_v44 = vpop.f32.mrf.mxu0 }
 0x24b   : > { %v1110_v37 = vrot.slane %v1063_v36, 7 }
 0x24d   : > { %v1113_v48 = vsel %vm780_vm2, %v1043_v44, %v1110_v37 }
 0x251   : > { %v1083_v38 = vpop.f32.mrf.mxu2  ;;  %v1103_v39 = vpop.f32.mrf.mxu3 }
 0x252   : > { %v1111_v40 = vrot.slane %v1083_v38, 6  ;;  %v1112_v42 = vrot.slane %v1103_v39, 5 }
 0x254   : > { %v1114_v52 = vsel %vm782_vm3, %v1111_v40, %v1112_v42 }
 0x255   : > { %v1115_v3 = vsel %vm784_vm4, %v1113_v48, %v1114_v52  ;;  %v7013_v52 = vld [vmem:[#allocation4 + $0x1c8] sm:$0xff] }
 0x256   : > { %v1117_v4 = vadd.f32 %v1115_v3, %v1025_v2  ;;  %v7019_v2 = vld [vmem:[#allocation4 + $0x1a8] sm:$0xff] }
 0x257   : > { %v7025_v3 = vld [vmem:[#allocation4 + $0x188] sm:$0xff] }
 0x258   : > { %v5293_v7 = vmul.f32 -1.442695, %v1117_v4  ;;  %v1138_v8 = vrot.slane %v1117_v4, 1  ;;  %v1162_v11 = vrot.slane %v1117_v4, 3  ;;  %v1159_v54 = vrot.slane %v1117_v4, 2  ;;  %v7029_v4 = vld [vmem:[#allocation4 + $0x198] sm:$0xff] }
 0x25a   : > { %5501 = vpow2.f32 %v5293_v7  ;;  %v5294_v12 = vmul.f32 -1.442695, %v1138_v8  ;;  %v5295_v14 = vmul.f32 -1.442695, %v1162_v11  ;;  %v7032_v7 = vld [vmem:[#allocation4 + $0x160] sm:$0xff]  ;;  %v7035_v8 = vld [vmem:[#allocation4 + $0x168] sm:$0xff] }
 0x25b   : > { %v7038_v11 = vld [vmem:[#allocation4 + $0x170] sm:$0xff] }
 0x25c   : > { %5503 = vpow2.f32 %v5294_v12  ;;  %v7041_v12 = vld [vmem:[#allocation4 + $0x178] sm:$0xff] }
 0x25d   : > { %5505 = vpow2.f32 %v5295_v14  ;;  %v7044_v14 = vld [vmem:[#allocation4 + $0x140] sm:$0xff] }
 0x260   : > { %v5502_v16 = vpop.eup %5501 }
 0x261   : > { %v1121_v17 = vadd.f32 1.0, %v5502_v16  ;;  %v7047_v16 = vld [vmem:[#allocation4 + $0x148] sm:$0xff] }
 0x262   : > { %v5504_v60 = vpop.eup %5503 }
 0x263   : > { %v5506_v10 = vpop.eup %5505  ;;  %5507 = vrcp.f32 %v1121_v17  ;;  %v1143_v59 = vadd.f32 1.0, %v5504_v60  ;;  %v1133_v5 = vand.u32 2147483648, %v1121_v17  ;;  %v1131_v51 = vand.u32 2147483647, %v1121_v17  ;;  %v7053_v60 = vld [vmem:[#allocation4 + $0x158] sm:$0xff] }
 0x264   : > { %v1167_v45 = vadd.f32 1.0, %v5506_v10  ;;  %vm1127_vm1 = vweird.f32 %v1121_v17  ;;  %v7056_v10 = vld [vmem:[#allocation4 + $0x120] sm:$0xff] }
 0x265   : > { %5509 = vrcp.f32 %v1143_v59  ;;  %v1155_v55 = vand.u32 2147483648, %v1143_v59  ;;  %v1153_v22 = vand.u32 2147483647, %v1143_v59  ;;  %v1134_v23 = vor.u32 1.1754944e-38, %v1133_v5  ;;  %v7086_v5 = vld [vmem:[#allocation4 + $0xf0] sm:$0xff] }
 0x266   : > { %5511 = vrcp.f32 %v1167_v45  ;;  %vm1132_vm7 = vcmp.eq.f32.partialorder %v1131_v51, 8.507059e+37  ;;  %vm1149_vm8 = vweird.f32 %v1143_v59  ;;  %v1179_v37 = vand.u32 2147483648, %v1167_v45  ;;  %v7098_v51 = vld [vmem:[#allocation4 + $0xd0] sm:$0xff] }
 0x267   : > { %5513 = vtanh.f32 %v1159_v54  ;;  %v1156_v28 = vor.u32 1.1754944e-38, %v1155_v55  ;;  %vm1154_vm10 = vcmp.eq.f32.partialorder %v1153_v22, 8.507059e+37  ;;  %vm1173_vm12 = vweird.f32 %v1167_v45  ;;  %v7074_v54 = vld [vmem:[#allocation4 + $0x110] sm:$0xff]  ;;  %9584 = vst [vmem:[#allocation28_spill] sm:$0xff] %v7098_v51  ;;  %v7101_v55 = vld [vmem:[#allocation4 + $0xd8] sm:$0xff] }
 0x268   : > { %v1177_v38 = vand.u32 2147483647, %v1167_v45  ;;  %v1180_v40 = vor.u32 1.1754944e-38, %v1179_v37  ;;  %9585 = vst [vmem:[#allocation30_spill] sm:$0xff] %v7101_v55  ;;  %v7110_v22 = vld [vmem:[#allocation4 + $0xb0] sm:$0xff]  ;;  %v7152_v37 = vld [vmem:[#allocation4 + $0x20] sm:$0xff] }
 0x269   : > { %v5508_v61 = vpop.eup %5507  ;;  %9588 = vst [vmem:[#allocation31_spill] sm:$0xff] %v7110_v22 }
 0x26a   : > { %v1123_v62 = vmul.f32 %v5508_v61, %v1121_v17  ;;  %vm1128_vm0 = vweird.f32 %v5508_v61  ;;  %vm1178_vm14 = vcmp.eq.f32.partialorder %v1177_v38, 8.507059e+37  ;;  %v7050_v17 = vld [vmem:[#allocation4 + $0x150] sm:$0xff]  ;;  %9602 = vst [vmem:[#allocation51_spill] sm:$0xff] %v7152_v37  ;;  %v7155_v38 = vld [vmem:[#allocation4 + $0x28] sm:$0xff] }
 0x26b   : > { %v5510_v49 = vpop.eup %5509  ;;  %vm1129_vm6 = vmor %vm1127_vm1, %vm1128_vm0  ;;  %9603 = vst [vmem:[#allocation43_spill] sm:$0xff] %v7155_v38 }
 0x26c   : > { %v5512_v13 = vpop.eup %5511  ;;  %v1124_v0 = vsub.f32 1.0, %v1123_v62  ;;  %v1145_v57 = vmul.f32 %v5510_v49, %v1143_v59  ;;  %vm1150_vm5 = vweird.f32 %v5510_v49  ;;  %v7059_v59 = vld [vmem:[#allocation4 + $0x128] sm:$0xff]  ;;  %v7068_v62 = vld [vmem:[#allocation4 + $0x100] sm:$0xff] }
 0x26d   : > { %v1169_v53 = vmul.f32 %v5512_v13, %v1167_v45  ;;  %vm1151_vm9 = vmor %vm1149_vm8, %vm1150_vm5  ;;  %v5514_v30 = vpop.eup %5513  ;;  %vm1174_vm11 = vweird.f32 %v5512_v13  ;;  %v7062_v45 = vld [vmem:[#allocation4 + $0x130] sm:$0xff] }
 0x26e   : > { %v1146_v9 = vsub.f32 1.0, %v1145_v57  ;;  %v1125_v1 = vmul.f32 %v5508_v61, %v1124_v0  ;;  %vm1175_vm13 = vmor %vm1173_vm12, %vm1174_vm11  ;;  %v7080_v0 = vld [vmem:[#allocation4 + $0xe0] sm:$0xff]  ;;  %v7083_v57 = vld [vmem:[#allocation4 + $0xe8] sm:$0xff] }
 0x26f   : > { %v1170_v24 = vsub.f32 1.0, %v1169_v53  ;;  %v7089_v53 = vld [vmem:[#allocation4 + $0xf8] sm:$0xff] }
 0x270   : > { %v1126_v20 = vadd.f32 %v5508_v61, %v1125_v1  ;;  %v1147_v21 = vmul.f32 %v5510_v49, %v1146_v9  ;;  %v7092_v9 = vld [vmem:[#allocation4 + $0xc0] sm:$0xff]  ;;  %v7095_v1 = vld [vmem:[#allocation4 + $0xc8] sm:$0xff] }
 0x271   : > { %v1171_v32 = vmul.f32 %v5512_v13, %v1170_v24  ;;  %9583 = vst [vmem:[#allocation27_spill] sm:$0xff] %v7095_v1  ;;  %v7116_v24 = vld [vmem:[#allocation4 + $0x80] sm:$0xff] }
 0x272   : > { %v1130_v25 = vsel %vm1129_vm6, %v5508_v61, %v1126_v20  ;;  %v1148_v26 = vadd.f32 %v5510_v49, %v1147_v21  ;;  %v7065_v61 = vld [vmem:[#allocation4 + $0x138] sm:$0xff]  ;;  %v7104_v20 = vld [vmem:[#allocation4 + $0xa0] sm:$0xff]  ;;  %v7107_v21 = vld [vmem:[#allocation4 + $0xa8] sm:$0xff]  ;;  %9590 = vst [vmem:[#allocation42_spill] sm:$0xff] %v7116_v24 }
 0x273   : > { %v1135_v27 = vsel %vm1132_vm7, %v1134_v23, %v1130_v25  ;;  %v1172_v36 = vadd.f32 %v5512_v13, %v1171_v32  ;;  %9586 = vst [vmem:[#allocation38_spill] sm:$0xff] %v7104_v20  ;;  %v7113_v23 = vld [vmem:[#allocation4 + $0xb8] sm:$0xff]  ;;  %v7119_v25 = vld [vmem:[#allocation4 + $0x88] sm:$0xff]  ;;  %v7140_v32 = vld [vmem:[#allocation4 + $0x40] sm:$0xff] }
 0x274   : > { %v1152_v29 = vsel %vm1151_vm9, %v5510_v49, %v1148_v26  ;;  %v1184_v34 = vmul.f32 %v5514_v30, %v1135_v27  ;;  %v7071_v49 = vld [vmem:[#allocation4 + $0x108] sm:$0xff]  ;;  %9587 = vst [vmem:[#allocation29_spill] sm:$0xff] %v7107_v21  ;;  %v7122_v26 = vld [vmem:[#allocation4 + $0x90] sm:$0xff]  ;;  %v7125_v27 = vld [vmem:[#allocation4 + $0x98] sm:$0xff] }
 0x275   : > { %v1157_v31 = vsel %vm1154_vm10, %v1156_v28, %v1152_v29  ;;  %v1176_v39 = vsel %vm1175_vm13, %v5512_v13, %v1172_v36  ;;  %v7077_v13 = vld [vmem:[#allocation4 + $0x118] sm:$0xff]  ;;  %9589 = vst [vmem:[#allocation33_spill] sm:$0xff] %v7113_v23  ;;  %v7128_v28 = vld [vmem:[#allocation4 + $0x60] sm:$0xff]  ;;  %v7131_v29 = vld [vmem:[#allocation4 + $0x68] sm:$0xff] }
 0x276   : > { %v1183_v33 = vmul.f32 %v1157_v31, %v6910_v43  ;;  %v1181_v44 = vsel %vm1178_vm14, %v1180_v40, %v1176_v39  ;;  %v7007_v43 = vld [vmem:[#allocation4 + $0x1e8] sm:$0xff]  ;;  %9591 = vst [vmem:[#allocation32_spill] sm:$0xff] %v7119_v25  ;;  %v7134_v30 = vld [vmem:[#allocation4 + $0x70] sm:$0xff]  ;;  %v7137_v31 = vld [vmem:[#allocation4 + $0x78] sm:$0xff] }
 0x277   : > { %9592 = vst [vmem:[#allocation34_spill] sm:$0xff] %v7122_v26  ;;  %v7149_v36 = vld [vmem:[#allocation4 + $0x58] sm:$0xff]  ;;  %v7158_v39 = vld [vmem:[#allocation4 + $0x30] sm:$0xff] }
 0x278   : > { %v7003_v35 = vadd.f32 %v1184_v34, %v1183_v33  ;;  %9593 = vst [vmem:[#allocation36_spill] sm:$0xff] %v7125_v27  ;;  %v7143_v33 = vld [vmem:[#allocation4 + $0x48] sm:$0xff]  ;;  %v7146_v34 = vld [vmem:[#allocation4 + $0x50] sm:$0xff]  ;;  %v7161_v40 = vld [vmem:[#allocation4 + $0x38] sm:$0xff] }
 0x279   : > { %9594 = vst [vmem:[#allocation46_spill] sm:$0xff] %v7128_v28 }
 0x27a   : > { %5515 = vtanh.f32 %v7003_v35  ;;  %9595 = vst [vmem:[#allocation35_spill] sm:$0xff] %v7131_v29 }
 0x27b   : > { %9596 = vst [vmem:[#allocation37_spill] sm:$0xff] %v7134_v30 }
 0x27c   : > { %9597 = vst [vmem:[#allocation40_spill] sm:$0xff] %v7137_v31 }
 0x27d   : > { %9598 = vst [vmem:[#allocation50_spill] sm:$0xff] %v7140_v32 }
 0x27e   : > { %9599 = vst [vmem:[#allocation39_spill] sm:$0xff] %v7143_v33 }
 0x27f   : > { %9600 = vst [vmem:[#allocation41_spill] sm:$0xff] %v7146_v34 }
 0x280   : > { %v5516_v42 = vpop.eup %5515  ;;  %9601 = vst [vmem:[#allocation44_spill] sm:$0xff] %v7149_v36 }
 0x281   : > { %v1187_v48 = vmul.f32 %v5516_v42, %v1181_v44  ;;  %9604 = vst [vmem:[#allocation45_spill] sm:$0xff] %v7158_v39  ;;  %v7164_v42 = vld [vmem:[#allocation4] sm:$0xff]  ;;  %v7167_v44 = vld [vmem:[#allocation4 + $0x8] sm:$0xff] }
 0x282   : > { %9605 = vst [vmem:[#allocation48_spill] sm:$0xff] %v7161_v40 }
 0x283   : > { %1188 = vst [vmem:[#allocation3 + $0x2] sm:$0x1] %v1187_v48  ;;  %1207 = vmatmul.f32.vlgmr.msrb.gmra.mxu0 %v1187_v48  ;;  %1227 = vmatmul.f32.vlgmr.msrb.gmra.mxu1 %v1187_v48 }
 0x284   : > { %1247 = vmatmul.f32.vlgmr.msra.gmra.mxu2 %v1187_v48  ;;  %1267 = vmatmul.f32.vlgmr.msra.gmra.mxu3 %v1187_v48  ;;  %9606 = vst [vmem:[#allocation52_spill] sm:$0xff] %v7164_v42  ;;  %v7170_v48 = vld [vmem:[#allocation4 + $0x10] sm:$0xff] }
 0x285   : > { %1521 = vmatpush.msrb.mxu0 %v6913_v41  ;;  %1541 = vmatpush.msrb.mxu1 %v7007_v43  ;;  %9607 = vst [vmem:[#allocation47_spill] sm:$0xff] %v7167_v44 }
 0x286   : > { %1561 = vmatpush.msra.mxu2 %v6917_v46  ;;  %1581 = vmatpush.msra.mxu3 %v6920_v18  ;;  %9608 = vst [vmem:[#allocation49_spill] sm:$0xff] %v7170_v48 }
 0x287   : > { %1522 = vmatpush.msrb.mxu0 %v6923_v56  ;;  %1542 = vmatpush.msrb.mxu1 %v7013_v52 }
 0x288   : > { %1562 = vmatpush.msra.mxu2 %v6927_v6  ;;  %1582 = vmatpush.msra.mxu3 %v6930_v47 }
 0x289   : > { %1523 = vmatpush.msrb.mxu0 %v6933_v15  ;;  %1543 = vmatpush.msrb.mxu1 %v7019_v2 }
 0x28a   : > { %1563 = vmatpush.msra.mxu2 %v6937_v50  ;;  %1583 = vmatpush.msra.mxu3 %v6940_v58 }
 0x28b   : > { %1524 = vmatpush.msrb.mxu0 %v6943_v19  ;;  %1544 = vmatpush.msrb.mxu1 %v7025_v3 }
 0x28c   : > { %1564 = vmatpush.msra.mxu2 %v6947_v63  ;;  %1584 = vmatpush.msra.mxu3 %v7029_v4 }
 0x28d   : > { %1525 = vmatpush.msrb.mxu0 %v7032_v7  ;;  %1545 = vmatpush.msrb.mxu1 %v7035_v8 }
 0x28e   : > { %1565 = vmatpush.msra.mxu2 %v7038_v11  ;;  %1585 = vmatpush.msra.mxu3 %v7041_v12 }
 0x28f   : > { %1526 = vmatpush.msrb.mxu0 %v7044_v14  ;;  %1546 = vmatpush.msrb.mxu1 %v7047_v16 }
 0x290   : > { %1566 = vmatpush.msra.mxu2 %v7050_v17  ;;  %1586 = vmatpush.msra.mxu3 %v7053_v60 }
 0x291   : > { %1527 = vmatpush.msrb.mxu0 %v7056_v10  ;;  %1547 = vmatpush.msrb.mxu1 %v7059_v59 }
 0x292   : > { %1567 = vmatpush.msra.mxu2 %v7062_v45  ;;  %1587 = vmatpush.msra.mxu3 %v7065_v61 }
 0x293   : > { %1528 = vmatpush.msrb.mxu0 %v7068_v62  ;;  %1548 = vmatpush.msrb.mxu1 %v7071_v49 }
 0x294   : > { %1568 = vmatpush.msra.mxu2 %v7074_v54  ;;  %1588 = vmatpush.msra.mxu3 %v7077_v13 }
 0x295   : > { %1529 = vmatpush.msrb.mxu0 %v7080_v0  ;;  %1549 = vmatpush.msrb.mxu1 %v7083_v57 }
 0x296   : > { %1569 = vmatpush.msra.mxu2 %v7086_v5  ;;  %1589 = vmatpush.msra.mxu3 %v7089_v53 }
 0x297   : > { %1530 = vmatpush.msrb.mxu0 %v7092_v9  ;;  %1550 = vmatpush.msrb.mxu1 %v7095_v1 }
 0x298   : > { %1570 = vmatpush.msra.mxu2 %v7098_v51  ;;  %1590 = vmatpush.msra.mxu3 %v7101_v55 }
 0x299   : > { %1531 = vmatpush.msrb.mxu0 %v7104_v20  ;;  %1551 = vmatpush.msrb.mxu1 %v7107_v21 }
 0x29a   : > { %1571 = vmatpush.msra.mxu2 %v7110_v22  ;;  %1591 = vmatpush.msra.mxu3 %v7113_v23 }
 0x29b   : > { %1532 = vmatpush.msrb.mxu0 %v7116_v24  ;;  %1552 = vmatpush.msrb.mxu1 %v7119_v25 }
 0x29c   : > { %1572 = vmatpush.msra.mxu2 %v7122_v26  ;;  %1592 = vmatpush.msra.mxu3 %v7125_v27 }
 0x29d   : > { %1533 = vmatpush.msrb.mxu0 %v7128_v28  ;;  %1553 = vmatpush.msrb.mxu1 %v7131_v29 }
 0x29e   : > { %1573 = vmatpush.msra.mxu2 %v7134_v30  ;;  %1593 = vmatpush.msra.mxu3 %v7137_v31 }
 0x29f   : > { %1534 = vmatpush.msrb.mxu0 %v7140_v32  ;;  %1554 = vmatpush.msrb.mxu1 %v7143_v33 }
 0x2a0   : > { %1574 = vmatpush.msra.mxu2 %v7146_v34  ;;  %1594 = vmatpush.msra.mxu3 %v7149_v36 }
 0x2a1   : > { %1535 = vmatpush.msrb.mxu0 %v7152_v37  ;;  %1555 = vmatpush.msrb.mxu1 %v7155_v38  ;;  %v7173_v38 = vld [vmem:[#allocation4 + $0x18] sm:$0xff] }
 0x2a2   : > { %1575 = vmatpush.msra.mxu2 %v7158_v39  ;;  %1595 = vmatpush.msra.mxu3 %v7161_v40  ;;  %9609 = vst [vmem:[#allocation53_spill] sm:$0xff] %v7173_v38 }
 0x2a3   : > { %1536 = vmatpush.msrb.mxu0 %v7164_v42  ;;  %1556 = vmatpush.msrb.mxu1 %v7167_v44  ;;  %v1190_v44 = vld [vmem:[#allocation2 + $0x3] ss:$8 sm:$0xf] }
 0x2a4   : > { %1576 = vmatpush.msra.mxu2 %v7170_v48  ;;  %1596 = vmatpush.msra.mxu3 %v7173_v38 }
 0x300   : > { %v1228_v39 = vpop.f32.mrf.mxu1  ;;  %v1208_v32 = vpop.f32.mrf.mxu0 }
 0x301   : > { %v1275_v37 = vrot.slane %v1228_v39, 7 }
 0x303   : > { %v1278_v42 = vsel %vm780_vm2, %v1208_v32, %v1275_v37 }
 0x307   : > { %v1248_v36 = vpop.f32.mrf.mxu2  ;;  %v1268_v40 = vpop.f32.mrf.mxu3 }
 0x308   : > { %v1276_v34 = vrot.slane %v1248_v36, 6  ;;  %v1277_v33 = vrot.slane %v1268_v40, 5 }
 0x30a   : > { %v1279_v31 = vsel %vm782_vm3, %v1276_v34, %v1277_v33 }
 0x30b   : > { %v1280_v30 = vsel %vm784_vm4, %v1278_v42, %v1279_v31 }
 0x30c   : > { %v1282_v29 = vadd.f32 %v1280_v30, %v1190_v44 }
 0x30e   : > { %v5296_v48 = vmul.f32 -1.442695, %v1282_v29  ;;  %v1303_v28 = vrot.slane %v1282_v29, 1  ;;  %v1327_v27 = vrot.slane %v1282_v29, 3  ;;  %v1324_v34 = vrot.slane %v1282_v29, 2 }
 0x310   : > { %5517 = vpow2.f32 %v5296_v48  ;;  %v5297_v38 = vmul.f32 -1.442695, %v1303_v28  ;;  %v5298_v26 = vmul.f32 -1.442695, %v1327_v27 }
 0x312   : > { %5519 = vpow2.f32 %v5297_v38 }
 0x313   : > { %5521 = vpow2.f32 %v5298_v26 }
 0x316   : > { %v5518_v39 = vpop.eup %5517 }
 0x317   : > { %v1286_v36 = vadd.f32 1.0, %v5518_v39 }
 0x318   : > { %v5520_v40 = vpop.eup %5519 }
 0x319   : > { %v5522_v25 = vpop.eup %5521  ;;  %5523 = vrcp.f32 %v1286_v36  ;;  %v1308_v32 = vadd.f32 1.0, %v5520_v40  ;;  %v1298_v28 = vand.u32 2147483648, %v1286_v36  ;;  %v1296_v39 = vand.u32 2147483647, %v1286_v36 }
 0x31a   : > { %v1332_v37 = vadd.f32 1.0, %v5522_v25  ;;  %vm1292_vm0 = vweird.f32 %v1286_v36 }
 0x31b   : > { %5525 = vrcp.f32 %v1308_v32  ;;  %v1320_v24 = vand.u32 2147483648, %v1308_v32  ;;  %v1318_v23 = vand.u32 2147483647, %v1308_v32  ;;  %v1299_v22 = vor.u32 1.1754944e-38, %v1298_v28 }
 0x31c   : > { %5527 = vrcp.f32 %v1332_v37  ;;  %vm1297_vm6 = vcmp.eq.f32.partialorder %v1296_v39, 8.507059e+37  ;;  %vm1314_vm7 = vweird.f32 %v1308_v32  ;;  %v1344_v28 = vand.u32 2147483648, %v1332_v37  ;;  %v9618_v39 = vld [vmem:[#allocation32_spill] sm:$0xff] }
 0x31d   : > { %5529 = vtanh.f32 %v1324_v34  ;;  %vm1319_vm9 = vcmp.eq.f32.partialorder %v1318_v23, 8.507059e+37  ;;  %vm1338_vm11 = vweird.f32 %v1332_v37 }
 0x31f   : > { %v5524_v33 = vpop.eup %5523 }
 0x320   : > { %v1288_v31 = vmul.f32 %v5524_v33, %v1286_v36  ;;  %vm1293_vm15 = vweird.f32 %v5524_v33 }
 0x321   : > { %v5526_v30 = vpop.eup %5525  ;;  %vm1294_vm5 = vmor %vm1292_vm0, %vm1293_vm15 }
 0x322   : > { %v5528_v42 = vpop.eup %5527  ;;  %v1289_v44 = vsub.f32 1.0, %v1288_v31  ;;  %v1310_v48 = vmul.f32 %v5526_v30, %v1308_v32  ;;  %vm1315_vm1 = vweird.f32 %v5526_v30  ;;  %v1342_v32 = vand.u32 2147483647, %v1332_v37 }
 0x323   : > { %v1334_v27 = vmul.f32 %v5528_v42, %v1332_v37  ;;  %vm1316_vm8 = vmor %vm1314_vm7, %vm1315_vm1  ;;  %v5530_v55 = vpop.eup %5529  ;;  %vm1339_vm10 = vweird.f32 %v5528_v42  ;;  %v9615_v37 = vld [vmem:[#allocation31_spill] sm:$0xff] }
 0x324   : > { %v1311_v38 = vsub.f32 1.0, %v1310_v48  ;;  %v1290_v26 = vmul.f32 %v5524_v33, %v1289_v44  ;;  %v1321_v48 = vor.u32 1.1754944e-38, %v1320_v24  ;;  %vm1340_vm12 = vmor %vm1338_vm11, %vm1339_vm10  ;;  %v1345_v24 = vor.u32 1.1754944e-38, %v1344_v28  ;;  %v9629_v28 = vld [vmem:[#allocation51_spill] sm:$0xff] }
 0x325   : > { %v1335_v21 = vsub.f32 1.0, %v1334_v27  ;;  %vm1343_vm13 = vcmp.eq.f32.partialorder %v1342_v32, 8.507059e+37  ;;  %v9617_v27 = vld [vmem:[#allocation42_spill] sm:$0xff]  ;;  %v9630_v32 = vld [vmem:[#allocation43_spill] sm:$0xff] }
 0x326   : > { %v1291_v40 = vadd.f32 %v5524_v33, %v1290_v26  ;;  %v1312_v25 = vmul.f32 %v5526_v30, %v1311_v38 }
 0x327   : > { %v1336_v36 = vmul.f32 %v5528_v42, %v1335_v21  ;;  %v9614_v21 = vld [vmem:[#allocation29_spill] sm:$0xff] }
 0x328   : > { %v1295_v29 = vsel %vm1294_vm5, %v5524_v33, %v1291_v40  ;;  %v1313_v31 = vadd.f32 %v5526_v30, %v1312_v25  ;;  %v9619_v40 = vld [vmem:[#allocation34_spill] sm:$0xff]  ;;  %v9620_v25 = vld [vmem:[#allocation36_spill] sm:$0xff] }
 0x329   : > { %v1300_v20 = vsel %vm1297_vm6, %v1299_v22, %v1295_v29  ;;  %v1337_v1 = vadd.f32 %v5528_v42, %v1336_v36  ;;  %v9621_v29 = vld [vmem:[#allocation46_spill] sm:$0xff]  ;;  %v9626_v36 = vld [vmem:[#allocation39_spill] sm:$0xff] }
 0x32a   : > { %v1317_v44 = vsel %vm1316_vm8, %v5526_v30, %v1313_v31  ;;  %v1349_v38 = vmul.f32 %v5530_v55, %v1300_v20  ;;  %v9612_v55 = vld [vmem:[#allocation30_spill] sm:$0xff]  ;;  %v9622_v31 = vld [vmem:[#allocation35_spill] sm:$0xff] }
 0x32b   : > { %v1322_v34 = vsel %vm1319_vm9, %v1321_v48, %v1317_v44  ;;  %v1341_v22 = vsel %vm1340_vm12, %v5528_v42, %v1337_v1  ;;  %v9611_v1 = vld [vmem:[#allocation28_spill] sm:$0xff]  ;;  %v9613_v20 = vld [vmem:[#allocation38_spill] sm:$0xff]  ;;  %v9616_v42 = vld [vmem:[#allocation33_spill] sm:$0xff] }
 0x32c   : > { %v1348_v26 = vmul.f32 %v1322_v34, %v7003_v35  ;;  %v1346_v33 = vsel %vm1343_vm13, %v1345_v24, %v1341_v22  ;;  %v9610_v35 = vld [vmem:[#allocation27_spill] sm:$0xff]  ;;  %v9623_v48 = vld [vmem:[#allocation37_spill] sm:$0xff]  ;;  %v9624_v44 = vld [vmem:[#allocation40_spill] sm:$0xff] }
 0x32d   : > { %v9625_v34 = vld [vmem:[#allocation50_spill] sm:$0xff]  ;;  %v9631_v22 = vld [vmem:[#allocation45_spill] sm:$0xff]  ;;  %v9632_v24 = vld [vmem:[#allocation48_spill] sm:$0xff] }
 0x32e   : > { %v7180_v51 = vadd.f32 %v1349_v38, %v1348_v26  ;;  %v9627_v26 = vld [vmem:[#allocation41_spill] sm:$0xff]  ;;  %v9628_v38 = vld [vmem:[#allocation44_spill] sm:$0xff] }
 0x330   : > { %5531 = vtanh.f32 %v7180_v51 }
 0x336   : > { %v5532_v23 = vpop.eup %5531 }
 0x337   : > { %v1352_v30 = vmul.f32 %v5532_v23, %v1346_v33  ;;  %v9633_v23 = vld [vmem:[#allocation52_spill] sm:$0xff]  ;;  %v9634_v33 = vld [vmem:[#allocation47_spill] sm:$0xff] }
 0x339   : > { %1353 = vst [vmem:[#allocation3 + $0x3] sm:$0x1] %v1352_v30  ;;  %1372 = vmatmul.f32.vlgmr.msra.gmra.mxu0 %v1352_v30  ;;  %1392 = vmatmul.f32.vlgmr.msra.gmra.mxu1 %v1352_v30 }
 0x33a   : > { %1412 = vmatmul.f32.vlgmr.msrb.gmra.mxu2 %v1352_v30  ;;  %1432 = vmatmul.f32.vlgmr.msrb.gmra.mxu3 %v1352_v30  ;;  %v9635_v30 = vld [vmem:[#allocation49_spill] sm:$0xff] }
 0x33b   : > { %1686 = vmatpush.msra.mxu0 %v6913_v41  ;;  %1706 = vmatpush.msra.mxu1 %v7007_v43 }
 0x33c   : > { %1726 = vmatpush.msrb.mxu2 %v6917_v46  ;;  %1746 = vmatpush.msrb.mxu3 %v6920_v18 }
 0x33d   : > { %1687 = vmatpush.msra.mxu0 %v6923_v56  ;;  %1707 = vmatpush.msra.mxu1 %v7013_v52 }
 0x33e   : > { %1727 = vmatpush.msrb.mxu2 %v6927_v6  ;;  %1747 = vmatpush.msrb.mxu3 %v6930_v47 }
 0x33f   : > { %1688 = vmatpush.msra.mxu0 %v6933_v15  ;;  %1708 = vmatpush.msra.mxu1 %v7019_v2 }
 0x340   : > { %1728 = vmatpush.msrb.mxu2 %v6937_v50  ;;  %1748 = vmatpush.msrb.mxu3 %v6940_v58 }
 0x341   : > { %1689 = vmatpush.msra.mxu0 %v6943_v19  ;;  %1709 = vmatpush.msra.mxu1 %v7025_v3 }
 0x342   : > { %1729 = vmatpush.msrb.mxu2 %v6947_v63  ;;  %1749 = vmatpush.msrb.mxu3 %v7029_v4 }
 0x343   : > { %1690 = vmatpush.msra.mxu0 %v7032_v7  ;;  %1710 = vmatpush.msra.mxu1 %v7035_v8 }
 0x344   : > { %1730 = vmatpush.msrb.mxu2 %v7038_v11  ;;  %1750 = vmatpush.msrb.mxu3 %v7041_v12 }
 0x345   : > { %1691 = vmatpush.msra.mxu0 %v7044_v14  ;;  %1711 = vmatpush.msra.mxu1 %v7047_v16 }
 0x346   : > { %1731 = vmatpush.msrb.mxu2 %v7050_v17  ;;  %1751 = vmatpush.msrb.mxu3 %v7053_v60 }
 0x347   : > { %1692 = vmatpush.msra.mxu0 %v7056_v10  ;;  %1712 = vmatpush.msra.mxu1 %v7059_v59 }
 0x348   : > { %1732 = vmatpush.msrb.mxu2 %v7062_v45  ;;  %1752 = vmatpush.msrb.mxu3 %v7065_v61 }
 0x349   : > { %1693 = vmatpush.msra.mxu0 %v7068_v62  ;;  %1713 = vmatpush.msra.mxu1 %v7071_v49 }
 0x34a   : > { %1733 = vmatpush.msrb.mxu2 %v7074_v54  ;;  %1753 = vmatpush.msrb.mxu3 %v7077_v13 }
 0x34b   : > { %1694 = vmatpush.msra.mxu0 %v7080_v0  ;;  %1714 = vmatpush.msra.mxu1 %v7083_v57 }
 0x34c   : > { %1734 = vmatpush.msrb.mxu2 %v7086_v5  ;;  %1754 = vmatpush.msrb.mxu3 %v7089_v53 }
 0x34d   : > { %1695 = vmatpush.msra.mxu0 %v7092_v9  ;;  %1715 = vmatpush.msra.mxu1 %v9610_v35 }
 0x34e   : > { %1735 = vmatpush.msrb.mxu2 %v9611_v1  ;;  %1755 = vmatpush.msrb.mxu3 %v9612_v55 }
 0x34f   : > { %1696 = vmatpush.msra.mxu0 %v9613_v20  ;;  %1716 = vmatpush.msra.mxu1 %v9614_v21 }
 0x350   : > { %1736 = vmatpush.msrb.mxu2 %v9615_v37  ;;  %1756 = vmatpush.msrb.mxu3 %v9616_v42 }
 0x351   : > { %1697 = vmatpush.msra.mxu0 %v9617_v27  ;;  %1717 = vmatpush.msra.mxu1 %v9618_v39 }
 0x352   : > { %1737 = vmatpush.msrb.mxu2 %v9619_v40  ;;  %1757 = vmatpush.msrb.mxu3 %v9620_v25 }
 0x353   : > { %1698 = vmatpush.msra.mxu0 %v9621_v29  ;;  %1718 = vmatpush.msra.mxu1 %v9622_v31 }
 0x354   : > { %1738 = vmatpush.msrb.mxu2 %v9623_v48  ;;  %1758 = vmatpush.msrb.mxu3 %v9624_v44 }
 0x355   : > { %1699 = vmatpush.msra.mxu0 %v9625_v34  ;;  %1719 = vmatpush.msra.mxu1 %v9626_v36  ;;  %v9636_v34 = vld [vmem:[#allocation53_spill] sm:$0xff] }
 0x356   : > { %1739 = vmatpush.msrb.mxu2 %v9627_v26  ;;  %1759 = vmatpush.msrb.mxu3 %v9628_v38 }
 0x357   : > { %1700 = vmatpush.msra.mxu0 %v9629_v28  ;;  %1720 = vmatpush.msra.mxu1 %v9630_v32 }
 0x358   : > { %1740 = vmatpush.msrb.mxu2 %v9631_v22  ;;  %1760 = vmatpush.msrb.mxu3 %v9632_v24  ;;  %v1355_v24 = vld [vmem:[#allocation2 + $0x4] ss:$8 sm:$0xf] }
 0x359   : > { %1701 = vmatpush.msra.mxu0 %v9633_v23  ;;  %1721 = vmatpush.msra.mxu1 %v9634_v33 }
 0x35a   : > { %1741 = vmatpush.msrb.mxu2 %v9635_v30  ;;  %1761 = vmatpush.msrb.mxu3 %v9636_v34 }
 0x3b6   : > { %v1393_v36 = vpop.f32.mrf.mxu1  ;;  %v1373_v31 = vpop.f32.mrf.mxu0 }
 0x3b7   : > { %v1440_v26 = vrot.slane %v1393_v36, 7 }
 0x3b9   : > { %v1443_v32 = vsel %vm780_vm2, %v1373_v31, %v1440_v26 }
 0x3bd   : > { %v1413_v44 = vpop.f32.mrf.mxu2  ;;  %v1433_v38 = vpop.f32.mrf.mxu3 }
 0x3be   : > { %v1441_v48 = vrot.slane %v1413_v44, 6  ;;  %v1442_v28 = vrot.slane %v1433_v38, 5 }
 0x3c0   : > { %v1444_v22 = vsel %vm782_vm3, %v1441_v48, %v1442_v28 }
 0x3c1   : > { %v1445_v23 = vsel %vm784_vm4, %v1443_v32, %v1444_v22 }
 0x3c2   : > { %v1447_v29 = vadd.f32 %v1445_v23, %v1355_v24 }
 0x3c4   : > { %v5299_v33 = vmul.f32 -1.442695, %v1447_v29  ;;  %v1468_v25 = vrot.slane %v1447_v29, 1  ;;  %v1492_v30 = vrot.slane %v1447_v29, 3  ;;  %v1489_v22 = vrot.slane %v1447_v29, 2 }
 0x3c6   : > { %5533 = vpow2.f32 %v5299_v33  ;;  %v5300_v34 = vmul.f32 -1.442695, %v1468_v25  ;;  %v5301_v40 = vmul.f32 -1.442695, %v1492_v30 }
 0x3c8   : > { %5535 = vpow2.f32 %v5300_v34 }
 0x3c9   : > { %5537 = vpow2.f32 %v5301_v40 }
 0x3cc   : > { %v5534_v36 = vpop.eup %5533 }
 0x3cd   : > { %v1451_v44 = vadd.f32 1.0, %v5534_v36 }
 0x3ce   : > { %v5536_v38 = vpop.eup %5535 }
 0x3cf   : > { %v5538_v39 = vpop.eup %5537  ;;  %5539 = vrcp.f32 %v1451_v44  ;;  %v1473_v31 = vadd.f32 1.0, %v5536_v38  ;;  %v1463_v25 = vand.u32 2147483648, %v1451_v44  ;;  %v1461_v36 = vand.u32 2147483647, %v1451_v44 }
 0x3d0   : > { %v1497_v26 = vadd.f32 1.0, %v5538_v39  ;;  %vm1457_vm15 = vweird.f32 %v1451_v44 }
 0x3d1   : > { %5541 = vrcp.f32 %v1473_v31  ;;  %v1485_v27 = vand.u32 2147483648, %v1473_v31  ;;  %v1483_v42 = vand.u32 2147483647, %v1473_v31  ;;  %v1464_v37 = vor.u32 1.1754944e-38, %v1463_v25 }
 0x3d2   : > { %5543 = vrcp.f32 %v1497_v26  ;;  %vm1462_vm5 = vcmp.eq.f32.partialorder %v1461_v36, 8.507059e+37  ;;  %vm1479_vm6 = vweird.f32 %v1473_v31  ;;  %v1509_v25 = vand.u32 2147483648, %v1497_v26 }
 0x3d3   : > { %5545 = vtanh.f32 %v1489_v22  ;;  %vm1484_vm8 = vcmp.eq.f32.partialorder %v1483_v42, 8.507059e+37  ;;  %vm1503_vm10 = vweird.f32 %v1497_v26 }
 0x3d5   : > { %v5540_v48 = vpop.eup %5539 }
 0x3d6   : > { %v1453_v28 = vmul.f32 %v5540_v48, %v1451_v44  ;;  %vm1458_vm14 = vweird.f32 %v5540_v48 }
 0x3d7   : > { %v5542_v32 = vpop.eup %5541  ;;  %vm1459_vm1 = vmor %vm1457_vm15, %vm1458_vm14 }
 0x3d8   : > { %v5544_v24 = vpop.eup %5543  ;;  %v1454_v23 = vsub.f32 1.0, %v1453_v28  ;;  %v1475_v33 = vmul.f32 %v5542_v32, %v1473_v31  ;;  %vm1480_vm0 = vweird.f32 %v5542_v32  ;;  %v1507_v31 = vand.u32 2147483647, %v1497_v26 }
 0x3d9   : > { %v1499_v30 = vmul.f32 %v5544_v24, %v1497_v26  ;;  %vm1481_vm7 = vmor %vm1479_vm6, %vm1480_vm0  ;;  %v5546_v55 = vpop.eup %5545  ;;  %vm1504_vm9 = vweird.f32 %v5544_v24 }
 0x3da   : > { %v1476_v34 = vsub.f32 1.0, %v1475_v33  ;;  %v1455_v40 = vmul.f32 %v5540_v48, %v1454_v23  ;;  %v1486_v33 = vor.u32 1.1754944e-38, %v1485_v27  ;;  %vm1505_vm11 = vmor %vm1503_vm10, %vm1504_vm9  ;;  %v1510_v27 = vor.u32 1.1754944e-38, %v1509_v25 }
 0x3db   : > { %v1500_v21 = vsub.f32 1.0, %v1499_v30  ;;  %vm1508_vm12 = vcmp.eq.f32.partialorder %v1507_v31, 8.507059e+37 }
 0x3dc   : > { %v1456_v38 = vadd.f32 %v5540_v48, %v1455_v40  ;;  %v1477_v39 = vmul.f32 %v5542_v32, %v1476_v34 }
 0x3dd   : > { %v1501_v44 = vmul.f32 %v5544_v24, %v1500_v21 }
 0x3de   : > { %v1460_v29 = vsel %vm1459_vm1, %v5540_v48, %v1456_v38  ;;  %v1478_v28 = vadd.f32 %v5542_v32, %v1477_v39 }
 0x3df   : > { %v1465_v20 = vsel %vm1462_vm5, %v1464_v37, %v1460_v29  ;;  %v1502_v35 = vadd.f32 %v5544_v24, %v1501_v44 }
 0x3e0   : > { %v1482_v23 = vsel %vm1481_vm7, %v5542_v32, %v1478_v28  ;;  %v1514_v34 = vmul.f32 %v5546_v55, %v1465_v20 }
 0x3e1   : > { %v1487_v22 = vsel %vm1484_vm8, %v1486_v33, %v1482_v23  ;;  %v1506_v37 = vsel %vm1505_vm11, %v5544_v24, %v1502_v35 }
 0x3e2   : > { %v1513_v40 = vmul.f32 %v1487_v22, %v7180_v51  ;;  %v1511_v48 = vsel %vm1508_vm12, %v1510_v27, %v1506_v37 }
 0x3e4   : > { %v7251_v1 = vadd.f32 %v1514_v34, %v1513_v40 }
 0x3e6   : > { %5547 = vtanh.f32 %v7251_v1 }
 0x3ec   : > { %v5548_v42 = vpop.eup %5547 }
 0x3ed   : > { %v1517_v32 = vmul.f32 %v5548_v42, %v1511_v48 }
 0x3ef   : > { %1518 = vst [vmem:[#allocation3 + $0x4] sm:$0x1] %v1517_v32  ;;  %1537 = vmatmul.f32.vlgmr.msrb.gmra.mxu0 %v1517_v32  ;;  %1557 = vmatmul.f32.vlgmr.msrb.gmra.mxu1 %v1517_v32 }
 0x3f0   : > { %1577 = vmatmul.f32.vlgmr.msra.gmra.mxu2 %v1517_v32  ;;  %1597 = vmatmul.f32.vlgmr.msra.gmra.mxu3 %v1517_v32 }
 0x3f1   : > { %1851 = vmatpush.msrb.mxu0 %v6913_v41  ;;  %1871 = vmatpush.msrb.mxu1 %v7007_v43  ;;  %v9637_v41 = vld [vmem:[#allocation27_spill] sm:$0xff]  ;;  %v9648_v43 = vld [vmem:[#allocation46_spill] sm:$0xff] }
 0x3f2   : > { %1891 = vmatpush.msra.mxu2 %v6917_v46  ;;  %1911 = vmatpush.msra.mxu3 %v6920_v18  ;;  %v9638_v46 = vld [vmem:[#allocation28_spill] sm:$0xff]  ;;  %v9639_v18 = vld [vmem:[#allocation30_spill] sm:$0xff] }
 0x3f3   : > { %1852 = vmatpush.msrb.mxu0 %v6923_v56  ;;  %1872 = vmatpush.msrb.mxu1 %v7013_v52  ;;  %v9640_v56 = vld [vmem:[#allocation38_spill] sm:$0xff]  ;;  %v9649_v52 = vld [vmem:[#allocation35_spill] sm:$0xff] }
 0x3f4   : > { %1892 = vmatpush.msra.mxu2 %v6927_v6  ;;  %1912 = vmatpush.msra.mxu3 %v6930_v47  ;;  %v9641_v6 = vld [vmem:[#allocation29_spill] sm:$0xff]  ;;  %v9642_v47 = vld [vmem:[#allocation31_spill] sm:$0xff] }
 0x3f5   : > { %1853 = vmatpush.msrb.mxu0 %v6933_v15  ;;  %1873 = vmatpush.msrb.mxu1 %v7019_v2  ;;  %v9643_v15 = vld [vmem:[#allocation33_spill] sm:$0xff] }
 0x3f6   : > { %1893 = vmatpush.msra.mxu2 %v6937_v50  ;;  %1913 = vmatpush.msra.mxu3 %v6940_v58  ;;  %v9644_v50 = vld [vmem:[#allocation42_spill] sm:$0xff]  ;;  %v9645_v58 = vld [vmem:[#allocation32_spill] sm:$0xff]  ;;  %v9650_v2 = vld [vmem:[#allocation37_spill] sm:$0xff] }
 0x3f7   : > { %1854 = vmatpush.msrb.mxu0 %v6943_v19  ;;  %1874 = vmatpush.msrb.mxu1 %v7025_v3  ;;  %v9646_v19 = vld [vmem:[#allocation34_spill] sm:$0xff]  ;;  %v9651_v3 = vld [vmem:[#allocation40_spill] sm:$0xff] }
 0x3f8   : > { %1894 = vmatpush.msra.mxu2 %v6947_v63  ;;  %1914 = vmatpush.msra.mxu3 %v7029_v4  ;;  %v9647_v63 = vld [vmem:[#allocation36_spill] sm:$0xff]  ;;  %v9652_v4 = vld [vmem:[#allocation50_spill] sm:$0xff] }
 0x3f9   : > { %1855 = vmatpush.msrb.mxu0 %v7032_v7  ;;  %1875 = vmatpush.msrb.mxu1 %v7035_v8  ;;  %v9653_v7 = vld [vmem:[#allocation39_spill] sm:$0xff]  ;;  %v9654_v8 = vld [vmem:[#allocation41_spill] sm:$0xff] }
 0x3fa   : > { %1895 = vmatpush.msra.mxu2 %v7038_v11  ;;  %1915 = vmatpush.msra.mxu3 %v7041_v12  ;;  %v9655_v11 = vld [vmem:[#allocation44_spill] sm:$0xff]  ;;  %v9656_v12 = vld [vmem:[#allocation51_spill] sm:$0xff] }
 0x3fb   : > { %1856 = vmatpush.msrb.mxu0 %v7044_v14  ;;  %1876 = vmatpush.msrb.mxu1 %v7047_v16  ;;  %v9657_v14 = vld [vmem:[#allocation43_spill] sm:$0xff]  ;;  %v9658_v16 = vld [vmem:[#allocation45_spill] sm:$0xff] }
 0x3fc   : > { %1896 = vmatpush.msra.mxu2 %v7050_v17  ;;  %1916 = vmatpush.msra.mxu3 %v7053_v60  ;;  %v9659_v17 = vld [vmem:[#allocation48_spill] sm:$0xff] }
 0x3fd   : > { %1857 = vmatpush.msrb.mxu0 %v7056_v10  ;;  %1877 = vmatpush.msrb.mxu1 %v7059_v59  ;;  %v9660_v60 = vld [vmem:[#allocation52_spill] sm:$0xff]  ;;  %v9661_v10 = vld [vmem:[#allocation47_spill] sm:$0xff]  ;;  %v9662_v59 = vld [vmem:[#allocation49_spill] sm:$0xff] }
 0x3fe   : > { %1897 = vmatpush.msra.mxu2 %v7062_v45  ;;  %1917 = vmatpush.msra.mxu3 %v7065_v61  ;;  %v9663_v45 = vld [vmem:[#allocation53_spill] sm:$0xff] }
 0x3ff   : > { %1858 = vmatpush.msrb.mxu0 %v7068_v62  ;;  %1878 = vmatpush.msrb.mxu1 %v7071_v49 }
 0x400   : > { %1898 = vmatpush.msra.mxu2 %v7074_v54  ;;  %1918 = vmatpush.msra.mxu3 %v7077_v13 }
 0x401   : > { %1859 = vmatpush.msrb.mxu0 %v7080_v0  ;;  %1879 = vmatpush.msrb.mxu1 %v7083_v57 }
 0x402   : > { %1899 = vmatpush.msra.mxu2 %v7086_v5  ;;  %1919 = vmatpush.msra.mxu3 %v7089_v53 }
 0x403   : > { %1860 = vmatpush.msrb.mxu0 %v7092_v9  ;;  %1880 = vmatpush.msrb.mxu1 %v9637_v41  ;;  %v1520_v9 = vld [vmem:[#allocation2 + $0x5] ss:$8 sm:$0xf] }
 0x404   : > { %1900 = vmatpush.msra.mxu2 %v9638_v46  ;;  %1920 = vmatpush.msra.mxu3 %v9639_v18 }
 0x405   : > { %1861 = vmatpush.msrb.mxu0 %v9640_v56  ;;  %1881 = vmatpush.msrb.mxu1 %v9641_v6 }
 0x406   : > { %1901 = vmatpush.msra.mxu2 %v9642_v47  ;;  %1921 = vmatpush.msra.mxu3 %v9643_v15 }
 0x407   : > { %1862 = vmatpush.msrb.mxu0 %v9644_v50  ;;  %1882 = vmatpush.msrb.mxu1 %v9645_v58 }
 0x408   : > { %1902 = vmatpush.msra.mxu2 %v9646_v19  ;;  %1922 = vmatpush.msra.mxu3 %v9647_v63 }
 0x409   : > { %1863 = vmatpush.msrb.mxu0 %v9648_v43  ;;  %1883 = vmatpush.msrb.mxu1 %v9649_v52 }
 0x40a   : > { %1903 = vmatpush.msra.mxu2 %v9650_v2  ;;  %1923 = vmatpush.msra.mxu3 %v9651_v3 }
 0x40b   : > { %1864 = vmatpush.msrb.mxu0 %v9652_v4  ;;  %1884 = vmatpush.msrb.mxu1 %v9653_v7 }
 0x40c   : > { %1904 = vmatpush.msra.mxu2 %v9654_v8  ;;  %1924 = vmatpush.msra.mxu3 %v9655_v11 }
 0x40d   : > { %1865 = vmatpush.msrb.mxu0 %v9656_v12  ;;  %1885 = vmatpush.msrb.mxu1 %v9657_v14 }
 0x40e   : > { %1905 = vmatpush.msra.mxu2 %v9658_v16  ;;  %1925 = vmatpush.msra.mxu3 %v9659_v17 }
 0x40f   : > { %1866 = vmatpush.msrb.mxu0 %v9660_v60  ;;  %1886 = vmatpush.msrb.mxu1 %v9661_v10 }
 0x410   : > { %1906 = vmatpush.msra.mxu2 %v9662_v59  ;;  %1926 = vmatpush.msra.mxu3 %v9663_v45 }
 0x46c   : > { %v1558_v61 = vpop.f32.mrf.mxu1  ;;  %v1538_v57 = vpop.f32.mrf.mxu0 }
 0x46d   : > { %v1605_v62 = vrot.slane %v1558_v61, 7 }
 0x46f   : > { %v1608_v5 = vsel %vm780_vm2, %v1538_v57, %v1605_v62 }
 0x473   : > { %v1578_v49 = vpop.f32.mrf.mxu2  ;;  %v1598_v54 = vpop.f32.mrf.mxu3 }
 0x474   : > { %v1606_v13 = vrot.slane %v1578_v49, 6  ;;  %v1607_v0 = vrot.slane %v1598_v54, 5 }
 0x476   : > { %v1609_v53 = vsel %vm782_vm3, %v1606_v13, %v1607_v0  ;;  %v1685_v0 = vld [vmem:[#allocation2 + $0x6] ss:$8 sm:$0xf] }
 0x477   : > { %v1610_v51 = vsel %vm784_vm4, %v1608_v5, %v1609_v53 }
 0x478   : > { %v1612_v35 = vadd.f32 %v1610_v51, %v1520_v9 }
 0x47a   : > { %v5302_v55 = vmul.f32 -1.442695, %v1612_v35  ;;  %v1633_v20 = vrot.slane %v1612_v35, 1  ;;  %v1657_v21 = vrot.slane %v1612_v35, 3  ;;  %v1654_v44 = vrot.slane %v1612_v35, 2 }
 0x47c   : > { %5549 = vpow2.f32 %v5302_v55  ;;  %v5303_v26 = vmul.f32 -1.442695, %v1633_v20  ;;  %v5304_v24 = vmul.f32 -1.442695, %v1657_v21 }
 0x47e   : > { %5551 = vpow2.f32 %v5303_v26 }
 0x47f   : > { %5553 = vpow2.f32 %v5304_v24 }
 0x482   : > { %v5550_v30 = vpop.eup %5549 }
 0x483   : > { %v1616_v36 = vadd.f32 1.0, %v5550_v30 }
 0x484   : > { %v5552_v38 = vpop.eup %5551 }
 0x485   : > { %v5554_v39 = vpop.eup %5553  ;;  %5555 = vrcp.f32 %v1616_v36  ;;  %v1638_v29 = vadd.f32 1.0, %v5552_v38  ;;  %v1628_v31 = vand.u32 2147483648, %v1616_v36  ;;  %v1626_v48 = vand.u32 2147483647, %v1616_v36 }
 0x486   : > { %v1662_v28 = vadd.f32 1.0, %v5554_v39  ;;  %vm1622_vm14 = vweird.f32 %v1616_v36 }
 0x487   : > { %5557 = vrcp.f32 %v1638_v29  ;;  %v1650_v32 = vand.u32 2147483648, %v1638_v29  ;;  %v1648_v18 = vand.u32 2147483647, %v1638_v29  ;;  %v1629_v56 = vor.u32 1.1754944e-38, %v1628_v31 }
 0x488   : > { %5559 = vrcp.f32 %v1662_v28  ;;  %vm1627_vm1 = vcmp.eq.f32.partialorder %v1626_v48, 8.507059e+37  ;;  %vm1644_vm5 = vweird.f32 %v1638_v29  ;;  %v1674_v8 = vand.u32 2147483648, %v1662_v28 }
 0x489   : > { %5561 = vtanh.f32 %v1654_v44  ;;  %v1651_v58 = vor.u32 1.1754944e-38, %v1650_v32  ;;  %vm1649_vm7 = vcmp.eq.f32.partialorder %v1648_v18, 8.507059e+37  ;;  %vm1668_vm9 = vweird.f32 %v1662_v28 }
 0x48a   : > { %v1672_v11 = vand.u32 2147483647, %v1662_v28  ;;  %v1675_v14 = vor.u32 1.1754944e-38, %v1674_v8 }
 0x48b   : > { %v5556_v33 = vpop.eup %5555 }
 0x48c   : > { %v1618_v23 = vmul.f32 %v5556_v33, %v1616_v36  ;;  %vm1623_vm13 = vweird.f32 %v5556_v33  ;;  %vm1673_vm11 = vcmp.eq.f32.partialorder %v1672_v11, 8.507059e+37 }
 0x48d   : > { %v5558_v22 = vpop.eup %5557  ;;  %vm1624_vm0 = vmor %vm1622_vm14, %vm1623_vm13 }
 0x48e   : > { %v5560_v40 = vpop.eup %5559  ;;  %v1619_v34 = vsub.f32 1.0, %v1618_v23  ;;  %v1640_v25 = vmul.f32 %v5558_v22, %v1638_v29  ;;  %vm1645_vm15 = vweird.f32 %v5558_v22 }
 0x48f   : > { %v1664_v37 = vmul.f32 %v5560_v40, %v1662_v28  ;;  %vm1646_vm6 = vmor %vm1644_vm5, %vm1645_vm15  ;;  %v5562_v63 = vpop.eup %5561  ;;  %vm1669_vm8 = vweird.f32 %v5560_v40 }
 0x490   : > { %v1641_v27 = vsub.f32 1.0, %v1640_v25  ;;  %v1620_v42 = vmul.f32 %v5556_v33, %v1619_v34  ;;  %vm1670_vm10 = vmor %vm1668_vm9, %vm1669_vm8 }
 0x491   : > { %v1665_v6 = vsub.f32 1.0, %v1664_v37 }
 0x492   : > { %v1621_v41 = vadd.f32 %v5556_v33, %v1620_v42  ;;  %v1642_v46 = vmul.f32 %v5558_v22, %v1641_v27 }
 0x493   : > { %v1666_v52 = vmul.f32 %v5560_v40, %v1665_v6 }
 0x494   : > { %v1625_v47 = vsel %vm1624_vm0, %v5556_v33, %v1621_v41  ;;  %v1643_v15 = vadd.f32 %v5558_v22, %v1642_v46 }
 0x495   : > { %v1630_v50 = vsel %vm1627_vm1, %v1629_v56, %v1625_v47  ;;  %v1667_v7 = vadd.f32 %v5560_v40, %v1666_v52 }
 0x496   : > { %v1647_v19 = vsel %vm1646_vm6, %v5558_v22, %v1643_v15  ;;  %v1679_v3 = vmul.f32 %v5562_v63, %v1630_v50 }
 0x497   : > { %v1652_v43 = vsel %vm1649_vm7, %v1651_v58, %v1647_v19  ;;  %v1671_v12 = vsel %vm1670_vm10, %v5560_v40, %v1667_v7 }
 0x498   : > { %v1678_v2 = vmul.f32 %v1652_v43, %v7251_v1  ;;  %v1676_v17 = vsel %vm1673_vm11, %v1675_v14, %v1671_v12 }
 0x49a   : > { %v7322_v4 = vadd.f32 %v1679_v3, %v1678_v2 }
 0x49c   : > { %5563 = vtanh.f32 %v7322_v4 }
 0x4a2   : > { %v5564_v16 = vpop.eup %5563 }
 0x4a3   : > { %v1682_v60 = vmul.f32 %v5564_v16, %v1676_v17  ;;  %v2078_v16 = vld [vmem:[#allocation7 + $0x1f8] sm:$0xff]  ;;  %v2073_v17 = vld [vmem:[#allocation7 + $0x1d0] sm:$0xff] }
 0x4a5   : > { %1683 = vst [vmem:[#allocation3 + $0x5] sm:$0x1] %v1682_v60  ;;  %1702 = vmatmul.f32.vlgmr.msra.gmra.mxu0 %v1682_v60  ;;  %1722 = vmatmul.f32.vlgmr.msra.gmra.mxu1 %v1682_v60 }
 0x4a6   : > { %1742 = vmatmul.f32.vlgmr.msrb.gmra.mxu2 %v1682_v60  ;;  %1762 = vmatmul.f32.vlgmr.msrb.gmra.mxu3 %v1682_v60  ;;  %v2074_v60 = vld [vmem:[#allocation7 + $0x1d8] sm:$0xff] }
 0x4a7   : > { %2149 = vmatpush.msrb.mxu3 %v2078_v16  ;;  %v2028_v16 = vld [vmem:[#allocation7 + $0x68] sm:$0xff] }
 0x4a9   : > { %2150 = vmatpush.msrb.mxu3 %v2074_v60 }
 0x522   : > { %v1723_v1 = vpop.f32.mrf.mxu1  ;;  %v1703_v49 = vpop.f32.mrf.mxu0 }
 0x523   : > { %v1770_v10 = vrot.slane %v1723_v1, 7  ;;  %v2069_v1 = vld [vmem:[#allocation7 + $0x1b0] sm:$0xff] }
 0x525   : > { %v1773_v54 = vsel %vm780_vm2, %v1703_v49, %v1770_v10  ;;  %v2070_v10 = vld [vmem:[#allocation7 + $0x1b8] sm:$0xff]  ;;  %v2072_v49 = vld [vmem:[#allocation7 + $0x1c8] sm:$0xff] }
 0x526   : > { %2151 = vmatpush.msrb.mxu3 %v2070_v10  ;;  %v7335_v10 = vld [vmem:[#allocation9 + $0x1f0] sm:$0xff] }
 0x529   : > { %v1743_v59 = vpop.f32.mrf.mxu2  ;;  %v1763_v45 = vpop.f32.mrf.mxu3 }
 0x52a   : > { %v1771_v61 = vrot.slane %v1743_v59, 6  ;;  %v1772_v62 = vrot.slane %v1763_v45, 5  ;;  %v2076_v59 = vld [vmem:[#allocation7 + $0x1e8] sm:$0xff]  ;;  %v2065_v45 = vld [vmem:[#allocation7 + $0x190] sm:$0xff] }
 0x52b   : > { %2109 = vmatpush.msra.mxu1 %v2076_v59  ;;  %v7337_v59 = vld [vmem:[#allocation9 + $0x1f8] sm:$0xff] }
 0x52c   : > { %v1774_v13 = vsel %vm782_vm3, %v1771_v61, %v1772_v62  ;;  %v2066_v61 = vld [vmem:[#allocation7 + $0x198] sm:$0xff]  ;;  %v2075_v62 = vld [vmem:[#allocation7 + $0x1e0] sm:$0xff] }
 0x52d   : > { %v1775_v57 = vsel %vm784_vm4, %v1773_v54, %v1774_v13  ;;  %2152 = vmatpush.msrb.mxu3 %v2066_v61  ;;  %v2061_v54 = vld [vmem:[#allocation7 + $0x170] sm:$0xff]  ;;  %2089 = vmatpush.msra.mxu0 %v2075_v62  ;;  %v2062_v13 = vld [vmem:[#allocation7 + $0x178] sm:$0xff]  ;;  %v2027_v61 = vld [vmem:[#allocation7 + $0x60] sm:$0xff] }
 0x52e   : > { %v1777_v5 = vadd.f32 %v1775_v57, %v1685_v0  ;;  %2110 = vmatpush.msra.mxu1 %v2072_v49  ;;  %v2071_v0 = vld [vmem:[#allocation7 + $0x1c0] sm:$0xff]  ;;  %v2068_v57 = vld [vmem:[#allocation7 + $0x1a8] sm:$0xff]  ;;  %v7343_v49 = vld [vmem:[#allocation9 + $0x1d0] sm:$0xff] }
 0x52f   : > { %2153 = vmatpush.msrb.mxu3 %v2062_v13  ;;  %2090 = vmatpush.msra.mxu0 %v2071_v0  ;;  %v2024_v62 = vld [vmem:[#allocation7 + $0x48] sm:$0xff] }
 0x530   : > { %v5305_v53 = vmul.f32 -1.442695, %v1777_v5  ;;  %v1798_v9 = vrot.slane %v1777_v5, 1  ;;  %v1822_v51 = vrot.slane %v1777_v5, 3  ;;  %v1819_v28 = vrot.slane %v1777_v5, 2  ;;  %v2057_v5 = vld [vmem:[#allocation7 + $0x150] sm:$0xff]  ;;  %2111 = vmatpush.msra.mxu1 %v2068_v57 }
 0x532   : > { %5565 = vpow2.f32 %v5305_v53  ;;  %v5306_v35 = vmul.f32 -1.442695, %v1798_v9  ;;  %v5307_v55 = vmul.f32 -1.442695, %v1822_v51  ;;  %v2058_v53 = vld [vmem:[#allocation7 + $0x158] sm:$0xff]  ;;  %v2067_v9 = vld [vmem:[#allocation7 + $0x1a0] sm:$0xff] }
 0x533   : > { %2154 = vmatpush.msrb.mxu3 %v2058_v53  ;;  %v2064_v51 = vld [vmem:[#allocation7 + $0x188] sm:$0xff]  ;;  %2091 = vmatpush.msra.mxu0 %v2067_v9  ;;  %v7352_v9 = vld [vmem:[#allocation9 + $0x1b0] sm:$0xff] }
 0x534   : > { %5567 = vpow2.f32 %v5306_v35  ;;  %v2053_v35 = vld [vmem:[#allocation7 + $0x130] sm:$0xff]  ;;  %2112 = vmatpush.msra.mxu1 %v2064_v51  ;;  %v2020_v53 = vld [vmem:[#allocation7 + $0x28] sm:$0xff]  ;;  %v7354_v51 = vld [vmem:[#allocation9 + $0x1b8] sm:$0xff] }
 0x535   : > { %5569 = vpow2.f32 %v5307_v55  ;;  %v2054_v55 = vld [vmem:[#allocation7 + $0x138] sm:$0xff] }
 0x536   : > { %2155 = vmatpush.msrb.mxu3 %v2054_v55 }
 0x538   : > { %v5566_v20 = vpop.eup %5565 }
 0x539   : > { %v1781_v21 = vadd.f32 1.0, %v5566_v20  ;;  %v2063_v20 = vld [vmem:[#allocation7 + $0x180] sm:$0xff] }
 0x53a   : > { %v5568_v26 = vpop.eup %5567  ;;  %2092 = vmatpush.msra.mxu0 %v2063_v20  ;;  %v2019_v20 = vld [vmem:[#allocation7 + $0x20] sm:$0xff] }
 0x53b   : > { %v5570_v24 = vpop.eup %5569  ;;  %5571 = vrcp.f32 %v1781_v21  ;;  %v1803_v30 = vadd.f32 1.0, %v5568_v26  ;;  %v1793_v44 = vand.u32 2147483648, %v1781_v21  ;;  %v1791_v31 = vand.u32 2147483647, %v1781_v21  ;;  %v2049_v26 = vld [vmem:[#allocation7 + $0x110] sm:$0xff] }
 0x53c   : > { %v1827_v36 = vadd.f32 1.0, %v5570_v24  ;;  %vm1787_vm13 = vweird.f32 %v1781_v21  ;;  %v2050_v24 = vld [vmem:[#allocation7 + $0x118] sm:$0xff] }
 0x53d   : > { %5573 = vrcp.f32 %v1803_v30  ;;  %v1815_v37 = vand.u32 2147483648, %v1803_v30  ;;  %v1813_v48 = vand.u32 2147483647, %v1803_v30  ;;  %v1794_v32 = vor.u32 1.1754944e-38, %v1793_v44  ;;  %2156 = vmatpush.msrb.mxu3 %v2050_v24  ;;  %v2048_v44 = vld [vmem:[#allocation7 + $0x108] sm:$0xff]  ;;  %v7360_v24 = vld [vmem:[#allocation9 + $0x190] sm:$0xff] }
 0x53e   : > { %5575 = vrcp.f32 %v1827_v36  ;;  %vm1792_vm0 = vcmp.eq.f32.partialorder %v1791_v31, 8.507059e+37  ;;  %vm1809_vm1 = vweird.f32 %v1803_v30  ;;  %v1839_v2 = vand.u32 2147483648, %v1827_v36  ;;  %v2044_v31 = vld [vmem:[#allocation7 + $0xe8] sm:$0xff] }
 0x53f   : > { %5577 = vtanh.f32 %v1819_v28  ;;  %v1816_v6 = vor.u32 1.1754944e-38, %v1815_v37  ;;  %vm1814_vm6 = vcmp.eq.f32.partialorder %v1813_v48, 8.507059e+37  ;;  %vm1833_vm8 = vweird.f32 %v1827_v36  ;;  %v2052_v28 = vld [vmem:[#allocation7 + $0x128] sm:$0xff]  ;;  %v2033_v37 = vld [vmem:[#allocation7 + $0x90] sm:$0xff]  ;;  %v2043_v48 = vld [vmem:[#allocation7 + $0xe0] sm:$0xff] }
 0x540   : > { %v1837_v3 = vand.u32 2147483647, %v1827_v36  ;;  %v1840_v8 = vor.u32 1.1754944e-38, %v1839_v2  ;;  %v2032_v2 = vld [vmem:[#allocation7 + $0x88] sm:$0xff] }
 0x541   : > { %v5572_v38 = vpop.eup %5571 }
 0x542   : > { %v1783_v39 = vmul.f32 %v5572_v38, %v1781_v21  ;;  %vm1788_vm12 = vweird.f32 %v5572_v38  ;;  %vm1838_vm10 = vcmp.eq.f32.partialorder %v1837_v3, 8.507059e+37  ;;  %v2060_v21 = vld [vmem:[#allocation7 + $0x168] sm:$0xff]  ;;  %v2021_v3 = vld [vmem:[#allocation7 + $0x30] sm:$0xff] }
 0x543   : > { %v5574_v29 = vpop.eup %5573  ;;  %vm1789_vm15 = vmor %vm1787_vm13, %vm1788_vm12  ;;  %2113 = vmatpush.msra.mxu1 %v2060_v21  ;;  %v2016_v21 = vld [vmem:[#allocation7 + $0x8] sm:$0xff] }
 0x544   : > { %v5576_v33 = vpop.eup %5575  ;;  %v1784_v23 = vsub.f32 1.0, %v1783_v39  ;;  %v1805_v22 = vmul.f32 %v5574_v29, %v1803_v30  ;;  %vm1810_vm14 = vweird.f32 %v5574_v29  ;;  %v2059_v30 = vld [vmem:[#allocation7 + $0x160] sm:$0xff]  ;;  %v2046_v39 = vld [vmem:[#allocation7 + $0xf8] sm:$0xff] }
 0x545   : > { %v1829_v40 = vmul.f32 %v5576_v33, %v1827_v36  ;;  %vm1811_vm5 = vmor %vm1809_vm1, %vm1810_vm14  ;;  %v5578_v15 = vpop.eup %5577  ;;  %vm1834_vm7 = vweird.f32 %v5576_v33  ;;  %v2056_v36 = vld [vmem:[#allocation7 + $0x148] sm:$0xff]  ;;  %2093 = vmatpush.msra.mxu0 %v2059_v30  ;;  %2157 = vmatpush.msrb.mxu3 %v2046_v39  ;;  %v7362_v30 = vld [vmem:[#allocation9 + $0x198] sm:$0xff] }
 0x546   : > { %v1806_v34 = vsub.f32 1.0, %v1805_v22  ;;  %v1785_v25 = vmul.f32 %v5572_v38, %v1784_v23  ;;  %vm1835_vm9 = vmor %vm1833_vm8, %vm1834_vm7  ;;  %2114 = vmatpush.msra.mxu1 %v2056_v36  ;;  %v2042_v23 = vld [vmem:[#allocation7 + $0xd8] sm:$0xff]  ;;  %v2051_v22 = vld [vmem:[#allocation7 + $0x120] sm:$0xff] }
 0x547   : > { %v1830_v41 = vsub.f32 1.0, %v1829_v40  ;;  %2158 = vmatpush.msrb.mxu3 %v2042_v23  ;;  %v2037_v40 = vld [vmem:[#allocation7 + $0xb0] sm:$0xff]  ;;  %v2015_v36 = vld [vmem:[#allocation7] sm:$0xff]  ;;  %v7368_v39 = vld [vmem:[#allocation9 + $0x1c8] sm:$0xff] }
 0x548   : > { %v1786_v27 = vadd.f32 %v5572_v38, %v1785_v25  ;;  %v1807_v42 = vmul.f32 %v5574_v29, %v1806_v34  ;;  %2115 = vmatpush.msra.mxu1 %v2052_v28  ;;  %v2038_v34 = vld [vmem:[#allocation7 + $0xb8] sm:$0xff]  ;;  %v2047_v25 = vld [vmem:[#allocation7 + $0x100] sm:$0xff]  ;;  %v7379_v23 = vld [vmem:[#allocation9 + $0x1a8] sm:$0xff] }
 0x549   : > { %v1831_v58 = vmul.f32 %v5576_v33, %v1830_v41  ;;  %2159 = vmatpush.msrb.mxu3 %v2038_v34  ;;  %v2029_v41 = vld [vmem:[#allocation7 + $0x70] sm:$0xff]  ;;  %v7373_v28 = vld [vmem:[#allocation9 + $0x178] sm:$0xff] }
 0x54a   : > { %v1790_v46 = vsel %vm1789_vm15, %v5572_v38, %v1786_v27  ;;  %v1808_v18 = vadd.f32 %v5574_v29, %v1807_v42  ;;  %v2045_v38 = vld [vmem:[#allocation7 + $0xf0] sm:$0xff]  ;;  %2116 = vmatpush.msra.mxu1 %v2048_v44  ;;  %v2034_v42 = vld [vmem:[#allocation7 + $0x98] sm:$0xff] }
 0x54b   : > { %v1795_v56 = vsel %vm1792_vm0, %v1794_v32, %v1790_v46  ;;  %v1832_v52 = vadd.f32 %v5576_v33, %v1831_v58  ;;  %2160 = vmatpush.msrb.mxu3 %v2034_v42  ;;  %v2040_v32 = vld [vmem:[#allocation7 + $0xc8] sm:$0xff]  ;;  %v2030_v46 = vld [vmem:[#allocation7 + $0x78] sm:$0xff] }
 0x54c   : > { %v1812_v47 = vsel %vm1811_vm5, %v5574_v29, %v1808_v18  ;;  %v1844_v63 = vmul.f32 %v5578_v15, %v1795_v56  ;;  %v2055_v29 = vld [vmem:[#allocation7 + $0x140] sm:$0xff]  ;;  %2117 = vmatpush.msra.mxu1 %v2044_v31  ;;  %v2026_v58 = vld [vmem:[#allocation7 + $0x58] sm:$0xff]  ;;  %v7393_v31 = vld [vmem:[#allocation9 + $0x188] sm:$0xff] }
 0x54d   : > { %v1817_v50 = vsel %vm1814_vm6, %v1816_v6, %v1812_v47  ;;  %v1836_v7 = vsel %vm1835_vm9, %v5576_v33, %v1832_v52  ;;  %v2041_v33 = vld [vmem:[#allocation7 + $0xd0] sm:$0xff]  ;;  %2094 = vmatpush.msra.mxu0 %v2055_v29  ;;  %2161 = vmatpush.msrb.mxu3 %v2030_v46  ;;  %v2039_v56 = vld [vmem:[#allocation7 + $0xc0] sm:$0xff]  ;;  %v2036_v6 = vld [vmem:[#allocation7 + $0xa8] sm:$0xff] }
 0x54e   : > { %v1843_v19 = vmul.f32 %v1817_v50, %v7322_v4  ;;  %v1841_v12 = vsel %vm1838_vm10, %v1840_v8, %v1836_v7  ;;  %v2077_v4 = vld [vmem:[#allocation7 + $0x1f0] sm:$0xff]  ;;  %2118 = vmatpush.msra.mxu1 %v2040_v32  ;;  %v2035_v52 = vld [vmem:[#allocation7 + $0xa0] sm:$0xff]  ;;  %v7399_v42 = vld [vmem:[#allocation9 + $0x138] sm:$0xff] }
 0x54f   : > { %2129 = vmatpush.msrb.mxu2 %v2077_v4  ;;  %2095 = vmatpush.msra.mxu0 %v2051_v22  ;;  %v2025_v47 = vld [vmem:[#allocation7 + $0x50] sm:$0xff]  ;;  %v2031_v4 = vld [vmem:[#allocation7 + $0x80] sm:$0xff] }
 0x550   : > { %v7329_v43 = vadd.f32 %v1844_v63, %v1843_v19  ;;  %2119 = vmatpush.msra.mxu1 %v2036_v6  ;;  %2162 = vmatpush.msrb.mxu3 %v2026_v58  ;;  %v1850_v8 = vld [vmem:[#allocation2 + $0x7] ss:$8 sm:$0xf] }
 0x551   : > { %2130 = vmatpush.msrb.mxu2 %v2073_v17  ;;  %2096 = vmatpush.msra.mxu0 %v2047_v25  ;;  %v2017_v17 = vld [vmem:[#allocation7 + $0x10] sm:$0xff]  ;;  %v7391_v25 = vld [vmem:[#allocation9 + $0x1a0] sm:$0xff]  ;;  %v7416_v6 = vld [vmem:[#allocation9 + $0x118] sm:$0xff] }
 0x552   : > { %5579 = vtanh.f32 %v7329_v43  ;;  %2120 = vmatpush.msra.mxu1 %v2032_v2  ;;  %v7370_v29 = vld [vmem:[#allocation9 + $0x170] sm:$0xff]  ;;  %v7404_v32 = vld [vmem:[#allocation9 + $0x180] sm:$0xff]  ;;  %v7429_v58 = vld [vmem:[#allocation9 + $0xf8] sm:$0xff] }
 0x553   : > { %2131 = vmatpush.msrb.mxu2 %v2069_v1  ;;  %2097 = vmatpush.msra.mxu0 %v2043_v48  ;;  %v2018_v1 = vld [vmem:[#allocation7 + $0x18] sm:$0xff]  ;;  %v7381_v22 = vld [vmem:[#allocation9 + $0x150] sm:$0xff] }
 0x554   : > { %2121 = vmatpush.msra.mxu1 %v2028_v16  ;;  %v7408_v46 = vld [vmem:[#allocation9 + $0x110] sm:$0xff]  ;;  %v7442_v2 = vld [vmem:[#allocation9 + $0xd8] sm:$0xff]  ;;  %v7464_v16 = vld [vmem:[#allocation9 + $0xe8] sm:$0xff] }
 0x555   : > { %2132 = vmatpush.msrb.mxu2 %v2065_v45  ;;  %2098 = vmatpush.msra.mxu0 %v2039_v56  ;;  %9665 = vst [vmem:[#allocation28_spill] sm:$0xff] %v7442_v2 }
 0x556   : > { %2122 = vmatpush.msra.mxu1 %v2024_v62  ;;  %v7473_v62 = vld [vmem:[#allocation9 + $0x98] sm:$0xff] }
 0x557   : > { %2133 = vmatpush.msrb.mxu2 %v2061_v54  ;;  %2099 = vmatpush.msra.mxu0 %v2035_v52  ;;  %v7345_v54 = vld [vmem:[#allocation9 + $0x1d8] sm:$0xff]  ;;  %v7438_v52 = vld [vmem:[#allocation9 + $0xd0] sm:$0xff]  ;;  %9669 = vst [vmem:[#allocation31_spill] sm:$0xff] %v7473_v62 }
 0x558   : > { %v5580_v11 = vpop.eup %5579  ;;  %2123 = vmatpush.msra.mxu1 %v2020_v53  ;;  %9664 = vst [vmem:[#allocation27_spill] sm:$0xff] %v7438_v52 }
 0x559   : > { %v1847_v14 = vmul.f32 %v5580_v11, %v1841_v12  ;;  %2134 = vmatpush.msrb.mxu2 %v2057_v5  ;;  %v2022_v11 = vld [vmem:[#allocation7 + $0x38] sm:$0xff]  ;;  %2100 = vmatpush.msra.mxu0 %v2031_v4  ;;  %v2023_v5 = vld [vmem:[#allocation7 + $0x40] sm:$0xff] }
 0x55a   : > { %2163 = vmatpush.msrb.mxu3 %v2022_v11  ;;  %2124 = vmatpush.msra.mxu1 %v2016_v21  ;;  %v7452_v11 = vld [vmem:[#allocation9 + $0xb0] sm:$0xff]  ;;  %v7462_v4 = vld [vmem:[#allocation9 + $0x100] sm:$0xff] }
 0x55b   : > { %1848 = vst [vmem:[#allocation3 + $0x6] sm:$0x1] %v1847_v14  ;;  %1867 = vmatmul.f32.vlgmr.msrb.gmra.mxu0 %v1847_v14  ;;  %1887 = vmatmul.f32.vlgmr.msrb.gmra.mxu1 %v1847_v14  ;;  %v7496_v21 = vld [vmem:[#allocation9 + $0xc0] sm:$0xff] }
 0x55c   : > { %1907 = vmatmul.f32.vlgmr.msra.gmra.mxu2 %v1847_v14  ;;  %1927 = vmatmul.f32.vlgmr.msra.gmra.mxu3 %v1847_v14  ;;  %9666 = vst [vmem:[#allocation30_spill] sm:$0xff] %v7452_v11 }
 0x55d   : > { %2135 = vmatpush.msrb.mxu2 %v2053_v35  ;;  %2164 = vmatpush.msrb.mxu3 %v2018_v1 }
 0x55e   : > { %2101 = vmatpush.msra.mxu0 %v2027_v61  ;;  %v7471_v61 = vld [vmem:[#allocation9 + $0x90] sm:$0xff] }
 0x55f   : > { %2136 = vmatpush.msrb.mxu2 %v2049_v26  ;;  %2298 = vmatpush.msra.mxu3 %v7337_v59  ;;  %v7358_v26 = vld [vmem:[#allocation9 + $0x1e8] sm:$0xff]  ;;  %9668 = vst [vmem:[#allocation29_spill] sm:$0xff] %v7471_v61 }
 0x560   : > { %2102 = vmatpush.msra.mxu0 %v2023_v5  ;;  %2258 = vmatpush.msrb.mxu1 %v7358_v26  ;;  %v7485_v5 = vld [vmem:[#allocation9 + $0x70] sm:$0xff] }
 0x561   : > { %2137 = vmatpush.msrb.mxu2 %v2045_v38  ;;  %2299 = vmatpush.msra.mxu3 %v7345_v54  ;;  %v7366_v38 = vld [vmem:[#allocation9 + $0x1e0] sm:$0xff]  ;;  %9670 = vst [vmem:[#allocation33_spill] sm:$0xff] %v7485_v5 }
 0x562   : > { %2103 = vmatpush.msra.mxu0 %v2019_v20  ;;  %2259 = vmatpush.msrb.mxu1 %v7368_v39  ;;  %v7494_v20 = vld [vmem:[#allocation9 + $0x78] sm:$0xff] }
 0x563   : > { %2138 = vmatpush.msrb.mxu2 %v2041_v33  ;;  %2300 = vmatpush.msra.mxu3 %v7354_v51  ;;  %v7377_v33 = vld [vmem:[#allocation9 + $0x1c0] sm:$0xff]  ;;  %9671 = vst [vmem:[#allocation42_spill] sm:$0xff] %v7494_v20 }
 0x564   : > { %2104 = vmatpush.msra.mxu0 %v2015_v36  ;;  %2260 = vmatpush.msrb.mxu1 %v7379_v23 }
 0x565   : > { %2139 = vmatpush.msrb.mxu2 %v2037_v40  ;;  %2301 = vmatpush.msra.mxu3 %v7362_v30  ;;  %v7385_v40 = vld [vmem:[#allocation9 + $0x158] sm:$0xff] }
 0x566   : > { %2238 = vmatpush.msrb.mxu0 %v7366_v38  ;;  %2261 = vmatpush.msrb.mxu1 %v7393_v31 }
 0x567   : > { %2140 = vmatpush.msrb.mxu2 %v2033_v37  ;;  %2302 = vmatpush.msra.mxu3 %v7373_v28  ;;  %v7395_v37 = vld [vmem:[#allocation9 + $0x130] sm:$0xff] }
 0x568   : > { %2239 = vmatpush.msrb.mxu0 %v7377_v33 }
 0x569   : > { %2141 = vmatpush.msrb.mxu2 %v2029_v41  ;;  %2303 = vmatpush.msra.mxu3 %v7385_v40  ;;  %v7406_v41 = vld [vmem:[#allocation9 + $0x168] sm:$0xff] }
 0x56a   : > { %2240 = vmatpush.msrb.mxu0 %v7391_v25  ;;  %2262 = vmatpush.msrb.mxu1 %v7406_v41 }
 0x56b   : > { %2142 = vmatpush.msrb.mxu2 %v2025_v47  ;;  %2304 = vmatpush.msra.mxu3 %v7399_v42  ;;  %v7420_v47 = vld [vmem:[#allocation9 + $0x160] sm:$0xff] }
 0x56c   : > { %2241 = vmatpush.msrb.mxu0 %v7404_v32 }
 0x56d   : > { %2143 = vmatpush.msrb.mxu2 %v2021_v3  ;;  %2305 = vmatpush.msra.mxu3 %v7416_v6 }
 0x56e   : > { %2242 = vmatpush.msrb.mxu0 %v7420_v47 }
 0x56f   : > { %2144 = vmatpush.msrb.mxu2 %v2017_v17  ;;  %2306 = vmatpush.msra.mxu3 %v7429_v58 }
 0x571   : > { %2278 = vmatpush.msra.mxu2 %v7335_v10  ;;  %2307 = vmatpush.msra.mxu3 %v7442_v2 }
 0x573   : > { %2279 = vmatpush.msra.mxu2 %v7343_v49 }
 0x575   : > { %2280 = vmatpush.msra.mxu2 %v7352_v9 }
 0x577   : > { %2281 = vmatpush.msra.mxu2 %v7360_v24 }
 0x579   : > { %2282 = vmatpush.msra.mxu2 %v7370_v29 }
 0x57b   : > { %2283 = vmatpush.msra.mxu2 %v7381_v22 }
 0x57d   : > { %2284 = vmatpush.msra.mxu2 %v7395_v37 }
 0x57f   : > { %2285 = vmatpush.msra.mxu2 %v7408_v46 }
 0x5d8   : > { %v1888_v27 = vpop.f32.mrf.mxu1  ;;  %v1868_v7 = vpop.f32.mrf.mxu0 }
 0x5d9   : > { %v1935_v18 = vrot.slane %v1888_v27, 7 }
 0x5db   : > { %v1938_v12 = vsel %vm780_vm2, %v1868_v7, %v1935_v18  ;;  %v7448_v7 = vld [vmem:[#allocation9 + $0x120] sm:$0xff] }
 0x5df   : > { %v1908_v15 = vpop.f32.mrf.mxu2  ;;  %v1928_v50 = vpop.f32.mrf.mxu3 }
 0x5e0   : > { %v1936_v19 = vrot.slane %v1908_v15, 6  ;;  %v1937_v63 = vrot.slane %v1928_v50, 5  ;;  %v7422_v15 = vld [vmem:[#allocation9 + $0x148] sm:$0xff]  ;;  %v7424_v50 = vld [vmem:[#allocation9 + $0xf0] sm:$0xff] }
 0x5e1   : > { %2263 = vmatpush.msrb.mxu1 %v7422_v15  ;;  %2286 = vmatpush.msra.mxu2 %v7424_v50 }
 0x5e2   : > { %v1939_v14 = vsel %vm782_vm3, %v1936_v19, %v1937_v63  ;;  %v7434_v19 = vld [vmem:[#allocation9 + $0x140] sm:$0xff]  ;;  %v7436_v63 = vld [vmem:[#allocation9 + $0x128] sm:$0xff] }
 0x5e3   : > { %v1940_v60 = vsel %vm784_vm4, %v1938_v12, %v1939_v14  ;;  %2243 = vmatpush.msrb.mxu0 %v7434_v19  ;;  %2264 = vmatpush.msrb.mxu1 %v7436_v63  ;;  %v7458_v14 = vld [vmem:[#allocation9 + $0xb8] sm:$0xff] }
 0x5e4   : > { %v7339_v45 = vadd.f32 %v1940_v60, %v1850_v8  ;;  %v7450_v8 = vld [vmem:[#allocation9 + $0x108] sm:$0xff]  ;;  %2287 = vmatpush.msra.mxu2 %v7438_v52  ;;  %9667 = vst [vmem:[#allocation38_spill] sm:$0xff] %v7458_v14  ;;  %2308 = vmatpush.msra.mxu3 %v7458_v14  ;;  %v7546_v14 = vld [vmem:[#allocation9 + $0x18] sm:$0xff] }
 0x5e5   : > { %2244 = vmatpush.msrb.mxu0 %v7448_v7  ;;  %2265 = vmatpush.msrb.mxu1 %v7450_v8  ;;  %v7538_v52 = vld [vmem:[#allocation9 + $0x68] sm:$0xff]  ;;  %9684 = vst [vmem:[#allocation44_spill] sm:$0xff] %v7546_v14 }
 0x5e6   : > { %v5308_v13 = vmul.f32 -1.442695, %v7339_v45  ;;  %v1963_v0 = vrot.slane %v7339_v45, 1  ;;  %v1987_v57 = vrot.slane %v7339_v45, 3  ;;  %v1984_v1 = vrot.slane %v7339_v45, 2  ;;  %2288 = vmatpush.msra.mxu2 %v7452_v11  ;;  %v7483_v45 = vld [vmem:[#allocation9 + $0xc8] sm:$0xff]  ;;  %2309 = vmatpush.msra.mxu3 %v7473_v62 }
 0x5e7   : > { %2245 = vmatpush.msrb.mxu0 %v7462_v4  ;;  %2266 = vmatpush.msrb.mxu1 %v7464_v16  ;;  %v7512_v62 = vld [vmem:[#allocation9 + $0xa0] sm:$0xff]  ;;  %9682 = vst [vmem:[#allocation39_spill] sm:$0xff] %v7538_v52 }
 0x5e8   : > { %5581 = vpow2.f32 %v5308_v13  ;;  %v5309_v35 = vmul.f32 -1.442695, %v1963_v0  ;;  %v5310_v55 = vmul.f32 -1.442695, %v1987_v57  ;;  %v7481_v57 = vld [vmem:[#allocation9 + $0xe0] sm:$0xff]  ;;  %2289 = vmatpush.msra.mxu2 %v7471_v61  ;;  %2310 = vmatpush.msra.mxu3 %v7494_v20  ;;  %9675 = vst [vmem:[#allocation46_spill] sm:$0xff] %v7512_v62 }
 0x5e9   : > { %2246 = vmatpush.msrb.mxu0 %v7481_v57  ;;  %2267 = vmatpush.msrb.mxu1 %v7483_v45  ;;  %v7514_v61 = vld [vmem:[#allocation9 + $0x88] sm:$0xff]  ;;  %v7529_v20 = vld [vmem:[#allocation9 + $0x38] sm:$0xff] }
 0x5ea   : > { %5583 = vpow2.f32 %v5309_v35  ;;  %2290 = vmatpush.msra.mxu2 %v7485_v5  ;;  %9676 = vst [vmem:[#allocation35_spill] sm:$0xff] %v7514_v61 }
 0x5eb   : > { %5585 = vpow2.f32 %v5310_v55  ;;  %2247 = vmatpush.msrb.mxu0 %v7496_v21  ;;  %9680 = vst [vmem:[#allocation40_spill] sm:$0xff] %v7529_v20 }
 0x5ed   : > { %2248 = vmatpush.msrb.mxu0 %v7512_v62 }
 0x5ee   : > { %v5582_v44 = vpop.eup %5581 }
 0x5ef   : > { %v7387_v34 = vadd.f32 1.0, %v5582_v44 }
 0x5f0   : > { %v5584_v27 = vpop.eup %5583 }
 0x5f1   : > { %v5586_v48 = vpop.eup %5585  ;;  %5587 = vrcp.f32 %v7387_v34  ;;  %v7410_v18 = vadd.f32 1.0, %v5584_v27  ;;  %v1958_v35 = vand.u32 2147483648, %v7387_v34  ;;  %v1956_v36 = vand.u32 2147483647, %v7387_v34  ;;  %v7501_v27 = vld [vmem:[#allocation9 + $0xa8] sm:$0xff] }
 0x5f2   : > { %v7412_v56 = vadd.f32 1.0, %v5586_v48  ;;  %9672 = vst [vmem:[#allocation32_spill] sm:$0xff] %v7501_v27  ;;  %v7503_v48 = vld [vmem:[#allocation9 + $0x50] sm:$0xff]  ;;  %vm1952_vm12 = vweird.f32 %v7387_v34  ;;  %2268 = vmatpush.msrb.mxu1 %v7501_v27 }
 0x5f3   : > { %5589 = vrcp.f32 %v7410_v18  ;;  %9673 = vst [vmem:[#allocation34_spill] sm:$0xff] %v7503_v48  ;;  %v1959_v11 = vor.u32 1.1754944e-38, %v1958_v35  ;;  %2291 = vmatpush.msra.mxu2 %v7503_v48  ;;  %vm1957_vm15 = vcmp.eq.f32.partialorder %v1956_v36, 8.507059e+37  ;;  %vm1974_vm0 = vweird.f32 %v7410_v18 }
 0x5f4   : > { %5591 = vrcp.f32 %v7412_v56  ;;  %2269 = vmatpush.msrb.mxu1 %v7514_v61  ;;  %vm1998_vm7 = vweird.f32 %v7412_v56 }
 0x5f5   : > { %5593 = vtanh.f32 %v1984_v1  ;;  %v1978_v1 = vand.u32 2147483647, %v7410_v18 }
 0x5f6   : > { %2270 = vmatpush.msrb.mxu1 %v7538_v52 }
 0x5f7   : > { %v7444_v3 = vpop.eup %5587  ;;  %vm1979_vm5 = vcmp.eq.f32.partialorder %v1978_v1, 8.507059e+37 }
 0x5f8   : > { %v1948_v12 = vmul.f32 %v7444_v3, %v7387_v34  ;;  %vm1953_vm11 = vweird.f32 %v7444_v3 }
 0x5f9   : > { %v7466_v17 = vpop.eup %5589  ;;  %vm7518_vm13 = vmor %vm1952_vm12, %vm1953_vm11 }
 0x5fa   : > { %v1949_v60 = vsub.f32 1.0, %v1948_v12  ;;  %v7475_v13 = vpop.eup %5591  ;;  %v1970_v0 = vmul.f32 %v7466_v17, %v7410_v18  ;;  %vm1975_vm14 = vweird.f32 %v7466_v17 }
 0x5fb   : > { %v1994_v55 = vmul.f32 %v7475_v13, %v7412_v56  ;;  %vm1976_vm1 = vmor %vm1974_vm0, %vm1975_vm14  ;;  %vm1999_vm6 = vweird.f32 %v7475_v13 }
 0x5fc   : > { %v1950_v53 = vmul.f32 %v7444_v3, %v1949_v60  ;;  %v1971_v44 = vsub.f32 1.0, %v1970_v0  ;;  %v1980_v60 = vand.u32 2147483648, %v7410_v18  ;;  %v7510_v0 = vld [vmem:[#allocation9 + $0x58] sm:$0xff]  ;;  %v7555_v18 = vld [vmem:[#allocation9 + $0x60] sm:$0xff]  ;;  %vm2000_vm8 = vmor %vm1998_vm7, %vm1999_vm6 }
 0x5fd   : > { %9674 = vst [vmem:[#allocation36_spill] sm:$0xff] %v7510_v0  ;;  %v1995_v2 = vsub.f32 1.0, %v1994_v55  ;;  %2311 = vmatpush.msra.mxu3 %v7510_v0 }
 0x5fe   : > { %v1951_v12 = vadd.f32 %v7444_v3, %v1950_v53  ;;  %v1972_v34 = vmul.f32 %v7466_v17, %v1971_v44  ;;  %v7527_v53 = vld [vmem:[#allocation9 + $0x30] sm:$0xff]  ;;  %v7536_v44 = vld [vmem:[#allocation9 + $0x80] sm:$0xff]  ;;  %v1981_v55 = vor.u32 1.1754944e-38, %v1980_v60  ;;  %9685 = vst [vmem:[#allocation51_spill] sm:$0xff] %v7555_v18 }
 0x5ff   : > { %9679 = vst [vmem:[#allocation37_spill] sm:$0xff] %v7527_v53  ;;  %2292 = vmatpush.msra.mxu2 %v7527_v53  ;;  %2312 = vmatpush.msra.mxu3 %v7529_v20  ;;  %v7562_v60 = vld [vmem:[#allocation9 + $0x40] sm:$0xff] }
 0x600   : > { %v1955_v5 = vsel %vm7518_vm13, %v7444_v3, %v1951_v12  ;;  %9681 = vst [vmem:[#allocation50_spill] sm:$0xff] %v7536_v44  ;;  %v1973_v27 = vadd.f32 %v7466_v17, %v1972_v34  ;;  %v7544_v3 = vld [vmem:[#allocation9 + $0x10] sm:$0xff]  ;;  %2249 = vmatpush.msrb.mxu0 %v7536_v44  ;;  %v7557_v12 = vld [vmem:[#allocation9 + $0x48] sm:$0xff]  ;;  %v1996_v34 = vmul.f32 %v7475_v13, %v1995_v2  ;;  %v7569_v20 = vld [vmem:[#allocation9 + $0x20] sm:$0xff] }
 0x601   : > { %9683 = vst [vmem:[#allocation41_spill] sm:$0xff] %v7544_v3  ;;  %v1960_v35 = vsel %vm1957_vm15, %v1959_v11, %v1955_v5  ;;  %v5594_v11 = vpop.eup %5593  ;;  %2293 = vmatpush.msra.mxu2 %v7544_v3  ;;  %2313 = vmatpush.msra.mxu3 %v7546_v14  ;;  %v7577_v14 = vld [vmem:[#allocation9] sm:$0xff] }
 0x602   : > { %v1977_v36 = vsel %vm1976_vm1, %v7466_v17, %v1973_v27  ;;  %9686 = vst [vmem:[#allocation43_spill] sm:$0xff] %v7557_v12  ;;  %v7564_v17 = vld [vmem:[#allocation9 + $0x28] sm:$0xff]  ;;  %v2009_v1 = vmul.f32 %v5594_v11, %v1960_v35  ;;  %2250 = vmatpush.msrb.mxu0 %v7555_v18  ;;  %2271 = vmatpush.msrb.mxu1 %v7557_v12  ;;  %v2002_v35 = vand.u32 2147483647, %v7412_v56 }
 0x603   : > { %v1982_v5 = vsel %vm1979_vm5, %v1981_v55, %v1977_v36  ;;  %9687 = vst [vmem:[#allocation45_spill] sm:$0xff] %v7562_v60  ;;  %v7571_v55 = vld [vmem:[#allocation9 + $0x8] sm:$0xff]  ;;  %v1997_v36 = vadd.f32 %v7475_v13, %v1996_v34 }
 0x604   : > { %9688 = vst [vmem:[#allocation48_spill] sm:$0xff] %v7564_v17  ;;  %v2008_v27 = vmul.f32 %v1982_v5, %v7329_v43  ;;  %2251 = vmatpush.msrb.mxu0 %v7562_v60  ;;  %2272 = vmatpush.msrb.mxu1 %v7564_v17  ;;  %v2004_v43 = vand.u32 2147483648, %v7412_v56  ;;  %vm2003_vm9 = vcmp.eq.f32.partialorder %v2002_v35, 8.507059e+37  ;;  %v9692_v56 = vmov 0.0   ;;  %v9696_v35 = vld [vmem:[#allocation30_spill] sm:$0xff] }
 0x605   : > { %9689 = vst [vmem:[#allocation52_spill] sm:$0xff] %v7569_v20  ;;  %v2001_v11 = vsel %vm2000_vm8, %v7475_v13, %v1997_v36  ;;  %v9693_v13 = vld [vmem:[#allocation27_spill] sm:$0xff]  ;;  %v9694_v36 = vld [vmem:[#allocation28_spill] sm:$0xff] }
 0x606   : > { %9690 = vst [vmem:[#allocation47_spill] sm:$0xff] %v7571_v55  ;;  %v2010_v2 = vadd.f32 %v2009_v1, %v2008_v27  ;;  %2252 = vmatpush.msrb.mxu0 %v7569_v20  ;;  %2273 = vmatpush.msrb.mxu1 %v7571_v55  ;;  %v2005_v5 = vor.u32 1.1754944e-38, %v2004_v43  ;;  %v9695_v43 = vld [vmem:[#allocation32_spill] sm:$0xff] }
 0x607   : > { %9691 = vst [vmem:[#allocation49_spill] sm:$0xff] %v7577_v14 }
 0x608   : > { %5595 = vtanh.f32 %v2010_v2  ;;  %2253 = vmatpush.msrb.mxu0 %v7577_v14  ;;  %v2006_v27 = vsel %vm2003_vm9, %v2005_v5, %v2001_v11  ;;  %v9697_v11 = vld [vmem:[#allocation38_spill] sm:$0xff]  ;;  %v9698_v5 = vld [vmem:[#allocation29_spill] sm:$0xff] }
 0x60e   : > { %v5596_v34 = vpop.eup %5595 }
 0x60f   : > { %v2012_v1 = vmul.f32 %v5596_v34, %v2006_v27  ;;  %v9699_v34 = vld [vmem:[#allocation31_spill] sm:$0xff]  ;;  %v9700_v27 = vld [vmem:[#allocation33_spill] sm:$0xff] }
 0x611   : > { %2013 = vst [vmem:[#allocation3 + $0x7] sm:$0x1] %v2012_v1  ;;  %v9701_v1 = vld [vmem:[#allocation42_spill] sm:$0xff] }
 0x618   : > { %v2014_v2 = vld [vmem:[#allocation3] sm:$0xff] }
 0x619   : > { %2105 = vmatmul.f32.vlgmr.msra.gmra.mxu0 %v2014_v2  ;;  %2125 = vmatmul.f32.vlgmr.msra.gmra.mxu1 %v2014_v2 }
 0x61a   : > { %2145 = vmatmul.f32.vlgmr.msrb.gmra.mxu2 %v2014_v2  ;;  %2165 = vmatmul.f32.vlgmr.msrb.gmra.mxu3 %v2014_v2  ;;  %v9702_v2 = vld [vmem:[#allocation40_spill] sm:$0xff] }
 0x61b   : > { %2402 = vmatpush.msra.mxu0 %v7366_v38  ;;  %2422 = vmatpush.msra.mxu1 %v7358_v26 }
 0x61c   : > { %2442 = vmatpush.msrb.mxu2 %v7335_v10  ;;  %2462 = vmatpush.msrb.mxu3 %v7337_v59 }
 0x61d   : > { %2403 = vmatpush.msra.mxu0 %v7377_v33  ;;  %2423 = vmatpush.msra.mxu1 %v7368_v39 }
 0x61e   : > { %2443 = vmatpush.msrb.mxu2 %v7343_v49  ;;  %2463 = vmatpush.msrb.mxu3 %v7345_v54 }
 0x61f   : > { %2404 = vmatpush.msra.mxu0 %v7391_v25  ;;  %2424 = vmatpush.msra.mxu1 %v7379_v23 }
 0x620   : > { %2444 = vmatpush.msrb.mxu2 %v7352_v9  ;;  %2464 = vmatpush.msrb.mxu3 %v7354_v51 }
 0x621   : > { %2274 = vmatmul.f32.vlgmr.msrb.gmra.mxu1 %v9692_v56  ;;  %2254 = vmatmul.f32.vlgmr.msrb.gmra.mxu0 %v9692_v56 }
 0x622   : > { %2294 = vmatmul.f32.vlgmr.msra.gmra.mxu2 %v9692_v56  ;;  %2314 = vmatmul.f32.vlgmr.msra.gmra.mxu3 %v9692_v56  ;;  %v9703_v56 = vld [vmem:[#allocation44_spill] sm:$0xff] }
 0x623   : > { %2405 = vmatpush.msra.mxu0 %v7404_v32  ;;  %2425 = vmatpush.msra.mxu1 %v7393_v31 }
 0x624   : > { %2445 = vmatpush.msrb.mxu2 %v7360_v24  ;;  %2465 = vmatpush.msrb.mxu3 %v7362_v30 }
 0x625   : > { %2406 = vmatpush.msra.mxu0 %v7420_v47  ;;  %2426 = vmatpush.msra.mxu1 %v7406_v41 }
 0x626   : > { %2446 = vmatpush.msrb.mxu2 %v7370_v29  ;;  %2466 = vmatpush.msrb.mxu3 %v7373_v28 }
 0x627   : > { %2407 = vmatpush.msra.mxu0 %v7434_v19  ;;  %2427 = vmatpush.msra.mxu1 %v7422_v15 }
 0x628   : > { %2447 = vmatpush.msrb.mxu2 %v7381_v22  ;;  %2467 = vmatpush.msrb.mxu3 %v7385_v40 }
 0x629   : > { %2408 = vmatpush.msra.mxu0 %v7448_v7  ;;  %2428 = vmatpush.msra.mxu1 %v7436_v63 }
 0x62a   : > { %2448 = vmatpush.msrb.mxu2 %v7395_v37  ;;  %2468 = vmatpush.msrb.mxu3 %v7399_v42 }
 0x62b   : > { %2409 = vmatpush.msra.mxu0 %v7462_v4  ;;  %2429 = vmatpush.msra.mxu1 %v7450_v8 }
 0x62c   : > { %2449 = vmatpush.msrb.mxu2 %v7408_v46  ;;  %2469 = vmatpush.msrb.mxu3 %v7416_v6 }
 0x62d   : > { %2410 = vmatpush.msra.mxu0 %v7481_v57  ;;  %2430 = vmatpush.msra.mxu1 %v7464_v16 }
 0x62e   : > { %2450 = vmatpush.msrb.mxu2 %v7424_v50  ;;  %2470 = vmatpush.msrb.mxu3 %v7429_v58 }
 0x62f   : > { %2411 = vmatpush.msra.mxu0 %v7496_v21  ;;  %2431 = vmatpush.msra.mxu1 %v7483_v45 }
 0x630   : > { %2451 = vmatpush.msrb.mxu2 %v9693_v13  ;;  %2471 = vmatpush.msrb.mxu3 %v9694_v36 }
 0x631   : > { %2412 = vmatpush.msra.mxu0 %v7512_v62  ;;  %2432 = vmatpush.msra.mxu1 %v9695_v43 }
 0x632   : > { %2452 = vmatpush.msrb.mxu2 %v9696_v35  ;;  %2472 = vmatpush.msrb.mxu3 %v9697_v11 }
 0x633   : > { %2413 = vmatpush.msra.mxu0 %v7536_v44  ;;  %2433 = vmatpush.msra.mxu1 %v7514_v61 }
 0x634   : > { %2453 = vmatpush.msrb.mxu2 %v9698_v5  ;;  %2473 = vmatpush.msrb.mxu3 %v9699_v34 }
 0x635   : > { %2414 = vmatpush.msra.mxu0 %v7555_v18  ;;  %2434 = vmatpush.msra.mxu1 %v7538_v52 }
 0x636   : > { %2454 = vmatpush.msrb.mxu2 %v9700_v27  ;;  %2474 = vmatpush.msrb.mxu3 %v9701_v1 }
 0x637   : > { %2415 = vmatpush.msra.mxu0 %v7562_v60  ;;  %2435 = vmatpush.msra.mxu1 %v7557_v12 }
 0x638   : > { %2455 = vmatpush.msrb.mxu2 %v7503_v48  ;;  %2475 = vmatpush.msrb.mxu3 %v7510_v0 }
 0x639   : > { %2416 = vmatpush.msra.mxu0 %v7569_v20  ;;  %2436 = vmatpush.msra.mxu1 %v7564_v17 }
 0x63a   : > { %2456 = vmatpush.msrb.mxu2 %v7527_v53  ;;  %2476 = vmatpush.msrb.mxu3 %v9702_v2 }
 0x63b   : > { %2417 = vmatpush.msra.mxu0 %v7577_v14  ;;  %2437 = vmatpush.msra.mxu1 %v7571_v55 }
 0x63c   : > { %2457 = vmatpush.msrb.mxu2 %v7544_v3  ;;  %2477 = vmatpush.msrb.mxu3 %v9703_v56 }
 0x63d   : > { %2566 = vmatpush.msrb.mxu0 %v7366_v38  ;;  %2586 = vmatpush.msrb.mxu1 %v7358_v26 }
 0x63e   : > { %2606 = vmatpush.msra.mxu2 %v7335_v10  ;;  %2626 = vmatpush.msra.mxu3 %v7337_v59 }
 0x63f   : > { %2567 = vmatpush.msrb.mxu0 %v7377_v33  ;;  %2587 = vmatpush.msrb.mxu1 %v7368_v39 }
 0x640   : > { %2607 = vmatpush.msra.mxu2 %v7343_v49  ;;  %2627 = vmatpush.msra.mxu3 %v7345_v54 }
 0x641   : > { %2568 = vmatpush.msrb.mxu0 %v7391_v25  ;;  %2588 = vmatpush.msrb.mxu1 %v7379_v23 }
 0x642   : > { %2608 = vmatpush.msra.mxu2 %v7352_v9  ;;  %2628 = vmatpush.msra.mxu3 %v7354_v51 }
 0x643   : > { %2569 = vmatpush.msrb.mxu0 %v7404_v32  ;;  %2589 = vmatpush.msrb.mxu1 %v7393_v31 }
 0x644   : > { %2609 = vmatpush.msra.mxu2 %v7360_v24  ;;  %2629 = vmatpush.msra.mxu3 %v7362_v30 }
 0x645   : > { %2570 = vmatpush.msrb.mxu0 %v7420_v47  ;;  %2590 = vmatpush.msrb.mxu1 %v7406_v41 }
 0x646   : > { %2610 = vmatpush.msra.mxu2 %v7370_v29  ;;  %2630 = vmatpush.msra.mxu3 %v7373_v28 }
 0x647   : > { %2571 = vmatpush.msrb.mxu0 %v7434_v19  ;;  %2591 = vmatpush.msrb.mxu1 %v7422_v15 }
 0x648   : > { %2611 = vmatpush.msra.mxu2 %v7381_v22  ;;  %2631 = vmatpush.msra.mxu3 %v7385_v40 }
 0x649   : > { %2572 = vmatpush.msrb.mxu0 %v7448_v7  ;;  %2592 = vmatpush.msrb.mxu1 %v7436_v63 }
 0x64a   : > { %2612 = vmatpush.msra.mxu2 %v7395_v37  ;;  %2632 = vmatpush.msra.mxu3 %v7399_v42 }
 0x64b   : > { %2573 = vmatpush.msrb.mxu0 %v7462_v4  ;;  %2593 = vmatpush.msrb.mxu1 %v7450_v8 }
 0x64c   : > { %2613 = vmatpush.msra.mxu2 %v7408_v46  ;;  %2633 = vmatpush.msra.mxu3 %v7416_v6 }
 0x64d   : > { %2574 = vmatpush.msrb.mxu0 %v7481_v57  ;;  %2594 = vmatpush.msrb.mxu1 %v7464_v16 }
 0x64e   : > { %2614 = vmatpush.msra.mxu2 %v7424_v50  ;;  %2634 = vmatpush.msra.mxu3 %v7429_v58 }
 0x64f   : > { %2575 = vmatpush.msrb.mxu0 %v7496_v21  ;;  %2595 = vmatpush.msrb.mxu1 %v7483_v45 }
 0x650   : > { %2615 = vmatpush.msra.mxu2 %v9693_v13  ;;  %2635 = vmatpush.msra.mxu3 %v9694_v36 }
 0x651   : > { %2576 = vmatpush.msrb.mxu0 %v7512_v62  ;;  %2596 = vmatpush.msrb.mxu1 %v9695_v43 }
 0x652   : > { %2616 = vmatpush.msra.mxu2 %v9696_v35  ;;  %2636 = vmatpush.msra.mxu3 %v9697_v11 }
 0x653   : > { %2577 = vmatpush.msrb.mxu0 %v7536_v44  ;;  %2597 = vmatpush.msrb.mxu1 %v7514_v61 }
 0x654   : > { %2617 = vmatpush.msra.mxu2 %v9698_v5  ;;  %2637 = vmatpush.msra.mxu3 %v9699_v34 }
 0x655   : > { %2578 = vmatpush.msrb.mxu0 %v7555_v18  ;;  %2598 = vmatpush.msrb.mxu1 %v7538_v52 }
 0x656   : > { %2618 = vmatpush.msra.mxu2 %v9700_v27  ;;  %2638 = vmatpush.msra.mxu3 %v9701_v1 }
 0x657   : > { %2579 = vmatpush.msrb.mxu0 %v7562_v60  ;;  %2599 = vmatpush.msrb.mxu1 %v7557_v12 }
 0x658   : > { %2619 = vmatpush.msra.mxu2 %v7503_v48  ;;  %2639 = vmatpush.msra.mxu3 %v7510_v0  ;;  %v2079_v0 = vld [vmem:[%s9147_s6] sm:$0xf] }
 0x659   : > { %2580 = vmatpush.msrb.mxu0 %v7569_v20  ;;  %2600 = vmatpush.msrb.mxu1 %v7564_v17  ;;  %v2081_v48 = vperm.slane %v2079_v0, 0  ;;  %v2082_v20 = vperm.slane %v2079_v0, 1 }
 0x65a   : > { %2620 = vmatpush.msra.mxu2 %v7527_v53  ;;  %2640 = vmatpush.msra.mxu3 %v9702_v2  ;;  %v2083_v2 = vperm.slane %v2079_v0, 2 }
 0x65b   : > { %2581 = vmatpush.msrb.mxu0 %v7577_v14  ;;  %2601 = vmatpush.msrb.mxu1 %v7571_v55  ;;  %v2084_v14 = vperm.slane %v2079_v0, 3 }
 0x65c   : > { %2621 = vmatpush.msra.mxu2 %v7544_v3  ;;  %2641 = vmatpush.msra.mxu3 %v9703_v56 }
 0x696   : > { %v2106_v12 = vpop.f32.mrf.mxu0  ;;  %v2126_v17 = vpop.f32.mrf.mxu1 }
 0x697   : > { %v2107_v60 = vadd.f32 %v2106_v12, %v2081_v48  ;;  %v2127_v53 = vadd.f32 %v2126_v17, %v2082_v20 }
 0x699   : > { %2169 = vst [vmem:[#allocation2] sm:$0xff] %v2107_v60 }
 0x69a   : > { %2170 = vst [vmem:[#allocation2 + $0x8] sm:$0xff] %v2127_v53 }
 0x69d   : > { %v2146_v1 = vpop.f32.mrf.mxu2  ;;  %v2166_v55 = vpop.f32.mrf.mxu3 }
 0x69e   : > { %v2147_v27 = vadd.f32 %v2146_v1, %v2083_v2  ;;  %v2167_v3 = vadd.f32 %v2166_v55, %v2084_v14  ;;  %v2275_v52 = vpop.f32.mrf.mxu1  ;;  %v2255_v18 = vpop.f32.mrf.mxu0 }
 0x69f   : > { %v2322_v56 = vrot.slane %v2275_v52, 7 }
 0x6a0   : > { %2171 = vst [vmem:[#allocation2 + $0x10] sm:$0xff] %v2147_v27 }
 0x6a1   : > { %2172 = vst [vmem:[#allocation2 + $0x18] sm:$0xff] %v2167_v3  ;;  %v2325_v48 = vsel %vm780_vm2, %v2255_v18, %v2322_v56 }
 0x6a5   : > { %v2295_v34 = vpop.f32.mrf.mxu2  ;;  %v2315_v5 = vpop.f32.mrf.mxu3 }
 0x6a6   : > { %v2323_v61 = vrot.slane %v2295_v34, 6  ;;  %v2324_v44 = vrot.slane %v2315_v5, 5 }
 0x6a8   : > { %v2326_v20 = vsel %vm782_vm3, %v2323_v61, %v2324_v44  ;;  %v2237_v53 = vld [vmem:[#allocation2] ss:$8 sm:$0xf] }
 0x6a9   : > { %v2327_v0 = vsel %vm784_vm4, %v2325_v48, %v2326_v20 }
 0x6aa   : > { %v2329_v12 = vadd.f32 %v2327_v0, %v2237_v53 }
 0x6ac   : > { %v5311_v60 = vmul.f32 -1.442695, %v2329_v12  ;;  %v2350_v17 = vrot.slane %v2329_v12, 1  ;;  %v2374_v14 = vrot.slane %v2329_v12, 3  ;;  %v2371_v48 = vrot.slane %v2329_v12, 2 }
 0x6ae   : > { %5597 = vpow2.f32 %v5311_v60  ;;  %v5312_v55 = vmul.f32 -1.442695, %v2350_v17  ;;  %v5313_v3 = vmul.f32 -1.442695, %v2374_v14 }
 0x6b0   : > { %5599 = vpow2.f32 %v5312_v55 }
 0x6b1   : > { %5601 = vpow2.f32 %v5313_v3 }
 0x6b4   : > { %v5598_v52 = vpop.eup %5597 }
 0x6b5   : > { %v2333_v27 = vadd.f32 1.0, %v5598_v52 }
 0x6b6   : > { %v5600_v34 = vpop.eup %5599 }
 0x6b7   : > { %v5602_v5 = vpop.eup %5601  ;;  %5603 = vrcp.f32 %v2333_v27  ;;  %v2355_v18 = vadd.f32 1.0, %v5600_v34  ;;  %v2345_v60 = vand.u32 2147483648, %v2333_v27  ;;  %v2343_v14 = vand.u32 2147483647, %v2333_v27 }
 0x6b8   : > { %v2379_v56 = vadd.f32 1.0, %v5602_v5  ;;  %vm2339_vm11 = vweird.f32 %v2333_v27 }
 0x6b9   : > { %5605 = vrcp.f32 %v2355_v18  ;;  %v2367_v52 = vand.u32 2147483648, %v2355_v18  ;;  %v2365_v5 = vand.u32 2147483647, %v2355_v18  ;;  %v2346_v35 = vor.u32 1.1754944e-38, %v2345_v60 }
 0x6ba   : > { %5607 = vrcp.f32 %v2379_v56  ;;  %vm2344_vm14 = vcmp.eq.f32.partialorder %v2343_v14, 8.507059e+37  ;;  %vm2361_vm15 = vweird.f32 %v2355_v18  ;;  %vm2385_vm6 = vweird.f32 %v2379_v56 }
 0x6bb   : > { %5609 = vtanh.f32 %v2371_v48  ;;  %v2368_v43 = vor.u32 1.1754944e-38, %v2367_v52  ;;  %vm2366_vm1 = vcmp.eq.f32.partialorder %v2365_v5, 8.507059e+37 }
 0x6bd   : > { %v5604_v61 = vpop.eup %5603 }
 0x6be   : > { %v2335_v44 = vmul.f32 %v5604_v61, %v2333_v27  ;;  %vm2340_vm10 = vweird.f32 %v5604_v61 }
 0x6bf   : > { %v5606_v1 = vpop.eup %5605  ;;  %vm2341_vm12 = vmor %vm2339_vm11, %vm2340_vm10 }
 0x6c0   : > { %v2336_v2 = vsub.f32 1.0, %v2335_v44  ;;  %v5608_v20 = vpop.eup %5607  ;;  %v2357_v53 = vmul.f32 %v5606_v1, %v2355_v18  ;;  %vm2362_vm13 = vweird.f32 %v5606_v1  ;;  %v2389_v18 = vand.u32 2147483647, %v2379_v56 }
 0x6c1   : > { %v2381_v17 = vmul.f32 %v5608_v20, %v2379_v56  ;;  %vm2363_vm0 = vmor %vm2361_vm15, %vm2362_vm13  ;;  %vm2386_vm5 = vweird.f32 %v5608_v20 }
 0x6c2   : > { %v2337_v0 = vmul.f32 %v5604_v61, %v2336_v2  ;;  %v2358_v55 = vsub.f32 1.0, %v2357_v53  ;;  %v5610_v53 = vpop.eup %5609  ;;  %vm2387_vm7 = vmor %vm2385_vm6, %vm2386_vm5  ;;  %vm2390_vm8 = vcmp.eq.f32.partialorder %v2389_v18, 8.507059e+37 }
 0x6c3   : > { %v2382_v44 = vsub.f32 1.0, %v2381_v17 }
 0x6c4   : > { %v2338_v3 = vadd.f32 %v5604_v61, %v2337_v0  ;;  %v2359_v34 = vmul.f32 %v5606_v1, %v2358_v55 }
 0x6c5   : > { %v2383_v27 = vmul.f32 %v5608_v20, %v2382_v44 }
 0x6c6   : > { %v2342_v11 = vsel %vm2341_vm12, %v5604_v61, %v2338_v3  ;;  %v2360_v12 = vadd.f32 %v5606_v1, %v2359_v34  ;;  %v2391_v61 = vand.u32 2147483648, %v2379_v56 }
 0x6c7   : > { %v2347_v2 = vsel %vm2344_vm14, %v2346_v35, %v2342_v11  ;;  %v2384_v55 = vadd.f32 %v5608_v20, %v2383_v27 }
 0x6c8   : > { %v2364_v62 = vsel %vm2363_vm0, %v5606_v1, %v2360_v12  ;;  %v2396_v48 = vmul.f32 %v5610_v53, %v2347_v2  ;;  %v2392_v11 = vor.u32 1.1754944e-38, %v2391_v61 }
 0x6c9   : > { %v2369_v0 = vsel %vm2366_vm1, %v2368_v43, %v2364_v62  ;;  %v2388_v35 = vsel %vm2387_vm7, %v5608_v20, %v2384_v55  ;;  %v2401_v62 = vld [vmem:[#allocation2 + $0x1] ss:$8 sm:$0xf] }
 0x6ca   : > { %v2395_v36 = vmul.f32 0.0, %v2369_v0  ;;  %v2393_v60 = vsel %vm2390_vm8, %v2392_v11, %v2388_v35 }
 0x6cc   : > { %v7724_v13 = vadd.f32 %v2396_v48, %v2395_v36 }
 0x6ce   : > { %5611 = vtanh.f32 %v7724_v13 }
 0x6d4   : > { %v5612_v1 = vpop.eup %5611 }
 0x6d5   : > { %v2399_v17 = vmul.f32 %v5612_v1, %v2393_v60 }
 0x6d7   : > { %2400 = vst [vmem:[#allocation3] sm:$0x1] %v2399_v17  ;;  %2418 = vmatmul.f32.vlgmr.msra.gmra.mxu0 %v2399_v17  ;;  %2438 = vmatmul.f32.vlgmr.msra.gmra.mxu1 %v2399_v17 }
 0x6d8   : > { %2458 = vmatmul.f32.vlgmr.msrb.gmra.mxu2 %v2399_v17  ;;  %2478 = vmatmul.f32.vlgmr.msrb.gmra.mxu3 %v2399_v17 }
 0x6d9   : > { %2730 = vmatpush.msra.mxu0 %v7366_v38  ;;  %2750 = vmatpush.msra.mxu1 %v7358_v26  ;;  %v9710_v26 = vld [vmem:[#allocation50_spill] sm:$0xff]  ;;  %v9713_v38 = vld [vmem:[#allocation31_spill] sm:$0xff] }
 0x6da   : > { %2770 = vmatpush.msrb.mxu2 %v7335_v10  ;;  %2790 = vmatpush.msrb.mxu3 %v7337_v59  ;;  %v9704_v10 = vld [vmem:[#allocation27_spill] sm:$0xff]  ;;  %v9705_v59 = vld [vmem:[#allocation28_spill] sm:$0xff] }
 0x6db   : > { %2731 = vmatpush.msra.mxu0 %v7377_v33  ;;  %2751 = vmatpush.msra.mxu1 %v7368_v39  ;;  %v9714_v39 = vld [vmem:[#allocation51_spill] sm:$0xff]  ;;  %v9717_v33 = vld [vmem:[#allocation42_spill] sm:$0xff] }
 0x6dc   : > { %2771 = vmatpush.msrb.mxu2 %v7343_v49  ;;  %2791 = vmatpush.msrb.mxu3 %v7345_v54  ;;  %v9706_v49 = vld [vmem:[#allocation46_spill] sm:$0xff]  ;;  %v9707_v54 = vld [vmem:[#allocation32_spill] sm:$0xff] }
 0x6dd   : > { %2732 = vmatpush.msra.mxu0 %v7391_v25  ;;  %2752 = vmatpush.msra.mxu1 %v7379_v23  ;;  %v9718_v23 = vld [vmem:[#allocation45_spill] sm:$0xff]  ;;  %v9721_v25 = vld [vmem:[#allocation36_spill] sm:$0xff] }
 0x6de   : > { %2772 = vmatpush.msrb.mxu2 %v7352_v9  ;;  %2792 = vmatpush.msrb.mxu3 %v7354_v51  ;;  %v9708_v9 = vld [vmem:[#allocation30_spill] sm:$0xff] }
 0x6df   : > { %2733 = vmatpush.msra.mxu0 %v7404_v32  ;;  %2753 = vmatpush.msra.mxu1 %v7393_v31  ;;  %v9709_v51 = vld [vmem:[#allocation38_spill] sm:$0xff]  ;;  %v9722_v31 = vld [vmem:[#allocation52_spill] sm:$0xff] }
 0x6e0   : > { %2773 = vmatpush.msrb.mxu2 %v7360_v24  ;;  %2793 = vmatpush.msrb.mxu3 %v7362_v30  ;;  %v9711_v24 = vld [vmem:[#allocation35_spill] sm:$0xff]  ;;  %v9712_v30 = vld [vmem:[#allocation29_spill] sm:$0xff]  ;;  %v9725_v32 = vld [vmem:[#allocation40_spill] sm:$0xff] }
 0x6e1   : > { %2734 = vmatpush.msra.mxu0 %v7420_v47  ;;  %2754 = vmatpush.msra.mxu1 %v7406_v41  ;;  %v9726_v41 = vld [vmem:[#allocation49_spill] sm:$0xff]  ;;  %v9729_v47 = vld [vmem:[#allocation44_spill] sm:$0xff] }
 0x6e2   : > { %2774 = vmatpush.msrb.mxu2 %v7370_v29  ;;  %2794 = vmatpush.msrb.mxu3 %v7373_v28  ;;  %v9715_v29 = vld [vmem:[#allocation39_spill] sm:$0xff]  ;;  %v9716_v28 = vld [vmem:[#allocation33_spill] sm:$0xff] }
 0x6e3   : > { %2735 = vmatpush.msra.mxu0 %v7434_v19  ;;  %2755 = vmatpush.msra.mxu1 %v7422_v15 }
 0x6e4   : > { %2775 = vmatpush.msrb.mxu2 %v7381_v22  ;;  %2795 = vmatpush.msrb.mxu3 %v7385_v40  ;;  %v9719_v22 = vld [vmem:[#allocation43_spill] sm:$0xff]  ;;  %v9720_v40 = vld [vmem:[#allocation34_spill] sm:$0xff] }
 0x6e5   : > { %2736 = vmatpush.msra.mxu0 %v7448_v7  ;;  %2756 = vmatpush.msra.mxu1 %v7436_v63 }
 0x6e6   : > { %2776 = vmatpush.msrb.mxu2 %v7395_v37  ;;  %2796 = vmatpush.msrb.mxu3 %v7399_v42  ;;  %v9723_v37 = vld [vmem:[#allocation48_spill] sm:$0xff]  ;;  %v9724_v42 = vld [vmem:[#allocation37_spill] sm:$0xff] }
 0x6e7   : > { %2737 = vmatpush.msra.mxu0 %v7462_v4  ;;  %2757 = vmatpush.msra.mxu1 %v7450_v8 }
 0x6e8   : > { %2777 = vmatpush.msrb.mxu2 %v7408_v46  ;;  %2797 = vmatpush.msrb.mxu3 %v7416_v6  ;;  %v9727_v46 = vld [vmem:[#allocation47_spill] sm:$0xff]  ;;  %v9728_v6 = vld [vmem:[#allocation41_spill] sm:$0xff] }
 0x6e9   : > { %2738 = vmatpush.msra.mxu0 %v7481_v57  ;;  %2758 = vmatpush.msra.mxu1 %v7464_v16 }
 0x6ea   : > { %2778 = vmatpush.msrb.mxu2 %v7424_v50  ;;  %2798 = vmatpush.msrb.mxu3 %v7429_v58 }
 0x6eb   : > { %2739 = vmatpush.msra.mxu0 %v7496_v21  ;;  %2759 = vmatpush.msra.mxu1 %v7483_v45 }
 0x6ec   : > { %2779 = vmatpush.msrb.mxu2 %v9704_v10  ;;  %2799 = vmatpush.msrb.mxu3 %v9705_v59 }
 0x6ed   : > { %2740 = vmatpush.msra.mxu0 %v9706_v49  ;;  %2760 = vmatpush.msra.mxu1 %v9707_v54 }
 0x6ee   : > { %2780 = vmatpush.msrb.mxu2 %v9708_v9  ;;  %2800 = vmatpush.msrb.mxu3 %v9709_v51 }
 0x6ef   : > { %2741 = vmatpush.msra.mxu0 %v9710_v26  ;;  %2761 = vmatpush.msra.mxu1 %v9711_v24 }
 0x6f0   : > { %2781 = vmatpush.msrb.mxu2 %v9712_v30  ;;  %2801 = vmatpush.msrb.mxu3 %v9713_v38 }
 0x6f1   : > { %2742 = vmatpush.msra.mxu0 %v9714_v39  ;;  %2762 = vmatpush.msra.mxu1 %v9715_v29 }
 0x6f2   : > { %2782 = vmatpush.msrb.mxu2 %v9716_v28  ;;  %2802 = vmatpush.msrb.mxu3 %v9717_v33 }
 0x6f3   : > { %2743 = vmatpush.msra.mxu0 %v9718_v23  ;;  %2763 = vmatpush.msra.mxu1 %v9719_v22 }
 0x6f4   : > { %2783 = vmatpush.msrb.mxu2 %v9720_v40  ;;  %2803 = vmatpush.msrb.mxu3 %v9721_v25 }
 0x6f5   : > { %2744 = vmatpush.msra.mxu0 %v9722_v31  ;;  %2764 = vmatpush.msra.mxu1 %v9723_v37 }
 0x6f6   : > { %2784 = vmatpush.msrb.mxu2 %v9724_v42  ;;  %2804 = vmatpush.msrb.mxu3 %v9725_v32 }
 0x6f7   : > { %2745 = vmatpush.msra.mxu0 %v9726_v41  ;;  %2765 = vmatpush.msra.mxu1 %v9727_v46 }
 0x6f8   : > { %2785 = vmatpush.msrb.mxu2 %v9728_v6  ;;  %2805 = vmatpush.msrb.mxu3 %v9729_v47 }
 0x754   : > { %v2439_v15 = vpop.f32.mrf.mxu1  ;;  %v2419_v8 = vpop.f32.mrf.mxu0 }
 0x755   : > { %v2486_v50 = vrot.slane %v2439_v15, 7 }
 0x757   : > { %v2489_v4 = vsel %vm780_vm2, %v2419_v8, %v2486_v50 }
 0x75b   : > { %v2459_v58 = vpop.f32.mrf.mxu2  ;;  %v2479_v19 = vpop.f32.mrf.mxu3 }
 0x75c   : > { %v2487_v63 = vrot.slane %v2459_v58, 6  ;;  %v2488_v7 = vrot.slane %v2479_v19, 5 }
 0x75e   : > { %v2490_v16 = vsel %vm782_vm3, %v2487_v63, %v2488_v7 }
 0x75f   : > { %v2491_v57 = vsel %vm784_vm4, %v2489_v4, %v2490_v16 }
 0x760   : > { %v2493_v45 = vadd.f32 %v2491_v57, %v2401_v62 }
 0x762   : > { %v5314_v36 = vmul.f32 -1.442695, %v2493_v45  ;;  %v2514_v43 = vrot.slane %v2493_v45, 1  ;;  %v2538_v56 = vrot.slane %v2493_v45, 3  ;;  %v2535_v27 = vrot.slane %v2493_v45, 2 }
 0x764   : > { %5613 = vpow2.f32 %v5314_v36  ;;  %v5315_v20 = vmul.f32 -1.442695, %v2514_v43  ;;  %v5316_v14 = vmul.f32 -1.442695, %v2538_v56  ;;  %v7801_v56 = vld [vmem:[#allocation9 + $0x1e8] sm:$0xff] }
 0x766   : > { %5615 = vpow2.f32 %v5315_v20  ;;  %v7804_v20 = vld [vmem:[#allocation9 + $0x1f0] sm:$0xff] }
 0x767   : > { %5617 = vpow2.f32 %v5316_v14  ;;  %v7807_v14 = vld [vmem:[#allocation9 + $0x1f8] sm:$0xff] }
 0x76a   : > { %v5614_v3 = vpop.eup %5613 }
 0x76b   : > { %v2497_v52 = vadd.f32 1.0, %v5614_v3  ;;  %v7810_v3 = vld [vmem:[#allocation9 + $0x1c0] sm:$0xff] }
 0x76c   : > { %v5616_v34 = vpop.eup %5615 }
 0x76d   : > { %v5618_v5 = vpop.eup %5617  ;;  %5619 = vrcp.f32 %v2497_v52  ;;  %v2519_v44 = vadd.f32 1.0, %v5616_v34  ;;  %v2509_v18 = vand.u32 2147483648, %v2497_v52  ;;  %v2507_v60 = vand.u32 2147483647, %v2497_v52  ;;  %v7816_v34 = vld [vmem:[#allocation9 + $0x1d0] sm:$0xff] }
 0x76e   : > { %v2543_v12 = vadd.f32 1.0, %v5618_v5  ;;  %vm2503_vm10 = vweird.f32 %v2497_v52  ;;  %v7819_v5 = vld [vmem:[#allocation9 + $0x1d8] sm:$0xff] }
 0x76f   : > { %5621 = vrcp.f32 %v2519_v44  ;;  %v2531_v17 = vand.u32 2147483648, %v2519_v44  ;;  %v2529_v9 = vand.u32 2147483647, %v2519_v44  ;;  %v2510_v51 = vor.u32 1.1754944e-38, %v2509_v18  ;;  %v7849_v18 = vld [vmem:[#allocation9 + $0x168] sm:$0xff] }
 0x770   : > { %5623 = vrcp.f32 %v2543_v12  ;;  %vm2508_vm13 = vcmp.eq.f32.partialorder %v2507_v60, 8.507059e+37  ;;  %vm2525_vm14 = vweird.f32 %v2519_v44  ;;  %v2555_v4 = vand.u32 2147483648, %v2543_v12  ;;  %v7861_v60 = vld [vmem:[#allocation9 + $0x148] sm:$0xff] }
 0x771   : > { %5625 = vtanh.f32 %v2535_v27  ;;  %v2532_v40 = vor.u32 1.1754944e-38, %v2531_v17  ;;  %vm2530_vm0 = vcmp.eq.f32.partialorder %v2529_v9, 8.507059e+37  ;;  %vm2549_vm5 = vweird.f32 %v2543_v12  ;;  %v7837_v27 = vld [vmem:[#allocation9 + $0x188] sm:$0xff]  ;;  %v7864_v17 = vld [vmem:[#allocation9 + $0x150] sm:$0xff] }
 0x772   : > { %v2553_v16 = vand.u32 2147483647, %v2543_v12  ;;  %v2556_v57 = vor.u32 1.1754944e-38, %v2555_v4  ;;  %v7873_v9 = vld [vmem:[#allocation9 + $0x128] sm:$0xff]  ;;  %v7918_v4 = vld [vmem:[#allocation9 + $0xb0] sm:$0xff] }
 0x773   : > { %v5620_v2 = vpop.eup %5619  ;;  %9733 = vst [vmem:[#allocation46_spill] sm:$0xff] %v7918_v4 }
 0x774   : > { %v2499_v53 = vmul.f32 %v5620_v2, %v2497_v52  ;;  %vm2504_vm9 = vweird.f32 %v5620_v2  ;;  %vm2554_vm7 = vcmp.eq.f32.partialorder %v2553_v16, 8.507059e+37  ;;  %v7813_v52 = vld [vmem:[#allocation9 + $0x1c8] sm:$0xff]  ;;  %v7926_v16 = vld [vmem:[#allocation9 + $0x90] sm:$0xff] }
 0x775   : > { %v5622_v0 = vpop.eup %5621  ;;  %vm2505_vm12 = vmor %vm2503_vm10, %vm2504_vm9  ;;  %9735 = vst [vmem:[#allocation30_spill] sm:$0xff] %v7926_v16 }
 0x776   : > { %v5624_v48 = vpop.eup %5623  ;;  %v2500_v55 = vsub.f32 1.0, %v2499_v53  ;;  %v2521_v61 = vmul.f32 %v5622_v0, %v2519_v44  ;;  %vm2526_vm11 = vweird.f32 %v5622_v0  ;;  %v7822_v44 = vld [vmem:[#allocation9 + $0x1a0] sm:$0xff]  ;;  %v7831_v53 = vld [vmem:[#allocation9 + $0x1b8] sm:$0xff] }
 0x777   : > { %v2545_v35 = vmul.f32 %v5624_v48, %v2543_v12  ;;  %vm2527_vm15 = vmor %vm2525_vm14, %vm2526_vm11  ;;  %v5626_v15 = vpop.eup %5625  ;;  %vm2550_vm1 = vweird.f32 %v5624_v48  ;;  %v7825_v12 = vld [vmem:[#allocation9 + $0x1a8] sm:$0xff] }
 0x778   : > { %v2522_v11 = vsub.f32 1.0, %v2521_v61  ;;  %v2501_v1 = vmul.f32 %v5620_v2, %v2500_v55  ;;  %vm2551_vm6 = vmor %vm2549_vm5, %vm2550_vm1  ;;  %v7843_v55 = vld [vmem:[#allocation9 + $0x198] sm:$0xff]  ;;  %v7846_v61 = vld [vmem:[#allocation9 + $0x160] sm:$0xff] }
 0x779   : > { %v2546_v30 = vsub.f32 1.0, %v2545_v35  ;;  %v7852_v35 = vld [vmem:[#allocation9 + $0x170] sm:$0xff] }
 0x77a   : > { %v2502_v10 = vadd.f32 %v5620_v2, %v2501_v1  ;;  %v2523_v59 = vmul.f32 %v5622_v0, %v2522_v11  ;;  %v7855_v11 = vld [vmem:[#allocation9 + $0x178] sm:$0xff]  ;;  %v7858_v1 = vld [vmem:[#allocation9 + $0x140] sm:$0xff] }
 0x77b   : > { %v2547_v58 = vmul.f32 %v5624_v48, %v2546_v30  ;;  %v7879_v30 = vld [vmem:[#allocation9 + $0x138] sm:$0xff] }
 0x77c   : > { %v2506_v38 = vsel %vm2505_vm12, %v5620_v2, %v2502_v10  ;;  %v2524_v28 = vadd.f32 %v5622_v0, %v2523_v59  ;;  %v7828_v2 = vld [vmem:[#allocation9 + $0x1b0] sm:$0xff]  ;;  %v7867_v10 = vld [vmem:[#allocation9 + $0x158] sm:$0xff]  ;;  %v7870_v59 = vld [vmem:[#allocation9 + $0x120] sm:$0xff] }
 0x77d   : > { %v2511_v33 = vsel %vm2508_vm13, %v2510_v51, %v2506_v38  ;;  %v2548_v8 = vadd.f32 %v5624_v48, %v2547_v58  ;;  %v7876_v51 = vld [vmem:[#allocation9 + $0x130] sm:$0xff]  ;;  %v7882_v38 = vld [vmem:[#allocation9 + $0x100] sm:$0xff]  ;;  %v7903_v58 = vld [vmem:[#allocation9 + $0xf8] sm:$0xff] }
 0x77e   : > { %v2528_v25 = vsel %vm2527_vm15, %v5622_v0, %v2524_v28  ;;  %v2560_v63 = vmul.f32 %v5626_v15, %v2511_v33  ;;  %v7834_v0 = vld [vmem:[#allocation9 + $0x180] sm:$0xff]  ;;  %v7885_v28 = vld [vmem:[#allocation9 + $0x108] sm:$0xff]  ;;  %v7888_v33 = vld [vmem:[#allocation9 + $0x110] sm:$0xff] }
 0x77f   : > { %v2533_v50 = vsel %vm2530_vm0, %v2532_v40, %v2528_v25  ;;  %v2552_v62 = vsel %vm2551_vm6, %v5624_v48, %v2548_v8  ;;  %v7840_v48 = vld [vmem:[#allocation9 + $0x190] sm:$0xff]  ;;  %v7891_v40 = vld [vmem:[#allocation9 + $0x118] sm:$0xff]  ;;  %v7894_v25 = vld [vmem:[#allocation9 + $0xe0] sm:$0xff] }
 0x780   : > { %v2559_v19 = vmul.f32 %v2533_v50, %v7724_v13  ;;  %v2557_v36 = vsel %vm2554_vm7, %v2556_v57, %v2552_v62  ;;  %v7798_v13 = vld [vmem:[#allocation9 + $0x1e0] sm:$0xff]  ;;  %v7897_v15 = vld [vmem:[#allocation9 + $0xe8] sm:$0xff]  ;;  %v7900_v50 = vld [vmem:[#allocation9 + $0xf0] sm:$0xff] }
 0x781   : > { %v7913_v8 = vld [vmem:[#allocation9 + $0xd8] sm:$0xff] }
 0x782   : > { %v7795_v7 = vadd.f32 %v2560_v63, %v2559_v19  ;;  %v7907_v19 = vld [vmem:[#allocation9 + $0xc8] sm:$0xff]  ;;  %v7910_v63 = vld [vmem:[#allocation9 + $0xd0] sm:$0xff]  ;;  %9732 = vst [vmem:[#allocation28_spill] sm:$0xff] %v7913_v8  ;;  %v7929_v62 = vld [vmem:[#allocation9 + $0x98] sm:$0xff] }
 0x783   : > { %9730 = vst [vmem:[#allocation53_spill] sm:$0xff] %v7907_v19 }
 0x784   : > { %5627 = vtanh.f32 %v7795_v7  ;;  %9731 = vst [vmem:[#allocation27_spill] sm:$0xff] %v7910_v63 }
 0x785   : > { %9736 = vst [vmem:[#allocation38_spill] sm:$0xff] %v7929_v62 }
 0x78a   : > { %v5628_v45 = vpop.eup %5627 }
 0x78b   : > { %v2563_v43 = vmul.f32 %v5628_v45, %v2557_v36 }
 0x78d   : > { %2564 = vst [vmem:[#allocation3 + $0x1] sm:$0x1] %v2563_v43  ;;  %2582 = vmatmul.f32.vlgmr.msrb.gmra.mxu0 %v2563_v43  ;;  %2602 = vmatmul.f32.vlgmr.msrb.gmra.mxu1 %v2563_v43 }
 0x78e   : > { %2622 = vmatmul.f32.vlgmr.msra.gmra.mxu2 %v2563_v43  ;;  %2642 = vmatmul.f32.vlgmr.msra.gmra.mxu3 %v2563_v43 }
 0x78f   : > { %2894 = vmatpush.msrb.mxu0 %v7798_v13  ;;  %2914 = vmatpush.msrb.mxu1 %v7801_v56 }
 0x790   : > { %2934 = vmatpush.msra.mxu2 %v7804_v20  ;;  %2954 = vmatpush.msra.mxu3 %v7807_v14 }
 0x791   : > { %2895 = vmatpush.msrb.mxu0 %v7810_v3  ;;  %2915 = vmatpush.msrb.mxu1 %v7813_v52 }
 0x792   : > { %2935 = vmatpush.msra.mxu2 %v7816_v34  ;;  %2955 = vmatpush.msra.mxu3 %v7819_v5 }
 0x793   : > { %2896 = vmatpush.msrb.mxu0 %v7822_v44  ;;  %2916 = vmatpush.msrb.mxu1 %v7825_v12 }
 0x794   : > { %2936 = vmatpush.msra.mxu2 %v7828_v2  ;;  %2956 = vmatpush.msra.mxu3 %v7831_v53 }
 0x795   : > { %2897 = vmatpush.msrb.mxu0 %v7834_v0  ;;  %2917 = vmatpush.msrb.mxu1 %v7837_v27 }
 0x796   : > { %2937 = vmatpush.msra.mxu2 %v7840_v48  ;;  %2957 = vmatpush.msra.mxu3 %v7843_v55 }
 0x797   : > { %2898 = vmatpush.msrb.mxu0 %v7846_v61  ;;  %2918 = vmatpush.msrb.mxu1 %v7849_v18 }
 0x798   : > { %2938 = vmatpush.msra.mxu2 %v7852_v35  ;;  %2958 = vmatpush.msra.mxu3 %v7855_v11 }
 0x799   : > { %2899 = vmatpush.msrb.mxu0 %v7858_v1  ;;  %2919 = vmatpush.msrb.mxu1 %v7861_v60 }
 0x79a   : > { %2939 = vmatpush.msra.mxu2 %v7864_v17  ;;  %2959 = vmatpush.msra.mxu3 %v7867_v10 }
 0x79b   : > { %2900 = vmatpush.msrb.mxu0 %v7870_v59  ;;  %2920 = vmatpush.msrb.mxu1 %v7873_v9 }
 0x79c   : > { %2940 = vmatpush.msra.mxu2 %v7876_v51  ;;  %2960 = vmatpush.msra.mxu3 %v7879_v30 }
 0x79d   : > { %2901 = vmatpush.msrb.mxu0 %v7882_v38  ;;  %2921 = vmatpush.msrb.mxu1 %v7885_v28 }
 0x79e   : > { %2941 = vmatpush.msra.mxu2 %v7888_v33  ;;  %2961 = vmatpush.msra.mxu3 %v7891_v40 }
 0x79f   : > { %2902 = vmatpush.msrb.mxu0 %v7894_v25  ;;  %2922 = vmatpush.msrb.mxu1 %v7897_v15 }
 0x7a0   : > { %2942 = vmatpush.msra.mxu2 %v7900_v50  ;;  %2962 = vmatpush.msra.mxu3 %v7903_v58 }
 0x7a1   : > { %2903 = vmatpush.msrb.mxu0 %v7496_v21  ;;  %2923 = vmatpush.msrb.mxu1 %v7907_v19  ;;  %v7921_v21 = vld [vmem:[#allocation9 + $0xb8] sm:$0xff] }
 0x7a2   : > { %2943 = vmatpush.msra.mxu2 %v7910_v63  ;;  %2963 = vmatpush.msra.mxu3 %v7913_v8  ;;  %9734 = vst [vmem:[#allocation32_spill] sm:$0xff] %v7921_v21 }
 0x7a3   : > { %2904 = vmatpush.msrb.mxu0 %v9706_v49  ;;  %2924 = vmatpush.msrb.mxu1 %v9707_v54  ;;  %v7934_v49 = vld [vmem:[#allocation9 + $0x70] sm:$0xff]  ;;  %v7937_v54 = vld [vmem:[#allocation9 + $0x78] sm:$0xff] }
 0x7a4   : > { %2944 = vmatpush.msra.mxu2 %v7918_v4  ;;  %2964 = vmatpush.msra.mxu3 %v7921_v21  ;;  %9737 = vst [vmem:[#allocation50_spill] sm:$0xff] %v7934_v49 }
 0x7a5   : > { %2905 = vmatpush.msrb.mxu0 %v9710_v26  ;;  %2925 = vmatpush.msrb.mxu1 %v9711_v24  ;;  %9738 = vst [vmem:[#allocation35_spill] sm:$0xff] %v7937_v54  ;;  %v7942_v26 = vld [vmem:[#allocation9 + $0x50] sm:$0xff]  ;;  %v7945_v24 = vld [vmem:[#allocation9 + $0x58] sm:$0xff] }
 0x7a6   : > { %2945 = vmatpush.msra.mxu2 %v7926_v16  ;;  %2965 = vmatpush.msra.mxu3 %v7929_v62  ;;  %9739 = vst [vmem:[#allocation29_spill] sm:$0xff] %v7942_v26 }
 0x7a7   : > { %2906 = vmatpush.msrb.mxu0 %v9714_v39  ;;  %2926 = vmatpush.msrb.mxu1 %v9715_v29  ;;  %9740 = vst [vmem:[#allocation31_spill] sm:$0xff] %v7945_v24 }
 0x7a8   : > { %2946 = vmatpush.msra.mxu2 %v7934_v49  ;;  %2966 = vmatpush.msra.mxu3 %v7937_v54 }
 0x7a9   : > { %2907 = vmatpush.msrb.mxu0 %v9718_v23  ;;  %2927 = vmatpush.msrb.mxu1 %v9719_v22 }
 0x7aa   : > { %2947 = vmatpush.msra.mxu2 %v7942_v26  ;;  %2967 = vmatpush.msra.mxu3 %v7945_v24 }
 0x7ab   : > { %2908 = vmatpush.msrb.mxu0 %v9722_v31  ;;  %2928 = vmatpush.msrb.mxu1 %v9723_v37 }
 0x7ac   : > { %2948 = vmatpush.msra.mxu2 %v9724_v42  ;;  %2968 = vmatpush.msra.mxu3 %v9725_v32  ;;  %v2565_v32 = vld [vmem:[#allocation2 + $0x2] ss:$8 sm:$0xf] }
 0x7ad   : > { %2909 = vmatpush.msrb.mxu0 %v9726_v41  ;;  %2929 = vmatpush.msrb.mxu1 %v9727_v46 }
 0x7ae   : > { %2949 = vmatpush.msra.mxu2 %v9728_v6  ;;  %2969 = vmatpush.msra.mxu3 %v9729_v47 }
 0x80a   : > { %v2603_v39 = vpop.f32.mrf.mxu1  ;;  %v2583_v45 = vpop.f32.mrf.mxu0 }
 0x80b   : > { %v2650_v29 = vrot.slane %v2603_v39, 7 }
 0x80d   : > { %v2653_v37 = vsel %vm780_vm2, %v2583_v45, %v2650_v29 }
 0x811   : > { %v2623_v23 = vpop.f32.mrf.mxu2  ;;  %v2643_v22 = vpop.f32.mrf.mxu3 }
 0x812   : > { %v2651_v57 = vrot.slane %v2623_v23, 6  ;;  %v2652_v31 = vrot.slane %v2643_v22, 5 }
 0x814   : > { %v2654_v42 = vsel %vm782_vm3, %v2651_v57, %v2652_v31 }
 0x815   : > { %v2655_v41 = vsel %vm784_vm4, %v2653_v37, %v2654_v42 }
 0x816   : > { %v2657_v36 = vadd.f32 %v2655_v41, %v2565_v32 }
 0x818   : > { %v5317_v46 = vmul.f32 -1.442695, %v2657_v36  ;;  %v2678_v43 = vrot.slane %v2657_v36, 1  ;;  %v2702_v6 = vrot.slane %v2657_v36, 3  ;;  %v2699_v42 = vrot.slane %v2657_v36, 2 }
 0x81a   : > { %5629 = vpow2.f32 %v5317_v46  ;;  %v5318_v47 = vmul.f32 -1.442695, %v2678_v43  ;;  %v5319_v24 = vmul.f32 -1.442695, %v2702_v6 }
 0x81c   : > { %5631 = vpow2.f32 %v5318_v47 }
 0x81d   : > { %5633 = vpow2.f32 %v5319_v24 }
 0x820   : > { %v5630_v39 = vpop.eup %5629 }
 0x821   : > { %v2661_v23 = vadd.f32 1.0, %v5630_v39 }
 0x822   : > { %v5632_v22 = vpop.eup %5631 }
 0x823   : > { %v5634_v26 = vpop.eup %5633  ;;  %5635 = vrcp.f32 %v2661_v23  ;;  %v2683_v29 = vadd.f32 1.0, %v5632_v22  ;;  %v2673_v43 = vand.u32 2147483648, %v2661_v23  ;;  %v2671_v39 = vand.u32 2147483647, %v2661_v23 }
 0x824   : > { %v2707_v45 = vadd.f32 1.0, %v5634_v26  ;;  %vm2667_vm9 = vweird.f32 %v2661_v23 }
 0x825   : > { %5637 = vrcp.f32 %v2683_v29  ;;  %v2695_v54 = vand.u32 2147483648, %v2683_v29  ;;  %v2693_v49 = vand.u32 2147483647, %v2683_v29  ;;  %v2674_v62 = vor.u32 1.1754944e-38, %v2673_v43 }
 0x826   : > { %5639 = vrcp.f32 %v2707_v45  ;;  %vm2672_vm12 = vcmp.eq.f32.partialorder %v2671_v39, 8.507059e+37  ;;  %vm2689_vm13 = vweird.f32 %v2683_v29  ;;  %v2719_v43 = vand.u32 2147483648, %v2707_v45  ;;  %v8016_v39 = vld [vmem:[#allocation9 + $0x88] sm:$0xff] }
 0x827   : > { %5641 = vtanh.f32 %v2699_v42  ;;  %vm2694_vm15 = vcmp.eq.f32.partialorder %v2693_v49, 8.507059e+37  ;;  %vm2713_vm1 = vweird.f32 %v2707_v45  ;;  %9748 = vst [vmem:[#allocation42_spill] sm:$0xff] %v8016_v39 }
 0x829   : > { %v5636_v57 = vpop.eup %5635 }
 0x82a   : > { %v2663_v31 = vmul.f32 %v5636_v57, %v2661_v23  ;;  %vm2668_vm8 = vweird.f32 %v5636_v57 }
 0x82b   : > { %v5638_v37 = vpop.eup %5637  ;;  %vm2669_vm11 = vmor %vm2667_vm9, %vm2668_vm8 }
 0x82c   : > { %v5640_v32 = vpop.eup %5639  ;;  %v2664_v41 = vsub.f32 1.0, %v2663_v31  ;;  %v2685_v46 = vmul.f32 %v5638_v37, %v2683_v29  ;;  %vm2690_vm10 = vweird.f32 %v5638_v37  ;;  %v2717_v29 = vand.u32 2147483647, %v2707_v45 }
 0x82d   : > { %v2709_v6 = vmul.f32 %v5640_v32, %v2707_v45  ;;  %vm2691_vm14 = vmor %vm2689_vm13, %vm2690_vm10  ;;  %v5642_v4 = vpop.eup %5641  ;;  %vm2714_vm0 = vweird.f32 %v5640_v32  ;;  %v9745_v45 = vld [vmem:[#allocation46_spill] sm:$0xff] }
 0x82e   : > { %v2686_v47 = vsub.f32 1.0, %v2685_v46  ;;  %v2665_v24 = vmul.f32 %v5636_v57, %v2664_v41  ;;  %v2696_v46 = vor.u32 1.1754944e-38, %v2695_v54  ;;  %vm2715_vm5 = vmor %vm2713_vm1, %vm2714_vm0  ;;  %v2720_v54 = vor.u32 1.1754944e-38, %v2719_v43  ;;  %v8037_v43 = vld [vmem:[#allocation9 + $0x20] sm:$0xff] }
 0x82f   : > { %v2710_v16 = vsub.f32 1.0, %v2709_v6  ;;  %vm2718_vm6 = vcmp.eq.f32.partialorder %v2717_v29, 8.507059e+37  ;;  %v8013_v6 = vld [vmem:[#allocation9 + $0x80] sm:$0xff]  ;;  %9759 = vst [vmem:[#allocation52_spill] sm:$0xff] %v8037_v43  ;;  %v8040_v29 = vld [vmem:[#allocation9 + $0x28] sm:$0xff] }
 0x830   : > { %v2666_v22 = vadd.f32 %v5636_v57, %v2665_v24  ;;  %v2687_v26 = vmul.f32 %v5638_v37, %v2686_v47  ;;  %9747 = vst [vmem:[#allocation33_spill] sm:$0xff] %v8013_v6 }
 0x831   : > { %v2711_v23 = vmul.f32 %v5640_v32, %v2710_v16  ;;  %v8008_v16 = vld [vmem:[#allocation9 + $0xa8] sm:$0xff]  ;;  %9760 = vst [vmem:[#allocation48_spill] sm:$0xff] %v8040_v29 }
 0x832   : > { %v2670_v36 = vsel %vm2669_vm11, %v5636_v57, %v2666_v22  ;;  %v2688_v31 = vadd.f32 %v5638_v37, %v2687_v26  ;;  %9744 = vst [vmem:[#allocation39_spill] sm:$0xff] %v8008_v16  ;;  %v9749_v22 = vld [vmem:[#allocation30_spill] sm:$0xff] }
 0x833   : > { %v2675_v21 = vsel %vm2672_vm12, %v2674_v62, %v2670_v36  ;;  %v2712_v63 = vadd.f32 %v5640_v32, %v2711_v23  ;;  %v9750_v26 = vld [vmem:[#allocation38_spill] sm:$0xff]  ;;  %v8021_v36 = vld [vmem:[#allocation9 + $0x60] sm:$0xff] }
 0x834   : > { %v2692_v41 = vsel %vm2691_vm14, %v5638_v37, %v2688_v31  ;;  %v2724_v47 = vmul.f32 %v5642_v4, %v2675_v21  ;;  %v9742_v4 = vld [vmem:[#allocation28_spill] sm:$0xff]  ;;  %v8005_v21 = vld [vmem:[#allocation9 + $0xa0] sm:$0xff]  ;;  %9751 = vst [vmem:[#allocation45_spill] sm:$0xff] %v8021_v36  ;;  %v8024_v31 = vld [vmem:[#allocation9 + $0x68] sm:$0xff] }
 0x835   : > { %v2697_v42 = vsel %vm2694_vm15, %v2696_v46, %v2692_v41  ;;  %v2716_v62 = vsel %vm2715_vm5, %v5640_v32, %v2712_v63  ;;  %v9741_v63 = vld [vmem:[#allocation27_spill] sm:$0xff]  ;;  %9743 = vst [vmem:[#allocation51_spill] sm:$0xff] %v8005_v21  ;;  %v9746_v32 = vld [vmem:[#allocation32_spill] sm:$0xff]  ;;  %v9753_v46 = vld [vmem:[#allocation50_spill] sm:$0xff] }
 0x836   : > { %v2723_v24 = vmul.f32 %v2697_v42, %v7795_v7  ;;  %v2721_v57 = vsel %vm2718_vm6, %v2720_v54, %v2716_v62  ;;  %v7999_v7 = vld [vmem:[#allocation9 + $0xc0] sm:$0xff]  ;;  %9752 = vst [vmem:[#allocation43_spill] sm:$0xff] %v8024_v31  ;;  %v9754_v41 = vld [vmem:[#allocation35_spill] sm:$0xff]  ;;  %v8032_v23 = vld [vmem:[#allocation9 + $0x48] sm:$0xff] }
 0x837   : > { %v8029_v42 = vld [vmem:[#allocation9 + $0x40] sm:$0xff]  ;;  %9756 = vst [vmem:[#allocation36_spill] sm:$0xff] %v8032_v23  ;;  %v8043_v62 = vld [vmem:[#allocation9 + $0x30] sm:$0xff]  ;;  %v8046_v54 = vld [vmem:[#allocation9 + $0x38] sm:$0xff] }
 0x838   : > { %v7960_v8 = vadd.f32 %v2724_v47, %v2723_v24  ;;  %9755 = vst [vmem:[#allocation34_spill] sm:$0xff] %v8029_v42  ;;  %v9757_v24 = vld [vmem:[#allocation29_spill] sm:$0xff]  ;;  %v9758_v47 = vld [vmem:[#allocation31_spill] sm:$0xff] }
 0x839   : > { %9761 = vst [vmem:[#allocation37_spill] sm:$0xff] %v8043_v62 }
 0x83a   : > { %5643 = vtanh.f32 %v7960_v8  ;;  %9762 = vst [vmem:[#allocation40_spill] sm:$0xff] %v8046_v54 }
 0x840   : > { %v5644_v49 = vpop.eup %5643 }
 0x841   : > { %v2727_v37 = vmul.f32 %v5644_v49, %v2721_v57  ;;  %v8049_v49 = vld [vmem:[#allocation9] sm:$0xff]  ;;  %v8052_v57 = vld [vmem:[#allocation9 + $0x8] sm:$0xff] }
 0x842   : > { %9763 = vst [vmem:[#allocation49_spill] sm:$0xff] %v8049_v49 }
 0x843   : > { %2728 = vst [vmem:[#allocation3 + $0x2] sm:$0x1] %v2727_v37  ;;  %2746 = vmatmul.f32.vlgmr.msra.gmra.mxu0 %v2727_v37  ;;  %2766 = vmatmul.f32.vlgmr.msra.gmra.mxu1 %v2727_v37 }
 0x844   : > { %2786 = vmatmul.f32.vlgmr.msrb.gmra.mxu2 %v2727_v37  ;;  %2806 = vmatmul.f32.vlgmr.msrb.gmra.mxu3 %v2727_v37  ;;  %9764 = vst [vmem:[#allocation47_spill] sm:$0xff] %v8052_v57  ;;  %v8055_v37 = vld [vmem:[#allocation9 + $0x10] sm:$0xff] }
 0x845   : > { %3058 = vmatpush.msra.mxu0 %v7798_v13  ;;  %3078 = vmatpush.msra.mxu1 %v7801_v56  ;;  %9765 = vst [vmem:[#allocation41_spill] sm:$0xff] %v8055_v37 }
 0x846   : > { %3098 = vmatpush.msrb.mxu2 %v7804_v20  ;;  %3118 = vmatpush.msrb.mxu3 %v7807_v14 }
 0x847   : > { %3059 = vmatpush.msra.mxu0 %v7810_v3  ;;  %3079 = vmatpush.msra.mxu1 %v7813_v52 }
 0x848   : > { %3099 = vmatpush.msrb.mxu2 %v7816_v34  ;;  %3119 = vmatpush.msrb.mxu3 %v7819_v5 }
 0x849   : > { %3060 = vmatpush.msra.mxu0 %v7822_v44  ;;  %3080 = vmatpush.msra.mxu1 %v7825_v12 }
 0x84a   : > { %3100 = vmatpush.msrb.mxu2 %v7828_v2  ;;  %3120 = vmatpush.msrb.mxu3 %v7831_v53 }
 0x84b   : > { %3061 = vmatpush.msra.mxu0 %v7834_v0  ;;  %3081 = vmatpush.msra.mxu1 %v7837_v27 }
 0x84c   : > { %3101 = vmatpush.msrb.mxu2 %v7840_v48  ;;  %3121 = vmatpush.msrb.mxu3 %v7843_v55 }
 0x84d   : > { %3062 = vmatpush.msra.mxu0 %v7846_v61  ;;  %3082 = vmatpush.msra.mxu1 %v7849_v18 }
 0x84e   : > { %3102 = vmatpush.msrb.mxu2 %v7852_v35  ;;  %3122 = vmatpush.msrb.mxu3 %v7855_v11 }
 0x84f   : > { %3063 = vmatpush.msra.mxu0 %v7858_v1  ;;  %3083 = vmatpush.msra.mxu1 %v7861_v60 }
 0x850   : > { %3103 = vmatpush.msrb.mxu2 %v7864_v17  ;;  %3123 = vmatpush.msrb.mxu3 %v7867_v10 }
 0x851   : > { %3064 = vmatpush.msra.mxu0 %v7870_v59  ;;  %3084 = vmatpush.msra.mxu1 %v7873_v9 }
 0x852   : > { %3104 = vmatpush.msrb.mxu2 %v7876_v51  ;;  %3124 = vmatpush.msrb.mxu3 %v7879_v30 }
 0x853   : > { %3065 = vmatpush.msra.mxu0 %v7882_v38  ;;  %3085 = vmatpush.msra.mxu1 %v7885_v28 }
 0x854   : > { %3105 = vmatpush.msrb.mxu2 %v7888_v33  ;;  %3125 = vmatpush.msrb.mxu3 %v7891_v40 }
 0x855   : > { %3066 = vmatpush.msra.mxu0 %v7894_v25  ;;  %3086 = vmatpush.msra.mxu1 %v7897_v15 }
 0x856   : > { %3106 = vmatpush.msrb.mxu2 %v7900_v50  ;;  %3126 = vmatpush.msrb.mxu3 %v7903_v58 }
 0x857   : > { %3067 = vmatpush.msra.mxu0 %v7999_v7  ;;  %3087 = vmatpush.msra.mxu1 %v7907_v19 }
 0x858   : > { %3107 = vmatpush.msrb.mxu2 %v9741_v63  ;;  %3127 = vmatpush.msrb.mxu3 %v9742_v4 }
 0x859   : > { %3068 = vmatpush.msra.mxu0 %v8005_v21  ;;  %3088 = vmatpush.msra.mxu1 %v8008_v16 }
 0x85a   : > { %3108 = vmatpush.msrb.mxu2 %v9745_v45  ;;  %3128 = vmatpush.msrb.mxu3 %v9746_v32 }
 0x85b   : > { %3069 = vmatpush.msra.mxu0 %v8013_v6  ;;  %3089 = vmatpush.msra.mxu1 %v8016_v39 }
 0x85c   : > { %3109 = vmatpush.msrb.mxu2 %v9749_v22  ;;  %3129 = vmatpush.msrb.mxu3 %v9750_v26 }
 0x85d   : > { %3070 = vmatpush.msra.mxu0 %v8021_v36  ;;  %3090 = vmatpush.msra.mxu1 %v8024_v31 }
 0x85e   : > { %3110 = vmatpush.msrb.mxu2 %v9753_v46  ;;  %3130 = vmatpush.msrb.mxu3 %v9754_v41 }
 0x85f   : > { %3071 = vmatpush.msra.mxu0 %v8029_v42  ;;  %3091 = vmatpush.msra.mxu1 %v8032_v23 }
 0x860   : > { %3111 = vmatpush.msrb.mxu2 %v9757_v24  ;;  %3131 = vmatpush.msrb.mxu3 %v9758_v47 }
 0x861   : > { %3072 = vmatpush.msra.mxu0 %v8037_v43  ;;  %3092 = vmatpush.msra.mxu1 %v8040_v29  ;;  %v8058_v29 = vld [vmem:[#allocation9 + $0x18] sm:$0xff] }
 0x862   : > { %3112 = vmatpush.msrb.mxu2 %v8043_v62  ;;  %3132 = vmatpush.msrb.mxu3 %v8046_v54  ;;  %9766 = vst [vmem:[#allocation44_spill] sm:$0xff] %v8058_v29 }
 0x863   : > { %3073 = vmatpush.msra.mxu0 %v8049_v49  ;;  %3093 = vmatpush.msra.mxu1 %v8052_v57  ;;  %v2729_v57 = vld [vmem:[#allocation2 + $0x3] ss:$8 sm:$0xf] }
 0x864   : > { %3113 = vmatpush.msrb.mxu2 %v8055_v37  ;;  %3133 = vmatpush.msrb.mxu3 %v8058_v29 }
 0x8c0   : > { %v2767_v62 = vpop.f32.mrf.mxu1  ;;  %v2747_v42 = vpop.f32.mrf.mxu0 }
 0x8c1   : > { %v2814_v43 = vrot.slane %v2767_v62, 7 }
 0x8c3   : > { %v2817_v49 = vsel %vm780_vm2, %v2747_v42, %v2814_v43 }
 0x8c7   : > { %v2787_v47 = vpop.f32.mrf.mxu2  ;;  %v2807_v54 = vpop.f32.mrf.mxu3 }
 0x8c8   : > { %v2815_v24 = vrot.slane %v2787_v47, 6  ;;  %v2816_v23 = vrot.slane %v2807_v54, 5 }
 0x8ca   : > { %v2818_v41 = vsel %vm782_vm3, %v2815_v24, %v2816_v23 }
 0x8cb   : > { %v2819_v46 = vsel %vm784_vm4, %v2817_v49, %v2818_v41 }
 0x8cc   : > { %v2821_v31 = vadd.f32 %v2819_v46, %v2729_v57 }
 0x8ce   : > { %v5320_v37 = vmul.f32 -1.442695, %v2821_v31  ;;  %v2842_v36 = vrot.slane %v2821_v31, 1  ;;  %v2866_v26 = vrot.slane %v2821_v31, 3  ;;  %v2863_v24 = vrot.slane %v2821_v31, 2 }
 0x8d0   : > { %5645 = vpow2.f32 %v5320_v37  ;;  %v5321_v29 = vmul.f32 -1.442695, %v2842_v36  ;;  %v5322_v22 = vmul.f32 -1.442695, %v2866_v26 }
 0x8d2   : > { %5647 = vpow2.f32 %v5321_v29 }
 0x8d3   : > { %5649 = vpow2.f32 %v5322_v22 }
 0x8d6   : > { %v5646_v62 = vpop.eup %5645 }
 0x8d7   : > { %v2825_v47 = vadd.f32 1.0, %v5646_v62 }
 0x8d8   : > { %v5648_v54 = vpop.eup %5647 }
 0x8d9   : > { %v5650_v39 = vpop.eup %5649  ;;  %5651 = vrcp.f32 %v2825_v47  ;;  %v2847_v42 = vadd.f32 1.0, %v5648_v54  ;;  %v2837_v36 = vand.u32 2147483648, %v2825_v47  ;;  %v2835_v62 = vand.u32 2147483647, %v2825_v47 }
 0x8da   : > { %v2871_v43 = vadd.f32 1.0, %v5650_v39  ;;  %vm2831_vm8 = vweird.f32 %v2825_v47 }
 0x8db   : > { %5653 = vrcp.f32 %v2847_v42  ;;  %v2859_v6 = vand.u32 2147483648, %v2847_v42  ;;  %v2857_v32 = vand.u32 2147483647, %v2847_v42  ;;  %v2838_v45 = vor.u32 1.1754944e-38, %v2837_v36 }
 0x8dc   : > { %5655 = vrcp.f32 %v2871_v43  ;;  %vm2836_vm11 = vcmp.eq.f32.partialorder %v2835_v62, 8.507059e+37  ;;  %vm2853_vm12 = vweird.f32 %v2847_v42  ;;  %v2883_v36 = vand.u32 2147483648, %v2871_v43  ;;  %v9775_v62 = vld [vmem:[#allocation42_spill] sm:$0xff] }
 0x8dd   : > { %5657 = vtanh.f32 %v2863_v24  ;;  %vm2858_vm14 = vcmp.eq.f32.partialorder %v2857_v32, 8.507059e+37  ;;  %vm2877_vm0 = vweird.f32 %v2871_v43 }
 0x8df   : > { %v5652_v23 = vpop.eup %5651 }
 0x8e0   : > { %v2827_v41 = vmul.f32 %v5652_v23, %v2825_v47  ;;  %vm2832_vm7 = vweird.f32 %v5652_v23 }
 0x8e1   : > { %v5654_v46 = vpop.eup %5653  ;;  %vm2833_vm10 = vmor %vm2831_vm8, %vm2832_vm7 }
 0x8e2   : > { %v5656_v49 = vpop.eup %5655  ;;  %v2828_v57 = vsub.f32 1.0, %v2827_v41  ;;  %v2849_v37 = vmul.f32 %v5654_v46, %v2847_v42  ;;  %vm2854_vm9 = vweird.f32 %v5654_v46  ;;  %v2881_v42 = vand.u32 2147483647, %v2871_v43 }
 0x8e3   : > { %v2873_v26 = vmul.f32 %v5656_v49, %v2871_v43  ;;  %vm2855_vm13 = vmor %vm2853_vm12, %vm2854_vm9  ;;  %v5658_v4 = vpop.eup %5657  ;;  %vm2878_vm15 = vweird.f32 %v5656_v49  ;;  %v9772_v43 = vld [vmem:[#allocation46_spill] sm:$0xff] }
 0x8e4   : > { %v2850_v29 = vsub.f32 1.0, %v2849_v37  ;;  %v2829_v22 = vmul.f32 %v5652_v23, %v2828_v57  ;;  %v2860_v37 = vor.u32 1.1754944e-38, %v2859_v6  ;;  %vm2879_vm1 = vmor %vm2877_vm0, %vm2878_vm15  ;;  %v2884_v6 = vor.u32 1.1754944e-38, %v2883_v36  ;;  %v9786_v36 = vld [vmem:[#allocation52_spill] sm:$0xff] }
 0x8e5   : > { %v2874_v16 = vsub.f32 1.0, %v2873_v26  ;;  %vm2882_vm5 = vcmp.eq.f32.partialorder %v2881_v42, 8.507059e+37  ;;  %v9774_v26 = vld [vmem:[#allocation33_spill] sm:$0xff]  ;;  %v9787_v42 = vld [vmem:[#allocation48_spill] sm:$0xff] }
 0x8e6   : > { %v2830_v54 = vadd.f32 %v5652_v23, %v2829_v22  ;;  %v2851_v39 = vmul.f32 %v5654_v46, %v2850_v29 }
 0x8e7   : > { %v2875_v47 = vmul.f32 %v5656_v49, %v2874_v16  ;;  %v9771_v16 = vld [vmem:[#allocation39_spill] sm:$0xff] }
 0x8e8   : > { %v2834_v31 = vsel %vm2833_vm10, %v5652_v23, %v2830_v54  ;;  %v2852_v41 = vadd.f32 %v5654_v46, %v2851_v39  ;;  %v9776_v54 = vld [vmem:[#allocation30_spill] sm:$0xff] }
 0x8e9   : > { %v2839_v21 = vsel %vm2836_vm11, %v2838_v45, %v2834_v31  ;;  %v2876_v19 = vadd.f32 %v5656_v49, %v2875_v47  ;;  %v9777_v39 = vld [vmem:[#allocation38_spill] sm:$0xff]  ;;  %v9778_v31 = vld [vmem:[#allocation45_spill] sm:$0xff]  ;;  %v9783_v47 = vld [vmem:[#allocation36_spill] sm:$0xff] }
 0x8ea   : > { %v2856_v57 = vsel %vm2855_vm13, %v5654_v46, %v2852_v41  ;;  %v2888_v29 = vmul.f32 %v5658_v4, %v2839_v21  ;;  %v9769_v4 = vld [vmem:[#allocation28_spill] sm:$0xff]  ;;  %v9770_v21 = vld [vmem:[#allocation51_spill] sm:$0xff] }
 0x8eb   : > { %v2861_v24 = vsel %vm2858_vm14, %v2860_v37, %v2856_v57  ;;  %v2880_v45 = vsel %vm2879_vm1, %v5656_v49, %v2876_v19  ;;  %v9767_v19 = vld [vmem:[#allocation53_spill] sm:$0xff]  ;;  %v9773_v49 = vld [vmem:[#allocation32_spill] sm:$0xff]  ;;  %v9779_v41 = vld [vmem:[#allocation43_spill] sm:$0xff] }
 0x8ec   : > { %v2887_v22 = vmul.f32 %v2861_v24, %v7960_v8  ;;  %v2885_v23 = vsel %vm2882_vm5, %v2884_v6, %v2880_v45  ;;  %v9768_v8 = vld [vmem:[#allocation27_spill] sm:$0xff]  ;;  %v9780_v37 = vld [vmem:[#allocation50_spill] sm:$0xff]  ;;  %v9788_v45 = vld [vmem:[#allocation37_spill] sm:$0xff] }
 0x8ed   : > { %v9781_v57 = vld [vmem:[#allocation35_spill] sm:$0xff]  ;;  %v9782_v24 = vld [vmem:[#allocation34_spill] sm:$0xff]  ;;  %v9789_v6 = vld [vmem:[#allocation40_spill] sm:$0xff] }
 0x8ee   : > { %v8065_v63 = vadd.f32 %v2888_v29, %v2887_v22  ;;  %v9784_v22 = vld [vmem:[#allocation29_spill] sm:$0xff]  ;;  %v9785_v29 = vld [vmem:[#allocation31_spill] sm:$0xff] }
 0x8f0   : > { %5659 = vtanh.f32 %v8065_v63 }
 0x8f6   : > { %v5660_v32 = vpop.eup %5659 }
 0x8f7   : > { %v2891_v46 = vmul.f32 %v5660_v32, %v2885_v23  ;;  %v9790_v32 = vld [vmem:[#allocation49_spill] sm:$0xff]  ;;  %v9791_v23 = vld [vmem:[#allocation47_spill] sm:$0xff] }
 0x8f9   : > { %2892 = vst [vmem:[#allocation3 + $0x3] sm:$0x1] %v2891_v46  ;;  %2910 = vmatmul.f32.vlgmr.msrb.gmra.mxu0 %v2891_v46  ;;  %2930 = vmatmul.f32.vlgmr.msrb.gmra.mxu1 %v2891_v46 }
 0x8fa   : > { %2950 = vmatmul.f32.vlgmr.msra.gmra.mxu2 %v2891_v46  ;;  %2970 = vmatmul.f32.vlgmr.msra.gmra.mxu3 %v2891_v46  ;;  %v9792_v46 = vld [vmem:[#allocation41_spill] sm:$0xff] }
 0x8fb   : > { %3222 = vmatpush.msrb.mxu0 %v7798_v13  ;;  %3242 = vmatpush.msrb.mxu1 %v7801_v56 }
 0x8fc   : > { %3262 = vmatpush.msra.mxu2 %v7804_v20  ;;  %3282 = vmatpush.msra.mxu3 %v7807_v14 }
 0x8fd   : > { %3223 = vmatpush.msrb.mxu0 %v7810_v3  ;;  %3243 = vmatpush.msrb.mxu1 %v7813_v52 }
 0x8fe   : > { %3263 = vmatpush.msra.mxu2 %v7816_v34  ;;  %3283 = vmatpush.msra.mxu3 %v7819_v5 }
 0x8ff   : > { %3224 = vmatpush.msrb.mxu0 %v7822_v44  ;;  %3244 = vmatpush.msrb.mxu1 %v7825_v12 }
 0x900   : > { %3264 = vmatpush.msra.mxu2 %v7828_v2  ;;  %3284 = vmatpush.msra.mxu3 %v7831_v53 }
 0x901   : > { %3225 = vmatpush.msrb.mxu0 %v7834_v0  ;;  %3245 = vmatpush.msrb.mxu1 %v7837_v27 }
 0x902   : > { %3265 = vmatpush.msra.mxu2 %v7840_v48  ;;  %3285 = vmatpush.msra.mxu3 %v7843_v55 }
 0x903   : > { %3226 = vmatpush.msrb.mxu0 %v7846_v61  ;;  %3246 = vmatpush.msrb.mxu1 %v7849_v18 }
 0x904   : > { %3266 = vmatpush.msra.mxu2 %v7852_v35  ;;  %3286 = vmatpush.msra.mxu3 %v7855_v11 }
 0x905   : > { %3227 = vmatpush.msrb.mxu0 %v7858_v1  ;;  %3247 = vmatpush.msrb.mxu1 %v7861_v60 }
 0x906   : > { %3267 = vmatpush.msra.mxu2 %v7864_v17  ;;  %3287 = vmatpush.msra.mxu3 %v7867_v10 }
 0x907   : > { %3228 = vmatpush.msrb.mxu0 %v7870_v59  ;;  %3248 = vmatpush.msrb.mxu1 %v7873_v9 }
 0x908   : > { %3268 = vmatpush.msra.mxu2 %v7876_v51  ;;  %3288 = vmatpush.msra.mxu3 %v7879_v30 }
 0x909   : > { %3229 = vmatpush.msrb.mxu0 %v7882_v38  ;;  %3249 = vmatpush.msrb.mxu1 %v7885_v28 }
 0x90a   : > { %3269 = vmatpush.msra.mxu2 %v7888_v33  ;;  %3289 = vmatpush.msra.mxu3 %v7891_v40 }
 0x90b   : > { %3230 = vmatpush.msrb.mxu0 %v7894_v25  ;;  %3250 = vmatpush.msrb.mxu1 %v7897_v15 }
 0x90c   : > { %3270 = vmatpush.msra.mxu2 %v7900_v50  ;;  %3290 = vmatpush.msra.mxu3 %v7903_v58 }
 0x90d   : > { %3231 = vmatpush.msrb.mxu0 %v7999_v7  ;;  %3251 = vmatpush.msrb.mxu1 %v9767_v19 }
 0x90e   : > { %3271 = vmatpush.msra.mxu2 %v9768_v8  ;;  %3291 = vmatpush.msra.mxu3 %v9769_v4 }
 0x90f   : > { %3232 = vmatpush.msrb.mxu0 %v9770_v21  ;;  %3252 = vmatpush.msrb.mxu1 %v9771_v16 }
 0x910   : > { %3272 = vmatpush.msra.mxu2 %v9772_v43  ;;  %3292 = vmatpush.msra.mxu3 %v9773_v49 }
 0x911   : > { %3233 = vmatpush.msrb.mxu0 %v9774_v26  ;;  %3253 = vmatpush.msrb.mxu1 %v9775_v62 }
 0x912   : > { %3273 = vmatpush.msra.mxu2 %v9776_v54  ;;  %3293 = vmatpush.msra.mxu3 %v9777_v39 }
 0x913   : > { %3234 = vmatpush.msrb.mxu0 %v9778_v31  ;;  %3254 = vmatpush.msrb.mxu1 %v9779_v41 }
 0x914   : > { %3274 = vmatpush.msra.mxu2 %v9780_v37  ;;  %3294 = vmatpush.msra.mxu3 %v9781_v57 }
 0x915   : > { %3235 = vmatpush.msrb.mxu0 %v9782_v24  ;;  %3255 = vmatpush.msrb.mxu1 %v9783_v47  ;;  %v9793_v24 = vld [vmem:[#allocation44_spill] sm:$0xff] }
 0x916   : > { %3275 = vmatpush.msra.mxu2 %v9784_v22  ;;  %3295 = vmatpush.msra.mxu3 %v9785_v29 }
 0x917   : > { %3236 = vmatpush.msrb.mxu0 %v9786_v36  ;;  %3256 = vmatpush.msrb.mxu1 %v9787_v42 }
 0x918   : > { %3276 = vmatpush.msra.mxu2 %v9788_v45  ;;  %3296 = vmatpush.msra.mxu3 %v9789_v6  ;;  %v2893_v6 = vld [vmem:[#allocation2 + $0x4] ss:$8 sm:$0xf] }
 0x919   : > { %3237 = vmatpush.msrb.mxu0 %v9790_v32  ;;  %3257 = vmatpush.msrb.mxu1 %v9791_v23 }
 0x91a   : > { %3277 = vmatpush.msra.mxu2 %v9792_v46  ;;  %3297 = vmatpush.msra.mxu3 %v9793_v24 }
 0x976   : > { %v2931_v47 = vpop.f32.mrf.mxu1  ;;  %v2911_v41 = vpop.f32.mrf.mxu0 }
 0x977   : > { %v2978_v22 = vrot.slane %v2931_v47, 7 }
 0x979   : > { %v2981_v42 = vsel %vm780_vm2, %v2911_v41, %v2978_v22 }
 0x97d   : > { %v2951_v57 = vpop.f32.mrf.mxu2  ;;  %v2971_v29 = vpop.f32.mrf.mxu3 }
 0x97e   : > { %v2979_v37 = vrot.slane %v2951_v57, 6  ;;  %v2980_v36 = vrot.slane %v2971_v29, 5 }
 0x980   : > { %v2982_v45 = vsel %vm782_vm3, %v2979_v37, %v2980_v36 }
 0x981   : > { %v2983_v32 = vsel %vm784_vm4, %v2981_v42, %v2982_v45 }
 0x982   : > { %v2985_v31 = vadd.f32 %v2983_v32, %v2893_v6 }
 0x984   : > { %v5323_v23 = vmul.f32 -1.442695, %v2985_v31  ;;  %v3006_v39 = vrot.slane %v2985_v31, 1  ;;  %v3030_v46 = vrot.slane %v2985_v31, 3  ;;  %v3027_v45 = vrot.slane %v2985_v31, 2 }
 0x986   : > { %5661 = vpow2.f32 %v5323_v23  ;;  %v5324_v24 = vmul.f32 -1.442695, %v3006_v39  ;;  %v5325_v54 = vmul.f32 -1.442695, %v3030_v46 }
 0x988   : > { %5663 = vpow2.f32 %v5324_v24 }
 0x989   : > { %5665 = vpow2.f32 %v5325_v54 }
 0x98c   : > { %v5662_v47 = vpop.eup %5661 }
 0x98d   : > { %v2989_v57 = vadd.f32 1.0, %v5662_v47 }
 0x98e   : > { %v5664_v29 = vpop.eup %5663 }
 0x98f   : > { %v5666_v62 = vpop.eup %5665  ;;  %5667 = vrcp.f32 %v2989_v57  ;;  %v3011_v41 = vadd.f32 1.0, %v5664_v29  ;;  %v3001_v39 = vand.u32 2147483648, %v2989_v57  ;;  %v2999_v47 = vand.u32 2147483647, %v2989_v57 }
 0x990   : > { %v3035_v22 = vadd.f32 1.0, %v5666_v62  ;;  %vm2995_vm7 = vweird.f32 %v2989_v57 }
 0x991   : > { %5669 = vrcp.f32 %v3011_v41  ;;  %v3023_v26 = vand.u32 2147483648, %v3011_v41  ;;  %v3021_v49 = vand.u32 2147483647, %v3011_v41  ;;  %v3002_v43 = vor.u32 1.1754944e-38, %v3001_v39 }
 0x992   : > { %5671 = vrcp.f32 %v3035_v22  ;;  %vm3000_vm10 = vcmp.eq.f32.partialorder %v2999_v47, 8.507059e+37  ;;  %vm3017_vm11 = vweird.f32 %v3011_v41  ;;  %v3047_v39 = vand.u32 2147483648, %v3035_v22 }
 0x993   : > { %5673 = vtanh.f32 %v3027_v45  ;;  %vm3022_vm13 = vcmp.eq.f32.partialorder %v3021_v49, 8.507059e+37  ;;  %vm3041_vm15 = vweird.f32 %v3035_v22 }
 0x995   : > { %v5668_v37 = vpop.eup %5667 }
 0x996   : > { %v2991_v36 = vmul.f32 %v5668_v37, %v2989_v57  ;;  %vm2996_vm6 = vweird.f32 %v5668_v37 }
 0x997   : > { %v5670_v42 = vpop.eup %5669  ;;  %vm2997_vm9 = vmor %vm2995_vm7, %vm2996_vm6 }
 0x998   : > { %v5672_v6 = vpop.eup %5671  ;;  %v2992_v32 = vsub.f32 1.0, %v2991_v36  ;;  %v3013_v23 = vmul.f32 %v5670_v42, %v3011_v41  ;;  %vm3018_vm8 = vweird.f32 %v5670_v42  ;;  %v3045_v41 = vand.u32 2147483647, %v3035_v22 }
 0x999   : > { %v3037_v46 = vmul.f32 %v5672_v6, %v3035_v22  ;;  %vm3019_vm12 = vmor %vm3017_vm11, %vm3018_vm8  ;;  %v5674_v4 = vpop.eup %5673  ;;  %vm3042_vm14 = vweird.f32 %v5672_v6 }
 0x99a   : > { %v3014_v24 = vsub.f32 1.0, %v3013_v23  ;;  %v2993_v54 = vmul.f32 %v5668_v37, %v2992_v32  ;;  %v3024_v23 = vor.u32 1.1754944e-38, %v3023_v26  ;;  %vm3043_vm0 = vmor %vm3041_vm15, %vm3042_vm14  ;;  %v3048_v26 = vor.u32 1.1754944e-38, %v3047_v39 }
 0x99b   : > { %v3038_v16 = vsub.f32 1.0, %v3037_v46  ;;  %vm3046_vm1 = vcmp.eq.f32.partialorder %v3045_v41, 8.507059e+37 }
 0x99c   : > { %v2994_v29 = vadd.f32 %v5668_v37, %v2993_v54  ;;  %v3015_v62 = vmul.f32 %v5670_v42, %v3014_v24 }
 0x99d   : > { %v3039_v57 = vmul.f32 %v5672_v6, %v3038_v16 }
 0x99e   : > { %v2998_v31 = vsel %vm2997_vm9, %v5668_v37, %v2994_v29  ;;  %v3016_v36 = vadd.f32 %v5670_v42, %v3015_v62 }
 0x99f   : > { %v3003_v21 = vsel %vm3000_vm10, %v3002_v43, %v2998_v31  ;;  %v3040_v19 = vadd.f32 %v5672_v6, %v3039_v57 }
 0x9a0   : > { %v3020_v32 = vsel %vm3019_vm12, %v5670_v42, %v3016_v36  ;;  %v3052_v24 = vmul.f32 %v5674_v4, %v3003_v21 }
 0x9a1   : > { %v3025_v45 = vsel %vm3022_vm13, %v3024_v23, %v3020_v32  ;;  %v3044_v43 = vsel %vm3043_vm0, %v5672_v6, %v3040_v19 }
 0x9a2   : > { %v3051_v54 = vmul.f32 %v3025_v45, %v8065_v63  ;;  %v3049_v37 = vsel %vm3046_vm1, %v3048_v26, %v3044_v43 }
 0x9a4   : > { %v8136_v8 = vadd.f32 %v3052_v24, %v3051_v54 }
 0x9a6   : > { %5675 = vtanh.f32 %v8136_v8 }
 0x9ac   : > { %v5676_v49 = vpop.eup %5675 }
 0x9ad   : > { %v3055_v42 = vmul.f32 %v5676_v49, %v3049_v37 }
 0x9af   : > { %3056 = vst [vmem:[#allocation3 + $0x4] sm:$0x1] %v3055_v42  ;;  %3074 = vmatmul.f32.vlgmr.msra.gmra.mxu0 %v3055_v42  ;;  %3094 = vmatmul.f32.vlgmr.msra.gmra.mxu1 %v3055_v42 }
 0x9b0   : > { %3114 = vmatmul.f32.vlgmr.msrb.gmra.mxu2 %v3055_v42  ;;  %3134 = vmatmul.f32.vlgmr.msrb.gmra.mxu3 %v3055_v42 }
 0x9b1   : > { %3386 = vmatpush.msra.mxu0 %v7798_v13  ;;  %3406 = vmatpush.msra.mxu1 %v7801_v56  ;;  %v9794_v13 = vld [vmem:[#allocation53_spill] sm:$0xff]  ;;  %v9795_v56 = vld [vmem:[#allocation27_spill] sm:$0xff] }
 0x9b2   : > { %3426 = vmatpush.msrb.mxu2 %v7804_v20  ;;  %3446 = vmatpush.msrb.mxu3 %v7807_v14  ;;  %v9796_v20 = vld [vmem:[#allocation28_spill] sm:$0xff]  ;;  %v9797_v14 = vld [vmem:[#allocation51_spill] sm:$0xff] }
 0x9b3   : > { %3387 = vmatpush.msra.mxu0 %v7810_v3  ;;  %3407 = vmatpush.msra.mxu1 %v7813_v52  ;;  %v9798_v3 = vld [vmem:[#allocation39_spill] sm:$0xff]  ;;  %v9799_v52 = vld [vmem:[#allocation46_spill] sm:$0xff] }
 0x9b4   : > { %3427 = vmatpush.msrb.mxu2 %v7816_v34  ;;  %3447 = vmatpush.msrb.mxu3 %v7819_v5  ;;  %v9800_v34 = vld [vmem:[#allocation32_spill] sm:$0xff]  ;;  %v9801_v5 = vld [vmem:[#allocation33_spill] sm:$0xff] }
 0x9b5   : > { %3388 = vmatpush.msra.mxu0 %v7822_v44  ;;  %3408 = vmatpush.msra.mxu1 %v7825_v12  ;;  %v9802_v44 = vld [vmem:[#allocation42_spill] sm:$0xff] }
 0x9b6   : > { %3428 = vmatpush.msrb.mxu2 %v7828_v2  ;;  %3448 = vmatpush.msrb.mxu3 %v7831_v53  ;;  %v9803_v12 = vld [vmem:[#allocation30_spill] sm:$0xff]  ;;  %v9805_v53 = vld [vmem:[#allocation45_spill] sm:$0xff] }
 0x9b7   : > { %3389 = vmatpush.msra.mxu0 %v7834_v0  ;;  %3409 = vmatpush.msra.mxu1 %v7837_v27  ;;  %v9804_v2 = vld [vmem:[#allocation38_spill] sm:$0xff]  ;;  %v9806_v0 = vld [vmem:[#allocation43_spill] sm:$0xff] }
 0x9b8   : > { %3429 = vmatpush.msrb.mxu2 %v7840_v48  ;;  %3449 = vmatpush.msrb.mxu3 %v7843_v55  ;;  %v9807_v27 = vld [vmem:[#allocation50_spill] sm:$0xff]  ;;  %v9808_v48 = vld [vmem:[#allocation35_spill] sm:$0xff] }
 0x9b9   : > { %3390 = vmatpush.msra.mxu0 %v7846_v61  ;;  %3410 = vmatpush.msra.mxu1 %v7849_v18  ;;  %v9809_v55 = vld [vmem:[#allocation34_spill] sm:$0xff]  ;;  %v9810_v61 = vld [vmem:[#allocation36_spill] sm:$0xff]  ;;  %v9811_v18 = vld [vmem:[#allocation29_spill] sm:$0xff] }
 0x9ba   : > { %3430 = vmatpush.msrb.mxu2 %v7852_v35  ;;  %3450 = vmatpush.msrb.mxu3 %v7855_v11  ;;  %v9812_v35 = vld [vmem:[#allocation31_spill] sm:$0xff]  ;;  %v9813_v11 = vld [vmem:[#allocation52_spill] sm:$0xff] }
 0x9bb   : > { %3391 = vmatpush.msra.mxu0 %v7858_v1  ;;  %3411 = vmatpush.msra.mxu1 %v7861_v60  ;;  %v9814_v1 = vld [vmem:[#allocation48_spill] sm:$0xff]  ;;  %v9815_v60 = vld [vmem:[#allocation37_spill] sm:$0xff] }
 0x9bc   : > { %3431 = vmatpush.msrb.mxu2 %v7864_v17  ;;  %3451 = vmatpush.msrb.mxu3 %v7867_v10  ;;  %v9816_v17 = vld [vmem:[#allocation40_spill] sm:$0xff]  ;;  %v9817_v10 = vld [vmem:[#allocation49_spill] sm:$0xff] }
 0x9bd   : > { %3392 = vmatpush.msra.mxu0 %v7870_v59  ;;  %3412 = vmatpush.msra.mxu1 %v7873_v9  ;;  %v9818_v59 = vld [vmem:[#allocation47_spill] sm:$0xff]  ;;  %v9819_v9 = vld [vmem:[#allocation41_spill] sm:$0xff] }
 0x9be   : > { %3432 = vmatpush.msrb.mxu2 %v7876_v51  ;;  %3452 = vmatpush.msrb.mxu3 %v7879_v30  ;;  %v9820_v51 = vld [vmem:[#allocation44_spill] sm:$0xff] }
 0x9bf   : > { %3393 = vmatpush.msra.mxu0 %v7882_v38  ;;  %3413 = vmatpush.msra.mxu1 %v7885_v28 }
 0x9c0   : > { %3433 = vmatpush.msrb.mxu2 %v7888_v33  ;;  %3453 = vmatpush.msrb.mxu3 %v7891_v40 }
 0x9c1   : > { %3394 = vmatpush.msra.mxu0 %v7894_v25  ;;  %3414 = vmatpush.msra.mxu1 %v7897_v15 }
 0x9c2   : > { %3434 = vmatpush.msrb.mxu2 %v7900_v50  ;;  %3454 = vmatpush.msrb.mxu3 %v7903_v58 }
 0x9c3   : > { %3395 = vmatpush.msra.mxu0 %v7999_v7  ;;  %3415 = vmatpush.msra.mxu1 %v9794_v13  ;;  %v3057_v7 = vld [vmem:[#allocation2 + $0x5] ss:$8 sm:$0xf] }
 0x9c4   : > { %3435 = vmatpush.msrb.mxu2 %v9795_v56  ;;  %3455 = vmatpush.msrb.mxu3 %v9796_v20 }
 0x9c5   : > { %3396 = vmatpush.msra.mxu0 %v9797_v14  ;;  %3416 = vmatpush.msra.mxu1 %v9798_v3 }
 0x9c6   : > { %3436 = vmatpush.msrb.mxu2 %v9799_v52  ;;  %3456 = vmatpush.msrb.mxu3 %v9800_v34 }
 0x9c7   : > { %3397 = vmatpush.msra.mxu0 %v9801_v5  ;;  %3417 = vmatpush.msra.mxu1 %v9802_v44 }
 0x9c8   : > { %3437 = vmatpush.msrb.mxu2 %v9803_v12  ;;  %3457 = vmatpush.msrb.mxu3 %v9804_v2 }
 0x9c9   : > { %3398 = vmatpush.msra.mxu0 %v9805_v53  ;;  %3418 = vmatpush.msra.mxu1 %v9806_v0 }
 0x9ca   : > { %3438 = vmatpush.msrb.mxu2 %v9807_v27  ;;  %3458 = vmatpush.msrb.mxu3 %v9808_v48 }
 0x9cb   : > { %3399 = vmatpush.msra.mxu0 %v9809_v55  ;;  %3419 = vmatpush.msra.mxu1 %v9810_v61 }
 0x9cc   : > { %3439 = vmatpush.msrb.mxu2 %v9811_v18  ;;  %3459 = vmatpush.msrb.mxu3 %v9812_v35 }
 0x9cd   : > { %3400 = vmatpush.msra.mxu0 %v9813_v11  ;;  %3420 = vmatpush.msra.mxu1 %v9814_v1 }
 0x9ce   : > { %3440 = vmatpush.msrb.mxu2 %v9815_v60  ;;  %3460 = vmatpush.msrb.mxu3 %v9816_v17 }
 0x9cf   : > { %3401 = vmatpush.msra.mxu0 %v9817_v10  ;;  %3421 = vmatpush.msra.mxu1 %v9818_v59 }
 0x9d0   : > { %3441 = vmatpush.msrb.mxu2 %v9819_v9  ;;  %3461 = vmatpush.msrb.mxu3 %v9820_v51 }
 0xa2c   : > { %v3095_v30 = vpop.f32.mrf.mxu1  ;;  %v3075_v15 = vpop.f32.mrf.mxu0 }
 0xa2d   : > { %v3142_v38 = vrot.slane %v3095_v30, 7 }
 0xa2f   : > { %v3145_v50 = vsel %vm780_vm2, %v3075_v15, %v3142_v38 }
 0xa33   : > { %v3115_v28 = vpop.f32.mrf.mxu2  ;;  %v3135_v33 = vpop.f32.mrf.mxu3 }
 0xa34   : > { %v3143_v40 = vrot.slane %v3115_v28, 6  ;;  %v3144_v25 = vrot.slane %v3135_v33, 5 }
 0xa36   : > { %v3146_v58 = vsel %vm782_vm3, %v3143_v40, %v3144_v25  ;;  %v3221_v25 = vld [vmem:[#allocation2 + $0x6] ss:$8 sm:$0xf] }
 0xa37   : > { %v3147_v63 = vsel %vm784_vm4, %v3145_v50, %v3146_v58 }
 0xa38   : > { %v3149_v19 = vadd.f32 %v3147_v63, %v3057_v7 }
 0xa3a   : > { %v5326_v4 = vmul.f32 -1.442695, %v3149_v19  ;;  %v3170_v21 = vrot.slane %v3149_v19, 1  ;;  %v3194_v16 = vrot.slane %v3149_v19, 3  ;;  %v3191_v57 = vrot.slane %v3149_v19, 2 }
 0xa3c   : > { %5677 = vpow2.f32 %v5326_v4  ;;  %v5327_v22 = vmul.f32 -1.442695, %v3170_v21  ;;  %v5328_v6 = vmul.f32 -1.442695, %v3194_v16 }
 0xa3e   : > { %5679 = vpow2.f32 %v5327_v22 }
 0xa3f   : > { %5681 = vpow2.f32 %v5328_v6 }
 0xa42   : > { %v5678_v46 = vpop.eup %5677 }
 0xa43   : > { %v3153_v47 = vadd.f32 1.0, %v5678_v46 }
 0xa44   : > { %v5680_v29 = vpop.eup %5679 }
 0xa45   : > { %v5682_v62 = vpop.eup %5681  ;;  %5683 = vrcp.f32 %v3153_v47  ;;  %v3175_v31 = vadd.f32 1.0, %v5680_v29  ;;  %v3165_v41 = vand.u32 2147483648, %v3153_v47  ;;  %v3163_v37 = vand.u32 2147483647, %v3153_v47 }
 0xa46   : > { %v3199_v36 = vadd.f32 1.0, %v5682_v62  ;;  %vm3159_vm6 = vweird.f32 %v3153_v47 }
 0xa47   : > { %5685 = vrcp.f32 %v3175_v31  ;;  %v3187_v42 = vand.u32 2147483648, %v3175_v31  ;;  %v3185_v20 = vand.u32 2147483647, %v3175_v31  ;;  %v3166_v14 = vor.u32 1.1754944e-38, %v3165_v41 }
 0xa48   : > { %5687 = vrcp.f32 %v3199_v36  ;;  %vm3164_vm9 = vcmp.eq.f32.partialorder %v3163_v37, 8.507059e+37  ;;  %vm3181_vm10 = vweird.f32 %v3175_v31  ;;  %v3211_v18 = vand.u32 2147483648, %v3199_v36 }
 0xa49   : > { %5689 = vtanh.f32 %v3191_v57  ;;  %v3188_v44 = vor.u32 1.1754944e-38, %v3187_v42  ;;  %vm3186_vm12 = vcmp.eq.f32.partialorder %v3185_v20, 8.507059e+37  ;;  %vm3205_vm14 = vweird.f32 %v3199_v36 }
 0xa4a   : > { %v3209_v35 = vand.u32 2147483647, %v3199_v36  ;;  %v3212_v1 = vor.u32 1.1754944e-38, %v3211_v18 }
 0xa4b   : > { %v5684_v23 = vpop.eup %5683 }
 0xa4c   : > { %v3155_v32 = vmul.f32 %v5684_v23, %v3153_v47  ;;  %vm3160_vm5 = vweird.f32 %v5684_v23  ;;  %vm3210_vm0 = vcmp.eq.f32.partialorder %v3209_v35, 8.507059e+37 }
 0xa4d   : > { %v5686_v45 = vpop.eup %5685  ;;  %vm3161_vm8 = vmor %vm3159_vm6, %vm3160_vm5 }
 0xa4e   : > { %v5688_v54 = vpop.eup %5687  ;;  %v3156_v24 = vsub.f32 1.0, %v3155_v32  ;;  %v3177_v39 = vmul.f32 %v5686_v45, %v3175_v31  ;;  %vm3182_vm7 = vweird.f32 %v5686_v45 }
 0xa4f   : > { %v3201_v43 = vmul.f32 %v5688_v54, %v3199_v36  ;;  %vm3183_vm11 = vmor %vm3181_vm10, %vm3182_vm7  ;;  %v5690_v2 = vpop.eup %5689  ;;  %vm3206_vm13 = vweird.f32 %v5688_v54 }
 0xa50   : > { %v3178_v26 = vsub.f32 1.0, %v3177_v39  ;;  %v3157_v49 = vmul.f32 %v5684_v23, %v3156_v24  ;;  %vm3207_vm15 = vmor %vm3205_vm14, %vm3206_vm13 }
 0xa51   : > { %v3202_v3 = vsub.f32 1.0, %v3201_v43 }
 0xa52   : > { %v3158_v13 = vadd.f32 %v5684_v23, %v3157_v49  ;;  %v3179_v56 = vmul.f32 %v5686_v45, %v3178_v26 }
 0xa53   : > { %v3203_v0 = vmul.f32 %v5688_v54, %v3202_v3 }
 0xa54   : > { %v3162_v52 = vsel %vm3161_vm8, %v5684_v23, %v3158_v13  ;;  %v3180_v34 = vadd.f32 %v5686_v45, %v3179_v56 }
 0xa55   : > { %v3167_v5 = vsel %vm3164_vm9, %v3166_v14, %v3162_v52  ;;  %v3204_v61 = vadd.f32 %v5688_v54, %v3203_v0 }
 0xa56   : > { %v3184_v12 = vsel %vm3183_vm11, %v5686_v45, %v3180_v34  ;;  %v3216_v48 = vmul.f32 %v5690_v2, %v3167_v5 }
 0xa57   : > { %v3189_v53 = vsel %vm3186_vm12, %v3188_v44, %v3184_v12  ;;  %v3208_v11 = vsel %vm3207_vm15, %v5688_v54, %v3204_v61 }
 0xa58   : > { %v3215_v27 = vmul.f32 %v3189_v53, %v8136_v8  ;;  %v3213_v17 = vsel %vm3210_vm0, %v3212_v1, %v3208_v11 }
 0xa5a   : > { %v8207_v55 = vadd.f32 %v3216_v48, %v3215_v27 }
 0xa5c   : > { %5691 = vtanh.f32 %v8207_v55 }
 0xa62   : > { %v5692_v60 = vpop.eup %5691 }
 0xa63   : > { %v3219_v10 = vmul.f32 %v5692_v60, %v3213_v17  ;;  %v3613_v60 = vld [vmem:[#allocation10 + $0x1f8] sm:$0xff]  ;;  %v3608_v17 = vld [vmem:[#allocation10 + $0x1d0] sm:$0xff] }
 0xa65   : > { %3220 = vst [vmem:[#allocation3 + $0x5] sm:$0x1] %v3219_v10  ;;  %3238 = vmatmul.f32.vlgmr.msrb.gmra.mxu0 %v3219_v10  ;;  %3258 = vmatmul.f32.vlgmr.msrb.gmra.mxu1 %v3219_v10 }
 0xa66   : > { %3278 = vmatmul.f32.vlgmr.msra.gmra.mxu2 %v3219_v10  ;;  %3298 = vmatmul.f32.vlgmr.msra.gmra.mxu3 %v3219_v10  ;;  %v3609_v10 = vld [vmem:[#allocation10 + $0x1d8] sm:$0xff] }
 0xa67   : > { %3684 = vmatpush.msra.mxu3 %v3613_v60  ;;  %v3563_v60 = vld [vmem:[#allocation10 + $0x68] sm:$0xff] }
 0xa69   : > { %3685 = vmatpush.msra.mxu3 %v3609_v10 }
 0xae2   : > { %v3259_v8 = vpop.f32.mrf.mxu1  ;;  %v3239_v28 = vpop.f32.mrf.mxu0 }
 0xae3   : > { %v3306_v59 = vrot.slane %v3259_v8, 7  ;;  %v3604_v8 = vld [vmem:[#allocation10 + $0x1b0] sm:$0xff] }
 0xae5   : > { %v3309_v33 = vsel %vm780_vm2, %v3239_v28, %v3306_v59  ;;  %v3605_v59 = vld [vmem:[#allocation10 + $0x1b8] sm:$0xff]  ;;  %v3607_v28 = vld [vmem:[#allocation10 + $0x1c8] sm:$0xff] }
 0xae6   : > { %3686 = vmatpush.msra.mxu3 %v3605_v59  ;;  %v8220_v59 = vld [vmem:[#allocation12 + $0x1f0] sm:$0xff] }
 0xae9   : > { %v3279_v9 = vpop.f32.mrf.mxu2  ;;  %v3299_v51 = vpop.f32.mrf.mxu3 }
 0xaea   : > { %v3307_v30 = vrot.slane %v3279_v9, 6  ;;  %v3308_v38 = vrot.slane %v3299_v51, 5  ;;  %v3611_v9 = vld [vmem:[#allocation10 + $0x1e8] sm:$0xff]  ;;  %v3600_v51 = vld [vmem:[#allocation10 + $0x190] sm:$0xff] }
 0xaeb   : > { %3644 = vmatpush.msrb.mxu1 %v3611_v9  ;;  %v8222_v9 = vld [vmem:[#allocation12 + $0x1f8] sm:$0xff] }
 0xaec   : > { %v3310_v40 = vsel %vm782_vm3, %v3307_v30, %v3308_v38  ;;  %v3601_v30 = vld [vmem:[#allocation10 + $0x198] sm:$0xff]  ;;  %v3610_v38 = vld [vmem:[#allocation10 + $0x1e0] sm:$0xff] }
 0xaed   : > { %v3311_v15 = vsel %vm784_vm4, %v3309_v33, %v3310_v40  ;;  %3687 = vmatpush.msra.mxu3 %v3601_v30  ;;  %v3596_v33 = vld [vmem:[#allocation10 + $0x170] sm:$0xff]  ;;  %3624 = vmatpush.msrb.mxu0 %v3610_v38  ;;  %v3597_v40 = vld [vmem:[#allocation10 + $0x178] sm:$0xff]  ;;  %v3562_v30 = vld [vmem:[#allocation10 + $0x60] sm:$0xff] }
 0xaee   : > { %v3313_v50 = vadd.f32 %v3311_v15, %v3221_v25  ;;  %3645 = vmatpush.msrb.mxu1 %v3607_v28  ;;  %v3606_v25 = vld [vmem:[#allocation10 + $0x1c0] sm:$0xff]  ;;  %v3603_v15 = vld [vmem:[#allocation10 + $0x1a8] sm:$0xff]  ;;  %v8228_v28 = vld [vmem:[#allocation12 + $0x1d0] sm:$0xff] }
 0xaef   : > { %3688 = vmatpush.msra.mxu3 %v3597_v40  ;;  %3625 = vmatpush.msrb.mxu0 %v3606_v25  ;;  %v3559_v38 = vld [vmem:[#allocation10 + $0x48] sm:$0xff] }
 0xaf0   : > { %v5329_v58 = vmul.f32 -1.442695, %v3313_v50  ;;  %v3334_v7 = vrot.slane %v3313_v50, 1  ;;  %v3358_v63 = vrot.slane %v3313_v50, 3  ;;  %v3355_v36 = vrot.slane %v3313_v50, 2  ;;  %v3592_v50 = vld [vmem:[#allocation10 + $0x150] sm:$0xff]  ;;  %3646 = vmatpush.msrb.mxu1 %v3603_v15 }
 0xaf2   : > { %5693 = vpow2.f32 %v5329_v58  ;;  %v5330_v19 = vmul.f32 -1.442695, %v3334_v7  ;;  %v5331_v4 = vmul.f32 -1.442695, %v3358_v63  ;;  %v3593_v58 = vld [vmem:[#allocation10 + $0x158] sm:$0xff]  ;;  %v3602_v7 = vld [vmem:[#allocation10 + $0x1a0] sm:$0xff] }
 0xaf3   : > { %3689 = vmatpush.msra.mxu3 %v3593_v58  ;;  %v3599_v63 = vld [vmem:[#allocation10 + $0x188] sm:$0xff]  ;;  %3626 = vmatpush.msrb.mxu0 %v3602_v7  ;;  %v8237_v7 = vld [vmem:[#allocation12 + $0x1b0] sm:$0xff] }
 0xaf4   : > { %5695 = vpow2.f32 %v5330_v19  ;;  %v3588_v19 = vld [vmem:[#allocation10 + $0x130] sm:$0xff]  ;;  %3647 = vmatpush.msrb.mxu1 %v3599_v63  ;;  %v3555_v58 = vld [vmem:[#allocation10 + $0x28] sm:$0xff]  ;;  %v8239_v63 = vld [vmem:[#allocation12 + $0x1b8] sm:$0xff] }
 0xaf5   : > { %5697 = vpow2.f32 %v5331_v4  ;;  %v3589_v4 = vld [vmem:[#allocation10 + $0x138] sm:$0xff] }
 0xaf6   : > { %3690 = vmatpush.msra.mxu3 %v3589_v4 }
 0xaf8   : > { %v5694_v21 = vpop.eup %5693 }
 0xaf9   : > { %v3317_v16 = vadd.f32 1.0, %v5694_v21  ;;  %v3598_v21 = vld [vmem:[#allocation10 + $0x180] sm:$0xff] }
 0xafa   : > { %v5696_v22 = vpop.eup %5695  ;;  %3627 = vmatpush.msrb.mxu0 %v3598_v21  ;;  %v3554_v21 = vld [vmem:[#allocation10 + $0x20] sm:$0xff] }
 0xafb   : > { %v5698_v6 = vpop.eup %5697  ;;  %5699 = vrcp.f32 %v3317_v16  ;;  %v3339_v46 = vadd.f32 1.0, %v5696_v22  ;;  %v3329_v57 = vand.u32 2147483648, %v3317_v16  ;;  %v3327_v41 = vand.u32 2147483647, %v3317_v16  ;;  %v3584_v22 = vld [vmem:[#allocation10 + $0x110] sm:$0xff] }
 0xafc   : > { %v3363_v47 = vadd.f32 1.0, %v5698_v6  ;;  %vm3323_vm5 = vweird.f32 %v3317_v16  ;;  %v3585_v6 = vld [vmem:[#allocation10 + $0x118] sm:$0xff] }
 0xafd   : > { %5701 = vrcp.f32 %v3339_v46  ;;  %v3351_v43 = vand.u32 2147483648, %v3339_v46  ;;  %v3349_v37 = vand.u32 2147483647, %v3339_v46  ;;  %v3330_v42 = vor.u32 1.1754944e-38, %v3329_v57  ;;  %3691 = vmatpush.msra.mxu3 %v3585_v6  ;;  %v3583_v57 = vld [vmem:[#allocation10 + $0x108] sm:$0xff]  ;;  %v8245_v6 = vld [vmem:[#allocation12 + $0x190] sm:$0xff] }
 0xafe   : > { %5703 = vrcp.f32 %v3363_v47  ;;  %vm3328_vm8 = vcmp.eq.f32.partialorder %v3327_v41, 8.507059e+37  ;;  %vm3345_vm9 = vweird.f32 %v3339_v46  ;;  %v3375_v27 = vand.u32 2147483648, %v3363_v47  ;;  %v3579_v41 = vld [vmem:[#allocation10 + $0xe8] sm:$0xff] }
 0xaff   : > { %5705 = vtanh.f32 %v3355_v36  ;;  %v3352_v3 = vor.u32 1.1754944e-38, %v3351_v43  ;;  %vm3350_vm11 = vcmp.eq.f32.partialorder %v3349_v37, 8.507059e+37  ;;  %vm3369_vm13 = vweird.f32 %v3363_v47  ;;  %v3587_v36 = vld [vmem:[#allocation10 + $0x128] sm:$0xff]  ;;  %v3568_v43 = vld [vmem:[#allocation10 + $0x90] sm:$0xff]  ;;  %v3578_v37 = vld [vmem:[#allocation10 + $0xe0] sm:$0xff] }
 0xb00   : > { %v3373_v48 = vand.u32 2147483647, %v3363_v47  ;;  %v3376_v18 = vor.u32 1.1754944e-38, %v3375_v27  ;;  %v3567_v27 = vld [vmem:[#allocation10 + $0x88] sm:$0xff] }
 0xb01   : > { %v5700_v29 = vpop.eup %5699 }
 0xb02   : > { %v3319_v62 = vmul.f32 %v5700_v29, %v3317_v16  ;;  %vm3324_vm1 = vweird.f32 %v5700_v29  ;;  %vm3374_vm15 = vcmp.eq.f32.partialorder %v3373_v48, 8.507059e+37  ;;  %v3595_v16 = vld [vmem:[#allocation10 + $0x168] sm:$0xff]  ;;  %v3556_v48 = vld [vmem:[#allocation10 + $0x30] sm:$0xff] }
 0xb03   : > { %v5702_v31 = vpop.eup %5701  ;;  %vm3325_vm7 = vmor %vm3323_vm5, %vm3324_vm1  ;;  %3648 = vmatpush.msrb.mxu1 %v3595_v16  ;;  %v3551_v16 = vld [vmem:[#allocation10 + $0x8] sm:$0xff] }
 0xb04   : > { %v5704_v23 = vpop.eup %5703  ;;  %v3320_v32 = vsub.f32 1.0, %v3319_v62  ;;  %v3341_v45 = vmul.f32 %v5702_v31, %v3339_v46  ;;  %vm3346_vm6 = vweird.f32 %v5702_v31  ;;  %v3594_v46 = vld [vmem:[#allocation10 + $0x160] sm:$0xff]  ;;  %v3581_v62 = vld [vmem:[#allocation10 + $0xf8] sm:$0xff] }
 0xb05   : > { %v3365_v54 = vmul.f32 %v5704_v23, %v3363_v47  ;;  %vm3347_vm10 = vmor %vm3345_vm9, %vm3346_vm6  ;;  %v5706_v34 = vpop.eup %5705  ;;  %vm3370_vm12 = vweird.f32 %v5704_v23  ;;  %v3591_v47 = vld [vmem:[#allocation10 + $0x148] sm:$0xff]  ;;  %3628 = vmatpush.msrb.mxu0 %v3594_v46  ;;  %3692 = vmatpush.msra.mxu3 %v3581_v62  ;;  %v8247_v46 = vld [vmem:[#allocation12 + $0x198] sm:$0xff] }
 0xb06   : > { %v3342_v24 = vsub.f32 1.0, %v3341_v45  ;;  %v3321_v39 = vmul.f32 %v5700_v29, %v3320_v32  ;;  %vm3371_vm14 = vmor %vm3369_vm13, %vm3370_vm12  ;;  %3649 = vmatpush.msrb.mxu1 %v3591_v47  ;;  %v3577_v32 = vld [vmem:[#allocation10 + $0xd8] sm:$0xff]  ;;  %v3586_v45 = vld [vmem:[#allocation10 + $0x120] sm:$0xff] }
 0xb07   : > { %v3366_v13 = vsub.f32 1.0, %v3365_v54  ;;  %3693 = vmatpush.msra.mxu3 %v3577_v32  ;;  %v3572_v54 = vld [vmem:[#allocation10 + $0xb0] sm:$0xff]  ;;  %v3550_v47 = vld [vmem:[#allocation10] sm:$0xff]  ;;  %v8253_v62 = vld [vmem:[#allocation12 + $0x1c8] sm:$0xff] }
 0xb08   : > { %v3322_v26 = vadd.f32 %v5700_v29, %v3321_v39  ;;  %v3343_v49 = vmul.f32 %v5702_v31, %v3342_v24  ;;  %3650 = vmatpush.msrb.mxu1 %v3587_v36  ;;  %v3573_v24 = vld [vmem:[#allocation10 + $0xb8] sm:$0xff]  ;;  %v3582_v39 = vld [vmem:[#allocation10 + $0x100] sm:$0xff]  ;;  %v8264_v32 = vld [vmem:[#allocation12 + $0x1a8] sm:$0xff] }
 0xb09   : > { %v3367_v44 = vmul.f32 %v5704_v23, %v3366_v13  ;;  %3694 = vmatpush.msra.mxu3 %v3573_v24  ;;  %v3564_v13 = vld [vmem:[#allocation10 + $0x70] sm:$0xff]  ;;  %v8258_v36 = vld [vmem:[#allocation12 + $0x178] sm:$0xff] }
 0xb0a   : > { %v3326_v56 = vsel %vm3325_vm7, %v5700_v29, %v3322_v26  ;;  %v3344_v20 = vadd.f32 %v5702_v31, %v3343_v49  ;;  %v3580_v29 = vld [vmem:[#allocation10 + $0xf0] sm:$0xff]  ;;  %3651 = vmatpush.msrb.mxu1 %v3583_v57  ;;  %v3569_v49 = vld [vmem:[#allocation10 + $0x98] sm:$0xff] }
 0xb0b   : > { %v3331_v14 = vsel %vm3328_vm8, %v3330_v42, %v3326_v56  ;;  %v3368_v0 = vadd.f32 %v5704_v23, %v3367_v44  ;;  %3695 = vmatpush.msra.mxu3 %v3569_v49  ;;  %v3575_v42 = vld [vmem:[#allocation10 + $0xc8] sm:$0xff]  ;;  %v3565_v56 = vld [vmem:[#allocation10 + $0x78] sm:$0xff] }
 0xb0c   : > { %v3348_v52 = vsel %vm3347_vm10, %v5702_v31, %v3344_v20  ;;  %v3380_v2 = vmul.f32 %v5706_v34, %v3331_v14  ;;  %v3590_v31 = vld [vmem:[#allocation10 + $0x140] sm:$0xff]  ;;  %3652 = vmatpush.msrb.mxu1 %v3579_v41  ;;  %v3561_v44 = vld [vmem:[#allocation10 + $0x58] sm:$0xff]  ;;  %v8278_v41 = vld [vmem:[#allocation12 + $0x188] sm:$0xff] }
 0xb0d   : > { %v3353_v5 = vsel %vm3350_vm11, %v3352_v3, %v3348_v52  ;;  %v3372_v61 = vsel %vm3371_vm14, %v5704_v23, %v3368_v0  ;;  %v3576_v23 = vld [vmem:[#allocation10 + $0xd0] sm:$0xff]  ;;  %3629 = vmatpush.msrb.mxu0 %v3590_v31  ;;  %3696 = vmatpush.msra.mxu3 %v3565_v56  ;;  %v3574_v14 = vld [vmem:[#allocation10 + $0xc0] sm:$0xff]  ;;  %v3571_v3 = vld [vmem:[#allocation10 + $0xa8] sm:$0xff] }
 0xb0e   : > { %v3379_v12 = vmul.f32 %v3353_v5, %v8207_v55  ;;  %v3377_v11 = vsel %vm3374_vm15, %v3376_v18, %v3372_v61  ;;  %v3612_v55 = vld [vmem:[#allocation10 + $0x1f0] sm:$0xff]  ;;  %3653 = vmatpush.msrb.mxu1 %v3575_v42  ;;  %v3570_v0 = vld [vmem:[#allocation10 + $0xa0] sm:$0xff]  ;;  %v8284_v49 = vld [vmem:[#allocation12 + $0x138] sm:$0xff] }
 0xb0f   : > { %3664 = vmatpush.msra.mxu2 %v3612_v55  ;;  %3630 = vmatpush.msrb.mxu0 %v3586_v45  ;;  %v3560_v52 = vld [vmem:[#allocation10 + $0x50] sm:$0xff]  ;;  %v3566_v55 = vld [vmem:[#allocation10 + $0x80] sm:$0xff] }
 0xb10   : > { %v8214_v53 = vadd.f32 %v3380_v2, %v3379_v12  ;;  %3654 = vmatpush.msrb.mxu1 %v3571_v3  ;;  %3697 = vmatpush.msra.mxu3 %v3561_v44  ;;  %v3385_v18 = vld [vmem:[#allocation2 + $0x7] ss:$8 sm:$0xf] }
 0xb11   : > { %3665 = vmatpush.msra.mxu2 %v3608_v17  ;;  %3631 = vmatpush.msrb.mxu0 %v3582_v39  ;;  %v3552_v17 = vld [vmem:[#allocation10 + $0x10] sm:$0xff]  ;;  %v8276_v39 = vld [vmem:[#allocation12 + $0x1a0] sm:$0xff]  ;;  %v8301_v3 = vld [vmem:[#allocation12 + $0x118] sm:$0xff] }
 0xb12   : > { %5707 = vtanh.f32 %v8214_v53  ;;  %3655 = vmatpush.msrb.mxu1 %v3567_v27  ;;  %v8255_v31 = vld [vmem:[#allocation12 + $0x170] sm:$0xff]  ;;  %v8289_v42 = vld [vmem:[#allocation12 + $0x180] sm:$0xff]  ;;  %v8311_v44 = vld [vmem:[#allocation12 + $0xf8] sm:$0xff] }
 0xb13   : > { %3666 = vmatpush.msra.mxu2 %v3604_v8  ;;  %3632 = vmatpush.msrb.mxu0 %v3578_v37  ;;  %v3553_v8 = vld [vmem:[#allocation10 + $0x18] sm:$0xff]  ;;  %v8266_v45 = vld [vmem:[#allocation12 + $0x150] sm:$0xff] }
 0xb14   : > { %3656 = vmatpush.msrb.mxu1 %v3563_v60  ;;  %v8293_v56 = vld [vmem:[#allocation12 + $0x110] sm:$0xff]  ;;  %v8325_v27 = vld [vmem:[#allocation12 + $0xd8] sm:$0xff]  ;;  %v8347_v60 = vld [vmem:[#allocation12 + $0xe8] sm:$0xff] }
 0xb15   : > { %3667 = vmatpush.msra.mxu2 %v3600_v51  ;;  %3633 = vmatpush.msrb.mxu0 %v3574_v14  ;;  %9822 = vst [vmem:[#allocation27_spill] sm:$0xff] %v8325_v27 }
 0xb16   : > { %3657 = vmatpush.msrb.mxu1 %v3559_v38 }
 0xb17   : > { %3668 = vmatpush.msra.mxu2 %v3596_v33  ;;  %3634 = vmatpush.msrb.mxu0 %v3570_v0  ;;  %v8230_v33 = vld [vmem:[#allocation12 + $0x1d8] sm:$0xff]  ;;  %v8323_v0 = vld [vmem:[#allocation12 + $0xd0] sm:$0xff] }
 0xb18   : > { %v5708_v35 = vpop.eup %5707  ;;  %3658 = vmatpush.msrb.mxu1 %v3555_v58  ;;  %9821 = vst [vmem:[#allocation53_spill] sm:$0xff] %v8323_v0  ;;  %v8370_v58 = vld [vmem:[#allocation12 + $0x70] sm:$0xff] }
 0xb19   : > { %v3383_v1 = vmul.f32 %v5708_v35, %v3377_v11  ;;  %3669 = vmatpush.msra.mxu2 %v3592_v50  ;;  %v3557_v35 = vld [vmem:[#allocation10 + $0x38] sm:$0xff]  ;;  %3635 = vmatpush.msrb.mxu0 %v3566_v55  ;;  %v3558_v50 = vld [vmem:[#allocation10 + $0x40] sm:$0xff]  ;;  %9827 = vst [vmem:[#allocation32_spill] sm:$0xff] %v8370_v58 }
 0xb1a   : > { %3698 = vmatpush.msra.mxu3 %v3557_v35  ;;  %3659 = vmatpush.msrb.mxu1 %v3551_v16  ;;  %v8337_v35 = vld [vmem:[#allocation12 + $0xb0] sm:$0xff]  ;;  %v8345_v55 = vld [vmem:[#allocation12 + $0x100] sm:$0xff] }
 0xb1b   : > { %3384 = vst [vmem:[#allocation3 + $0x6] sm:$0x1] %v3383_v1  ;;  %3402 = vmatmul.f32.vlgmr.msra.gmra.mxu0 %v3383_v1  ;;  %3422 = vmatmul.f32.vlgmr.msra.gmra.mxu1 %v3383_v1  ;;  %v8381_v16 = vld [vmem:[#allocation12 + $0xc0] sm:$0xff] }
 0xb1c   : > { %3442 = vmatmul.f32.vlgmr.msrb.gmra.mxu2 %v3383_v1  ;;  %3462 = vmatmul.f32.vlgmr.msrb.gmra.mxu3 %v3383_v1  ;;  %9823 = vst [vmem:[#allocation28_spill] sm:$0xff] %v8337_v35 }
 0xb1d   : > { %3670 = vmatpush.msra.mxu2 %v3588_v19  ;;  %3699 = vmatpush.msra.mxu3 %v3553_v8 }
 0xb1e   : > { %3636 = vmatpush.msrb.mxu0 %v3562_v30 }
 0xb1f   : > { %3671 = vmatpush.msra.mxu2 %v3584_v22  ;;  %3833 = vmatpush.msrb.mxu3 %v8222_v9  ;;  %v8243_v22 = vld [vmem:[#allocation12 + $0x1e8] sm:$0xff] }
 0xb20   : > { %3637 = vmatpush.msrb.mxu0 %v3558_v50  ;;  %3793 = vmatpush.msra.mxu1 %v8243_v22  ;;  %v8368_v50 = vld [vmem:[#allocation12 + $0xc8] sm:$0xff] }
 0xb21   : > { %3672 = vmatpush.msra.mxu2 %v3580_v29  ;;  %3834 = vmatpush.msrb.mxu3 %v8230_v33  ;;  %v8251_v29 = vld [vmem:[#allocation12 + $0x1e0] sm:$0xff] }
 0xb22   : > { %3638 = vmatpush.msrb.mxu0 %v3554_v21  ;;  %3794 = vmatpush.msra.mxu1 %v8253_v62  ;;  %v8379_v21 = vld [vmem:[#allocation12 + $0x78] sm:$0xff] }
 0xb23   : > { %3673 = vmatpush.msra.mxu2 %v3576_v23  ;;  %3835 = vmatpush.msrb.mxu3 %v8239_v63  ;;  %v8262_v23 = vld [vmem:[#allocation12 + $0x1c0] sm:$0xff]  ;;  %9828 = vst [vmem:[#allocation33_spill] sm:$0xff] %v8379_v21 }
 0xb24   : > { %3639 = vmatpush.msrb.mxu0 %v3550_v47  ;;  %3795 = vmatpush.msra.mxu1 %v8264_v32 }
 0xb25   : > { %3674 = vmatpush.msra.mxu2 %v3572_v54  ;;  %3836 = vmatpush.msrb.mxu3 %v8247_v46  ;;  %v8270_v54 = vld [vmem:[#allocation12 + $0x158] sm:$0xff] }
 0xb26   : > { %3773 = vmatpush.msra.mxu0 %v8251_v29  ;;  %3796 = vmatpush.msra.mxu1 %v8278_v41 }
 0xb27   : > { %3675 = vmatpush.msra.mxu2 %v3568_v43  ;;  %3837 = vmatpush.msrb.mxu3 %v8258_v36  ;;  %v8280_v43 = vld [vmem:[#allocation12 + $0x130] sm:$0xff] }
 0xb28   : > { %3774 = vmatpush.msra.mxu0 %v8262_v23 }
 0xb29   : > { %3676 = vmatpush.msra.mxu2 %v3564_v13  ;;  %3838 = vmatpush.msrb.mxu3 %v8270_v54  ;;  %v8291_v13 = vld [vmem:[#allocation12 + $0x168] sm:$0xff] }
 0xb2a   : > { %3775 = vmatpush.msra.mxu0 %v8276_v39  ;;  %3797 = vmatpush.msra.mxu1 %v8291_v13 }
 0xb2b   : > { %3677 = vmatpush.msra.mxu2 %v3560_v52  ;;  %3839 = vmatpush.msrb.mxu3 %v8284_v49  ;;  %v8303_v52 = vld [vmem:[#allocation12 + $0x160] sm:$0xff] }
 0xb2c   : > { %3776 = vmatpush.msra.mxu0 %v8289_v42 }
 0xb2d   : > { %3678 = vmatpush.msra.mxu2 %v3556_v48  ;;  %3840 = vmatpush.msrb.mxu3 %v8301_v3  ;;  %v8329_v48 = vld [vmem:[#allocation12 + $0x120] sm:$0xff] }
 0xb2e   : > { %3777 = vmatpush.msra.mxu0 %v8303_v52 }
 0xb2f   : > { %3679 = vmatpush.msra.mxu2 %v3552_v17  ;;  %3841 = vmatpush.msrb.mxu3 %v8311_v44  ;;  %v8351_v17 = vld [vmem:[#allocation12 + $0x90] sm:$0xff] }
 0xb30   : > { %9825 = vst [vmem:[#allocation39_spill] sm:$0xff] %v8351_v17 }
 0xb31   : > { %3813 = vmatpush.msrb.mxu2 %v8220_v59  ;;  %3842 = vmatpush.msrb.mxu3 %v8325_v27 }
 0xb33   : > { %3814 = vmatpush.msrb.mxu2 %v8228_v28 }
 0xb35   : > { %3815 = vmatpush.msrb.mxu2 %v8237_v7 }
 0xb37   : > { %3816 = vmatpush.msrb.mxu2 %v8245_v6 }
 0xb39   : > { %3817 = vmatpush.msrb.mxu2 %v8255_v31 }
 0xb3b   : > { %3818 = vmatpush.msrb.mxu2 %v8266_v45 }
 0xb3d   : > { %3819 = vmatpush.msrb.mxu2 %v8280_v43 }
 0xb3f   : > { %3820 = vmatpush.msrb.mxu2 %v8293_v56 }
 0xb98   : > { %v3423_v26 = vpop.f32.mrf.mxu1  ;;  %v3403_v61 = vpop.f32.mrf.mxu0 }
 0xb99   : > { %v3470_v20 = vrot.slane %v3423_v26, 7 }
 0xb9b   : > { %v3473_v11 = vsel %vm780_vm2, %v3403_v61, %v3470_v20  ;;  %v8331_v61 = vld [vmem:[#allocation12 + $0x108] sm:$0xff] }
 0xb9f   : > { %v3443_v34 = vpop.f32.mrf.mxu2  ;;  %v3463_v5 = vpop.f32.mrf.mxu3 }
 0xba0   : > { %v3471_v12 = vrot.slane %v3443_v34, 6  ;;  %v3472_v2 = vrot.slane %v3463_v5, 5  ;;  %v8305_v34 = vld [vmem:[#allocation12 + $0x148] sm:$0xff]  ;;  %v8309_v5 = vld [vmem:[#allocation12 + $0xf0] sm:$0xff] }
 0xba1   : > { %3798 = vmatpush.msra.mxu1 %v8305_v34  ;;  %3821 = vmatpush.msrb.mxu2 %v8309_v5 }
 0xba2   : > { %v3474_v1 = vsel %vm782_vm3, %v3471_v12, %v3472_v2  ;;  %v8316_v12 = vld [vmem:[#allocation12 + $0x140] sm:$0xff]  ;;  %v8318_v2 = vld [vmem:[#allocation12 + $0x128] sm:$0xff] }
 0xba3   : > { %v3475_v10 = vsel %vm784_vm4, %v3473_v11, %v3474_v1  ;;  %3778 = vmatpush.msra.mxu0 %v8316_v12  ;;  %3799 = vmatpush.msra.mxu1 %v8318_v2  ;;  %v8339_v11 = vld [vmem:[#allocation12 + $0xb8] sm:$0xff] }
 0xba4   : > { %v8224_v51 = vadd.f32 %v3475_v10, %v3385_v18  ;;  %9824 = vst [vmem:[#allocation51_spill] sm:$0xff] %v8339_v11  ;;  %3822 = vmatpush.msrb.mxu2 %v8323_v0  ;;  %v8353_v10 = vld [vmem:[#allocation12 + $0x98] sm:$0xff]  ;;  %3843 = vmatpush.msrb.mxu3 %v8339_v11  ;;  %v8423_v0 = vld [vmem:[#allocation12 + $0x68] sm:$0xff] }
 0xba5   : > { %3779 = vmatpush.msra.mxu0 %v8329_v48  ;;  %3800 = vmatpush.msra.mxu1 %v8331_v61  ;;  %9826 = vst [vmem:[#allocation46_spill] sm:$0xff] %v8353_v10  ;;  %v8431_v11 = vld [vmem:[#allocation12 + $0x18] sm:$0xff] }
 0xba6   : > { %v5332_v40 = vmul.f32 -1.442695, %v8224_v51  ;;  %v3498_v25 = vrot.slane %v8224_v51, 1  ;;  %v3522_v15 = vrot.slane %v8224_v51, 3  ;;  %v3519_v38 = vrot.slane %v8224_v51, 2  ;;  %3823 = vmatpush.msrb.mxu2 %v8337_v35  ;;  %3844 = vmatpush.msrb.mxu3 %v8353_v10  ;;  %v8397_v10 = vld [vmem:[#allocation12 + $0xa0] sm:$0xff] }
 0xba7   : > { %3780 = vmatpush.msra.mxu0 %v8345_v55  ;;  %3801 = vmatpush.msra.mxu1 %v8347_v60  ;;  %9832 = vst [vmem:[#allocation45_spill] sm:$0xff] %v8397_v10 }
 0xba8   : > { %5709 = vpow2.f32 %v5332_v40  ;;  %v5333_v19 = vmul.f32 -1.442695, %v3498_v25  ;;  %v5334_v4 = vmul.f32 -1.442695, %v3522_v15  ;;  %v8366_v15 = vld [vmem:[#allocation12 + $0xe0] sm:$0xff]  ;;  %3824 = vmatpush.msrb.mxu2 %v8351_v17  ;;  %3845 = vmatpush.msrb.mxu3 %v8379_v21  ;;  %v8399_v17 = vld [vmem:[#allocation12 + $0x88] sm:$0xff] }
 0xba9   : > { %3781 = vmatpush.msra.mxu0 %v8366_v15  ;;  %3802 = vmatpush.msra.mxu1 %v8368_v50  ;;  %9833 = vst [vmem:[#allocation43_spill] sm:$0xff] %v8399_v17  ;;  %v8414_v21 = vld [vmem:[#allocation12 + $0x38] sm:$0xff] }
 0xbaa   : > { %5711 = vpow2.f32 %v5333_v19  ;;  %3825 = vmatpush.msrb.mxu2 %v8370_v58  ;;  %9837 = vst [vmem:[#allocation35_spill] sm:$0xff] %v8414_v21 }
 0xbab   : > { %5713 = vpow2.f32 %v5334_v4  ;;  %3782 = vmatpush.msra.mxu0 %v8381_v16  ;;  %9839 = vst [vmem:[#allocation36_spill] sm:$0xff] %v8423_v0 }
 0xbac   : > { %9841 = vst [vmem:[#allocation31_spill] sm:$0xff] %v8431_v11 }
 0xbad   : > { %3783 = vmatpush.msra.mxu0 %v8397_v10 }
 0xbae   : > { %v5710_v57 = vpop.eup %5709 }
 0xbaf   : > { %v8272_v24 = vadd.f32 1.0, %v5710_v57 }
 0xbb0   : > { %v5712_v26 = vpop.eup %5711 }
 0xbb1   : > { %v5714_v37 = vpop.eup %5713  ;;  %5715 = vrcp.f32 %v8272_v24  ;;  %v8295_v20 = vadd.f32 1.0, %v5712_v26  ;;  %v3493_v19 = vand.u32 2147483648, %v8272_v24  ;;  %v3491_v47 = vand.u32 2147483647, %v8272_v24  ;;  %v8386_v26 = vld [vmem:[#allocation12 + $0xa8] sm:$0xff] }
 0xbb2   : > { %v8297_v14 = vadd.f32 1.0, %v5714_v37  ;;  %9829 = vst [vmem:[#allocation42_spill] sm:$0xff] %v8386_v26  ;;  %v8388_v37 = vld [vmem:[#allocation12 + $0x50] sm:$0xff]  ;;  %vm3487_vm1 = vweird.f32 %v8272_v24  ;;  %3803 = vmatpush.msra.mxu1 %v8386_v26 }
 0xbb3   : > { %5717 = vrcp.f32 %v8295_v20  ;;  %9830 = vst [vmem:[#allocation30_spill] sm:$0xff] %v8388_v37  ;;  %v3494_v35 = vor.u32 1.1754944e-38, %v3493_v19  ;;  %3826 = vmatpush.msrb.mxu2 %v8388_v37  ;;  %vm3492_vm7 = vcmp.eq.f32.partialorder %v3491_v47, 8.507059e+37  ;;  %vm3509_vm8 = vweird.f32 %v8295_v20 }
 0xbb4   : > { %5719 = vrcp.f32 %v8297_v14  ;;  %3804 = vmatpush.msra.mxu1 %v8399_v17  ;;  %vm3533_vm12 = vweird.f32 %v8297_v14 }
 0xbb5   : > { %5721 = vtanh.f32 %v3519_v38  ;;  %v3513_v38 = vand.u32 2147483647, %v8295_v20 }
 0xbb6   : > { %3805 = vmatpush.msra.mxu1 %v8423_v0 }
 0xbb7   : > { %v8333_v18 = vpop.eup %5715  ;;  %vm3514_vm10 = vcmp.eq.f32.partialorder %v3513_v38, 8.507059e+37 }
 0xbb8   : > { %v3483_v1 = vmul.f32 %v8333_v18, %v8272_v24  ;;  %vm3488_vm0 = vweird.f32 %v8333_v18 }
 0xbb9   : > { %v8355_v8 = vpop.eup %5717  ;;  %vm8403_vm5 = vmor %vm3487_vm1, %vm3488_vm0 }
 0xbba   : > { %v3484_v30 = vsub.f32 1.0, %v3483_v1  ;;  %v8360_v40 = vpop.eup %5719  ;;  %v3505_v25 = vmul.f32 %v8355_v8, %v8295_v20  ;;  %vm3510_vm6 = vweird.f32 %v8355_v8 }
 0xbbb   : > { %v3529_v4 = vmul.f32 %v8360_v40, %v8297_v14  ;;  %vm3511_vm9 = vmor %vm3509_vm8, %vm3510_vm6  ;;  %vm3534_vm11 = vweird.f32 %v8360_v40 }
 0xbbc   : > { %v3485_v51 = vmul.f32 %v8333_v18, %v3484_v30  ;;  %v3506_v57 = vsub.f32 1.0, %v3505_v25  ;;  %v3515_v30 = vand.u32 2147483648, %v8295_v20  ;;  %v8395_v25 = vld [vmem:[#allocation12 + $0x58] sm:$0xff]  ;;  %v8440_v20 = vld [vmem:[#allocation12 + $0x60] sm:$0xff]  ;;  %vm3535_vm13 = vmor %vm3533_vm12, %vm3534_vm11 }
 0xbbd   : > { %9831 = vst [vmem:[#allocation38_spill] sm:$0xff] %v8395_v25  ;;  %v3530_v27 = vsub.f32 1.0, %v3529_v4  ;;  %3846 = vmatpush.msrb.mxu3 %v8395_v25 }
 0xbbe   : > { %v3486_v1 = vadd.f32 %v8333_v18, %v3485_v51  ;;  %v3507_v24 = vmul.f32 %v8355_v8, %v3506_v57  ;;  %v8412_v51 = vld [vmem:[#allocation12 + $0x30] sm:$0xff]  ;;  %v8421_v57 = vld [vmem:[#allocation12 + $0x80] sm:$0xff]  ;;  %v3516_v4 = vor.u32 1.1754944e-38, %v3515_v30  ;;  %9842 = vst [vmem:[#allocation52_spill] sm:$0xff] %v8440_v20 }
 0xbbf   : > { %9836 = vst [vmem:[#allocation50_spill] sm:$0xff] %v8412_v51  ;;  %3827 = vmatpush.msrb.mxu2 %v8412_v51  ;;  %3847 = vmatpush.msrb.mxu3 %v8414_v21  ;;  %v8447_v30 = vld [vmem:[#allocation12 + $0x40] sm:$0xff] }
 0xbc0   : > { %v3490_v58 = vsel %vm8403_vm5, %v8333_v18, %v3486_v1  ;;  %9838 = vst [vmem:[#allocation34_spill] sm:$0xff] %v8421_v57  ;;  %v3508_v26 = vadd.f32 %v8355_v8, %v3507_v24  ;;  %v8429_v18 = vld [vmem:[#allocation12 + $0x10] sm:$0xff]  ;;  %3784 = vmatpush.msra.mxu0 %v8421_v57  ;;  %v8442_v1 = vld [vmem:[#allocation12 + $0x48] sm:$0xff]  ;;  %v3531_v24 = vmul.f32 %v8360_v40, %v3530_v27  ;;  %v8454_v21 = vld [vmem:[#allocation12 + $0x20] sm:$0xff] }
 0xbc1   : > { %9840 = vst [vmem:[#allocation29_spill] sm:$0xff] %v8429_v18  ;;  %v3495_v19 = vsel %vm3492_vm7, %v3494_v35, %v3490_v58  ;;  %v5722_v35 = vpop.eup %5721  ;;  %3828 = vmatpush.msrb.mxu2 %v8429_v18  ;;  %3848 = vmatpush.msrb.mxu3 %v8431_v11  ;;  %v8462_v11 = vld [vmem:[#allocation12] sm:$0xff] }
 0xbc2   : > { %v3512_v47 = vsel %vm3511_vm9, %v8355_v8, %v3508_v26  ;;  %9843 = vst [vmem:[#allocation48_spill] sm:$0xff] %v8442_v1  ;;  %v8449_v8 = vld [vmem:[#allocation12 + $0x28] sm:$0xff]  ;;  %v3544_v38 = vmul.f32 %v5722_v35, %v3495_v19  ;;  %3785 = vmatpush.msra.mxu0 %v8440_v20  ;;  %3806 = vmatpush.msra.mxu1 %v8442_v1  ;;  %v3537_v19 = vand.u32 2147483647, %v8297_v14 }
 0xbc3   : > { %v3517_v58 = vsel %vm3514_vm10, %v3516_v4, %v3512_v47  ;;  %9844 = vst [vmem:[#allocation37_spill] sm:$0xff] %v8447_v30  ;;  %v8456_v4 = vld [vmem:[#allocation12 + $0x8] sm:$0xff]  ;;  %v3532_v47 = vadd.f32 %v8360_v40, %v3531_v24 }
 0xbc4   : > { %9845 = vst [vmem:[#allocation40_spill] sm:$0xff] %v8449_v8  ;;  %v3543_v26 = vmul.f32 %v3517_v58, %v8214_v53  ;;  %3786 = vmatpush.msra.mxu0 %v8447_v30  ;;  %3807 = vmatpush.msra.mxu1 %v8449_v8  ;;  %v3539_v53 = vand.u32 2147483648, %v8297_v14  ;;  %vm3538_vm14 = vcmp.eq.f32.partialorder %v3537_v19, 8.507059e+37  ;;  %v9849_v14 = vmov 0.0   ;;  %v9853_v19 = vld [vmem:[#allocation28_spill] sm:$0xff] }
 0xbc5   : > { %9846 = vst [vmem:[#allocation49_spill] sm:$0xff] %v8454_v21  ;;  %v3536_v35 = vsel %vm3535_vm13, %v8360_v40, %v3532_v47  ;;  %v9850_v40 = vld [vmem:[#allocation53_spill] sm:$0xff]  ;;  %v9851_v47 = vld [vmem:[#allocation27_spill] sm:$0xff] }
 0xbc6   : > { %9847 = vst [vmem:[#allocation47_spill] sm:$0xff] %v8456_v4  ;;  %v3545_v27 = vadd.f32 %v3544_v38, %v3543_v26  ;;  %3787 = vmatpush.msra.mxu0 %v8454_v21  ;;  %3808 = vmatpush.msra.mxu1 %v8456_v4  ;;  %v3540_v58 = vor.u32 1.1754944e-38, %v3539_v53  ;;  %v9852_v53 = vld [vmem:[#allocation42_spill] sm:$0xff] }
 0xbc7   : > { %9848 = vst [vmem:[#allocation41_spill] sm:$0xff] %v8462_v11 }
 0xbc8   : > { %5723 = vtanh.f32 %v3545_v27  ;;  %3788 = vmatpush.msra.mxu0 %v8462_v11  ;;  %v3541_v26 = vsel %vm3538_vm14, %v3540_v58, %v3536_v35  ;;  %v9854_v35 = vld [vmem:[#allocation51_spill] sm:$0xff] }
 0xbc9   : > { %v9855_v58 = vld [vmem:[#allocation39_spill] sm:$0xff] }
 0xbce   : > { %v5724_v24 = vpop.eup %5723 }
 0xbcf   : > { %v3547_v38 = vmul.f32 %v5724_v24, %v3541_v26  ;;  %v9856_v24 = vld [vmem:[#allocation46_spill] sm:$0xff]  ;;  %v9857_v26 = vld [vmem:[#allocation32_spill] sm:$0xff] }
 0xbd1   : > { %3548 = vst [vmem:[#allocation3 + $0x7] sm:$0x1] %v3547_v38  ;;  %v9858_v38 = vld [vmem:[#allocation33_spill] sm:$0xff] }
 0xbd8   : > { %v3549_v27 = vld [vmem:[#allocation3] sm:$0xff] }
 0xbd9   : > { %3640 = vmatmul.f32.vlgmr.msrb.gmra.mxu0 %v3549_v27  ;;  %3660 = vmatmul.f32.vlgmr.msrb.gmra.mxu1 %v3549_v27 }
 0xbda   : > { %3680 = vmatmul.f32.vlgmr.msra.gmra.mxu2 %v3549_v27  ;;  %3700 = vmatmul.f32.vlgmr.msra.gmra.mxu3 %v3549_v27  ;;  %v9859_v27 = vld [vmem:[#allocation35_spill] sm:$0xff] }
 0xbdb   : > { %3937 = vmatpush.msrb.mxu0 %v8251_v29  ;;  %3957 = vmatpush.msrb.mxu1 %v8243_v22 }
 0xbdc   : > { %3977 = vmatpush.msra.mxu2 %v8220_v59  ;;  %3997 = vmatpush.msra.mxu3 %v8222_v9 }
 0xbdd   : > { %3938 = vmatpush.msrb.mxu0 %v8262_v23  ;;  %3958 = vmatpush.msrb.mxu1 %v8253_v62 }
 0xbde   : > { %3978 = vmatpush.msra.mxu2 %v8228_v28  ;;  %3998 = vmatpush.msra.mxu3 %v8230_v33 }
 0xbdf   : > { %3939 = vmatpush.msrb.mxu0 %v8276_v39  ;;  %3959 = vmatpush.msrb.mxu1 %v8264_v32 }
 0xbe0   : > { %3979 = vmatpush.msra.mxu2 %v8237_v7  ;;  %3999 = vmatpush.msra.mxu3 %v8239_v63 }
 0xbe1   : > { %3809 = vmatmul.f32.vlgmr.msra.gmra.mxu1 %v9849_v14  ;;  %3789 = vmatmul.f32.vlgmr.msra.gmra.mxu0 %v9849_v14 }
 0xbe2   : > { %3829 = vmatmul.f32.vlgmr.msrb.gmra.mxu2 %v9849_v14  ;;  %3849 = vmatmul.f32.vlgmr.msrb.gmra.mxu3 %v9849_v14  ;;  %v9860_v14 = vld [vmem:[#allocation31_spill] sm:$0xff] }
 0xbe3   : > { %3940 = vmatpush.msrb.mxu0 %v8289_v42  ;;  %3960 = vmatpush.msrb.mxu1 %v8278_v41 }
 0xbe4   : > { %3980 = vmatpush.msra.mxu2 %v8245_v6  ;;  %4000 = vmatpush.msra.mxu3 %v8247_v46 }
 0xbe5   : > { %3941 = vmatpush.msrb.mxu0 %v8303_v52  ;;  %3961 = vmatpush.msrb.mxu1 %v8291_v13 }
 0xbe6   : > { %3981 = vmatpush.msra.mxu2 %v8255_v31  ;;  %4001 = vmatpush.msra.mxu3 %v8258_v36 }
 0xbe7   : > { %3942 = vmatpush.msrb.mxu0 %v8316_v12  ;;  %3962 = vmatpush.msrb.mxu1 %v8305_v34 }
 0xbe8   : > { %3982 = vmatpush.msra.mxu2 %v8266_v45  ;;  %4002 = vmatpush.msra.mxu3 %v8270_v54 }
 0xbe9   : > { %3943 = vmatpush.msrb.mxu0 %v8329_v48  ;;  %3963 = vmatpush.msrb.mxu1 %v8318_v2 }
 0xbea   : > { %3983 = vmatpush.msra.mxu2 %v8280_v43  ;;  %4003 = vmatpush.msra.mxu3 %v8284_v49 }
 0xbeb   : > { %3944 = vmatpush.msrb.mxu0 %v8345_v55  ;;  %3964 = vmatpush.msrb.mxu1 %v8331_v61 }
 0xbec   : > { %3984 = vmatpush.msra.mxu2 %v8293_v56  ;;  %4004 = vmatpush.msra.mxu3 %v8301_v3 }
 0xbed   : > { %3945 = vmatpush.msrb.mxu0 %v8366_v15  ;;  %3965 = vmatpush.msrb.mxu1 %v8347_v60 }
 0xbee   : > { %3985 = vmatpush.msra.mxu2 %v8309_v5  ;;  %4005 = vmatpush.msra.mxu3 %v8311_v44 }
 0xbef   : > { %3946 = vmatpush.msrb.mxu0 %v8381_v16  ;;  %3966 = vmatpush.msrb.mxu1 %v8368_v50 }
 0xbf0   : > { %3986 = vmatpush.msra.mxu2 %v9850_v40  ;;  %4006 = vmatpush.msra.mxu3 %v9851_v47 }
 0xbf1   : > { %3947 = vmatpush.msrb.mxu0 %v8397_v10  ;;  %3967 = vmatpush.msrb.mxu1 %v9852_v53 }
 0xbf2   : > { %3987 = vmatpush.msra.mxu2 %v9853_v19  ;;  %4007 = vmatpush.msra.mxu3 %v9854_v35 }
 0xbf3   : > { %3948 = vmatpush.msrb.mxu0 %v8421_v57  ;;  %3968 = vmatpush.msrb.mxu1 %v8399_v17 }
 0xbf4   : > { %3988 = vmatpush.msra.mxu2 %v9855_v58  ;;  %4008 = vmatpush.msra.mxu3 %v9856_v24 }
 0xbf5   : > { %3949 = vmatpush.msrb.mxu0 %v8440_v20  ;;  %3969 = vmatpush.msrb.mxu1 %v8423_v0 }
 0xbf6   : > { %3989 = vmatpush.msra.mxu2 %v9857_v26  ;;  %4009 = vmatpush.msra.mxu3 %v9858_v38 }
 0xbf7   : > { %3950 = vmatpush.msrb.mxu0 %v8447_v30  ;;  %3970 = vmatpush.msrb.mxu1 %v8442_v1 }
 0xbf8   : > { %3990 = vmatpush.msra.mxu2 %v8388_v37  ;;  %4010 = vmatpush.msra.mxu3 %v8395_v25 }
 0xbf9   : > { %3951 = vmatpush.msrb.mxu0 %v8454_v21  ;;  %3971 = vmatpush.msrb.mxu1 %v8449_v8 }
 0xbfa   : > { %3991 = vmatpush.msra.mxu2 %v8412_v51  ;;  %4011 = vmatpush.msra.mxu3 %v9859_v27 }
 0xbfb   : > { %3952 = vmatpush.msrb.mxu0 %v8462_v11  ;;  %3972 = vmatpush.msrb.mxu1 %v8456_v4 }
 0xbfc   : > { %3992 = vmatpush.msra.mxu2 %v8429_v18  ;;  %4012 = vmatpush.msra.mxu3 %v9860_v14 }
 0xbfd   : > { %4101 = vmatpush.msra.mxu0 %v8251_v29  ;;  %4121 = vmatpush.msra.mxu1 %v8243_v22 }
 0xbfe   : > { %4141 = vmatpush.msrb.mxu2 %v8220_v59  ;;  %4161 = vmatpush.msrb.mxu3 %v8222_v9 }
 0xbff   : > { %4102 = vmatpush.msra.mxu0 %v8262_v23  ;;  %4122 = vmatpush.msra.mxu1 %v8253_v62 }
 0xc00   : > { %4142 = vmatpush.msrb.mxu2 %v8228_v28  ;;  %4162 = vmatpush.msrb.mxu3 %v8230_v33 }
 0xc01   : > { %4103 = vmatpush.msra.mxu0 %v8276_v39  ;;  %4123 = vmatpush.msra.mxu1 %v8264_v32 }
 0xc02   : > { %4143 = vmatpush.msrb.mxu2 %v8237_v7  ;;  %4163 = vmatpush.msrb.mxu3 %v8239_v63 }
 0xc03   : > { %4104 = vmatpush.msra.mxu0 %v8289_v42  ;;  %4124 = vmatpush.msra.mxu1 %v8278_v41 }
 0xc04   : > { %4144 = vmatpush.msrb.mxu2 %v8245_v6  ;;  %4164 = vmatpush.msrb.mxu3 %v8247_v46 }
 0xc05   : > { %4105 = vmatpush.msra.mxu0 %v8303_v52  ;;  %4125 = vmatpush.msra.mxu1 %v8291_v13 }
 0xc06   : > { %4145 = vmatpush.msrb.mxu2 %v8255_v31  ;;  %4165 = vmatpush.msrb.mxu3 %v8258_v36 }
 0xc07   : > { %4106 = vmatpush.msra.mxu0 %v8316_v12  ;;  %4126 = vmatpush.msra.mxu1 %v8305_v34 }
 0xc08   : > { %4146 = vmatpush.msrb.mxu2 %v8266_v45  ;;  %4166 = vmatpush.msrb.mxu3 %v8270_v54 }
 0xc09   : > { %4107 = vmatpush.msra.mxu0 %v8329_v48  ;;  %4127 = vmatpush.msra.mxu1 %v8318_v2 }
 0xc0a   : > { %4147 = vmatpush.msrb.mxu2 %v8280_v43  ;;  %4167 = vmatpush.msrb.mxu3 %v8284_v49 }
 0xc0b   : > { %4108 = vmatpush.msra.mxu0 %v8345_v55  ;;  %4128 = vmatpush.msra.mxu1 %v8331_v61 }
 0xc0c   : > { %4148 = vmatpush.msrb.mxu2 %v8293_v56  ;;  %4168 = vmatpush.msrb.mxu3 %v8301_v3 }
 0xc0d   : > { %4109 = vmatpush.msra.mxu0 %v8366_v15  ;;  %4129 = vmatpush.msra.mxu1 %v8347_v60 }
 0xc0e   : > { %4149 = vmatpush.msrb.mxu2 %v8309_v5  ;;  %4169 = vmatpush.msrb.mxu3 %v8311_v44 }
 0xc0f   : > { %4110 = vmatpush.msra.mxu0 %v8381_v16  ;;  %4130 = vmatpush.msra.mxu1 %v8368_v50 }
 0xc10   : > { %4150 = vmatpush.msrb.mxu2 %v9850_v40  ;;  %4170 = vmatpush.msrb.mxu3 %v9851_v47 }
 0xc11   : > { %4111 = vmatpush.msra.mxu0 %v8397_v10  ;;  %4131 = vmatpush.msra.mxu1 %v9852_v53 }
 0xc12   : > { %4151 = vmatpush.msrb.mxu2 %v9853_v19  ;;  %4171 = vmatpush.msrb.mxu3 %v9854_v35 }
 0xc13   : > { %4112 = vmatpush.msra.mxu0 %v8421_v57  ;;  %4132 = vmatpush.msra.mxu1 %v8399_v17 }
 0xc14   : > { %4152 = vmatpush.msrb.mxu2 %v9855_v58  ;;  %4172 = vmatpush.msrb.mxu3 %v9856_v24 }
 0xc15   : > { %4113 = vmatpush.msra.mxu0 %v8440_v20  ;;  %4133 = vmatpush.msra.mxu1 %v8423_v0 }
 0xc16   : > { %4153 = vmatpush.msrb.mxu2 %v9857_v26  ;;  %4173 = vmatpush.msrb.mxu3 %v9858_v38 }
 0xc17   : > { %4114 = vmatpush.msra.mxu0 %v8447_v30  ;;  %4134 = vmatpush.msra.mxu1 %v8442_v1 }
 0xc18   : > { %4154 = vmatpush.msrb.mxu2 %v8388_v37  ;;  %4174 = vmatpush.msrb.mxu3 %v8395_v25  ;;  %v3614_v25 = vld [vmem:[%s9150_s9] sm:$0xf] }
 0xc19   : > { %4115 = vmatpush.msra.mxu0 %v8454_v21  ;;  %4135 = vmatpush.msra.mxu1 %v8449_v8  ;;  %v3616_v37 = vperm.slane %v3614_v25, 0  ;;  %v3617_v21 = vperm.slane %v3614_v25, 1 }
 0xc1a   : > { %4155 = vmatpush.msrb.mxu2 %v8412_v51  ;;  %4175 = vmatpush.msrb.mxu3 %v9859_v27  ;;  %v3618_v27 = vperm.slane %v3614_v25, 2 }
 0xc1b   : > { %4116 = vmatpush.msra.mxu0 %v8462_v11  ;;  %4136 = vmatpush.msra.mxu1 %v8456_v4  ;;  %v3619_v11 = vperm.slane %v3614_v25, 3 }
 0xc1c   : > { %4156 = vmatpush.msrb.mxu2 %v8429_v18  ;;  %4176 = vmatpush.msrb.mxu3 %v9860_v14 }
 0xc56   : > { %v3641_v1 = vpop.f32.mrf.mxu0  ;;  %v3661_v8 = vpop.f32.mrf.mxu1 }
 0xc57   : > { %v3642_v30 = vadd.f32 %v3641_v1, %v3616_v37  ;;  %v3662_v51 = vadd.f32 %v3661_v8, %v3617_v21 }
 0xc59   : > { %3704 = vst [vmem:[#allocation2] sm:$0xff] %v3642_v30 }
 0xc5a   : > { %3705 = vst [vmem:[#allocation2 + $0x8] sm:$0xff] %v3662_v51 }
 0xc5d   : > { %v3681_v38 = vpop.f32.mrf.mxu2  ;;  %v3701_v4 = vpop.f32.mrf.mxu3 }
 0xc5e   : > { %v3682_v26 = vadd.f32 %v3681_v38, %v3618_v27  ;;  %v3702_v18 = vadd.f32 %v3701_v4, %v3619_v11  ;;  %v3810_v0 = vpop.f32.mrf.mxu1  ;;  %v3790_v20 = vpop.f32.mrf.mxu0 }
 0xc5f   : > { %v3857_v14 = vrot.slane %v3810_v0, 7 }
 0xc60   : > { %3706 = vst [vmem:[#allocation2 + $0x10] sm:$0xff] %v3682_v26 }
 0xc61   : > { %3707 = vst [vmem:[#allocation2 + $0x18] sm:$0xff] %v3702_v18  ;;  %v3860_v37 = vsel %vm780_vm2, %v3790_v20, %v3857_v14 }
 0xc65   : > { %v3830_v24 = vpop.f32.mrf.mxu2  ;;  %v3850_v58 = vpop.f32.mrf.mxu3 }
 0xc66   : > { %v3858_v17 = vrot.slane %v3830_v24, 6  ;;  %v3859_v57 = vrot.slane %v3850_v58, 5 }
 0xc68   : > { %v3861_v21 = vsel %vm782_vm3, %v3858_v17, %v3859_v57  ;;  %v3772_v51 = vld [vmem:[#allocation2] ss:$8 sm:$0xf] }
 0xc69   : > { %v3862_v25 = vsel %vm784_vm4, %v3860_v37, %v3861_v21 }
 0xc6a   : > { %v3864_v1 = vadd.f32 %v3862_v25, %v3772_v51 }
 0xc6c   : > { %v5335_v30 = vmul.f32 -1.442695, %v3864_v1  ;;  %v3885_v8 = vrot.slane %v3864_v1, 1  ;;  %v3909_v11 = vrot.slane %v3864_v1, 3  ;;  %v3906_v37 = vrot.slane %v3864_v1, 2 }
 0xc6e   : > { %5725 = vpow2.f32 %v5335_v30  ;;  %v5336_v4 = vmul.f32 -1.442695, %v3885_v8  ;;  %v5337_v18 = vmul.f32 -1.442695, %v3909_v11 }
 0xc70   : > { %5727 = vpow2.f32 %v5336_v4 }
 0xc71   : > { %5729 = vpow2.f32 %v5337_v18 }
 0xc74   : > { %v5726_v0 = vpop.eup %5725 }
 0xc75   : > { %v3868_v26 = vadd.f32 1.0, %v5726_v0 }
 0xc76   : > { %v5728_v24 = vpop.eup %5727 }
 0xc77   : > { %v5730_v58 = vpop.eup %5729  ;;  %5731 = vrcp.f32 %v3868_v26  ;;  %v3890_v20 = vadd.f32 1.0, %v5728_v24  ;;  %v3880_v30 = vand.u32 2147483648, %v3868_v26  ;;  %v3878_v11 = vand.u32 2147483647, %v3868_v26 }
 0xc78   : > { %v3914_v38 = vadd.f32 1.0, %v5730_v58  ;;  %vm3874_vm0 = vweird.f32 %v3868_v26 }
 0xc79   : > { %5733 = vrcp.f32 %v3890_v20  ;;  %v3902_v0 = vand.u32 2147483648, %v3890_v20  ;;  %v3900_v58 = vand.u32 2147483647, %v3890_v20  ;;  %v3881_v19 = vor.u32 1.1754944e-38, %v3880_v30 }
 0xc7a   : > { %5735 = vrcp.f32 %v3914_v38  ;;  %vm3879_vm6 = vcmp.eq.f32.partialorder %v3878_v11, 8.507059e+37  ;;  %vm3896_vm7 = vweird.f32 %v3890_v20  ;;  %vm3920_vm11 = vweird.f32 %v3914_v38 }
 0xc7b   : > { %5737 = vtanh.f32 %v3906_v37  ;;  %v3903_v53 = vor.u32 1.1754944e-38, %v3902_v0  ;;  %vm3901_vm9 = vcmp.eq.f32.partialorder %v3900_v58, 8.507059e+37 }
 0xc7d   : > { %v5732_v17 = vpop.eup %5731 }
 0xc7e   : > { %v3870_v57 = vmul.f32 %v5732_v17, %v3868_v26  ;;  %vm3875_vm15 = vweird.f32 %v5732_v17 }
 0xc7f   : > { %v5734_v27 = vpop.eup %5733  ;;  %vm3876_vm1 = vmor %vm3874_vm0, %vm3875_vm15 }
 0xc80   : > { %v3871_v14 = vsub.f32 1.0, %v3870_v57  ;;  %v5736_v21 = vpop.eup %5735  ;;  %v3892_v51 = vmul.f32 %v5734_v27, %v3890_v20  ;;  %vm3897_vm5 = vweird.f32 %v5734_v27  ;;  %v3924_v20 = vand.u32 2147483647, %v3914_v38 }
 0xc81   : > { %v3916_v8 = vmul.f32 %v5736_v21, %v3914_v38  ;;  %vm3898_vm8 = vmor %vm3896_vm7, %vm3897_vm5  ;;  %vm3921_vm10 = vweird.f32 %v5736_v21 }
 0xc82   : > { %v3872_v25 = vmul.f32 %v5732_v17, %v3871_v14  ;;  %v3893_v4 = vsub.f32 1.0, %v3892_v51  ;;  %v5738_v51 = vpop.eup %5737  ;;  %vm3922_vm12 = vmor %vm3920_vm11, %vm3921_vm10  ;;  %vm3925_vm13 = vcmp.eq.f32.partialorder %v3924_v20, 8.507059e+37 }
 0xc83   : > { %v3917_v57 = vsub.f32 1.0, %v3916_v8 }
 0xc84   : > { %v3873_v18 = vadd.f32 %v5732_v17, %v3872_v25  ;;  %v3894_v24 = vmul.f32 %v5734_v27, %v3893_v4 }
 0xc85   : > { %v3918_v26 = vmul.f32 %v5736_v21, %v3917_v57 }
 0xc86   : > { %v3877_v35 = vsel %vm3876_vm1, %v5732_v17, %v3873_v18  ;;  %v3895_v1 = vadd.f32 %v5734_v27, %v3894_v24  ;;  %v3926_v17 = vand.u32 2147483648, %v3914_v38 }
 0xc87   : > { %v3882_v14 = vsel %vm3879_vm6, %v3881_v19, %v3877_v35  ;;  %v3919_v4 = vadd.f32 %v5736_v21, %v3918_v26 }
 0xc88   : > { %v3899_v10 = vsel %vm3898_vm8, %v5734_v27, %v3895_v1  ;;  %v3931_v37 = vmul.f32 %v5738_v51, %v3882_v14  ;;  %v3927_v35 = vor.u32 1.1754944e-38, %v3926_v17 }
 0xc89   : > { %v3904_v25 = vsel %vm3901_vm9, %v3903_v53, %v3899_v10  ;;  %v3923_v19 = vsel %vm3922_vm12, %v5736_v21, %v3919_v4  ;;  %v3936_v10 = vld [vmem:[#allocation2 + $0x1] ss:$8 sm:$0xf] }
 0xc8a   : > { %v3930_v47 = vmul.f32 0.0, %v3904_v25  ;;  %v3928_v30 = vsel %vm3925_vm13, %v3927_v35, %v3923_v19 }
 0xc8c   : > { %v8609_v40 = vadd.f32 %v3931_v37, %v3930_v47 }
 0xc8e   : > { %5739 = vtanh.f32 %v8609_v40 }
 0xc94   : > { %v5740_v27 = vpop.eup %5739 }
 0xc95   : > { %v3934_v8 = vmul.f32 %v5740_v27, %v3928_v30 }
 0xc97   : > { %3935 = vst [vmem:[#allocation3] sm:$0x1] %v3934_v8  ;;  %3953 = vmatmul.f32.vlgmr.msrb.gmra.mxu0 %v3934_v8  ;;  %3973 = vmatmul.f32.vlgmr.msrb.gmra.mxu1 %v3934_v8 }
 0xc98   : > { %3993 = vmatmul.f32.vlgmr.msra.gmra.mxu2 %v3934_v8  ;;  %4013 = vmatmul.f32.vlgmr.msra.gmra.mxu3 %v3934_v8 }
 0xc99   : > { %4265 = vmatpush.msrb.mxu0 %v8251_v29  ;;  %4285 = vmatpush.msrb.mxu1 %v8243_v22  ;;  %v9867_v22 = vld [vmem:[#allocation34_spill] sm:$0xff] }
 0xc9a   : > { %4305 = vmatpush.msra.mxu2 %v8220_v59  ;;  %4325 = vmatpush.msra.mxu3 %v8222_v9  ;;  %v9861_v59 = vld [vmem:[#allocation53_spill] sm:$0xff]  ;;  %v9862_v9 = vld [vmem:[#allocation27_spill] sm:$0xff]  ;;  %v9870_v29 = vld [vmem:[#allocation46_spill] sm:$0xff] }
 0xc9b   : > { %4266 = vmatpush.msrb.mxu0 %v8262_v23  ;;  %4286 = vmatpush.msrb.mxu1 %v8253_v62  ;;  %v9871_v62 = vld [vmem:[#allocation52_spill] sm:$0xff]  ;;  %v9874_v23 = vld [vmem:[#allocation33_spill] sm:$0xff] }
 0xc9c   : > { %4306 = vmatpush.msra.mxu2 %v8228_v28  ;;  %4326 = vmatpush.msra.mxu3 %v8230_v33  ;;  %v9863_v28 = vld [vmem:[#allocation45_spill] sm:$0xff]  ;;  %v9864_v33 = vld [vmem:[#allocation42_spill] sm:$0xff] }
 0xc9d   : > { %4267 = vmatpush.msrb.mxu0 %v8276_v39  ;;  %4287 = vmatpush.msrb.mxu1 %v8264_v32  ;;  %v9875_v32 = vld [vmem:[#allocation37_spill] sm:$0xff]  ;;  %v9878_v39 = vld [vmem:[#allocation38_spill] sm:$0xff] }
 0xc9e   : > { %4307 = vmatpush.msra.mxu2 %v8237_v7  ;;  %4327 = vmatpush.msra.mxu3 %v8239_v63  ;;  %v9865_v7 = vld [vmem:[#allocation28_spill] sm:$0xff]  ;;  %v9866_v63 = vld [vmem:[#allocation51_spill] sm:$0xff] }
 0xc9f   : > { %4268 = vmatpush.msrb.mxu0 %v8289_v42  ;;  %4288 = vmatpush.msrb.mxu1 %v8278_v41  ;;  %v9879_v41 = vld [vmem:[#allocation49_spill] sm:$0xff]  ;;  %v9882_v42 = vld [vmem:[#allocation35_spill] sm:$0xff] }
 0xca0   : > { %4308 = vmatpush.msra.mxu2 %v8245_v6  ;;  %4328 = vmatpush.msra.mxu3 %v8247_v46  ;;  %v9868_v6 = vld [vmem:[#allocation43_spill] sm:$0xff] }
 0xca1   : > { %4269 = vmatpush.msrb.mxu0 %v8303_v52  ;;  %4289 = vmatpush.msrb.mxu1 %v8291_v13  ;;  %v9869_v46 = vld [vmem:[#allocation39_spill] sm:$0xff]  ;;  %v9883_v13 = vld [vmem:[#allocation41_spill] sm:$0xff] }
 0xca2   : > { %4309 = vmatpush.msra.mxu2 %v8255_v31  ;;  %4329 = vmatpush.msra.mxu3 %v8258_v36  ;;  %v9872_v31 = vld [vmem:[#allocation36_spill] sm:$0xff]  ;;  %v9886_v52 = vld [vmem:[#allocation31_spill] sm:$0xff] }
 0xca3   : > { %4270 = vmatpush.msrb.mxu0 %v8316_v12  ;;  %4290 = vmatpush.msrb.mxu1 %v8305_v34  ;;  %v9873_v36 = vld [vmem:[#allocation32_spill] sm:$0xff] }
 0xca4   : > { %4310 = vmatpush.msra.mxu2 %v8266_v45  ;;  %4330 = vmatpush.msra.mxu3 %v8270_v54  ;;  %v9876_v45 = vld [vmem:[#allocation48_spill] sm:$0xff]  ;;  %v9877_v54 = vld [vmem:[#allocation30_spill] sm:$0xff] }
 0xca5   : > { %4271 = vmatpush.msrb.mxu0 %v8329_v48  ;;  %4291 = vmatpush.msrb.mxu1 %v8318_v2 }
 0xca6   : > { %4311 = vmatpush.msra.mxu2 %v8280_v43  ;;  %4331 = vmatpush.msra.mxu3 %v8284_v49  ;;  %v9880_v43 = vld [vmem:[#allocation40_spill] sm:$0xff]  ;;  %v9881_v49 = vld [vmem:[#allocation50_spill] sm:$0xff] }
 0xca7   : > { %4272 = vmatpush.msrb.mxu0 %v8345_v55  ;;  %4292 = vmatpush.msrb.mxu1 %v8331_v61 }
 0xca8   : > { %4312 = vmatpush.msra.mxu2 %v8293_v56  ;;  %4332 = vmatpush.msra.mxu3 %v8301_v3  ;;  %v9884_v56 = vld [vmem:[#allocation47_spill] sm:$0xff]  ;;  %v9885_v3 = vld [vmem:[#allocation29_spill] sm:$0xff] }
 0xca9   : > { %4273 = vmatpush.msrb.mxu0 %v8366_v15  ;;  %4293 = vmatpush.msrb.mxu1 %v8347_v60 }
 0xcaa   : > { %4313 = vmatpush.msra.mxu2 %v8309_v5  ;;  %4333 = vmatpush.msra.mxu3 %v8311_v44 }
 0xcab   : > { %4274 = vmatpush.msrb.mxu0 %v8381_v16  ;;  %4294 = vmatpush.msrb.mxu1 %v8368_v50 }
 0xcac   : > { %4314 = vmatpush.msra.mxu2 %v9861_v59  ;;  %4334 = vmatpush.msra.mxu3 %v9862_v9 }
 0xcad   : > { %4275 = vmatpush.msrb.mxu0 %v9863_v28  ;;  %4295 = vmatpush.msrb.mxu1 %v9864_v33 }
 0xcae   : > { %4315 = vmatpush.msra.mxu2 %v9865_v7  ;;  %4335 = vmatpush.msra.mxu3 %v9866_v63 }
 0xcaf   : > { %4276 = vmatpush.msrb.mxu0 %v9867_v22  ;;  %4296 = vmatpush.msrb.mxu1 %v9868_v6 }
 0xcb0   : > { %4316 = vmatpush.msra.mxu2 %v9869_v46  ;;  %4336 = vmatpush.msra.mxu3 %v9870_v29 }
 0xcb1   : > { %4277 = vmatpush.msrb.mxu0 %v9871_v62  ;;  %4297 = vmatpush.msrb.mxu1 %v9872_v31 }
 0xcb2   : > { %4317 = vmatpush.msra.mxu2 %v9873_v36  ;;  %4337 = vmatpush.msra.mxu3 %v9874_v23 }
 0xcb3   : > { %4278 = vmatpush.msrb.mxu0 %v9875_v32  ;;  %4298 = vmatpush.msrb.mxu1 %v9876_v45 }
 0xcb4   : > { %4318 = vmatpush.msra.mxu2 %v9877_v54  ;;  %4338 = vmatpush.msra.mxu3 %v9878_v39 }
 0xcb5   : > { %4279 = vmatpush.msrb.mxu0 %v9879_v41  ;;  %4299 = vmatpush.msrb.mxu1 %v9880_v43 }
 0xcb6   : > { %4319 = vmatpush.msra.mxu2 %v9881_v49  ;;  %4339 = vmatpush.msra.mxu3 %v9882_v42 }
 0xcb7   : > { %4280 = vmatpush.msrb.mxu0 %v9883_v13  ;;  %4300 = vmatpush.msrb.mxu1 %v9884_v56 }
 0xcb8   : > { %4320 = vmatpush.msra.mxu2 %v9885_v3  ;;  %4340 = vmatpush.msra.mxu3 %v9886_v52 }
 0xd14   : > { %v3974_v34 = vpop.f32.mrf.mxu1  ;;  %v3954_v61 = vpop.f32.mrf.mxu0 }
 0xd15   : > { %v4021_v5 = vrot.slane %v3974_v34, 7 }
 0xd17   : > { %v4024_v55 = vsel %vm780_vm2, %v3954_v61, %v4021_v5 }
 0xd1b   : > { %v3994_v44 = vpop.f32.mrf.mxu2  ;;  %v4014_v12 = vpop.f32.mrf.mxu3 }
 0xd1c   : > { %v4022_v2 = vrot.slane %v3994_v44, 6  ;;  %v4023_v48 = vrot.slane %v4014_v12, 5 }
 0xd1e   : > { %v4025_v60 = vsel %vm782_vm3, %v4022_v2, %v4023_v48 }
 0xd1f   : > { %v4026_v15 = vsel %vm784_vm4, %v4024_v55, %v4025_v60 }
 0xd20   : > { %v4028_v50 = vadd.f32 %v4026_v15, %v3936_v10 }
 0xd22   : > { %v5338_v47 = vmul.f32 -1.442695, %v4028_v50  ;;  %v4049_v53 = vrot.slane %v4028_v50, 1  ;;  %v4073_v38 = vrot.slane %v4028_v50, 3  ;;  %v4070_v26 = vrot.slane %v4028_v50, 2 }
 0xd24   : > { %5741 = vpow2.f32 %v5338_v47  ;;  %v5339_v21 = vmul.f32 -1.442695, %v4049_v53  ;;  %v5340_v11 = vmul.f32 -1.442695, %v4073_v38  ;;  %v8686_v38 = vld [vmem:[#allocation12 + $0x1e8] sm:$0xff] }
 0xd26   : > { %5743 = vpow2.f32 %v5339_v21  ;;  %v8689_v21 = vld [vmem:[#allocation12 + $0x1f0] sm:$0xff] }
 0xd27   : > { %5745 = vpow2.f32 %v5340_v11  ;;  %v8692_v11 = vld [vmem:[#allocation12 + $0x1f8] sm:$0xff] }
 0xd2a   : > { %v5742_v18 = vpop.eup %5741 }
 0xd2b   : > { %v4032_v0 = vadd.f32 1.0, %v5742_v18  ;;  %v8695_v18 = vld [vmem:[#allocation12 + $0x1c0] sm:$0xff] }
 0xd2c   : > { %v5744_v24 = vpop.eup %5743 }
 0xd2d   : > { %v5746_v58 = vpop.eup %5745  ;;  %5747 = vrcp.f32 %v4032_v0  ;;  %v4054_v57 = vadd.f32 1.0, %v5744_v24  ;;  %v4044_v20 = vand.u32 2147483648, %v4032_v0  ;;  %v4042_v30 = vand.u32 2147483647, %v4032_v0  ;;  %v8701_v24 = vld [vmem:[#allocation12 + $0x1d0] sm:$0xff] }
 0xd2e   : > { %v4078_v1 = vadd.f32 1.0, %v5746_v58  ;;  %vm4038_vm15 = vweird.f32 %v4032_v0  ;;  %v8704_v58 = vld [vmem:[#allocation12 + $0x1d8] sm:$0xff] }
 0xd2f   : > { %5749 = vrcp.f32 %v4054_v57  ;;  %v4066_v8 = vand.u32 2147483648, %v4054_v57  ;;  %v4064_v7 = vand.u32 2147483647, %v4054_v57  ;;  %v4045_v63 = vor.u32 1.1754944e-38, %v4044_v20  ;;  %v8734_v20 = vld [vmem:[#allocation12 + $0x168] sm:$0xff] }
 0xd30   : > { %5751 = vrcp.f32 %v4078_v1  ;;  %vm4043_vm5 = vcmp.eq.f32.partialorder %v4042_v30, 8.507059e+37  ;;  %vm4060_vm6 = vweird.f32 %v4054_v57  ;;  %v4090_v55 = vand.u32 2147483648, %v4078_v1  ;;  %v8746_v30 = vld [vmem:[#allocation12 + $0x148] sm:$0xff] }
 0xd31   : > { %5753 = vtanh.f32 %v4070_v26  ;;  %v4067_v54 = vor.u32 1.1754944e-38, %v4066_v8  ;;  %vm4065_vm8 = vcmp.eq.f32.partialorder %v4064_v7, 8.507059e+37  ;;  %vm4084_vm10 = vweird.f32 %v4078_v1  ;;  %v8722_v26 = vld [vmem:[#allocation12 + $0x188] sm:$0xff]  ;;  %v8749_v8 = vld [vmem:[#allocation12 + $0x150] sm:$0xff] }
 0xd32   : > { %v4088_v60 = vand.u32 2147483647, %v4078_v1  ;;  %v4091_v15 = vor.u32 1.1754944e-38, %v4090_v55  ;;  %v8758_v7 = vld [vmem:[#allocation12 + $0x128] sm:$0xff]  ;;  %v8803_v55 = vld [vmem:[#allocation12 + $0xb0] sm:$0xff] }
 0xd33   : > { %v5748_v14 = vpop.eup %5747  ;;  %9890 = vst [vmem:[#allocation45_spill] sm:$0xff] %v8803_v55 }
 0xd34   : > { %v4034_v51 = vmul.f32 %v5748_v14, %v4032_v0  ;;  %vm4039_vm14 = vweird.f32 %v5748_v14  ;;  %vm4089_vm12 = vcmp.eq.f32.partialorder %v4088_v60, 8.507059e+37  ;;  %v8698_v0 = vld [vmem:[#allocation12 + $0x1c8] sm:$0xff]  ;;  %v8811_v60 = vld [vmem:[#allocation12 + $0x90] sm:$0xff] }
 0xd35   : > { %v5750_v25 = vpop.eup %5749  ;;  %vm4040_vm1 = vmor %vm4038_vm15, %vm4039_vm14  ;;  %9892 = vst [vmem:[#allocation28_spill] sm:$0xff] %v8811_v60 }
 0xd36   : > { %v5752_v37 = vpop.eup %5751  ;;  %v4035_v4 = vsub.f32 1.0, %v4034_v51  ;;  %v4056_v17 = vmul.f32 %v5750_v25, %v4054_v57  ;;  %vm4061_vm0 = vweird.f32 %v5750_v25  ;;  %v8707_v57 = vld [vmem:[#allocation12 + $0x1a0] sm:$0xff]  ;;  %v8716_v51 = vld [vmem:[#allocation12 + $0x1b8] sm:$0xff] }
 0xd37   : > { %v4080_v19 = vmul.f32 %v5752_v37, %v4078_v1  ;;  %vm4062_vm7 = vmor %vm4060_vm6, %vm4061_vm0  ;;  %v5754_v34 = vpop.eup %5753  ;;  %vm4085_vm9 = vweird.f32 %v5752_v37  ;;  %v8710_v1 = vld [vmem:[#allocation12 + $0x1a8] sm:$0xff] }
 0xd38   : > { %v4057_v35 = vsub.f32 1.0, %v4056_v17  ;;  %v4036_v27 = vmul.f32 %v5748_v14, %v4035_v4  ;;  %vm4086_vm11 = vmor %vm4084_vm10, %vm4085_vm9  ;;  %v8728_v4 = vld [vmem:[#allocation12 + $0x198] sm:$0xff]  ;;  %v8731_v17 = vld [vmem:[#allocation12 + $0x160] sm:$0xff] }
 0xd39   : > { %v4081_v46 = vsub.f32 1.0, %v4080_v19  ;;  %v8737_v19 = vld [vmem:[#allocation12 + $0x170] sm:$0xff] }
 0xd3a   : > { %v4037_v59 = vadd.f32 %v5748_v14, %v4036_v27  ;;  %v4058_v9 = vmul.f32 %v5750_v25, %v4057_v35  ;;  %v8740_v35 = vld [vmem:[#allocation12 + $0x178] sm:$0xff]  ;;  %v8743_v27 = vld [vmem:[#allocation12 + $0x140] sm:$0xff] }
 0xd3b   : > { %v4082_v44 = vmul.f32 %v5752_v37, %v4081_v46  ;;  %v8764_v46 = vld [vmem:[#allocation12 + $0x138] sm:$0xff] }
 0xd3c   : > { %v4041_v29 = vsel %vm4040_vm1, %v5748_v14, %v4037_v59  ;;  %v4059_v36 = vadd.f32 %v5750_v25, %v4058_v9  ;;  %v8713_v14 = vld [vmem:[#allocation12 + $0x1b0] sm:$0xff]  ;;  %v8752_v59 = vld [vmem:[#allocation12 + $0x158] sm:$0xff]  ;;  %v8755_v9 = vld [vmem:[#allocation12 + $0x120] sm:$0xff] }
 0xd3d   : > { %v4046_v23 = vsel %vm4043_vm5, %v4045_v63, %v4041_v29  ;;  %v4083_v61 = vadd.f32 %v5752_v37, %v4082_v44  ;;  %v8761_v63 = vld [vmem:[#allocation12 + $0x130] sm:$0xff]  ;;  %v8767_v29 = vld [vmem:[#allocation12 + $0x100] sm:$0xff]  ;;  %v8788_v44 = vld [vmem:[#allocation12 + $0xf8] sm:$0xff] }
 0xd3e   : > { %v4063_v39 = vsel %vm4062_vm7, %v5750_v25, %v4059_v36  ;;  %v4095_v2 = vmul.f32 %v5754_v34, %v4046_v23  ;;  %v8719_v25 = vld [vmem:[#allocation12 + $0x180] sm:$0xff]  ;;  %v8770_v36 = vld [vmem:[#allocation12 + $0x108] sm:$0xff]  ;;  %v8773_v23 = vld [vmem:[#allocation12 + $0x110] sm:$0xff] }
 0xd3f   : > { %v4068_v5 = vsel %vm4065_vm8, %v4067_v54, %v4063_v39  ;;  %v4087_v10 = vsel %vm4086_vm11, %v5752_v37, %v4083_v61  ;;  %v8725_v37 = vld [vmem:[#allocation12 + $0x190] sm:$0xff]  ;;  %v8776_v54 = vld [vmem:[#allocation12 + $0x118] sm:$0xff]  ;;  %v8779_v39 = vld [vmem:[#allocation12 + $0xe0] sm:$0xff] }
 0xd40   : > { %v4094_v12 = vmul.f32 %v4068_v5, %v8609_v40  ;;  %v4092_v47 = vsel %vm4089_vm12, %v4091_v15, %v4087_v10  ;;  %v8683_v40 = vld [vmem:[#allocation12 + $0x1e0] sm:$0xff]  ;;  %v8782_v34 = vld [vmem:[#allocation12 + $0xe8] sm:$0xff]  ;;  %v8785_v5 = vld [vmem:[#allocation12 + $0xf0] sm:$0xff] }
 0xd41   : > { %v8798_v61 = vld [vmem:[#allocation12 + $0xd8] sm:$0xff] }
 0xd42   : > { %v8680_v48 = vadd.f32 %v4095_v2, %v4094_v12  ;;  %v8792_v12 = vld [vmem:[#allocation12 + $0xc8] sm:$0xff]  ;;  %v8795_v2 = vld [vmem:[#allocation12 + $0xd0] sm:$0xff]  ;;  %9889 = vst [vmem:[#allocation27_spill] sm:$0xff] %v8798_v61  ;;  %v8814_v10 = vld [vmem:[#allocation12 + $0x98] sm:$0xff] }
 0xd43   : > { %9887 = vst [vmem:[#allocation44_spill] sm:$0xff] %v8792_v12 }
 0xd44   : > { %5755 = vtanh.f32 %v8680_v48  ;;  %9888 = vst [vmem:[#allocation53_spill] sm:$0xff] %v8795_v2 }
 0xd45   : > { %9893 = vst [vmem:[#allocation51_spill] sm:$0xff] %v8814_v10 }
 0xd4a   : > { %v5756_v50 = vpop.eup %5755 }
 0xd4b   : > { %v4098_v53 = vmul.f32 %v5756_v50, %v4092_v47 }
 0xd4d   : > { %4099 = vst [vmem:[#allocation3 + $0x1] sm:$0x1] %v4098_v53  ;;  %4117 = vmatmul.f32.vlgmr.msra.gmra.mxu0 %v4098_v53  ;;  %4137 = vmatmul.f32.vlgmr.msra.gmra.mxu1 %v4098_v53 }
 0xd4e   : > { %4157 = vmatmul.f32.vlgmr.msrb.gmra.mxu2 %v4098_v53  ;;  %4177 = vmatmul.f32.vlgmr.msrb.gmra.mxu3 %v4098_v53 }
 0xd4f   : > { %4429 = vmatpush.msra.mxu0 %v8683_v40  ;;  %4449 = vmatpush.msra.mxu1 %v8686_v38 }
 0xd50   : > { %4469 = vmatpush.msrb.mxu2 %v8689_v21  ;;  %4489 = vmatpush.msrb.mxu3 %v8692_v11 }
 0xd51   : > { %4430 = vmatpush.msra.mxu0 %v8695_v18  ;;  %4450 = vmatpush.msra.mxu1 %v8698_v0 }
 0xd52   : > { %4470 = vmatpush.msrb.mxu2 %v8701_v24  ;;  %4490 = vmatpush.msrb.mxu3 %v8704_v58 }
 0xd53   : > { %4431 = vmatpush.msra.mxu0 %v8707_v57  ;;  %4451 = vmatpush.msra.mxu1 %v8710_v1 }
 0xd54   : > { %4471 = vmatpush.msrb.mxu2 %v8713_v14  ;;  %4491 = vmatpush.msrb.mxu3 %v8716_v51 }
 0xd55   : > { %4432 = vmatpush.msra.mxu0 %v8719_v25  ;;  %4452 = vmatpush.msra.mxu1 %v8722_v26 }
 0xd56   : > { %4472 = vmatpush.msrb.mxu2 %v8725_v37  ;;  %4492 = vmatpush.msrb.mxu3 %v8728_v4 }
 0xd57   : > { %4433 = vmatpush.msra.mxu0 %v8731_v17  ;;  %4453 = vmatpush.msra.mxu1 %v8734_v20 }
 0xd58   : > { %4473 = vmatpush.msrb.mxu2 %v8737_v19  ;;  %4493 = vmatpush.msrb.mxu3 %v8740_v35 }
 0xd59   : > { %4434 = vmatpush.msra.mxu0 %v8743_v27  ;;  %4454 = vmatpush.msra.mxu1 %v8746_v30 }
 0xd5a   : > { %4474 = vmatpush.msrb.mxu2 %v8749_v8  ;;  %4494 = vmatpush.msrb.mxu3 %v8752_v59 }
 0xd5b   : > { %4435 = vmatpush.msra.mxu0 %v8755_v9  ;;  %4455 = vmatpush.msra.mxu1 %v8758_v7 }
 0xd5c   : > { %4475 = vmatpush.msrb.mxu2 %v8761_v63  ;;  %4495 = vmatpush.msrb.mxu3 %v8764_v46 }
 0xd5d   : > { %4436 = vmatpush.msra.mxu0 %v8767_v29  ;;  %4456 = vmatpush.msra.mxu1 %v8770_v36 }
 0xd5e   : > { %4476 = vmatpush.msrb.mxu2 %v8773_v23  ;;  %4496 = vmatpush.msrb.mxu3 %v8776_v54 }
 0xd5f   : > { %4437 = vmatpush.msra.mxu0 %v8779_v39  ;;  %4457 = vmatpush.msra.mxu1 %v8782_v34 }
 0xd60   : > { %4477 = vmatpush.msrb.mxu2 %v8785_v5  ;;  %4497 = vmatpush.msrb.mxu3 %v8788_v44 }
 0xd61   : > { %4438 = vmatpush.msra.mxu0 %v8381_v16  ;;  %4458 = vmatpush.msra.mxu1 %v8792_v12  ;;  %v8806_v16 = vld [vmem:[#allocation12 + $0xb8] sm:$0xff] }
 0xd62   : > { %4478 = vmatpush.msrb.mxu2 %v8795_v2  ;;  %4498 = vmatpush.msrb.mxu3 %v8798_v61  ;;  %9891 = vst [vmem:[#allocation42_spill] sm:$0xff] %v8806_v16 }
 0xd63   : > { %4439 = vmatpush.msra.mxu0 %v9863_v28  ;;  %4459 = vmatpush.msra.mxu1 %v9864_v33  ;;  %v8819_v28 = vld [vmem:[#allocation12 + $0x70] sm:$0xff]  ;;  %v8822_v33 = vld [vmem:[#allocation12 + $0x78] sm:$0xff] }
 0xd64   : > { %4479 = vmatpush.msrb.mxu2 %v8803_v55  ;;  %4499 = vmatpush.msrb.mxu3 %v8806_v16  ;;  %9894 = vst [vmem:[#allocation34_spill] sm:$0xff] %v8819_v28 }
 0xd65   : > { %4440 = vmatpush.msra.mxu0 %v9867_v22  ;;  %4460 = vmatpush.msra.mxu1 %v9868_v6  ;;  %9895 = vst [vmem:[#allocation43_spill] sm:$0xff] %v8822_v33  ;;  %v8827_v22 = vld [vmem:[#allocation12 + $0x50] sm:$0xff]  ;;  %v8830_v6 = vld [vmem:[#allocation12 + $0x58] sm:$0xff] }
 0xd66   : > { %4480 = vmatpush.msrb.mxu2 %v8811_v60  ;;  %4500 = vmatpush.msrb.mxu3 %v8814_v10  ;;  %9896 = vst [vmem:[#allocation39_spill] sm:$0xff] %v8827_v22 }
 0xd67   : > { %4441 = vmatpush.msra.mxu0 %v9871_v62  ;;  %4461 = vmatpush.msra.mxu1 %v9872_v31  ;;  %9897 = vst [vmem:[#allocation46_spill] sm:$0xff] %v8830_v6 }
 0xd68   : > { %4481 = vmatpush.msrb.mxu2 %v8819_v28  ;;  %4501 = vmatpush.msrb.mxu3 %v8822_v33 }
 0xd69   : > { %4442 = vmatpush.msra.mxu0 %v9875_v32  ;;  %4462 = vmatpush.msra.mxu1 %v9876_v45 }
 0xd6a   : > { %4482 = vmatpush.msrb.mxu2 %v8827_v22  ;;  %4502 = vmatpush.msrb.mxu3 %v8830_v6 }
 0xd6b   : > { %4443 = vmatpush.msra.mxu0 %v9879_v41  ;;  %4463 = vmatpush.msra.mxu1 %v9880_v43 }
 0xd6c   : > { %4483 = vmatpush.msrb.mxu2 %v9881_v49  ;;  %4503 = vmatpush.msrb.mxu3 %v9882_v42  ;;  %v4100_v42 = vld [vmem:[#allocation2 + $0x2] ss:$8 sm:$0xf] }
 0xd6d   : > { %4444 = vmatpush.msra.mxu0 %v9883_v13  ;;  %4464 = vmatpush.msra.mxu1 %v9884_v56 }
 0xd6e   : > { %4484 = vmatpush.msrb.mxu2 %v9885_v3  ;;  %4504 = vmatpush.msrb.mxu3 %v9886_v52 }
 0xdca   : > { %v4138_v62 = vpop.f32.mrf.mxu1  ;;  %v4118_v50 = vpop.f32.mrf.mxu0 }
 0xdcb   : > { %v4185_v31 = vrot.slane %v4138_v62, 7 }
 0xdcd   : > { %v4188_v43 = vsel %vm780_vm2, %v4118_v50, %v4185_v31 }
 0xdd1   : > { %v4158_v32 = vpop.f32.mrf.mxu2  ;;  %v4178_v45 = vpop.f32.mrf.mxu3 }
 0xdd2   : > { %v4186_v15 = vrot.slane %v4158_v32, 6  ;;  %v4187_v41 = vrot.slane %v4178_v45, 5 }
 0xdd4   : > { %v4189_v49 = vsel %vm782_vm3, %v4186_v15, %v4187_v41 }
 0xdd5   : > { %v4190_v13 = vsel %vm784_vm4, %v4188_v43, %v4189_v49 }
 0xdd6   : > { %v4192_v47 = vadd.f32 %v4190_v13, %v4100_v42 }
 0xdd8   : > { %v5341_v56 = vmul.f32 -1.442695, %v4192_v47  ;;  %v4213_v53 = vrot.slane %v4192_v47, 1  ;;  %v4237_v3 = vrot.slane %v4192_v47, 3  ;;  %v4234_v49 = vrot.slane %v4192_v47, 2 }
 0xdda   : > { %5757 = vpow2.f32 %v5341_v56  ;;  %v5342_v52 = vmul.f32 -1.442695, %v4213_v53  ;;  %v5343_v6 = vmul.f32 -1.442695, %v4237_v3 }
 0xddc   : > { %5759 = vpow2.f32 %v5342_v52 }
 0xddd   : > { %5761 = vpow2.f32 %v5343_v6 }
 0xde0   : > { %v5758_v62 = vpop.eup %5757 }
 0xde1   : > { %v4196_v32 = vadd.f32 1.0, %v5758_v62 }
 0xde2   : > { %v5760_v45 = vpop.eup %5759 }
 0xde3   : > { %v5762_v22 = vpop.eup %5761  ;;  %5763 = vrcp.f32 %v4196_v32  ;;  %v4218_v31 = vadd.f32 1.0, %v5760_v45  ;;  %v4208_v53 = vand.u32 2147483648, %v4196_v32  ;;  %v4206_v62 = vand.u32 2147483647, %v4196_v32 }
 0xde4   : > { %v4242_v50 = vadd.f32 1.0, %v5762_v22  ;;  %vm4202_vm14 = vweird.f32 %v4196_v32 }
 0xde5   : > { %5765 = vrcp.f32 %v4218_v31  ;;  %v4230_v33 = vand.u32 2147483648, %v4218_v31  ;;  %v4228_v28 = vand.u32 2147483647, %v4218_v31  ;;  %v4209_v10 = vor.u32 1.1754944e-38, %v4208_v53 }
 0xde6   : > { %5767 = vrcp.f32 %v4242_v50  ;;  %vm4207_vm1 = vcmp.eq.f32.partialorder %v4206_v62, 8.507059e+37  ;;  %vm4224_vm5 = vweird.f32 %v4218_v31  ;;  %v4254_v53 = vand.u32 2147483648, %v4242_v50  ;;  %v8901_v62 = vld [vmem:[#allocation12 + $0x88] sm:$0xff] }
 0xde7   : > { %5769 = vtanh.f32 %v4234_v49  ;;  %vm4229_vm7 = vcmp.eq.f32.partialorder %v4228_v28, 8.507059e+37  ;;  %vm4248_vm9 = vweird.f32 %v4242_v50  ;;  %9905 = vst [vmem:[#allocation33_spill] sm:$0xff] %v8901_v62 }
 0xde9   : > { %v5764_v15 = vpop.eup %5763 }
 0xdea   : > { %v4198_v41 = vmul.f32 %v5764_v15, %v4196_v32  ;;  %vm4203_vm13 = vweird.f32 %v5764_v15 }
 0xdeb   : > { %v5766_v43 = vpop.eup %5765  ;;  %vm4204_vm0 = vmor %vm4202_vm14, %vm4203_vm13 }
 0xdec   : > { %v5768_v42 = vpop.eup %5767  ;;  %v4199_v13 = vsub.f32 1.0, %v4198_v41  ;;  %v4220_v56 = vmul.f32 %v5766_v43, %v4218_v31  ;;  %vm4225_vm15 = vweird.f32 %v5766_v43  ;;  %v4252_v31 = vand.u32 2147483647, %v4242_v50 }
 0xded   : > { %v4244_v3 = vmul.f32 %v5768_v42, %v4242_v50  ;;  %vm4226_vm6 = vmor %vm4224_vm5, %vm4225_vm15  ;;  %v5770_v55 = vpop.eup %5769  ;;  %vm4249_vm8 = vweird.f32 %v5768_v42  ;;  %v9902_v50 = vld [vmem:[#allocation45_spill] sm:$0xff] }
 0xdee   : > { %v4221_v52 = vsub.f32 1.0, %v4220_v56  ;;  %v4200_v6 = vmul.f32 %v5764_v15, %v4199_v13  ;;  %v4231_v56 = vor.u32 1.1754944e-38, %v4230_v33  ;;  %vm4250_vm10 = vmor %vm4248_vm9, %vm4249_vm8  ;;  %v4255_v33 = vor.u32 1.1754944e-38, %v4254_v53  ;;  %v8922_v53 = vld [vmem:[#allocation12 + $0x20] sm:$0xff] }
 0xdef   : > { %v4245_v60 = vsub.f32 1.0, %v4244_v3  ;;  %vm4253_vm11 = vcmp.eq.f32.partialorder %v4252_v31, 8.507059e+37  ;;  %v8898_v3 = vld [vmem:[#allocation12 + $0x80] sm:$0xff]  ;;  %9916 = vst [vmem:[#allocation49_spill] sm:$0xff] %v8922_v53  ;;  %v8925_v31 = vld [vmem:[#allocation12 + $0x28] sm:$0xff] }
 0xdf0   : > { %v4201_v45 = vadd.f32 %v5764_v15, %v4200_v6  ;;  %v4222_v22 = vmul.f32 %v5766_v43, %v4221_v52  ;;  %9904 = vst [vmem:[#allocation32_spill] sm:$0xff] %v8898_v3 }
 0xdf1   : > { %v4246_v32 = vmul.f32 %v5768_v42, %v4245_v60  ;;  %v8893_v60 = vld [vmem:[#allocation12 + $0xa8] sm:$0xff]  ;;  %9917 = vst [vmem:[#allocation40_spill] sm:$0xff] %v8925_v31 }
 0xdf2   : > { %v4205_v47 = vsel %vm4204_vm0, %v5764_v15, %v4201_v45  ;;  %v4223_v41 = vadd.f32 %v5766_v43, %v4222_v22  ;;  %9901 = vst [vmem:[#allocation36_spill] sm:$0xff] %v8893_v60  ;;  %v9906_v45 = vld [vmem:[#allocation28_spill] sm:$0xff]  ;;  %v9907_v22 = vld [vmem:[#allocation51_spill] sm:$0xff] }
 0xdf3   : > { %v4210_v16 = vsel %vm4207_vm1, %v4209_v10, %v4205_v47  ;;  %v4247_v2 = vadd.f32 %v5768_v42, %v4246_v32  ;;  %v8906_v47 = vld [vmem:[#allocation12 + $0x60] sm:$0xff]  ;;  %v8917_v32 = vld [vmem:[#allocation12 + $0x48] sm:$0xff] }
 0xdf4   : > { %v4227_v13 = vsel %vm4226_vm6, %v5766_v43, %v4223_v41  ;;  %v4259_v52 = vmul.f32 %v5770_v55, %v4210_v16  ;;  %v9899_v55 = vld [vmem:[#allocation27_spill] sm:$0xff]  ;;  %v8890_v16 = vld [vmem:[#allocation12 + $0xa0] sm:$0xff]  ;;  %9908 = vst [vmem:[#allocation37_spill] sm:$0xff] %v8906_v47  ;;  %v8909_v41 = vld [vmem:[#allocation12 + $0x68] sm:$0xff] }
 0xdf5   : > { %v4232_v49 = vsel %vm4229_vm7, %v4231_v56, %v4227_v13  ;;  %v4251_v10 = vsel %vm4250_vm10, %v5768_v42, %v4247_v2  ;;  %v9898_v2 = vld [vmem:[#allocation53_spill] sm:$0xff]  ;;  %9900 = vst [vmem:[#allocation52_spill] sm:$0xff] %v8890_v16  ;;  %v9903_v42 = vld [vmem:[#allocation42_spill] sm:$0xff]  ;;  %v9911_v13 = vld [vmem:[#allocation43_spill] sm:$0xff] }
 0xdf6   : > { %v4258_v6 = vmul.f32 %v4232_v49, %v8680_v48  ;;  %v4256_v15 = vsel %vm4253_vm11, %v4255_v33, %v4251_v10  ;;  %v8884_v48 = vld [vmem:[#allocation12 + $0xc0] sm:$0xff]  ;;  %9909 = vst [vmem:[#allocation48_spill] sm:$0xff] %v8909_v41  ;;  %v9910_v56 = vld [vmem:[#allocation34_spill] sm:$0xff]  ;;  %v8928_v10 = vld [vmem:[#allocation12 + $0x30] sm:$0xff] }
 0xdf7   : > { %v8914_v49 = vld [vmem:[#allocation12 + $0x40] sm:$0xff]  ;;  %9913 = vst [vmem:[#allocation38_spill] sm:$0xff] %v8917_v32  ;;  %v8931_v33 = vld [vmem:[#allocation12 + $0x38] sm:$0xff] }
 0xdf8   : > { %v8845_v61 = vadd.f32 %v4259_v52, %v4258_v6  ;;  %9912 = vst [vmem:[#allocation30_spill] sm:$0xff] %v8914_v49  ;;  %v9914_v6 = vld [vmem:[#allocation39_spill] sm:$0xff]  ;;  %v9915_v52 = vld [vmem:[#allocation46_spill] sm:$0xff] }
 0xdf9   : > { %9918 = vst [vmem:[#allocation50_spill] sm:$0xff] %v8928_v10 }
 0xdfa   : > { %5771 = vtanh.f32 %v8845_v61  ;;  %9919 = vst [vmem:[#allocation35_spill] sm:$0xff] %v8931_v33 }
 0xe00   : > { %v5772_v28 = vpop.eup %5771 }
 0xe01   : > { %v4262_v43 = vmul.f32 %v5772_v28, %v4256_v15  ;;  %v8934_v28 = vld [vmem:[#allocation12] sm:$0xff]  ;;  %v8937_v15 = vld [vmem:[#allocation12 + $0x8] sm:$0xff] }
 0xe02   : > { %9920 = vst [vmem:[#allocation41_spill] sm:$0xff] %v8934_v28 }
 0xe03   : > { %4263 = vst [vmem:[#allocation3 + $0x2] sm:$0x1] %v4262_v43  ;;  %4281 = vmatmul.f32.vlgmr.msrb.gmra.mxu0 %v4262_v43  ;;  %4301 = vmatmul.f32.vlgmr.msrb.gmra.mxu1 %v4262_v43 }
 0xe04   : > { %4321 = vmatmul.f32.vlgmr.msra.gmra.mxu2 %v4262_v43  ;;  %4341 = vmatmul.f32.vlgmr.msra.gmra.mxu3 %v4262_v43  ;;  %9921 = vst [vmem:[#allocation47_spill] sm:$0xff] %v8937_v15  ;;  %v8940_v43 = vld [vmem:[#allocation12 + $0x10] sm:$0xff] }
 0xe05   : > { %4593 = vmatpush.msrb.mxu0 %v8683_v40  ;;  %4613 = vmatpush.msrb.mxu1 %v8686_v38  ;;  %9922 = vst [vmem:[#allocation29_spill] sm:$0xff] %v8940_v43 }
 0xe06   : > { %4633 = vmatpush.msra.mxu2 %v8689_v21  ;;  %4653 = vmatpush.msra.mxu3 %v8692_v11 }
 0xe07   : > { %4594 = vmatpush.msrb.mxu0 %v8695_v18  ;;  %4614 = vmatpush.msrb.mxu1 %v8698_v0 }
 0xe08   : > { %4634 = vmatpush.msra.mxu2 %v8701_v24  ;;  %4654 = vmatpush.msra.mxu3 %v8704_v58 }
 0xe09   : > { %4595 = vmatpush.msrb.mxu0 %v8707_v57  ;;  %4615 = vmatpush.msrb.mxu1 %v8710_v1 }
 0xe0a   : > { %4635 = vmatpush.msra.mxu2 %v8713_v14  ;;  %4655 = vmatpush.msra.mxu3 %v8716_v51 }
 0xe0b   : > { %4596 = vmatpush.msrb.mxu0 %v8719_v25  ;;  %4616 = vmatpush.msrb.mxu1 %v8722_v26 }
 0xe0c   : > { %4636 = vmatpush.msra.mxu2 %v8725_v37  ;;  %4656 = vmatpush.msra.mxu3 %v8728_v4 }
 0xe0d   : > { %4597 = vmatpush.msrb.mxu0 %v8731_v17  ;;  %4617 = vmatpush.msrb.mxu1 %v8734_v20 }
 0xe0e   : > { %4637 = vmatpush.msra.mxu2 %v8737_v19  ;;  %4657 = vmatpush.msra.mxu3 %v8740_v35 }
 0xe0f   : > { %4598 = vmatpush.msrb.mxu0 %v8743_v27  ;;  %4618 = vmatpush.msrb.mxu1 %v8746_v30 }
 0xe10   : > { %4638 = vmatpush.msra.mxu2 %v8749_v8  ;;  %4658 = vmatpush.msra.mxu3 %v8752_v59 }
 0xe11   : > { %4599 = vmatpush.msrb.mxu0 %v8755_v9  ;;  %4619 = vmatpush.msrb.mxu1 %v8758_v7 }
 0xe12   : > { %4639 = vmatpush.msra.mxu2 %v8761_v63  ;;  %4659 = vmatpush.msra.mxu3 %v8764_v46 }
 0xe13   : > { %4600 = vmatpush.msrb.mxu0 %v8767_v29  ;;  %4620 = vmatpush.msrb.mxu1 %v8770_v36 }
 0xe14   : > { %4640 = vmatpush.msra.mxu2 %v8773_v23  ;;  %4660 = vmatpush.msra.mxu3 %v8776_v54 }
 0xe15   : > { %4601 = vmatpush.msrb.mxu0 %v8779_v39  ;;  %4621 = vmatpush.msrb.mxu1 %v8782_v34 }
 0xe16   : > { %4641 = vmatpush.msra.mxu2 %v8785_v5  ;;  %4661 = vmatpush.msra.mxu3 %v8788_v44 }
 0xe17   : > { %4602 = vmatpush.msrb.mxu0 %v8884_v48  ;;  %4622 = vmatpush.msrb.mxu1 %v8792_v12 }
 0xe18   : > { %4642 = vmatpush.msra.mxu2 %v9898_v2  ;;  %4662 = vmatpush.msra.mxu3 %v9899_v55 }
 0xe19   : > { %4603 = vmatpush.msrb.mxu0 %v8890_v16  ;;  %4623 = vmatpush.msrb.mxu1 %v8893_v60 }
 0xe1a   : > { %4643 = vmatpush.msra.mxu2 %v9902_v50  ;;  %4663 = vmatpush.msra.mxu3 %v9903_v42 }
 0xe1b   : > { %4604 = vmatpush.msrb.mxu0 %v8898_v3  ;;  %4624 = vmatpush.msrb.mxu1 %v8901_v62 }
 0xe1c   : > { %4644 = vmatpush.msra.mxu2 %v9906_v45  ;;  %4664 = vmatpush.msra.mxu3 %v9907_v22 }
 0xe1d   : > { %4605 = vmatpush.msrb.mxu0 %v8906_v47  ;;  %4625 = vmatpush.msrb.mxu1 %v8909_v41 }
 0xe1e   : > { %4645 = vmatpush.msra.mxu2 %v9910_v56  ;;  %4665 = vmatpush.msra.mxu3 %v9911_v13 }
 0xe1f   : > { %4606 = vmatpush.msrb.mxu0 %v8914_v49  ;;  %4626 = vmatpush.msrb.mxu1 %v8917_v32 }
 0xe20   : > { %4646 = vmatpush.msra.mxu2 %v9914_v6  ;;  %4666 = vmatpush.msra.mxu3 %v9915_v52 }
 0xe21   : > { %4607 = vmatpush.msrb.mxu0 %v8922_v53  ;;  %4627 = vmatpush.msrb.mxu1 %v8925_v31  ;;  %v8943_v31 = vld [vmem:[#allocation12 + $0x18] sm:$0xff] }
 0xe22   : > { %4647 = vmatpush.msra.mxu2 %v8928_v10  ;;  %4667 = vmatpush.msra.mxu3 %v8931_v33  ;;  %9923 = vst [vmem:[#allocation31_spill] sm:$0xff] %v8943_v31 }
 0xe23   : > { %4608 = vmatpush.msrb.mxu0 %v8934_v28  ;;  %4628 = vmatpush.msrb.mxu1 %v8937_v15  ;;  %v4264_v15 = vld [vmem:[#allocation2 + $0x3] ss:$8 sm:$0xf] }
 0xe24   : > { %4648 = vmatpush.msra.mxu2 %v8940_v43  ;;  %4668 = vmatpush.msra.mxu3 %v8943_v31 }
 0xe80   : > { %v4302_v10 = vpop.f32.mrf.mxu1  ;;  %v4282_v49 = vpop.f32.mrf.mxu0 }
 0xe81   : > { %v4349_v53 = vrot.slane %v4302_v10, 7 }
 0xe83   : > { %v4352_v28 = vsel %vm780_vm2, %v4282_v49, %v4349_v53 }
 0xe87   : > { %v4322_v52 = vpop.f32.mrf.mxu2  ;;  %v4342_v33 = vpop.f32.mrf.mxu3 }
 0xe88   : > { %v4350_v6 = vrot.slane %v4322_v52, 6  ;;  %v4351_v32 = vrot.slane %v4342_v33, 5 }
 0xe8a   : > { %v4353_v13 = vsel %vm782_vm3, %v4350_v6, %v4351_v32 }
 0xe8b   : > { %v4354_v56 = vsel %vm784_vm4, %v4352_v28, %v4353_v13 }
 0xe8c   : > { %v4356_v41 = vadd.f32 %v4354_v56, %v4264_v15 }
 0xe8e   : > { %v5344_v43 = vmul.f32 -1.442695, %v4356_v41  ;;  %v4377_v47 = vrot.slane %v4356_v41, 1  ;;  %v4401_v22 = vrot.slane %v4356_v41, 3  ;;  %v4398_v6 = vrot.slane %v4356_v41, 2 }
 0xe90   : > { %5773 = vpow2.f32 %v5344_v43  ;;  %v5345_v31 = vmul.f32 -1.442695, %v4377_v47  ;;  %v5346_v45 = vmul.f32 -1.442695, %v4401_v22 }
 0xe92   : > { %5775 = vpow2.f32 %v5345_v31 }
 0xe93   : > { %5777 = vpow2.f32 %v5346_v45 }
 0xe96   : > { %v5774_v10 = vpop.eup %5773 }
 0xe97   : > { %v4360_v52 = vadd.f32 1.0, %v5774_v10 }
 0xe98   : > { %v5776_v33 = vpop.eup %5775 }
 0xe99   : > { %v5778_v62 = vpop.eup %5777  ;;  %5779 = vrcp.f32 %v4360_v52  ;;  %v4382_v49 = vadd.f32 1.0, %v5776_v33  ;;  %v4372_v47 = vand.u32 2147483648, %v4360_v52  ;;  %v4370_v10 = vand.u32 2147483647, %v4360_v52 }
 0xe9a   : > { %v4406_v53 = vadd.f32 1.0, %v5778_v62  ;;  %vm4366_vm13 = vweird.f32 %v4360_v52 }
 0xe9b   : > { %5781 = vrcp.f32 %v4382_v49  ;;  %v4394_v3 = vand.u32 2147483648, %v4382_v49  ;;  %v4392_v42 = vand.u32 2147483647, %v4382_v49  ;;  %v4373_v50 = vor.u32 1.1754944e-38, %v4372_v47 }
 0xe9c   : > { %5783 = vrcp.f32 %v4406_v53  ;;  %vm4371_vm0 = vcmp.eq.f32.partialorder %v4370_v10, 8.507059e+37  ;;  %vm4388_vm1 = vweird.f32 %v4382_v49  ;;  %v4418_v47 = vand.u32 2147483648, %v4406_v53  ;;  %v9932_v10 = vld [vmem:[#allocation33_spill] sm:$0xff] }
 0xe9d   : > { %5785 = vtanh.f32 %v4398_v6  ;;  %vm4393_vm6 = vcmp.eq.f32.partialorder %v4392_v42, 8.507059e+37  ;;  %vm4412_vm8 = vweird.f32 %v4406_v53 }
 0xe9f   : > { %v5780_v32 = vpop.eup %5779 }
 0xea0   : > { %v4362_v13 = vmul.f32 %v5780_v32, %v4360_v52  ;;  %vm4367_vm12 = vweird.f32 %v5780_v32 }
 0xea1   : > { %v5782_v56 = vpop.eup %5781  ;;  %vm4368_vm15 = vmor %vm4366_vm13, %vm4367_vm12 }
 0xea2   : > { %v5784_v28 = vpop.eup %5783  ;;  %v4363_v15 = vsub.f32 1.0, %v4362_v13  ;;  %v4384_v43 = vmul.f32 %v5782_v56, %v4382_v49  ;;  %vm4389_vm14 = vweird.f32 %v5782_v56  ;;  %v4416_v49 = vand.u32 2147483647, %v4406_v53 }
 0xea3   : > { %v4408_v22 = vmul.f32 %v5784_v28, %v4406_v53  ;;  %vm4390_vm5 = vmor %vm4388_vm1, %vm4389_vm14  ;;  %v5786_v55 = vpop.eup %5785  ;;  %vm4413_vm7 = vweird.f32 %v5784_v28  ;;  %v9929_v53 = vld [vmem:[#allocation45_spill] sm:$0xff] }
 0xea4   : > { %v4385_v31 = vsub.f32 1.0, %v4384_v43  ;;  %v4364_v45 = vmul.f32 %v5780_v32, %v4363_v15  ;;  %v4395_v43 = vor.u32 1.1754944e-38, %v4394_v3  ;;  %vm4414_vm9 = vmor %vm4412_vm8, %vm4413_vm7  ;;  %v4419_v3 = vor.u32 1.1754944e-38, %v4418_v47  ;;  %v9943_v47 = vld [vmem:[#allocation49_spill] sm:$0xff] }
 0xea5   : > { %v4409_v60 = vsub.f32 1.0, %v4408_v22  ;;  %vm4417_vm10 = vcmp.eq.f32.partialorder %v4416_v49, 8.507059e+37  ;;  %v9931_v22 = vld [vmem:[#allocation32_spill] sm:$0xff] }
 0xea6   : > { %v4365_v33 = vadd.f32 %v5780_v32, %v4364_v45  ;;  %v4386_v62 = vmul.f32 %v5782_v56, %v4385_v31  ;;  %v9944_v49 = vld [vmem:[#allocation40_spill] sm:$0xff] }
 0xea7   : > { %v4410_v52 = vmul.f32 %v5784_v28, %v4409_v60  ;;  %v9928_v60 = vld [vmem:[#allocation36_spill] sm:$0xff] }
 0xea8   : > { %v4369_v41 = vsel %vm4368_vm15, %v5780_v32, %v4365_v33  ;;  %v4387_v13 = vadd.f32 %v5782_v56, %v4386_v62  ;;  %v9933_v33 = vld [vmem:[#allocation28_spill] sm:$0xff]  ;;  %v9934_v62 = vld [vmem:[#allocation51_spill] sm:$0xff] }
 0xea9   : > { %v4374_v16 = vsel %vm4371_vm0, %v4373_v50, %v4369_v41  ;;  %v4411_v12 = vadd.f32 %v5784_v28, %v4410_v52  ;;  %v9935_v41 = vld [vmem:[#allocation37_spill] sm:$0xff]  ;;  %v9940_v52 = vld [vmem:[#allocation38_spill] sm:$0xff] }
 0xeaa   : > { %v4391_v15 = vsel %vm4390_vm5, %v5782_v56, %v4387_v13  ;;  %v4423_v31 = vmul.f32 %v5786_v55, %v4374_v16  ;;  %v9926_v55 = vld [vmem:[#allocation27_spill] sm:$0xff]  ;;  %v9927_v16 = vld [vmem:[#allocation52_spill] sm:$0xff] }
 0xeab   : > { %v4396_v6 = vsel %vm4393_vm6, %v4395_v43, %v4391_v15  ;;  %v4415_v50 = vsel %vm4414_vm9, %v5784_v28, %v4411_v12  ;;  %v9924_v12 = vld [vmem:[#allocation44_spill] sm:$0xff]  ;;  %v9930_v28 = vld [vmem:[#allocation42_spill] sm:$0xff]  ;;  %v9938_v15 = vld [vmem:[#allocation43_spill] sm:$0xff] }
 0xeac   : > { %v4422_v45 = vmul.f32 %v4396_v6, %v8845_v61  ;;  %v4420_v32 = vsel %vm4417_vm10, %v4419_v3, %v4415_v50  ;;  %v9925_v61 = vld [vmem:[#allocation53_spill] sm:$0xff]  ;;  %v9936_v13 = vld [vmem:[#allocation48_spill] sm:$0xff]  ;;  %v9937_v43 = vld [vmem:[#allocation34_spill] sm:$0xff] }
 0xead   : > { %v9939_v6 = vld [vmem:[#allocation30_spill] sm:$0xff]  ;;  %v9946_v3 = vld [vmem:[#allocation35_spill] sm:$0xff] }
 0xeae   : > { %v8950_v2 = vadd.f32 %v4423_v31, %v4422_v45  ;;  %v9941_v45 = vld [vmem:[#allocation39_spill] sm:$0xff]  ;;  %v9942_v31 = vld [vmem:[#allocation46_spill] sm:$0xff] }
 0xeaf   : > { %v9945_v50 = vld [vmem:[#allocation50_spill] sm:$0xff] }
 0xeb0   : > { %5787 = vtanh.f32 %v8950_v2 }
 0xeb6   : > { %v5788_v42 = vpop.eup %5787 }
 0xeb7   : > { %v4426_v56 = vmul.f32 %v5788_v42, %v4420_v32  ;;  %v9947_v42 = vld [vmem:[#allocation41_spill] sm:$0xff]  ;;  %v9948_v32 = vld [vmem:[#allocation47_spill] sm:$0xff] }
 0xeb9   : > { %4427 = vst [vmem:[#allocation3 + $0x3] sm:$0x1] %v4426_v56  ;;  %4445 = vmatmul.f32.vlgmr.msra.gmra.mxu0 %v4426_v56  ;;  %4465 = vmatmul.f32.vlgmr.msra.gmra.mxu1 %v4426_v56 }
 0xeba   : > { %4485 = vmatmul.f32.vlgmr.msrb.gmra.mxu2 %v4426_v56  ;;  %4505 = vmatmul.f32.vlgmr.msrb.gmra.mxu3 %v4426_v56  ;;  %v9949_v56 = vld [vmem:[#allocation29_spill] sm:$0xff] }
 0xebb   : > { %4757 = vmatpush.msra.mxu0 %v8683_v40  ;;  %4777 = vmatpush.msra.mxu1 %v8686_v38 }
 0xebc   : > { %4797 = vmatpush.msrb.mxu2 %v8689_v21  ;;  %4817 = vmatpush.msrb.mxu3 %v8692_v11 }
 0xebd   : > { %4758 = vmatpush.msra.mxu0 %v8695_v18  ;;  %4778 = vmatpush.msra.mxu1 %v8698_v0 }
 0xebe   : > { %4798 = vmatpush.msrb.mxu2 %v8701_v24  ;;  %4818 = vmatpush.msrb.mxu3 %v8704_v58 }
 0xebf   : > { %4759 = vmatpush.msra.mxu0 %v8707_v57  ;;  %4779 = vmatpush.msra.mxu1 %v8710_v1 }
 0xec0   : > { %4799 = vmatpush.msrb.mxu2 %v8713_v14  ;;  %4819 = vmatpush.msrb.mxu3 %v8716_v51 }
 0xec1   : > { %4760 = vmatpush.msra.mxu0 %v8719_v25  ;;  %4780 = vmatpush.msra.mxu1 %v8722_v26 }
 0xec2   : > { %4800 = vmatpush.msrb.mxu2 %v8725_v37  ;;  %4820 = vmatpush.msrb.mxu3 %v8728_v4 }
 0xec3   : > { %4761 = vmatpush.msra.mxu0 %v8731_v17  ;;  %4781 = vmatpush.msra.mxu1 %v8734_v20 }
 0xec4   : > { %4801 = vmatpush.msrb.mxu2 %v8737_v19  ;;  %4821 = vmatpush.msrb.mxu3 %v8740_v35 }
 0xec5   : > { %4762 = vmatpush.msra.mxu0 %v8743_v27  ;;  %4782 = vmatpush.msra.mxu1 %v8746_v30 }
 0xec6   : > { %4802 = vmatpush.msrb.mxu2 %v8749_v8  ;;  %4822 = vmatpush.msrb.mxu3 %v8752_v59 }
 0xec7   : > { %4763 = vmatpush.msra.mxu0 %v8755_v9  ;;  %4783 = vmatpush.msra.mxu1 %v8758_v7 }
 0xec8   : > { %4803 = vmatpush.msrb.mxu2 %v8761_v63  ;;  %4823 = vmatpush.msrb.mxu3 %v8764_v46 }
 0xec9   : > { %4764 = vmatpush.msra.mxu0 %v8767_v29  ;;  %4784 = vmatpush.msra.mxu1 %v8770_v36 }
 0xeca   : > { %4804 = vmatpush.msrb.mxu2 %v8773_v23  ;;  %4824 = vmatpush.msrb.mxu3 %v8776_v54 }
 0xecb   : > { %4765 = vmatpush.msra.mxu0 %v8779_v39  ;;  %4785 = vmatpush.msra.mxu1 %v8782_v34 }
 0xecc   : > { %4805 = vmatpush.msrb.mxu2 %v8785_v5  ;;  %4825 = vmatpush.msrb.mxu3 %v8788_v44 }
 0xecd   : > { %4766 = vmatpush.msra.mxu0 %v8884_v48  ;;  %4786 = vmatpush.msra.mxu1 %v9924_v12 }
 0xece   : > { %4806 = vmatpush.msrb.mxu2 %v9925_v61  ;;  %4826 = vmatpush.msrb.mxu3 %v9926_v55 }
 0xecf   : > { %4767 = vmatpush.msra.mxu0 %v9927_v16  ;;  %4787 = vmatpush.msra.mxu1 %v9928_v60 }
 0xed0   : > { %4807 = vmatpush.msrb.mxu2 %v9929_v53  ;;  %4827 = vmatpush.msrb.mxu3 %v9930_v28 }
 0xed1   : > { %4768 = vmatpush.msra.mxu0 %v9931_v22  ;;  %4788 = vmatpush.msra.mxu1 %v9932_v10 }
 0xed2   : > { %4808 = vmatpush.msrb.mxu2 %v9933_v33  ;;  %4828 = vmatpush.msrb.mxu3 %v9934_v62 }
 0xed3   : > { %4769 = vmatpush.msra.mxu0 %v9935_v41  ;;  %4789 = vmatpush.msra.mxu1 %v9936_v13 }
 0xed4   : > { %4809 = vmatpush.msrb.mxu2 %v9937_v43  ;;  %4829 = vmatpush.msrb.mxu3 %v9938_v15 }
 0xed5   : > { %4770 = vmatpush.msra.mxu0 %v9939_v6  ;;  %4790 = vmatpush.msra.mxu1 %v9940_v52  ;;  %v9950_v6 = vld [vmem:[#allocation31_spill] sm:$0xff] }
 0xed6   : > { %4810 = vmatpush.msrb.mxu2 %v9941_v45  ;;  %4830 = vmatpush.msrb.mxu3 %v9942_v31 }
 0xed7   : > { %4771 = vmatpush.msra.mxu0 %v9943_v47  ;;  %4791 = vmatpush.msra.mxu1 %v9944_v49 }
 0xed8   : > { %4811 = vmatpush.msrb.mxu2 %v9945_v50  ;;  %4831 = vmatpush.msrb.mxu3 %v9946_v3  ;;  %v4428_v3 = vld [vmem:[#allocation2 + $0x4] ss:$8 sm:$0xf] }
 0xed9   : > { %4772 = vmatpush.msra.mxu0 %v9947_v42  ;;  %4792 = vmatpush.msra.mxu1 %v9948_v32 }
 0xeda   : > { %4812 = vmatpush.msrb.mxu2 %v9949_v56  ;;  %4832 = vmatpush.msrb.mxu3 %v9950_v6 }
 0xf36   : > { %v4466_v52 = vpop.f32.mrf.mxu1  ;;  %v4446_v13 = vpop.f32.mrf.mxu0 }
 0xf37   : > { %v4513_v45 = vrot.slane %v4466_v52, 7 }
 0xf39   : > { %v4516_v49 = vsel %vm780_vm2, %v4446_v13, %v4513_v45 }
 0xf3d   : > { %v4486_v15 = vpop.f32.mrf.mxu2  ;;  %v4506_v31 = vpop.f32.mrf.mxu3 }
 0xf3e   : > { %v4514_v43 = vrot.slane %v4486_v15, 6  ;;  %v4515_v47 = vrot.slane %v4506_v31, 5 }
 0xf40   : > { %v4517_v50 = vsel %vm782_vm3, %v4514_v43, %v4515_v47 }
 0xf41   : > { %v4518_v42 = vsel %vm784_vm4, %v4516_v49, %v4517_v50 }
 0xf42   : > { %v4520_v41 = vadd.f32 %v4518_v42, %v4428_v3 }
 0xf44   : > { %v5347_v32 = vmul.f32 -1.442695, %v4520_v41  ;;  %v4541_v62 = vrot.slane %v4520_v41, 1  ;;  %v4565_v56 = vrot.slane %v4520_v41, 3  ;;  %v4562_v50 = vrot.slane %v4520_v41, 2 }
 0xf46   : > { %5789 = vpow2.f32 %v5347_v32  ;;  %v5348_v6 = vmul.f32 -1.442695, %v4541_v62  ;;  %v5349_v33 = vmul.f32 -1.442695, %v4565_v56 }
 0xf48   : > { %5791 = vpow2.f32 %v5348_v6 }
 0xf49   : > { %5793 = vpow2.f32 %v5349_v33 }
 0xf4c   : > { %v5790_v52 = vpop.eup %5789 }
 0xf4d   : > { %v4524_v15 = vadd.f32 1.0, %v5790_v52 }
 0xf4e   : > { %v5792_v31 = vpop.eup %5791 }
 0xf4f   : > { %v5794_v10 = vpop.eup %5793  ;;  %5795 = vrcp.f32 %v4524_v15  ;;  %v4546_v13 = vadd.f32 1.0, %v5792_v31  ;;  %v4536_v62 = vand.u32 2147483648, %v4524_v15  ;;  %v4534_v52 = vand.u32 2147483647, %v4524_v15 }
 0xf50   : > { %v4570_v45 = vadd.f32 1.0, %v5794_v10  ;;  %vm4530_vm12 = vweird.f32 %v4524_v15 }
 0xf51   : > { %5797 = vrcp.f32 %v4546_v13  ;;  %v4558_v22 = vand.u32 2147483648, %v4546_v13  ;;  %v4556_v28 = vand.u32 2147483647, %v4546_v13  ;;  %v4537_v53 = vor.u32 1.1754944e-38, %v4536_v62 }
 0xf52   : > { %5799 = vrcp.f32 %v4570_v45  ;;  %vm4535_vm15 = vcmp.eq.f32.partialorder %v4534_v52, 8.507059e+37  ;;  %vm4552_vm0 = vweird.f32 %v4546_v13  ;;  %v4582_v62 = vand.u32 2147483648, %v4570_v45 }
 0xf53   : > { %5801 = vtanh.f32 %v4562_v50  ;;  %vm4557_vm5 = vcmp.eq.f32.partialorder %v4556_v28, 8.507059e+37  ;;  %vm4576_vm7 = vweird.f32 %v4570_v45 }
 0xf55   : > { %v5796_v43 = vpop.eup %5795 }
 0xf56   : > { %v4526_v47 = vmul.f32 %v5796_v43, %v4524_v15  ;;  %vm4531_vm11 = vweird.f32 %v5796_v43 }
 0xf57   : > { %v5798_v49 = vpop.eup %5797  ;;  %vm4532_vm14 = vmor %vm4530_vm12, %vm4531_vm11 }
 0xf58   : > { %v5800_v3 = vpop.eup %5799  ;;  %v4527_v42 = vsub.f32 1.0, %v4526_v47  ;;  %v4548_v32 = vmul.f32 %v5798_v49, %v4546_v13  ;;  %vm4553_vm13 = vweird.f32 %v5798_v49  ;;  %v4580_v13 = vand.u32 2147483647, %v4570_v45 }
 0xf59   : > { %v4572_v56 = vmul.f32 %v5800_v3, %v4570_v45  ;;  %vm4554_vm1 = vmor %vm4552_vm0, %vm4553_vm13  ;;  %v5802_v55 = vpop.eup %5801  ;;  %vm4577_vm6 = vweird.f32 %v5800_v3 }
 0xf5a   : > { %v4549_v6 = vsub.f32 1.0, %v4548_v32  ;;  %v4528_v33 = vmul.f32 %v5796_v43, %v4527_v42  ;;  %v4559_v32 = vor.u32 1.1754944e-38, %v4558_v22  ;;  %vm4578_vm8 = vmor %vm4576_vm7, %vm4577_vm6  ;;  %v4583_v22 = vor.u32 1.1754944e-38, %v4582_v62 }
 0xf5b   : > { %v4573_v60 = vsub.f32 1.0, %v4572_v56  ;;  %vm4581_vm9 = vcmp.eq.f32.partialorder %v4580_v13, 8.507059e+37 }
 0xf5c   : > { %v4529_v31 = vadd.f32 %v5796_v43, %v4528_v33  ;;  %v4550_v10 = vmul.f32 %v5798_v49, %v4549_v6 }
 0xf5d   : > { %v4574_v15 = vmul.f32 %v5800_v3, %v4573_v60 }
 0xf5e   : > { %v4533_v41 = vsel %vm4532_vm14, %v5796_v43, %v4529_v31  ;;  %v4551_v47 = vadd.f32 %v5798_v49, %v4550_v10 }
 0xf5f   : > { %v4538_v16 = vsel %vm4535_vm15, %v4537_v53, %v4533_v41  ;;  %v4575_v12 = vadd.f32 %v5800_v3, %v4574_v15 }
 0xf60   : > { %v4555_v42 = vsel %vm4554_vm1, %v5798_v49, %v4551_v47  ;;  %v4587_v6 = vmul.f32 %v5802_v55, %v4538_v16 }
 0xf61   : > { %v4560_v50 = vsel %vm4557_vm5, %v4559_v32, %v4555_v42  ;;  %v4579_v53 = vsel %vm4578_vm8, %v5800_v3, %v4575_v12 }
 0xf62   : > { %v4586_v33 = vmul.f32 %v4560_v50, %v8950_v2  ;;  %v4584_v43 = vsel %vm4581_vm9, %v4583_v22, %v4579_v53 }
 0xf64   : > { %v9021_v61 = vadd.f32 %v4587_v6, %v4586_v33 }
 0xf66   : > { %5803 = vtanh.f32 %v9021_v61 }
 0xf6c   : > { %v5804_v28 = vpop.eup %5803 }
 0xf6d   : > { %v4590_v49 = vmul.f32 %v5804_v28, %v4584_v43 }
 0xf6f   : > { %4591 = vst [vmem:[#allocation3 + $0x4] sm:$0x1] %v4590_v49  ;;  %4609 = vmatmul.f32.vlgmr.msrb.gmra.mxu0 %v4590_v49  ;;  %4629 = vmatmul.f32.vlgmr.msrb.gmra.mxu1 %v4590_v49 }
 0xf70   : > { %4649 = vmatmul.f32.vlgmr.msra.gmra.mxu2 %v4590_v49  ;;  %4669 = vmatmul.f32.vlgmr.msra.gmra.mxu3 %v4590_v49 }
 0xf71   : > { %4921 = vmatpush.msrb.mxu0 %v8683_v40  ;;  %4941 = vmatpush.msrb.mxu1 %v8686_v38  ;;  %v9951_v40 = vld [vmem:[#allocation44_spill] sm:$0xff]  ;;  %v9952_v38 = vld [vmem:[#allocation53_spill] sm:$0xff] }
 0xf72   : > { %4961 = vmatpush.msra.mxu2 %v8689_v21  ;;  %4981 = vmatpush.msra.mxu3 %v8692_v11  ;;  %v9953_v21 = vld [vmem:[#allocation27_spill] sm:$0xff]  ;;  %v9954_v11 = vld [vmem:[#allocation52_spill] sm:$0xff] }
 0xf73   : > { %4922 = vmatpush.msrb.mxu0 %v8695_v18  ;;  %4942 = vmatpush.msrb.mxu1 %v8698_v0  ;;  %v9955_v18 = vld [vmem:[#allocation36_spill] sm:$0xff]  ;;  %v9956_v0 = vld [vmem:[#allocation45_spill] sm:$0xff] }
 0xf74   : > { %4962 = vmatpush.msra.mxu2 %v8701_v24  ;;  %4982 = vmatpush.msra.mxu3 %v8704_v58  ;;  %v9957_v24 = vld [vmem:[#allocation42_spill] sm:$0xff]  ;;  %v9958_v58 = vld [vmem:[#allocation32_spill] sm:$0xff] }
 0xf75   : > { %4923 = vmatpush.msrb.mxu0 %v8707_v57  ;;  %4943 = vmatpush.msrb.mxu1 %v8710_v1  ;;  %v9959_v57 = vld [vmem:[#allocation33_spill] sm:$0xff]  ;;  %v9960_v1 = vld [vmem:[#allocation28_spill] sm:$0xff] }
 0xf76   : > { %4963 = vmatpush.msra.mxu2 %v8713_v14  ;;  %4983 = vmatpush.msra.mxu3 %v8716_v51  ;;  %v9961_v14 = vld [vmem:[#allocation51_spill] sm:$0xff]  ;;  %v9962_v51 = vld [vmem:[#allocation37_spill] sm:$0xff] }
 0xf77   : > { %4924 = vmatpush.msrb.mxu0 %v8719_v25  ;;  %4944 = vmatpush.msrb.mxu1 %v8722_v26  ;;  %v9963_v25 = vld [vmem:[#allocation48_spill] sm:$0xff]  ;;  %v9964_v26 = vld [vmem:[#allocation34_spill] sm:$0xff] }
 0xf78   : > { %4964 = vmatpush.msra.mxu2 %v8725_v37  ;;  %4984 = vmatpush.msra.mxu3 %v8728_v4  ;;  %v9965_v37 = vld [vmem:[#allocation43_spill] sm:$0xff]  ;;  %v9966_v4 = vld [vmem:[#allocation30_spill] sm:$0xff] }
 0xf79   : > { %4925 = vmatpush.msrb.mxu0 %v8731_v17  ;;  %4945 = vmatpush.msrb.mxu1 %v8734_v20  ;;  %v9967_v17 = vld [vmem:[#allocation38_spill] sm:$0xff]  ;;  %v9968_v20 = vld [vmem:[#allocation39_spill] sm:$0xff] }
 0xf7a   : > { %4965 = vmatpush.msra.mxu2 %v8737_v19  ;;  %4985 = vmatpush.msra.mxu3 %v8740_v35  ;;  %v9969_v19 = vld [vmem:[#allocation46_spill] sm:$0xff]  ;;  %v9970_v35 = vld [vmem:[#allocation49_spill] sm:$0xff] }
 0xf7b   : > { %4926 = vmatpush.msrb.mxu0 %v8743_v27  ;;  %4946 = vmatpush.msrb.mxu1 %v8746_v30  ;;  %v9971_v27 = vld [vmem:[#allocation40_spill] sm:$0xff]  ;;  %v9972_v30 = vld [vmem:[#allocation50_spill] sm:$0xff] }
 0xf7c   : > { %4966 = vmatpush.msra.mxu2 %v8749_v8  ;;  %4986 = vmatpush.msra.mxu3 %v8752_v59  ;;  %v9973_v8 = vld [vmem:[#allocation35_spill] sm:$0xff]  ;;  %v9974_v59 = vld [vmem:[#allocation41_spill] sm:$0xff] }
 0xf7d   : > { %4927 = vmatpush.msrb.mxu0 %v8755_v9  ;;  %4947 = vmatpush.msrb.mxu1 %v8758_v7  ;;  %v9975_v9 = vld [vmem:[#allocation47_spill] sm:$0xff]  ;;  %v9976_v7 = vld [vmem:[#allocation29_spill] sm:$0xff] }
 0xf7e   : > { %4967 = vmatpush.msra.mxu2 %v8761_v63  ;;  %4987 = vmatpush.msra.mxu3 %v8764_v46  ;;  %v9977_v63 = vld [vmem:[#allocation31_spill] sm:$0xff] }
 0xf7f   : > { %4928 = vmatpush.msrb.mxu0 %v8767_v29  ;;  %4948 = vmatpush.msrb.mxu1 %v8770_v36 }
 0xf80   : > { %4968 = vmatpush.msra.mxu2 %v8773_v23  ;;  %4988 = vmatpush.msra.mxu3 %v8776_v54 }
 0xf81   : > { %4929 = vmatpush.msrb.mxu0 %v8779_v39  ;;  %4949 = vmatpush.msrb.mxu1 %v8782_v34 }
 0xf82   : > { %4969 = vmatpush.msra.mxu2 %v8785_v5  ;;  %4989 = vmatpush.msra.mxu3 %v8788_v44 }
 0xf83   : > { %4930 = vmatpush.msrb.mxu0 %v8884_v48  ;;  %4950 = vmatpush.msrb.mxu1 %v9951_v40  ;;  %v4592_v48 = vld [vmem:[#allocation2 + $0x5] ss:$8 sm:$0xf] }
 0xf84   : > { %4970 = vmatpush.msra.mxu2 %v9952_v38  ;;  %4990 = vmatpush.msra.mxu3 %v9953_v21 }
 0xf85   : > { %4931 = vmatpush.msrb.mxu0 %v9954_v11  ;;  %4951 = vmatpush.msrb.mxu1 %v9955_v18 }
 0xf86   : > { %4971 = vmatpush.msra.mxu2 %v9956_v0  ;;  %4991 = vmatpush.msra.mxu3 %v9957_v24 }
 0xf87   : > { %4932 = vmatpush.msrb.mxu0 %v9958_v58  ;;  %4952 = vmatpush.msrb.mxu1 %v9959_v57 }
 0xf88   : > { %4972 = vmatpush.msra.mxu2 %v9960_v1  ;;  %4992 = vmatpush.msra.mxu3 %v9961_v14 }
 0xf89   : > { %4933 = vmatpush.msrb.mxu0 %v9962_v51  ;;  %4953 = vmatpush.msrb.mxu1 %v9963_v25 }
 0xf8a   : > { %4973 = vmatpush.msra.mxu2 %v9964_v26  ;;  %4993 = vmatpush.msra.mxu3 %v9965_v37 }
 0xf8b   : > { %4934 = vmatpush.msrb.mxu0 %v9966_v4  ;;  %4954 = vmatpush.msrb.mxu1 %v9967_v17 }
 0xf8c   : > { %4974 = vmatpush.msra.mxu2 %v9968_v20  ;;  %4994 = vmatpush.msra.mxu3 %v9969_v19 }
 0xf8d   : > { %4935 = vmatpush.msrb.mxu0 %v9970_v35  ;;  %4955 = vmatpush.msrb.mxu1 %v9971_v27 }
 0xf8e   : > { %4975 = vmatpush.msra.mxu2 %v9972_v30  ;;  %4995 = vmatpush.msra.mxu3 %v9973_v8 }
 0xf8f   : > { %4936 = vmatpush.msrb.mxu0 %v9974_v59  ;;  %4956 = vmatpush.msrb.mxu1 %v9975_v9 }
 0xf90   : > { %4976 = vmatpush.msra.mxu2 %v9976_v7  ;;  %4996 = vmatpush.msra.mxu3 %v9977_v63 }
 0xfec   : > { %v4630_v46 = vpop.f32.mrf.mxu1  ;;  %v4610_v34 = vpop.f32.mrf.mxu0 }
 0xfed   : > { %v4677_v29 = vrot.slane %v4630_v46, 7 }
 0xfef   : > { %v4680_v5 = vsel %vm780_vm2, %v4610_v34, %v4677_v29 }
 0xff3   : > { %v4650_v36 = vpop.f32.mrf.mxu2  ;;  %v4670_v23 = vpop.f32.mrf.mxu3 }
 0xff4   : > { %v4678_v54 = vrot.slane %v4650_v36, 6  ;;  %v4679_v39 = vrot.slane %v4670_v23, 5 }
 0xff6   : > { %v4681_v44 = vsel %vm782_vm3, %v4678_v54, %v4679_v39  ;;  %v4756_v39 = vld [vmem:[#allocation2 + $0x6] ss:$8 sm:$0xf] }
 0xff7   : > { %v4682_v2 = vsel %vm784_vm4, %v4680_v5, %v4681_v44 }
 0xff8   : > { %v4684_v12 = vadd.f32 %v4682_v2, %v4592_v48 }
 0xffa   : > { %v5350_v55 = vmul.f32 -1.442695, %v4684_v12  ;;  %v4705_v16 = vrot.slane %v4684_v12, 1  ;;  %v4729_v60 = vrot.slane %v4684_v12, 3  ;;  %v4726_v15 = vrot.slane %v4684_v12, 2 }
 0xffc   : > { %5805 = vpow2.f32 %v5350_v55  ;;  %v5351_v45 = vmul.f32 -1.442695, %v4705_v16  ;;  %v5352_v3 = vmul.f32 -1.442695, %v4729_v60 }
 0xffe   : > { %5807 = vpow2.f32 %v5351_v45 }
 0xfff   : > { %5809 = vpow2.f32 %v5352_v3 }
0x1002   : > { %v5806_v56 = vpop.eup %5805 }
0x1003   : > { %v4688_v52 = vadd.f32 1.0, %v5806_v56 }
0x1004   : > { %v5808_v31 = vpop.eup %5807 }
0x1005   : > { %v5810_v10 = vpop.eup %5809  ;;  %5811 = vrcp.f32 %v4688_v52  ;;  %v4710_v41 = vadd.f32 1.0, %v5808_v31  ;;  %v4700_v13 = vand.u32 2147483648, %v4688_v52  ;;  %v4698_v43 = vand.u32 2147483647, %v4688_v52 }
0x1006   : > { %v4734_v47 = vadd.f32 1.0, %v5810_v10  ;;  %vm4694_vm11 = vweird.f32 %v4688_v52 }
0x1007   : > { %5813 = vrcp.f32 %v4710_v41  ;;  %v4722_v49 = vand.u32 2147483648, %v4710_v41  ;;  %v4720_v21 = vand.u32 2147483647, %v4710_v41  ;;  %v4701_v11 = vor.u32 1.1754944e-38, %v4700_v13 }
0x1008   : > { %5815 = vrcp.f32 %v4734_v47  ;;  %vm4699_vm14 = vcmp.eq.f32.partialorder %v4698_v43, 8.507059e+37  ;;  %vm4716_vm15 = vweird.f32 %v4710_v41  ;;  %v4746_v20 = vand.u32 2147483648, %v4734_v47 }
0x1009   : > { %5817 = vtanh.f32 %v4726_v15  ;;  %v4723_v57 = vor.u32 1.1754944e-38, %v4722_v49  ;;  %vm4721_vm1 = vcmp.eq.f32.partialorder %v4720_v21, 8.507059e+37  ;;  %vm4740_vm6 = vweird.f32 %v4734_v47 }
0x100a   : > { %v4744_v19 = vand.u32 2147483647, %v4734_v47  ;;  %v4747_v27 = vor.u32 1.1754944e-38, %v4746_v20 }
0x100b   : > { %v5812_v32 = vpop.eup %5811 }
0x100c   : > { %v4690_v42 = vmul.f32 %v5812_v32, %v4688_v52  ;;  %vm4695_vm10 = vweird.f32 %v5812_v32  ;;  %vm4745_vm8 = vcmp.eq.f32.partialorder %v4744_v19, 8.507059e+37 }
0x100d   : > { %v5814_v50 = vpop.eup %5813  ;;  %vm4696_vm13 = vmor %vm4694_vm11, %vm4695_vm10 }
0x100e   : > { %v5816_v33 = vpop.eup %5815  ;;  %v4691_v6 = vsub.f32 1.0, %v4690_v42  ;;  %v4712_v62 = vmul.f32 %v5814_v50, %v4710_v41  ;;  %vm4717_vm12 = vweird.f32 %v5814_v50 }
0x100f   : > { %v4736_v53 = vmul.f32 %v5816_v33, %v4734_v47  ;;  %vm4718_vm0 = vmor %vm4716_vm15, %vm4717_vm12  ;;  %v5818_v14 = vpop.eup %5817  ;;  %vm4741_vm5 = vweird.f32 %v5816_v33 }
0x1010   : > { %v4713_v22 = vsub.f32 1.0, %v4712_v62  ;;  %v4692_v28 = vmul.f32 %v5812_v32, %v4691_v6  ;;  %vm4742_vm7 = vmor %vm4740_vm6, %vm4741_vm5 }
0x1011   : > { %v4737_v18 = vsub.f32 1.0, %v4736_v53 }
0x1012   : > { %v4693_v40 = vadd.f32 %v5812_v32, %v4692_v28  ;;  %v4714_v38 = vmul.f32 %v5814_v50, %v4713_v22 }
0x1013   : > { %v4738_v25 = vmul.f32 %v5816_v33, %v4737_v18 }
0x1014   : > { %v4697_v0 = vsel %vm4696_vm13, %v5812_v32, %v4693_v40  ;;  %v4715_v24 = vadd.f32 %v5814_v50, %v4714_v38 }
0x1015   : > { %v4702_v58 = vsel %vm4699_vm14, %v4701_v11, %v4697_v0  ;;  %v4739_v17 = vadd.f32 %v5816_v33, %v4738_v25 }
0x1016   : > { %v4719_v1 = vsel %vm4718_vm0, %v5814_v50, %v4715_v24  ;;  %v4751_v37 = vmul.f32 %v5818_v14, %v4702_v58 }
0x1017   : > { %v4724_v51 = vsel %vm4721_vm1, %v4723_v57, %v4719_v1  ;;  %v4743_v35 = vsel %vm4742_vm7, %v5816_v33, %v4739_v17 }
0x1018   : > { %v4750_v26 = vmul.f32 %v4724_v51, %v9021_v61  ;;  %v4748_v8 = vsel %vm4745_vm8, %v4747_v27, %v4743_v35 }
0x101a   : > { %v9092_v4 = vadd.f32 %v4751_v37, %v4750_v26 }
0x101c   : > { %5819 = vtanh.f32 %v9092_v4 }
0x1022   : > { %v5820_v30 = vpop.eup %5819 }
0x1023   : > { %v4754_v59 = vmul.f32 %v5820_v30, %v4748_v8  ;;  %v5100_v30 = vld [vmem:[#allocation13 + $0x78] sm:$0xff]  ;;  %v5099_v8 = vld [vmem:[#allocation13 + $0x70] sm:$0xff] }
0x1025   : > { %4755 = vst [vmem:[#allocation3 + $0x5] sm:$0x1] %v4754_v59  ;;  %4773 = vmatmul.f32.vlgmr.msra.gmra.mxu0 %v4754_v59  ;;  %4793 = vmatmul.f32.vlgmr.msra.gmra.mxu1 %v4754_v59 }
0x1026   : > { %4813 = vmatmul.f32.vlgmr.msrb.gmra.mxu2 %v4754_v59  ;;  %4833 = vmatmul.f32.vlgmr.msrb.gmra.mxu3 %v4754_v59 }
0x1027   : > { %5105 = vmatpush.msra.mxu0 %v5100_v30 }
0x1029   : > { %5106 = vmatpush.msra.mxu0 %v5099_v8 }
0x10a2   : > { %v4794_v61 = vpop.f32.mrf.mxu1  ;;  %v4774_v36 = vpop.f32.mrf.mxu0 }
0x10a3   : > { %v4841_v9 = vrot.slane %v4794_v61, 7 }
0x10a5   : > { %v4844_v23 = vsel %vm780_vm2, %v4774_v36, %v4841_v9  ;;  %v5097_v36 = vld [vmem:[#allocation13 + $0x60] sm:$0xff] }
0x10a9   : > { %v4814_v7 = vpop.f32.mrf.mxu2  ;;  %v4834_v63 = vpop.f32.mrf.mxu3 }
0x10aa   : > { %v4842_v46 = vrot.slane %v4814_v7, 6  ;;  %v4843_v29 = vrot.slane %v4834_v63, 5  ;;  %v5098_v7 = vld [vmem:[#allocation13 + $0x68] sm:$0xff] }
0x10ab   : > { %5107 = vmatpush.msra.mxu0 %v5098_v7 }
0x10ac   : > { %v4845_v54 = vsel %vm782_vm3, %v4842_v46, %v4843_v29 }
0x10ad   : > { %v4846_v34 = vsel %vm784_vm4, %v4844_v23, %v4845_v54  ;;  %5108 = vmatpush.msra.mxu0 %v5097_v36 }
0x10ae   : > { %v4848_v5 = vadd.f32 %v4846_v34, %v4756_v39  ;;  %v4920_v39 = vld [vmem:[#allocation2 + $0x7] ss:$8 sm:$0xf] }
0x10b0   : > { %v5353_v44 = vmul.f32 -1.442695, %v4848_v5  ;;  %v4869_v48 = vrot.slane %v4848_v5, 1  ;;  %v4893_v2 = vrot.slane %v4848_v5, 3  ;;  %v4890_v47 = vrot.slane %v4848_v5, 2  ;;  %v5096_v5 = vld [vmem:[#allocation13 + $0x58] sm:$0xff] }
0x10b1   : > { %5109 = vmatpush.msra.mxu0 %v5096_v5 }
0x10b2   : > { %5821 = vpow2.f32 %v5353_v44  ;;  %v5354_v12 = vmul.f32 -1.442695, %v4869_v48  ;;  %v5355_v55 = vmul.f32 -1.442695, %v4893_v2  ;;  %v5095_v48 = vld [vmem:[#allocation13 + $0x50] sm:$0xff] }
0x10b3   : > { %5110 = vmatpush.msra.mxu0 %v5095_v48 }
0x10b4   : > { %5823 = vpow2.f32 %v5354_v12 }
0x10b5   : > { %5825 = vpow2.f32 %v5355_v55 }
0x10b8   : > { %v5822_v16 = vpop.eup %5821 }
0x10b9   : > { %v4852_v60 = vadd.f32 1.0, %v5822_v16  ;;  %v5094_v16 = vld [vmem:[#allocation13 + $0x48] sm:$0xff] }
0x10ba   : > { %v5824_v45 = vpop.eup %5823  ;;  %5111 = vmatpush.msra.mxu0 %v5094_v16 }
0x10bb   : > { %v5826_v3 = vpop.eup %5825  ;;  %5827 = vrcp.f32 %v4852_v60  ;;  %v4874_v56 = vadd.f32 1.0, %v5824_v45  ;;  %v4864_v15 = vand.u32 2147483648, %v4852_v60  ;;  %v4862_v13 = vand.u32 2147483647, %v4852_v60 }
0x10bc   : > { %v4898_v52 = vadd.f32 1.0, %v5826_v3  ;;  %vm4858_vm10 = vweird.f32 %v4852_v60  ;;  %v5093_v3 = vld [vmem:[#allocation13 + $0x40] sm:$0xff] }
0x10bd   : > { %5829 = vrcp.f32 %v4874_v56  ;;  %v4886_v53 = vand.u32 2147483648, %v4874_v56  ;;  %v4884_v43 = vand.u32 2147483647, %v4874_v56  ;;  %v4865_v49 = vor.u32 1.1754944e-38, %v4864_v15  ;;  %5112 = vmatpush.msra.mxu0 %v5093_v3 }
0x10be   : > { %5831 = vrcp.f32 %v4898_v52  ;;  %vm4863_vm13 = vcmp.eq.f32.partialorder %v4862_v13, 8.507059e+37  ;;  %vm4880_vm14 = vweird.f32 %v4874_v56  ;;  %v4910_v26 = vand.u32 2147483648, %v4898_v52 }
0x10bf   : > { %5833 = vtanh.f32 %v4890_v47  ;;  %v4887_v18 = vor.u32 1.1754944e-38, %v4886_v53  ;;  %vm4885_vm0 = vcmp.eq.f32.partialorder %v4884_v43, 8.507059e+37  ;;  %vm4904_vm5 = vweird.f32 %v4898_v52  ;;  %v5085_v53 = vld [vmem:[#allocation13] sm:$0xff] }
0x10c0   : > { %v4908_v37 = vand.u32 2147483647, %v4898_v52  ;;  %v4911_v20 = vor.u32 1.1754944e-38, %v4910_v26 }
0x10c1   : > { %v5828_v31 = vpop.eup %5827 }
0x10c2   : > { %v4854_v10 = vmul.f32 %v5828_v31, %v4852_v60  ;;  %vm4859_vm9 = vweird.f32 %v5828_v31  ;;  %vm4909_vm7 = vcmp.eq.f32.partialorder %v4908_v37, 8.507059e+37 }
0x10c3   : > { %v5830_v41 = vpop.eup %5829  ;;  %vm4860_vm12 = vmor %vm4858_vm10, %vm4859_vm9 }
0x10c4   : > { %v5832_v32 = vpop.eup %5831  ;;  %v4855_v42 = vsub.f32 1.0, %v4854_v10  ;;  %v4876_v50 = vmul.f32 %v5830_v41, %v4874_v56  ;;  %vm4881_vm11 = vweird.f32 %v5830_v41  ;;  %v5092_v56 = vld [vmem:[#allocation13 + $0x38] sm:$0xff] }
0x10c5   : > { %v4900_v33 = vmul.f32 %v5832_v32, %v4898_v52  ;;  %vm4882_vm15 = vmor %vm4880_vm14, %vm4881_vm11  ;;  %v5834_v24 = vpop.eup %5833  ;;  %vm4905_vm1 = vweird.f32 %v5832_v32  ;;  %5113 = vmatpush.msra.mxu0 %v5092_v56  ;;  %v5091_v52 = vld [vmem:[#allocation13 + $0x30] sm:$0xff] }
0x10c6   : > { %v4877_v6 = vsub.f32 1.0, %v4876_v50  ;;  %v4856_v62 = vmul.f32 %v5828_v31, %v4855_v42  ;;  %vm4906_vm6 = vmor %vm4904_vm5, %vm4905_vm1  ;;  %v5089_v42 = vld [vmem:[#allocation13 + $0x20] sm:$0xff] }
0x10c7   : > { %v4901_v40 = vsub.f32 1.0, %v4900_v33  ;;  %5114 = vmatpush.msra.mxu0 %v5091_v52  ;;  %v5088_v33 = vld [vmem:[#allocation13 + $0x18] sm:$0xff] }
0x10c8   : > { %v4857_v22 = vadd.f32 %v5828_v31, %v4856_v62  ;;  %v4878_v28 = vmul.f32 %v5830_v41, %v4877_v6  ;;  %v5087_v6 = vld [vmem:[#allocation13 + $0x10] sm:$0xff]  ;;  %v5086_v62 = vld [vmem:[#allocation13 + $0x8] sm:$0xff] }
0x10c9   : > { %v4902_v57 = vmul.f32 %v5832_v32, %v4901_v40 }
0x10ca   : > { %v4861_v38 = vsel %vm4860_vm12, %v5828_v31, %v4857_v22  ;;  %v4879_v21 = vadd.f32 %v5830_v41, %v4878_v28 }
0x10cb   : > { %v4866_v11 = vsel %vm4863_vm13, %v4865_v49, %v4861_v38  ;;  %v4903_v25 = vadd.f32 %v5832_v32, %v4902_v57 }
0x10cc   : > { %v4883_v0 = vsel %vm4882_vm15, %v5830_v41, %v4879_v21  ;;  %v4915_v14 = vmul.f32 %v5834_v24, %v4866_v11  ;;  %v5090_v41 = vld [vmem:[#allocation13 + $0x28] sm:$0xff] }
0x10cd   : > { %v4888_v58 = vsel %vm4885_vm0, %v4887_v18, %v4883_v0  ;;  %v4907_v17 = vsel %vm4906_vm6, %v5832_v32, %v4903_v25  ;;  %5115 = vmatpush.msra.mxu0 %v5090_v41 }
0x10ce   : > { %v4914_v1 = vmul.f32 %v4888_v58, %v9092_v4  ;;  %v4912_v35 = vsel %vm4909_vm7, %v4911_v20, %v4907_v17 }
0x10cf   : > { %5116 = vmatpush.msra.mxu0 %v5089_v42 }
0x10d0   : > { %v9099_v51 = vadd.f32 %v4915_v14, %v4914_v1 }
0x10d1   : > { %5117 = vmatpush.msra.mxu0 %v5088_v33 }
0x10d2   : > { %5835 = vtanh.f32 %v9099_v51 }
0x10d3   : > { %5118 = vmatpush.msra.mxu0 %v5087_v6 }
0x10d5   : > { %5119 = vmatpush.msra.mxu0 %v5086_v62 }
0x10d7   : > { %5120 = vmatpush.msra.mxu0 %v5085_v53 }
0x10d8   : > { %v5836_v19 = vpop.eup %5835 }
0x10d9   : > { %v4918_v27 = vmul.f32 %v5836_v19, %v4912_v35 }
0x10db   : > { %4919 = vst [vmem:[#allocation3 + $0x6] sm:$0x1] %v4918_v27  ;;  %4937 = vmatmul.f32.vlgmr.msrb.gmra.mxu0 %v4918_v27  ;;  %4957 = vmatmul.f32.vlgmr.msrb.gmra.mxu1 %v4918_v27 }
0x10dc   : > { %4977 = vmatmul.f32.vlgmr.msra.gmra.mxu2 %v4918_v27  ;;  %4997 = vmatmul.f32.vlgmr.msra.gmra.mxu3 %v4918_v27 }
0x1158   : > { %v4958_v4 = vpop.f32.mrf.mxu1  ;;  %v4938_v29 = vpop.f32.mrf.mxu0 }
0x1159   : > { %v5005_v59 = vrot.slane %v4958_v4, 7 }
0x115b   : > { %v5008_v23 = vsel %vm780_vm2, %v4938_v29, %v5005_v59 }
0x115f   : > { %v4978_v61 = vpop.f32.mrf.mxu2  ;;  %v4998_v9 = vpop.f32.mrf.mxu3 }
0x1160   : > { %v5006_v63 = vrot.slane %v4978_v61, 6  ;;  %v5007_v46 = vrot.slane %v4998_v9, 5 }
0x1162   : > { %v5009_v54 = vsel %vm782_vm3, %v5006_v63, %v5007_v46 }
0x1163   : > { %v5010_v34 = vsel %vm784_vm4, %v5008_v23, %v5009_v54 }
0x1164   : > { %v5012_v44 = vadd.f32 %v5010_v34, %v4920_v39 }
0x1166   : > { %v5356_v2 = vmul.f32 -1.442695, %v5012_v44  ;;  %v5033_v12 = vrot.slane %v5012_v44, 1  ;;  %v5057_v55 = vrot.slane %v5012_v44, 3  ;;  %v5054_v49 = vrot.slane %v5012_v44, 2 }
0x1168   : > { %5837 = vpow2.f32 %v5356_v2  ;;  %v5357_v60 = vmul.f32 -1.442695, %v5033_v12  ;;  %v5358_v45 = vmul.f32 -1.442695, %v5057_v55 }
0x116a   : > { %5839 = vpow2.f32 %v5357_v60 }
0x116b   : > { %5841 = vpow2.f32 %v5358_v45 }
0x116e   : > { %v5838_v31 = vpop.eup %5837 }
0x116f   : > { %v5016_v10 = vadd.f32 1.0, %v5838_v31 }
0x1170   : > { %v5840_v47 = vpop.eup %5839 }
0x1171   : > { %v5842_v32 = vpop.eup %5841  ;;  %5843 = vrcp.f32 %v5016_v10  ;;  %v5038_v50 = vadd.f32 1.0, %v5840_v47  ;;  %v5028_v11 = vand.u32 2147483648, %v5016_v10  ;;  %v5026_v0 = vand.u32 2147483647, %v5016_v10 }
0x1172   : > { %v5062_v15 = vadd.f32 1.0, %v5842_v32  ;;  %vm5022_vm3 = vweird.f32 %v5016_v10 }
0x1173   : > { %5845 = vrcp.f32 %v5038_v50  ;;  %v5050_v57 = vand.u32 2147483648, %v5038_v50  ;;  %v5048_v14 = vand.u32 2147483647, %v5038_v50  ;;  %v5029_v26 = vor.u32 1.1754944e-38, %v5028_v11 }
0x1174   : > { %5847 = vrcp.f32 %v5062_v15  ;;  %vm5027_vm9 = vcmp.eq.f32.partialorder %v5026_v0, 8.507059e+37  ;;  %vm5044_vm10 = vweird.f32 %v5038_v50  ;;  %v5074_v7 = vand.u32 2147483648, %v5062_v15 }
0x1175   : > { %5849 = vtanh.f32 %v5054_v49  ;;  %v5051_v19 = vor.u32 1.1754944e-38, %v5050_v57  ;;  %vm5049_vm12 = vcmp.eq.f32.partialorder %v5048_v14, 8.507059e+37  ;;  %vm5068_vm14 = vweird.f32 %v5062_v15 }
0x1176   : > { %v5072_v63 = vand.u32 2147483647, %v5062_v15  ;;  %v5075_v29 = vor.u32 1.1754944e-38, %v5074_v7 }
0x1177   : > { %v5844_v13 = vpop.eup %5843 }
0x1178   : > { %v5018_v22 = vmul.f32 %v5844_v13, %v5016_v10  ;;  %vm5023_vm2 = vweird.f32 %v5844_v13  ;;  %vm5073_vm0 = vcmp.eq.f32.partialorder %v5072_v63, 8.507059e+37 }
0x1179   : > { %v5846_v28 = vpop.eup %5845  ;;  %vm5024_vm4 = vmor %vm5022_vm3, %vm5023_vm2 }
0x117a   : > { %v5019_v43 = vsub.f32 1.0, %v5018_v22  ;;  %v5848_v40 = vpop.eup %5847  ;;  %v5040_v38 = vmul.f32 %v5846_v28, %v5038_v50  ;;  %vm5045_vm8 = vweird.f32 %v5846_v28 }
0x117b   : > { %v5064_v18 = vmul.f32 %v5848_v40, %v5062_v15  ;;  %vm5046_vm11 = vmor %vm5044_vm10, %vm5045_vm8  ;;  %v5850_v27 = vpop.eup %5849  ;;  %vm5069_vm13 = vweird.f32 %v5848_v40 }
0x117c   : > { %v5020_v21 = vmul.f32 %v5844_v13, %v5019_v43  ;;  %v5041_v24 = vsub.f32 1.0, %v5040_v38  ;;  %vm5070_vm15 = vmor %vm5068_vm14, %vm5069_vm13 }
0x117d   : > { %v5065_v37 = vsub.f32 1.0, %v5064_v18 }
0x117e   : > { %v5021_v58 = vadd.f32 %v5844_v13, %v5020_v21  ;;  %v5042_v1 = vmul.f32 %v5846_v28, %v5041_v24 }
0x117f   : > { %v5066_v30 = vmul.f32 %v5848_v40, %v5065_v37 }
0x1180   : > { %v5025_v25 = vsel %vm5024_vm4, %v5844_v13, %v5021_v58  ;;  %v5043_v17 = vadd.f32 %v5846_v28, %v5042_v1 }
0x1181   : > { %v5030_v20 = vsel %vm5027_vm9, %v5029_v26, %v5025_v25  ;;  %v5067_v9 = vadd.f32 %v5848_v40, %v5066_v30 }
0x1182   : > { %v5047_v35 = vsel %vm5046_vm11, %v5846_v28, %v5043_v17  ;;  %v5079_v59 = vmul.f32 %v5850_v27, %v5030_v20 }
0x1183   : > { %v5052_v4 = vsel %vm5049_vm12, %v5051_v19, %v5047_v35  ;;  %v5071_v46 = vsel %vm5070_vm15, %v5848_v40, %v5067_v9 }
0x1184   : > { %v5078_v8 = vmul.f32 %v5052_v4, %v9099_v51  ;;  %v5076_v23 = vsel %vm5073_vm0, %v5075_v29, %v5071_v46  ;;  %v5468_v51 = vld [vmem:[%s9152_s11] ss:$0 sm:$0xff] }
0x1186   : > { %v5080_v61 = vadd.f32 %v5079_v59, %v5078_v8 }
0x1188   : > { %5851 = vtanh.f32 %v5080_v61 }
0x118e   : > { %v5852_v36 = vpop.eup %5851 }
0x118f   : > { %v5082_v54 = vmul.f32 %v5852_v36, %v5076_v23 }
0x1191   : > { %5083 = vst [vmem:[#allocation3 + $0x7] sm:$0x1] %v5082_v54 }
0x1198   : > { %v5084_v39 = vld [vmem:[#allocation3] sm:$0xff] }
0x1199   : > { %5121 = vmatmul.f32.vlgmr.msra.gmra.mxu0 %v5084_v39 }
0x1216   : > { %v5122_v34 = vpop.f32.mrf.mxu0 }
0x1217   : > { %v5123_v5 = vadd.f32 %v5468_v51, %v5122_v34 }
0x1219   : > { %5125 = vst [vmem:[%s504_s19] sm:$0xff] %v5123_v5 }
0x121a   : > { %6252 = shalt.err (!%p6249_p8)
}
0x121b   : > { %5387 = dma.vmem_to_hbm [thread:$0]  (%p6419_p5), %s5140_s20, 128, %s5142_s23, %s5127_s27  }
0x121c PF: > { %s9978_s4 = sld [smem:[#allocation23_spill]] }
0x121d   : > { %s9979_s14 = sld [smem:[#allocation21_spill]] }
0x1222   : > { %p5424_p9 = scmp.ge.s32.totalorder %s9978_s4, 2 }
0x1223   : > { %s5153_s28 = sand.u32 1, %s9979_s14  }
0x1224   : > { %p5409_p10 = pnand %p5424_p9, %p6423_p6  ;;  %s5154_s16 = scalar_lea.sflag [#allocation6], %s5153_s28 }
0x1226   : > { %p5410_p11 = pneg %p5409_p10 }
0x1228   : > { %6286 = dma.done.wait (%p5410_p11), %s5154_s16, 128  }
0x1229   : > { %6288 = vsyncadd (%p5410_p11), %s5154_s16, 4294967168  ;;  %s9981_s24 = sld [smem:[#allocation24_spill]]  ;;  %s9984_s21 = smov %s6295_s22 }
0x122a   : > { %s9982_s17 = sld [smem:[#allocation22_spill]] }
0x122b   : > { %s9983_s23 = sld [smem:[#allocation25_spill]] }
0x122f   : > { %p26_p12 = scmp.ge.s32.totalorder %s9981_s24, 4  }
0x1230   : > { %s9985_s22 = smov %s9982_s17 }
0x1231   :  { %28 = sbr.rel (!%p26_p12) target bundleno = 10 (0xa), region = 136 }
0x1236   :  { %5160 = vsyncpa [#allocation5], 1 }
0x1237   :  { %5162 = vsyncpa [#allocation5 + $0x1], 1 }
0x1238   :  { %5163 = vsyncpa [#allocation8], 1 }
0x1239   :  { %5164 = vsyncpa [#allocation11], 1 }
0x123a   :  { %5165 = vsyncpa [#allocation14], 1 }
0x123b   :  { %5166 = vsyncpa [#allocation6], 1 }
0x123c   :  { %5168 = vsyncpa [#allocation6 + $0x1], 1 }

</bundles_post_ra>
